<compile_context>
chip_gen: v7x
topology: tpu7x:2x2x1
jax: 0.10.0
libtpu: 0.0.40
codegen_flags: <defaults>
</compile_context>

<pallas_src>
import functools

import jax
import jax.numpy as jnp
from jax.experimental import pallas as pl
from jax.experimental.pallas import tpu as pltpu

# ----------------------------- configuration --------------------------------
B = 2
H = W = 8
IN_C = 32            # skip-connection channels
OUT_C = 32
PREV_C = 32          # prev_output_channel
TEMB_C = 64
GROUPS = 8           # resnet_groups (32 in SD; reduced for small test channels)
HEADS = 2            # attn_num_head_channels
DIM_HEAD = OUT_C // HEADS
CROSS_DIM = 64       # cross_attention_dim
SEQ = 8              # encoder sequence length
RESNET_EPS = 1e-6
GN_EPS_T = 1e-6      # Transformer2D GroupNorm eps
LN_EPS = 1e-5

_PAR1 = pltpu.CompilerParams(dimension_semantics=("parallel",))


# --------------------------- BlockSpec helpers -------------------------------
def _bspec(a):
    """Per-batch block of a (B, ...) array."""
    nd = a.ndim
    return pl.BlockSpec((1,) + tuple(a.shape[1:]),
                        lambda b: (b,) + (0,) * (nd - 1))


def _cspec(a):
    """Whole-array block, same for every grid step (weights / biases)."""
    nd = a.ndim
    return pl.BlockSpec(tuple(a.shape), lambda b: (0,) * nd)


def _ospec(shape):
    nd = len(shape)
    return pl.BlockSpec((1,) + tuple(shape[1:]),
                        lambda b: (b,) + (0,) * (nd - 1))


# --------------------------- in-kernel helpers --------------------------------
def _groupnorm_2d(x, gamma, beta, groups, eps):
    """GroupNorm on a single-batch (HW, C) f32 tile; stats in f32, var clamped."""
    hw, c = x.shape
    cg = c // groups
    n = float(hw * cg)
    colsum = jnp.sum(x, axis=0, keepdims=True)          # (1, C)
    colsq = jnp.sum(x * x, axis=0, keepdims=True)       # (1, C)
    # channel -> group membership matrices built from 2-D iota (no int division)
    ci = jax.lax.broadcasted_iota(jnp.int32, (c, groups), 0)
    gi = jax.lax.broadcasted_iota(jnp.int32, (c, groups), 1)
    lo = gi * cg
    m = ((ci >= lo) & (ci < lo + cg)).astype(jnp.float32)        # (C, G)
    gi2 = jax.lax.broadcasted_iota(jnp.int32, (groups, c), 0)
    ci2 = jax.lax.broadcasted_iota(jnp.int32, (groups, c), 1)
    lo2 = gi2 * cg
    mt = ((ci2 >= lo2) & (ci2 < lo2 + cg)).astype(jnp.float32)   # (G, C)
    mean_g = jnp.dot(colsum, m, preferred_element_type=jnp.float32) / n  # (1, G)
    msq_g = jnp.dot(colsq, m, preferred_element_type=jnp.float32) / n
    var_g = jnp.maximum(msq_g - mean_g * mean_g, 0.0)            # clamp (review)
    mean_c = jnp.dot(mean_g, mt, preferred_element_type=jnp.float32)     # (1, C)
    var_c = jnp.dot(var_g, mt, preferred_element_type=jnp.float32)
    y = (x - mean_c) * jax.lax.rsqrt(var_c + eps)
    return y * gamma + beta


def _layernorm_2d(x, gamma, beta, eps):
    mean = jnp.mean(x, axis=-1, keepdims=True)
    xc = x - mean
    var = jnp.mean(xc * xc, axis=-1, keepdims=True)
    return xc * jax.lax.rsqrt(var + eps) * gamma + beta


def _erf_approx(x):
    # Abramowitz & Stegun 7.1.26 (|err| <= 1.5e-7), elementary ops only so it
    # lowers cleanly inside Mosaic.
    p = 0.3275911
    a1, a2, a3, a4, a5 = 0.254829592, -0.284496736, 1.421413741, -1.453152027, 1.061405429
    ax = jnp.abs(x)
    t = 1.0 / (1.0 + p * ax)
    poly = ((((a5 * t + a4) * t + a3) * t + a2) * t + a1) * t
    y = 1.0 - poly * jnp.exp(-ax * ax)
    return jnp.where(x >= 0.0, y, -y)


def _gelu_exact(x):
    return 0.5 * x * (1.0 + _erf_approx(x * 0.7071067811865475))


def _silu(x):
    return x * jax.nn.sigmoid(x)


def _mha(n_q, src_kv, wq_ref, wk_ref, wv_ref, wo_ref, scale, heads):
    """Multi-head attention for one batch element.

    n_q: (Sq, C) f32 layer-normed query source; src_kv: (Sk, Ckv) key/value
    source.  Per-head weights are (H, Cin, Dh) / (H, Dh, C) bf16 refs.  All
    GEMMs in bf16 with f32 accumulation; softmax in f32.  The head merge +
    output projection is decomposed per head so no transposes are needed.
    """
    nqb = n_q.astype(jnp.bfloat16)
    kvb = src_kv.astype(jnp.bfloat16)
    out = None
    for h in range(heads):
        q = jnp.dot(nqb, wq_ref[h], preferred_element_type=jnp.float32) * scale
        k = jnp.dot(kvb, wk_ref[h], preferred_element_type=jnp.float32)
        v = jnp.dot(kvb, wv_ref[h], preferred_element_type=jnp.float32)
        s = jax.lax.dot_general(q.astype(jnp.bfloat16), k.astype(jnp.bfloat16),
                                (((1,), (1,)), ((), ())),
                                preferred_element_type=jnp.float32)   # (Sq, Sk)
        m = jnp.max(s, axis=-1, keepdims=True)
        p = jnp.exp(s - m)
        l = jnp.sum(p, axis=-1, keepdims=True)
        p = p * pl.reciprocal(l, approx=True)
        pv = jnp.dot(p.astype(jnp.bfloat16), v.astype(jnp.bfloat16),
                     preferred_element_type=jnp.float32)              # (Sq, Dh)
        oh = jnp.dot(pv.astype(jnp.bfloat16), wo_ref[h],
                     preferred_element_type=jnp.float32)              # (Sq, C)
        out = oh if out is None else out + oh
    return out


# ------------------------------ Pallas kernels --------------------------------
def _gn_silu_kernel(x_ref, g_ref, b_ref, o_ref, *, groups, eps):
    y = _groupnorm_2d(x_ref[0], g_ref[...], b_ref[...], groups, eps)
    o_ref[0] = _silu(y)


def _conv_temb_gn_silu_kernel(cols_ref, w_ref, b_ref, t_ref, tw_ref, tb_ref,
                              g_ref, bt_ref, o_ref, *, groups, eps):
    # conv1 as im2col GEMM (bf16 operands, f32 accumulate)
    conv = jnp.dot(cols_ref[0], w_ref[...],
                   preferred_element_type=jnp.float32) + b_ref[...]   # (HW, Cout)
    # time-embedding projection: Linear(silu(temb))
    t = _silu(t_ref[0])                                               # (1, TEMB)
    tp = jnp.dot(t.astype(jnp.bfloat16), tw_ref[...],
                 preferred_element_type=jnp.float32) + tb_ref[...]    # (1, Cout)
    h = conv + tp
    y = _groupnorm_2d(h, g_ref[...], bt_ref[...], groups, eps)
    o_ref[0] = _silu(y)


def _conv_shortcut_kernel(cols_ref, w_ref, b_ref, x_ref, sw_ref, sb_ref, o_ref):
    conv = jnp.dot(cols_ref[0], w_ref[...],
                   preferred_element_type=jnp.float32) + b_ref[...]
    sc = jnp.dot(x_ref[0], sw_ref[...],
                 preferred_element_type=jnp.float32) + sb_ref[...]
    o_ref[0] = conv + sc                      # output_scale_factor = 1.0


def _conv_bias_kernel(cols_ref, w_ref, b_ref, o_ref):
    o_ref[0] = jnp.dot(cols_ref[0], w_ref[...],
                       preferred_element_type=jnp.float32) + b_ref[...]


def _t_selfattn_kernel(x_ref, gng_ref, gnb_ref, pw_ref, pb_ref, lng_ref, lnb_ref,
                       wq_ref, wk_ref, wv_ref, wo_ref, bo_ref, o_ref,
                       *, groups, gn_eps, ln_eps, scale, heads):
    x = x_ref[0]                                                      # (HW, C) f32
    g = _groupnorm_2d(x, gng_ref[...], gnb_ref[...], groups, gn_eps)
    h0 = jnp.dot(g.astype(jnp.bfloat16), pw_ref[...],
                 preferred_element_type=jnp.float32) + pb_ref[...]    # proj_in
    n1 = _layernorm_2d(h0, lng_ref[...], lnb_ref[...], ln_eps)
    attn = _mha(n1, n1, wq_ref, wk_ref, wv_ref, wo_ref, scale, heads)
    o_ref[0] = attn + bo_ref[...] + h0


def _t_crossattn_kernel(x_ref, ctx_ref, lng_ref, lnb_ref, wq_ref, wk_ref, wv_ref,
                        wo_ref, bo_ref, o_ref, *, ln_eps, scale, heads):
    x = x_ref[0]
    n = _layernorm_2d(x, lng_ref[...], lnb_ref[...], ln_eps)
    attn = _mha(n, ctx_ref[0], wq_ref, wk_ref, wv_ref, wo_ref, scale, heads)
    o_ref[0] = attn + bo_ref[...] + x


def _t_ff_kernel(x_ref, res_ref, lng_ref, lnb_ref, gw_ref, gb_ref, fw_ref, fb_ref,
                 pw_ref, pb_ref, o_ref, *, ln_eps, ff_inner):
    x = x_ref[0]                                                       # (HW, C)
    n = _layernorm_2d(x, lng_ref[...], lnb_ref[...], ln_eps)
    proj = jnp.dot(n.astype(jnp.bfloat16), gw_ref[...],
                   preferred_element_type=jnp.float32) + gb_ref[...]   # (HW, 2*ff)
    a = proj[:, :ff_inner]                                             # lane-aligned split
    gate = proj[:, ff_inner:]
    gated = a * _gelu_exact(gate)                                      # GEGLU
    ff = jnp.dot(gated.astype(jnp.bfloat16), fw_ref[...],
                 preferred_element_type=jnp.float32) + fb_ref[...]
    h3 = ff + x
    out = jnp.dot(h3.astype(jnp.bfloat16), pw_ref[...],
                  preferred_element_type=jnp.float32) + pb_ref[...]    # proj_out
    o_ref[0] = out + res_ref[0]                                        # outer residual


# ------------------------------ call wrappers ---------------------------------
def gn_silu(x, gamma, beta, groups, eps):
    Bn, HW, C = x.shape
    g2 = gamma.reshape(1, C).astype(jnp.float32)
    b2 = beta.reshape(1, C).astype(jnp.float32)
    return pl.pallas_call(
        functools.partial(_gn_silu_kernel, groups=groups, eps=float(eps)),
        out_shape=jax.ShapeDtypeStruct((Bn, HW, C), jnp.float32),
        grid=(Bn,),
        in_specs=[_bspec(x), _cspec(g2), _cspec(b2)],
        out_specs=_ospec((Bn, HW, C)),
        compiler_params=_PAR1,
    )(x.astype(jnp.float32), g2, b2)


def conv_temb_gn_silu(cols, w, bias, temb, temb_w, temb_b, gamma, beta, groups, eps):
    Bn, HW, _ = cols.shape
    Cout = w.shape[1]
    b2 = bias.reshape(1, Cout).astype(jnp.float32)
    tw = temb_w.T.astype(jnp.bfloat16)
    tb = temb_b.reshape(1, Cout).astype(jnp.float32)
    t3 = temb.reshape(Bn, 1, -1).astype(jnp.float32)
    g2 = gamma.reshape(1, Cout).astype(jnp.float32)
    be2 = beta.reshape(1, Cout).astype(jnp.float32)
    return pl.pallas_call(
        functools.partial(_conv_temb_gn_silu_kernel, groups=groups, eps=float(eps)),
        out_shape=jax.ShapeDtypeStruct((Bn, HW, Cout), jnp.float32),
        grid=(Bn,),
        in_specs=[_bspec(cols), _cspec(w), _cspec(b2), _bspec(t3), _cspec(tw),
                  _cspec(tb), _cspec(g2), _cspec(be2)],
        out_specs=_ospec((Bn, HW, Cout)),
        compiler_params=_PAR1,
    )(cols, w, b2, t3, tw, tb, g2, be2)


def conv_shortcut_add(cols, w, bias, x_in, sw, sb):
    Bn, HW, _ = cols.shape
    Cout = w.shape[1]
    b2 = bias.reshape(1, Cout).astype(jnp.float32)
    sb2 = sb.reshape(1, Cout).astype(jnp.float32)
    return pl.pallas_call(
        _conv_shortcut_kernel,
        out_shape=jax.ShapeDtypeStruct((Bn, HW, Cout), jnp.float32),
        grid=(Bn,),
        in_specs=[_bspec(cols), _cspec(w), _cspec(b2), _bspec(x_in),
                  _cspec(sw), _cspec(sb2)],
        out_specs=_ospec((Bn, HW, Cout)),
        compiler_params=_PAR1,
    )(cols, w, b2, x_in, sw, sb2)


def conv_bias(cols, w, bias):
    Bn, M, _ = cols.shape
    Cout = w.shape[1]
    b2 = bias.reshape(1, Cout).astype(jnp.float32)
    return pl.pallas_call(
        _conv_bias_kernel,
        out_shape=jax.ShapeDtypeStruct((Bn, M, Cout), jnp.float32),
        grid=(Bn,),
        in_specs=[_bspec(cols), _cspec(w), _cspec(b2)],
        out_specs=_ospec((Bn, M, Cout)),
        compiler_params=_PAR1,
    )(cols, w, b2)


def _per_head_in(w):
    """torch Linear weight (out=H*Dh, in) -> (H, in, Dh) bf16."""
    out_dim, in_dim = w.shape
    dh = out_dim // HEADS
    return jnp.transpose(w.T.reshape(in_dim, HEADS, dh), (1, 0, 2)).astype(jnp.bfloat16)


def _per_head_out(w):
    """torch Linear weight (out=C, in=H*Dh) -> (H, Dh, C) bf16."""
    out_dim, in_dim = w.shape
    dh = in_dim // HEADS
    return w.T.reshape(HEADS, dh, out_dim).astype(jnp.bfloat16)


def t_self_attn(x, p):
    Bn, HW, C = x.shape
    gng = p["norm_g"].reshape(1, C).astype(jnp.float32)
    gnb = p["norm_b"].reshape(1, C).astype(jnp.float32)
    pw = p["proj_in_w"][:, :, 0, 0].T.astype(jnp.bfloat16)
    pb = p["proj_in_b"].reshape(1, C).astype(jnp.float32)
    blk = p["block"]
    lng = blk["ln1_g"].reshape(1, C).astype(jnp.float32)
    lnb = blk["ln1_b"].reshape(1, C).astype(jnp.float32)
    a = blk["attn1"]
    wq, wk, wv = _per_head_in(a["to_q"]), _per_head_in(a["to_k"]), _per_head_in(a["to_v"])
    wo = _per_head_out(a["to_out_w"])
    bo = a["to_out_b"].reshape(1, C).astype(jnp.float32)
    kern = functools.partial(_t_selfattn_kernel, groups=GROUPS, gn_eps=GN_EPS_T,
                             ln_eps=LN_EPS, scale=DIM_HEAD ** -0.5, heads=HEADS)
    return pl.pallas_call(
        kern,
        out_shape=jax.ShapeDtypeStruct((Bn, HW, C), jnp.float32),
        grid=(Bn,),
        in_specs=[_bspec(x), _cspec(gng), _cspec(gnb), _cspec(pw), _cspec(pb),
                  _cspec(lng), _cspec(lnb), _cspec(wq), _cspec(wk), _cspec(wv),
                  _cspec(wo), _cspec(bo)],
        out_specs=_ospec((Bn, HW, C)),
        compiler_params=_PAR1,
    )(x, gng, gnb, pw, pb, lng, lnb, wq, wk, wv, wo, bo)


def t_cross_attn(x, ctx, blk):
    Bn, HW, C = x.shape
    lng = blk["ln2_g"].reshape(1, C).astype(jnp.float32)
    lnb = blk["ln2_b"].reshape(1, C).astype(jnp.float32)
    a = blk["attn2"]
    wq, wk, wv = _per_head_in(a["to_q"]), _per_head_in(a["to_k"]), _per_head_in(a["to_v"])
    wo = _per_head_out(a["to_out_w"])
    bo = a["to_out_b"].reshape(1, C).astype(jnp.float32)
    ctxb = ctx.astype(jnp.bfloat16)
    kern = functools.partial(_t_crossattn_kernel, ln_eps=LN_EPS,
                             scale=DIM_HEAD ** -0.5, heads=HEADS)
    return pl.pallas_call(
        kern,
        out_shape=jax.ShapeDtypeStruct((Bn, HW, C), jnp.float32),
        grid=(Bn,),
        in_specs=[_bspec(x), _bspec(ctxb), _cspec(lng), _cspec(lnb), _cspec(wq),
                  _cspec(wk), _cspec(wv), _cspec(wo), _cspec(bo)],
        out_specs=_ospec((Bn, HW, C)),
        compiler_params=_PAR1,
    )(x, ctxb, lng, lnb, wq, wk, wv, wo, bo)


def t_ff_proj_out(x, residual, p):
    Bn, HW, C = x.shape
    blk = p["block"]
    ff_inner = blk["ff_out_w"].shape[1]
    lng = blk["ln3_g"].reshape(1, C).astype(jnp.float32)
    lnb = blk["ln3_b"].reshape(1, C).astype(jnp.float32)
    gw = blk["geglu_w"].T.astype(jnp.bfloat16)             # (C, 2*ff_inner)
    gb = blk["geglu_b"].reshape(1, -1).astype(jnp.float32)
    fw = blk["ff_out_w"].T.astype(jnp.bfloat16)            # (ff_inner, C)
    fb = blk["ff_out_b"].reshape(1, C).astype(jnp.float32)
    pw = p["proj_out_w"][:, :, 0, 0].T.astype(jnp.bfloat16)
    pb = p["proj_out_b"].reshape(1, C).astype(jnp.float32)
    kern = functools.partial(_t_ff_kernel, ln_eps=LN_EPS, ff_inner=int(ff_inner))
    return pl.pallas_call(
        kern,
        out_shape=jax.ShapeDtypeStruct((Bn, HW, C), jnp.float32),
        grid=(Bn,),
        in_specs=[_bspec(x), _bspec(residual), _cspec(lng), _cspec(lnb), _cspec(gw),
                  _cspec(gb), _cspec(fw), _cspec(fb), _cspec(pw), _cspec(pb)],
        out_specs=_ospec((Bn, HW, C)),
        compiler_params=_PAR1,
    )(x, residual, lng, lnb, gw, gb, fw, fb, pw, pb)


# -------------------------------- JAX glue -------------------------------------
def im2col3x3(x):  # (B, H, W, C) -> (B, H*W, 9*C); pad=1, stride=1
    Bn, Hn, Wn, C = x.shape
    xp = jnp.pad(x, ((0, 0), (1, 1), (1, 1), (0, 0)))
    patches = [xp[:, dy:dy + Hn, dx:dx + Wn, :] for dy in range(3) for dx in range(3)]
    return jnp.concatenate(patches, axis=-1).reshape(Bn, Hn * Wn, 9 * C)


def conv3x3_w_to_mat(w):  # (Cout, Cin, 3, 3) -> (9*Cin, Cout)
    Cout, Cin = w.shape[0], w.shape[1]
    return jnp.transpose(w, (2, 3, 1, 0)).reshape(9 * Cin, Cout)


# ------------------------------- top level --------------------------------------
@jax.jit
def cross_attn_up_block(hidden_states, res_hidden_states_tuple, temb,
                        encoder_hidden_states, params):
    """Inputs/outputs NCHW, matching the PyTorch module."""
    res = res_hidden_states_tuple[-1]
    x = jnp.concatenate([hidden_states, res], axis=1)                 # channel concat
    Bn, C, Hn, Wn = x.shape
    x = jnp.transpose(x, (0, 2, 3, 1)).reshape(Bn, Hn * Wn, C).astype(jnp.float32)

    # ----- ResnetBlock2D (3 fused kernels) -----
    rp = params["resnet"]
    h = gn_silu(x, rp["norm1_g"], rp["norm1_b"], GROUPS, RESNET_EPS)   # (B,HW,Ccat)
    cols1 = im2col3x3(h.reshape(Bn, Hn, Wn, C)).astype(jnp.bfloat16)
    w1 = conv3x3_w_to_mat(rp["conv1_w"]).astype(jnp.bfloat16)
    h = conv_temb_gn_silu(cols1, w1, rp["conv1_b"], temb, rp["temb_w"], rp["temb_b"],
                          rp["norm2_g"], rp["norm2_b"], GROUPS, RESNET_EPS)
    cols2 = im2col3x3(h.reshape(Bn, Hn, Wn, OUT_C)).astype(jnp.bfloat16)
    w2 = conv3x3_w_to_mat(rp["conv2_w"]).astype(jnp.bfloat16)
    sw = rp["short_w"][:, :, 0, 0].T.astype(jnp.bfloat16)
    h = conv_shortcut_add(cols2, w2, rp["conv2_b"], x.astype(jnp.bfloat16),
                          sw, rp["short_b"])                           # (B,HW,OUT_C)

    # ----- Transformer2DModel (3 fused kernels) -----
    ap = params["attn"]
    h1 = t_self_attn(h, ap)                            # gn + proj_in + attn1 + resid
    h2 = t_cross_attn(h1, encoder_hidden_states, ap["block"])          # attn2 + resid
    h3 = t_ff_proj_out(h2, h, ap)                      # ff + proj_out + outer resid

    # ----- Upsample2D (nearest 2x + conv) -----
    up_p = params["upsample"]
    img = h3.reshape(Bn, Hn, Wn, OUT_C)
    up = jnp.repeat(jnp.repeat(img, 2, axis=1), 2, axis=2)             # nearest 2x
    cols_u = im2col3x3(up).astype(jnp.bfloat16)                        # (B, 4HW, 9C)
    wu = conv3x3_w_to_mat(up_p["conv_w"]).astype(jnp.bfloat16)
    out = conv_bias(cols_u, wu, up_p["conv_b"])                        # (B, 4HW, C)
    out = out.reshape(Bn, 2 * Hn, 2 * Wn, OUT_C)
    return jnp.transpose(out, (0, 3, 1, 2))                            # back to NCHW


# ------------------------------ parameters --------------------------------------
def init_params(key):
    keys = iter(jax.random.split(key, 64))

    def rnd(shape, scale=0.05):
        return jax.random.normal(next(keys), shape, jnp.float32) * scale

    c_cat = PREV_C + IN_C
    resnet = dict(
        norm1_g=jnp.ones((c_cat,), jnp.float32), norm1_b=jnp.zeros((c_cat,), jnp.float32),
        conv1_w=rnd((OUT_C, c_cat, 3, 3)), conv1_b=rnd((OUT_C,)),
        temb_w=rnd((OUT_C, TEMB_C)), temb_b=rnd((OUT_C,)),
        norm2_g=jnp.ones((OUT_C,), jnp.float32), norm2_b=jnp.zeros((OUT_C,), jnp.float32),
        conv2_w=rnd((OUT_C, OUT_C, 3, 3)), conv2_b=rnd((OUT_C,)),
        short_w=rnd((OUT_C, c_cat, 1, 1)), short_b=rnd((OUT_C,)),
    )
    ff_inner = 4 * OUT_C
    block = dict(
        ln1_g=jnp.ones((OUT_C,), jnp.float32), ln1_b=jnp.zeros((OUT_C,), jnp.float32),
        attn1=dict(to_q=rnd((OUT_C, OUT_C)), to_k=rnd((OUT_C, OUT_C)),
                   to_v=rnd((OUT_C, OUT_C)), to_out_w=rnd((OUT_C, OUT_C)),
                   to_out_b=rnd((OUT_C,))),
        ln2_g=jnp.ones((OUT_C,), jnp.float32), ln2_b=jnp.zeros((OUT_C,), jnp.float32),
        attn2=dict(to_q=rnd((OUT_C, OUT_C)), to_k=rnd((OUT_C, CROSS_DIM)),
                   to_v=rnd((OUT_C, CROSS_DIM)), to_out_w=rnd((OUT_C, OUT_C)),
                   to_out_b=rnd((OUT_C,))),
        ln3_g=jnp.ones((OUT_C,), jnp.float32), ln3_b=jnp.zeros((OUT_C,), jnp.float32),
        geglu_w=rnd((2 * ff_inner, OUT_C)), geglu_b=rnd((2 * ff_inner,)),
        ff_out_w=rnd((OUT_C, ff_inner)), ff_out_b=rnd((OUT_C,)),
    )
    attn = dict(
        norm_g=jnp.ones((OUT_C,), jnp.float32), norm_b=jnp.zeros((OUT_C,), jnp.float32),
        proj_in_w=rnd((OUT_C, OUT_C, 1, 1)), proj_in_b=rnd((OUT_C,)),
        block=block,
        proj_out_w=rnd((OUT_C, OUT_C, 1, 1)), proj_out_b=rnd((OUT_C,)),
    )
    upsample = dict(conv_w=rnd((OUT_C, OUT_C, 3, 3)), conv_b=rnd((OUT_C,)))
    return dict(resnet=resnet, attn=attn, upsample=upsample)


# --------------------------------- main ------------------------------------------
if __name__ == "__main__":
    key = jax.random.PRNGKey(0)
    kp, k1, k2, k3, k4 = jax.random.split(key, 5)
    params = init_params(kp)

    hidden_states = jax.random.normal(k1, (B, PREV_C, H, W), jnp.float32)   # NCHW
    res_hidden = jax.random.normal(k2, (B, IN_C, H, W), jnp.float32)        # NCHW skip
    temb = jax.random.normal(k3, (B, TEMB_C), jnp.float32)
    encoder_hidden_states = jax.random.normal(k4, (B, SEQ, CROSS_DIM), jnp.float32)

    out = cross_attn_up_block(hidden_states, (res_hidden,), temb,
                              encoder_hidden_states, params)
    out = jax.block_until_ready(out)
    assert out.shape == (B, OUT_C, 2 * H, 2 * W), out.shape
    assert bool(jnp.all(jnp.isfinite(out)))
    print("KERNEL_OK")
</pallas_src>

<mosaic_0001>
module attributes {stable_mosaic.version = 11 : i64} {
  func.func @_gn_silu_kernel(%arg0: i32, %arg1: memref<1x64x64xf32, #tpu.memory_space<vmem>>, %arg2: memref<1x64xf32, #tpu.memory_space<vmem>>, %arg3: memref<1x64xf32, #tpu.memory_space<vmem>>, %arg4: memref<1x64x64xf32, #tpu.memory_space<vmem>>) attributes {dimension_semantics = [#tpu.dimension_semantics<parallel>], iteration_bounds = array<i64: 2>, scalar_prefetch = 0 : i64, scratch_operands = 0 : i64, tpu.core_type = #tpu.core_type<tc>, window_params = [{transform_indices = @transform_0, window_bounds = array<i64: 1, 64, 64>}, {pipeline_mode = #tpu.pipeline_mode<synchronous>, transform_indices = @transform_1, window_bounds = array<i64: 1, 64>}, {pipeline_mode = #tpu.pipeline_mode<synchronous>, transform_indices = @transform_2, window_bounds = array<i64: 1, 64>}, {transform_indices = @transform_3, window_bounds = array<i64: 1, 64, 64>}]} {
    %c0 = arith.constant 0 : index
    %c0_0 = arith.constant 0 : index
    %c0_1 = arith.constant 0 : index
    %0 = vector.load %arg1[%c0, %c0_0, %c0_1] : memref<1x64x64xf32, #tpu.memory_space<vmem>>, vector<1x64x64xf32>
    %1 = vector.shape_cast %0 : vector<1x64x64xf32> to vector<64x64xf32>
    %c0_2 = arith.constant 0 : index
    %c0_3 = arith.constant 0 : index
    %2 = vector.load %arg2[%c0_2, %c0_3] : memref<1x64xf32, #tpu.memory_space<vmem>>, vector<1x64xf32>
    %c0_4 = arith.constant 0 : index
    %c0_5 = arith.constant 0 : index
    %3 = vector.load %arg3[%c0_4, %c0_5] : memref<1x64xf32, #tpu.memory_space<vmem>>, vector<1x64xf32>
    %cst = arith.constant dense<0.000000e+00> : vector<64xf32>
    %4 = vector.multi_reduction <add>, %1, %cst [0] : vector<64x64xf32> to vector<64xf32>
    %5 = vector.shape_cast %4 : vector<64xf32> to vector<1x64xf32>
    %6 = arith.mulf %1, %1 : vector<64x64xf32>
    %cst_6 = arith.constant dense<0.000000e+00> : vector<64xf32>
    %7 = vector.multi_reduction <add>, %6, %cst_6 [0] : vector<64x64xf32> to vector<64xf32>
    %8 = vector.shape_cast %7 : vector<64xf32> to vector<1x64xf32>
    %9 = tpu.iota {dimensions = array<i32: 0>} : vector<64x8xi32>
    %10 = tpu.iota {dimensions = array<i32: 1>} : vector<64x8xi32>
    %c8_i32 = arith.constant 8 : i32
    %11 = vector.broadcast %c8_i32 : i32 to vector<64x8xi32>
    %12 = arith.muli %10, %11 : vector<64x8xi32>
    %13 = arith.cmpi sge, %9, %12 : vector<64x8xi32>
    %c8_i32_7 = arith.constant 8 : i32
    %14 = vector.broadcast %c8_i32_7 : i32 to vector<64x8xi32>
    %15 = arith.addi %12, %14 : vector<64x8xi32>
    %16 = arith.cmpi slt, %9, %15 : vector<64x8xi32>
    %17 = arith.andi %13, %16 : vector<64x8xi1>
    %18 = arith.extui %17 : vector<64x8xi1> to vector<64x8xi32>
    %19 = arith.sitofp %18 : vector<64x8xi32> to vector<64x8xf32>
    %20 = tpu.iota {dimensions = array<i32: 0>} : vector<8x64xi32>
    %21 = tpu.iota {dimensions = array<i32: 1>} : vector<8x64xi32>
    %c8_i32_8 = arith.constant 8 : i32
    %22 = vector.broadcast %c8_i32_8 : i32 to vector<8x64xi32>
    %23 = arith.muli %20, %22 : vector<8x64xi32>
    %24 = arith.cmpi sge, %21, %23 : vector<8x64xi32>
    %c8_i32_9 = arith.constant 8 : i32
    %25 = vector.broadcast %c8_i32_9 : i32 to vector<8x64xi32>
    %26 = arith.addi %23, %25 : vector<8x64xi32>
    %27 = arith.cmpi slt, %21, %26 : vector<8x64xi32>
    %28 = arith.andi %24, %27 : vector<8x64xi1>
    %29 = arith.extui %28 : vector<8x64xi1> to vector<8x64xi32>
    %30 = arith.sitofp %29 : vector<8x64xi32> to vector<8x64xf32>
    %cst_10 = arith.constant dense<0.000000e+00> : vector<1x8xf32>
    %31 = tpu.matmul %5, %19, %cst_10 {dimension_numbers = #tpu.dot_dimension_numbers<[1], [0], [0], [1], [0, 0, 1, 1], [], []>} : vector<1x64xf32>, vector<64x8xf32>, vector<1x8xf32> -> vector<1x8xf32>
    %cst_11 = arith.constant 5.120000e+02 : f32
    %32 = vector.broadcast %cst_11 : f32 to vector<1x8xf32>
    %33 = arith.divf %31, %32 : vector<1x8xf32>
    %cst_12 = arith.constant dense<0.000000e+00> : vector<1x8xf32>
    %34 = tpu.matmul %8, %19, %cst_12 {dimension_numbers = #tpu.dot_dimension_numbers<[1], [0], [0], [1], [0, 0, 1, 1], [], []>} : vector<1x64xf32>, vector<64x8xf32>, vector<1x8xf32> -> vector<1x8xf32>
    %cst_13 = arith.constant 5.120000e+02 : f32
    %35 = vector.broadcast %cst_13 : f32 to vector<1x8xf32>
    %36 = arith.divf %34, %35 : vector<1x8xf32>
    %37 = arith.mulf %33, %33 : vector<1x8xf32>
    %38 = arith.subf %36, %37 : vector<1x8xf32>
    %cst_14 = arith.constant 0.000000e+00 : f32
    %39 = vector.broadcast %cst_14 : f32 to vector<1x8xf32>
    %40 = arith.maximumf %38, %39 : vector<1x8xf32>
    %cst_15 = arith.constant dense<0.000000e+00> : vector<1x64xf32>
    %41 = tpu.matmul %33, %30, %cst_15 {dimension_numbers = #tpu.dot_dimension_numbers<[1], [0], [0], [1], [0, 0, 1, 1], [], []>} : vector<1x8xf32>, vector<8x64xf32>, vector<1x64xf32> -> vector<1x64xf32>
    %cst_16 = arith.constant dense<0.000000e+00> : vector<1x64xf32>
    %42 = tpu.matmul %40, %30, %cst_16 {dimension_numbers = #tpu.dot_dimension_numbers<[1], [0], [0], [1], [0, 0, 1, 1], [], []>} : vector<1x8xf32>, vector<8x64xf32>, vector<1x64xf32> -> vector<1x64xf32>
    %43 = vector.broadcast %41 : vector<1x64xf32> to vector<64x64xf32>
    %44 = arith.subf %1, %43 : vector<64x64xf32>
    %cst_17 = arith.constant 9.99999997E-7 : f32
    %45 = vector.broadcast %cst_17 : f32 to vector<1x64xf32>
    %46 = arith.addf %42, %45 : vector<1x64xf32>
    %47 = math.rsqrt %46 : vector<1x64xf32>
    %48 = vector.broadcast %47 : vector<1x64xf32> to vector<64x64xf32>
    %49 = arith.mulf %44, %48 : vector<64x64xf32>
    %50 = vector.broadcast %2 : vector<1x64xf32> to vector<64x64xf32>
    %51 = arith.mulf %49, %50 : vector<64x64xf32>
    %52 = vector.broadcast %3 : vector<1x64xf32> to vector<64x64xf32>
    %53 = arith.addf %51, %52 : vector<64x64xf32>
    %54 = arith.negf %53 : vector<64x64xf32>
    %55 = math.exp %54 : vector<64x64xf32>
    %cst_18 = arith.constant 1.000000e+00 : f32
    %56 = vector.broadcast %cst_18 : f32 to vector<64x64xf32>
    %57 = arith.addf %56, %55 : vector<64x64xf32>
    %58 = arith.divf %56, %57 : vector<64x64xf32>
    %59 = arith.mulf %53, %58 : vector<64x64xf32>
    %c0_19 = arith.constant 0 : index
    %c0_20 = arith.constant 0 : index
    %c0_21 = arith.constant 0 : index
    %60 = vector.load %arg4[%c0_19, %c0_20, %c0_21] : memref<1x64x64xf32, #tpu.memory_space<vmem>>, vector<1x64x64xf32>
    %61 = vector.shape_cast %60 : vector<1x64x64xf32> to vector<64x64xf32>
    %62 = vector.shape_cast %59 : vector<64x64xf32> to vector<1x64x64xf32>
    tpu.vector_store %arg4[%c0_19, %c0_20, %c0_21], %62 {strides = array<i32>} : memref<1x64x64xf32, #tpu.memory_space<vmem>>, vector<1x64x64xf32>,
    return
  }
  func.func @transform_0(%arg0: i32) -> (i32, i32, i32) {
    %c0_i32 = arith.constant 0 : i32
    %c0_i32_0 = arith.constant 0 : i32
    %c0_i32_1 = arith.constant 0 : i32
    return %arg0, %c0_i32, %c0_i32_0 : i32, i32, i32
  }
  func.func @transform_1(%arg0: i32) -> (i32, i32) {
    %c0_i32 = arith.constant 0 : i32
    %c0_i32_0 = arith.constant 0 : i32
    %c0_i32_1 = arith.constant 0 : i32
    return %c0_i32, %c0_i32_0 : i32, i32
  }
  func.func @transform_2(%arg0: i32) -> (i32, i32) {
    %c0_i32 = arith.constant 0 : i32
    %c0_i32_0 = arith.constant 0 : i32
    %c0_i32_1 = arith.constant 0 : i32
    return %c0_i32, %c0_i32_0 : i32, i32
  }
  func.func @transform_3(%arg0: i32) -> (i32, i32, i32) {
    %c0_i32 = arith.constant 0 : i32
    %c0_i32_0 = arith.constant 0 : i32
    %c0_i32_1 = arith.constant 0 : i32
    return %arg0, %c0_i32, %c0_i32_0 : i32, i32, i32
  }
}

module attributes {stable_mosaic.version = 11 : i64} {
  func.func @_conv_temb_gn_silu_kernel(%arg0: i32, %arg1: memref<1x64x576xbf16, #tpu.memory_space<vmem>>, %arg2: memref<576x32xbf16, #tpu.memory_space<vmem>>, %arg3: memref<1x32xf32, #tpu.memory_space<vmem>>, %arg4: memref<1x1x64xf32, #tpu.memory_space<vmem>>, %arg5: memref<64x32xbf16, #tpu.memory_space<vmem>>, %arg6: memref<1x32xf32, #tpu.memory_space<vmem>>, %arg7: memref<1x32xf32, #tpu.memory_space<vmem>>, %arg8: memref<1x32xf32, #tpu.memory_space<vmem>>, %arg9: memref<1x64x32xf32, #tpu.memory_space<vmem>>) attributes {dimension_semantics = [#tpu.dimension_semantics<parallel>], iteration_bounds = array<i64: 2>, scalar_prefetch = 0 : i64, scratch_operands = 0 : i64, tpu.core_type = #tpu.core_type<tc>, window_params = [{transform_indices = @transform_0, window_bounds = array<i64: 1, 64, 576>}, {pipeline_mode = #tpu.pipeline_mode<synchronous>, transform_indices = @transform_1, window_bounds = array<i64: 576, 32>}, {pipeline_mode = #tpu.pipeline_mode<synchronous>, transform_indices = @transform_2, window_bounds = array<i64: 1, 32>}, {transform_indices = @transform_3, window_bounds = array<i64: 1, 1, 64>}, {pipeline_mode = #tpu.pipeline_mode<synchronous>, transform_indices = @transform_4, window_bounds = array<i64: 64, 32>}, {pipeline_mode = #tpu.pipeline_mode<synchronous>, transform_indices = @transform_5, window_bounds = array<i64: 1, 32>}, {pipeline_mode = #tpu.pipeline_mode<synchronous>, transform_indices = @transform_6, window_bounds = array<i64: 1, 32>}, {pipeline_mode = #tpu.pipeline_mode<synchronous>, transform_indices = @transform_7, window_bounds = array<i64: 1, 32>}, {transform_indices = @transform_8, window_bounds = array<i64: 1, 64, 32>}]} {
    %c0 = arith.constant 0 : index
    %c0_0 = arith.constant 0 : index
    %c0_1 = arith.constant 0 : index
    %0 = vector.load %arg1[%c0, %c0_0, %c0_1] : memref<1x64x576xbf16, #tpu.memory_space<vmem>>, vector<1x64x576xbf16>
    %1 = vector.shape_cast %0 : vector<1x64x576xbf16> to vector<64x576xbf16>
    %c0_2 = arith.constant 0 : index
    %c0_3 = arith.constant 0 : index
    %2 = vector.load %arg2[%c0_2, %c0_3] : memref<576x32xbf16, #tpu.memory_space<vmem>>, vector<576x32xbf16>
    %cst = arith.constant dense<0.000000e+00> : vector<64x32xf32>
    %3 = tpu.matmul %1, %2, %cst {dimension_numbers = #tpu.dot_dimension_numbers<[1], [0], [0], [1], [0, 0, 1, 1], [], []>} : vector<64x576xbf16>, vector<576x32xbf16>, vector<64x32xf32> -> vector<64x32xf32>
    %c0_4 = arith.constant 0 : index
    %c0_5 = arith.constant 0 : index
    %4 = vector.load %arg3[%c0_4, %c0_5] : memref<1x32xf32, #tpu.memory_space<vmem>>, vector<1x32xf32>
    %5 = vector.broadcast %4 : vector<1x32xf32> to vector<64x32xf32>
    %6 = arith.addf %3, %5 : vector<64x32xf32>
    %c0_6 = arith.constant 0 : index
    %c0_7 = arith.constant 0 : index
    %c0_8 = arith.constant 0 : index
    %7 = vector.load %arg4[%c0_6, %c0_7, %c0_8] : memref<1x1x64xf32, #tpu.memory_space<vmem>>, vector<1x1x64xf32>
    %8 = vector.shape_cast %7 : vector<1x1x64xf32> to vector<1x64xf32>
    %9 = arith.negf %8 : vector<1x64xf32>
    %10 = math.exp %9 : vector<1x64xf32>
    %cst_9 = arith.constant 1.000000e+00 : f32
    %11 = vector.broadcast %cst_9 : f32 to vector<1x64xf32>
    %12 = arith.addf %11, %10 : vector<1x64xf32>
    %13 = arith.divf %11, %12 : vector<1x64xf32>
    %14 = arith.mulf %8, %13 : vector<1x64xf32>
    %15 = arith.truncf %14 : vector<1x64xf32> to vector<1x64xbf16>
    %c0_10 = arith.constant 0 : index
    %c0_11 = arith.constant 0 : index
    %16 = vector.load %arg5[%c0_10, %c0_11] : memref<64x32xbf16, #tpu.memory_space<vmem>>, vector<64x32xbf16>
    %cst_12 = arith.constant dense<0.000000e+00> : vector<1x32xf32>
    %17 = tpu.matmul %15, %16, %cst_12 {dimension_numbers = #tpu.dot_dimension_numbers<[1], [0], [0], [1], [0, 0, 1, 1], [], []>} : vector<1x64xbf16>, vector<64x32xbf16>, vector<1x32xf32> -> vector<1x32xf32>
    %c0_13 = arith.constant 0 : index
    %c0_14 = arith.constant 0 : index
    %18 = vector.load %arg6[%c0_13, %c0_14] : memref<1x32xf32, #tpu.memory_space<vmem>>, vector<1x32xf32>
    %19 = arith.addf %17, %18 : vector<1x32xf32>
    %20 = vector.broadcast %19 : vector<1x32xf32> to vector<64x32xf32>
    %21 = arith.addf %6, %20 : vector<64x32xf32>
    %c0_15 = arith.constant 0 : index
    %c0_16 = arith.constant 0 : index
    %22 = vector.load %arg7[%c0_15, %c0_16] : memref<1x32xf32, #tpu.memory_space<vmem>>, vector<1x32xf32>
    %c0_17 = arith.constant 0 : index
    %c0_18 = arith.constant 0 : index
    %23 = vector.load %arg8[%c0_17, %c0_18] : memref<1x32xf32, #tpu.memory_space<vmem>>, vector<1x32xf32>
    %cst_19 = arith.constant dense<0.000000e+00> : vector<32xf32>
    %24 = vector.multi_reduction <add>, %21, %cst_19 [0] : vector<64x32xf32> to vector<32xf32>
    %25 = vector.shape_cast %24 : vector<32xf32> to vector<1x32xf32>
    %26 = arith.mulf %21, %21 : vector<64x32xf32>
    %cst_20 = arith.constant dense<0.000000e+00> : vector<32xf32>
    %27 = vector.multi_reduction <add>, %26, %cst_20 [0] : vector<64x32xf32> to vector<32xf32>
    %28 = vector.shape_cast %27 : vector<32xf32> to vector<1x32xf32>
    %29 = tpu.iota {dimensions = array<i32: 0>} : vector<32x8xi32>
    %30 = tpu.iota {dimensions = array<i32: 1>} : vector<32x8xi32>
    %c4_i32 = arith.constant 4 : i32
    %31 = vector.broadcast %c4_i32 : i32 to vector<32x8xi32>
    %32 = arith.muli %30, %31 : vector<32x8xi32>
    %33 = arith.cmpi sge, %29, %32 : vector<32x8xi32>
    %c4_i32_21 = arith.constant 4 : i32
    %34 = vector.broadcast %c4_i32_21 : i32 to vector<32x8xi32>
    %35 = arith.addi %32, %34 : vector<32x8xi32>
    %36 = arith.cmpi slt, %29, %35 : vector<32x8xi32>
    %37 = arith.andi %33, %36 : vector<32x8xi1>
    %38 = arith.extui %37 : vector<32x8xi1> to vector<32x8xi32>
    %39 = arith.sitofp %38 : vector<32x8xi32> to vector<32x8xf32>
    %40 = tpu.iota {dimensions = array<i32: 0>} : vector<8x32xi32>
    %41 = tpu.iota {dimensions = array<i32: 1>} : vector<8x32xi32>
    %c4_i32_22 = arith.constant 4 : i32
    %42 = vector.broadcast %c4_i32_22 : i32 to vector<8x32xi32>
    %43 = arith.muli %40, %42 : vector<8x32xi32>
    %44 = arith.cmpi sge, %41, %43 : vector<8x32xi32>
    %c4_i32_23 = arith.constant 4 : i32
    %45 = vector.broadcast %c4_i32_23 : i32 to vector<8x32xi32>
    %46 = arith.addi %43, %45 : vector<8x32xi32>
    %47 = arith.cmpi slt, %41, %46 : vector<8x32xi32>
    %48 = arith.andi %44, %47 : vector<8x32xi1>
    %49 = arith.extui %48 : vector<8x32xi1> to vector<8x32xi32>
    %50 = arith.sitofp %49 : vector<8x32xi32> to vector<8x32xf32>
    %cst_24 = arith.constant dense<0.000000e+00> : vector<1x8xf32>
    %51 = tpu.matmul %25, %39, %cst_24 {dimension_numbers = #tpu.dot_dimension_numbers<[1], [0], [0], [1], [0, 0, 1, 1], [], []>} : vector<1x32xf32>, vector<32x8xf32>, vector<1x8xf32> -> vector<1x8xf32>
    %cst_25 = arith.constant 2.560000e+02 : f32
    %52 = vector.broadcast %cst_25 : f32 to vector<1x8xf32>
    %53 = arith.divf %51, %52 : vector<1x8xf32>
    %cst_26 = arith.constant dense<0.000000e+00> : vector<1x8xf32>
    %54 = tpu.matmul %28, %39, %cst_26 {dimension_numbers = #tpu.dot_dimension_numbers<[1], [0], [0], [1], [0, 0, 1, 1], [], []>} : vector<1x32xf32>, vector<32x8xf32>, vector<1x8xf32> -> vector<1x8xf32>
    %cst_27 = arith.constant 2.560000e+02 : f32
    %55 = vector.broadcast %cst_27 : f32 to vector<1x8xf32>
    %56 = arith.divf %54, %55 : vector<1x8xf32>
    %57 = arith.mulf %53, %53 : vector<1x8xf32>
    %58 = arith.subf %56, %57 : vector<1x8xf32>
    %cst_28 = arith.constant 0.000000e+00 : f32
    %59 = vector.broadcast %cst_28 : f32 to vector<1x8xf32>
    %60 = arith.maximumf %58, %59 : vector<1x8xf32>
    %cst_29 = arith.constant dense<0.000000e+00> : vector<1x32xf32>
    %61 = tpu.matmul %53, %50, %cst_29 {dimension_numbers = #tpu.dot_dimension_numbers<[1], [0], [0], [1], [0, 0, 1, 1], [], []>} : vector<1x8xf32>, vector<8x32xf32>, vector<1x32xf32> -> vector<1x32xf32>
    %cst_30 = arith.constant dense<0.000000e+00> : vector<1x32xf32>
    %62 = tpu.matmul %60, %50, %cst_30 {dimension_numbers = #tpu.dot_dimension_numbers<[1], [0], [0], [1], [0, 0, 1, 1], [], []>} : vector<1x8xf32>, vector<8x32xf32>, vector<1x32xf32> -> vector<1x32xf32>
    %63 = vector.broadcast %61 : vector<1x32xf32> to vector<64x32xf32>
    %64 = arith.subf %21, %63 : vector<64x32xf32>
    %cst_31 = arith.constant 9.99999997E-7 : f32
    %65 = vector.broadcast %cst_31 : f32 to vector<1x32xf32>
    %66 = arith.addf %62, %65 : vector<1x32xf32>
    %67 = math.rsqrt %66 : vector<1x32xf32>
    %68 = vector.broadcast %67 : vector<1x32xf32> to vector<64x32xf32>
    %69 = arith.mulf %64, %68 : vector<64x32xf32>
    %70 = vector.broadcast %22 : vector<1x32xf32> to vector<64x32xf32>
    %71 = arith.mulf %69, %70 : vector<64x32xf32>
    %72 = vector.broadcast %23 : vector<1x32xf32> to vector<64x32xf32>
    %73 = arith.addf %71, %72 : vector<64x32xf32>
    %74 = arith.negf %73 : vector<64x32xf32>
    %75 = math.exp %74 : vector<64x32xf32>
    %cst_32 = arith.constant 1.000000e+00 : f32
    %76 = vector.broadcast %cst_32 : f32 to vector<64x32xf32>
    %77 = arith.addf %76, %75 : vector<64x32xf32>
    %78 = arith.divf %76, %77 : vector<64x32xf32>
    %79 = arith.mulf %73, %78 : vector<64x32xf32>
    %c0_33 = arith.constant 0 : index
    %c0_34 = arith.constant 0 : index
    %c0_35 = arith.constant 0 : index
    %80 = vector.load %arg9[%c0_33, %c0_34, %c0_35] : memref<1x64x32xf32, #tpu.memory_space<vmem>>, vector<1x64x32xf32>
    %81 = vector.shape_cast %80 : vector<1x64x32xf32> to vector<64x32xf32>
    %82 = vector.shape_cast %79 : vector<64x32xf32> to vector<1x64x32xf32>
    tpu.vector_store %arg9[%c0_33, %c0_34, %c0_35], %82 {strides = array<i32>} : memref<1x64x32xf32, #tpu.memory_space<vmem>>, vector<1x64x32xf32>,
    return
  }
  func.func @transform_0(%arg0: i32) -> (i32, i32, i32) {
    %c0_i32 = arith.constant 0 : i32
    %c0_i32_0 = arith.constant 0 : i32
    %c0_i32_1 = arith.constant 0 : i32
    return %arg0, %c0_i32, %c0_i32_0 : i32, i32, i32
  }
  func.func @transform_1(%arg0: i32) -> (i32, i32) {
    %c0_i32 = arith.constant 0 : i32
    %c0_i32_0 = arith.constant 0 : i32
    %c0_i32_1 = arith.constant 0 : i32
    return %c0_i32, %c0_i32_0 : i32, i32
  }
  func.func @transform_2(%arg0: i32) -> (i32, i32) {
    %c0_i32 = arith.constant 0 : i32
    %c0_i32_0 = arith.constant 0 : i32
    %c0_i32_1 = arith.constant 0 : i32
    return %c0_i32, %c0_i32_0 : i32, i32
  }
  func.func @transform_3(%arg0: i32) -> (i32, i32, i32) {
    %c0_i32 = arith.constant 0 : i32
    %c0_i32_0 = arith.constant 0 : i32
    %c0_i32_1 = arith.constant 0 : i32
    return %arg0, %c0_i32, %c0_i32_0 : i32, i32, i32
  }
  func.func @transform_4(%arg0: i32) -> (i32, i32) {
    %c0_i32 = arith.constant 0 : i32
    %c0_i32_0 = arith.constant 0 : i32
    %c0_i32_1 = arith.constant 0 : i32
    return %c0_i32, %c0_i32_0 : i32, i32
  }
  func.func @transform_5(%arg0: i32) -> (i32, i32) {
    %c0_i32 = arith.constant 0 : i32
    %c0_i32_0 = arith.constant 0 : i32
    %c0_i32_1 = arith.constant 0 : i32
    return %c0_i32, %c0_i32_0 : i32, i32
  }
  func.func @transform_6(%arg0: i32) -> (i32, i32) {
    %c0_i32 = arith.constant 0 : i32
    %c0_i32_0 = arith.constant 0 : i32
    %c0_i32_1 = arith.constant 0 : i32
    return %c0_i32, %c0_i32_0 : i32, i32
  }
  func.func @transform_7(%arg0: i32) -> (i32, i32) {
    %c0_i32 = arith.constant 0 : i32
    %c0_i32_0 = arith.constant 0 : i32
    %c0_i32_1 = arith.constant 0 : i32
    return %c0_i32, %c0_i32_0 : i32, i32
  }
  func.func @transform_8(%arg0: i32) -> (i32, i32, i32) {
    %c0_i32 = arith.constant 0 : i32
    %c0_i32_0 = arith.constant 0 : i32
    %c0_i32_1 = arith.constant 0 : i32
    return %arg0, %c0_i32, %c0_i32_0 : i32, i32, i32
  }
}

module attributes {stable_mosaic.version = 11 : i64} {
  func.func @_conv_shortcut_kernel(%arg0: i32, %arg1: memref<1x64x288xbf16, #tpu.memory_space<vmem>>, %arg2: memref<288x32xbf16, #tpu.memory_space<vmem>>, %arg3: memref<1x32xf32, #tpu.memory_space<vmem>>, %arg4: memref<1x64x64xbf16, #tpu.memory_space<vmem>>, %arg5: memref<64x32xbf16, #tpu.memory_space<vmem>>, %arg6: memref<1x32xf32, #tpu.memory_space<vmem>>, %arg7: memref<1x64x32xf32, #tpu.memory_space<vmem>>) attributes {dimension_semantics = [#tpu.dimension_semantics<parallel>], iteration_bounds = array<i64: 2>, scalar_prefetch = 0 : i64, scratch_operands = 0 : i64, tpu.core_type = #tpu.core_type<tc>, window_params = [{transform_indices = @transform_0, window_bounds = array<i64: 1, 64, 288>}, {pipeline_mode = #tpu.pipeline_mode<synchronous>, transform_indices = @transform_1, window_bounds = array<i64: 288, 32>}, {pipeline_mode = #tpu.pipeline_mode<synchronous>, transform_indices = @transform_2, window_bounds = array<i64: 1, 32>}, {transform_indices = @transform_3, window_bounds = array<i64: 1, 64, 64>}, {pipeline_mode = #tpu.pipeline_mode<synchronous>, transform_indices = @transform_4, window_bounds = array<i64: 64, 32>}, {pipeline_mode = #tpu.pipeline_mode<synchronous>, transform_indices = @transform_5, window_bounds = array<i64: 1, 32>}, {transform_indices = @transform_6, window_bounds = array<i64: 1, 64, 32>}]} {
    %c0 = arith.constant 0 : index
    %c0_0 = arith.constant 0 : index
    %c0_1 = arith.constant 0 : index
    %0 = vector.load %arg1[%c0, %c0_0, %c0_1] : memref<1x64x288xbf16, #tpu.memory_space<vmem>>, vector<1x64x288xbf16>
    %1 = vector.shape_cast %0 : vector<1x64x288xbf16> to vector<64x288xbf16>
    %c0_2 = arith.constant 0 : index
    %c0_3 = arith.constant 0 : index
    %2 = vector.load %arg2[%c0_2, %c0_3] : memref<288x32xbf16, #tpu.memory_space<vmem>>, vector<288x32xbf16>
    %cst = arith.constant dense<0.000000e+00> : vector<64x32xf32>
    %3 = tpu.matmul %1, %2, %cst {dimension_numbers = #tpu.dot_dimension_numbers<[1], [0], [0], [1], [0, 0, 1, 1], [], []>} : vector<64x288xbf16>, vector<288x32xbf16>, vector<64x32xf32> -> vector<64x32xf32>
    %c0_4 = arith.constant 0 : index
    %c0_5 = arith.constant 0 : index
    %4 = vector.load %arg3[%c0_4, %c0_5] : memref<1x32xf32, #tpu.memory_space<vmem>>, vector<1x32xf32>
    %5 = vector.broadcast %4 : vector<1x32xf32> to vector<64x32xf32>
    %6 = arith.addf %3, %5 : vector<64x32xf32>
    %c0_6 = arith.constant 0 : index
    %c0_7 = arith.constant 0 : index
    %c0_8 = arith.constant 0 : index
    %7 = vector.load %arg4[%c0_6, %c0_7, %c0_8] : memref<1x64x64xbf16, #tpu.memory_space<vmem>>, vector<1x64x64xbf16>
    %8 = vector.shape_cast %7 : vector<1x64x64xbf16> to vector<64x64xbf16>
    %c0_9 = arith.constant 0 : index
    %c0_10 = arith.constant 0 : index
    %9 = vector.load %arg5[%c0_9, %c0_10] : memref<64x32xbf16, #tpu.memory_space<vmem>>, vector<64x32xbf16>
    %cst_11 = arith.constant dense<0.000000e+00> : vector<64x32xf32>
    %10 = tpu.matmul %8, %9, %cst_11 {dimension_numbers = #tpu.dot_dimension_numbers<[1], [0], [0], [1], [0, 0, 1, 1], [], []>} : vector<64x64xbf16>, vector<64x32xbf16>, vector<64x32xf32> -> vector<64x32xf32>
    %c0_12 = arith.constant 0 : index
    %c0_13 = arith.constant 0 : index
    %11 = vector.load %arg6[%c0_12, %c0_13] : memref<1x32xf32, #tpu.memory_space<vmem>>, vector<1x32xf32>
    %12 = vector.broadcast %11 : vector<1x32xf32> to vector<64x32xf32>
    %13 = arith.addf %10, %12 : vector<64x32xf32>
    %14 = arith.addf %6, %13 : vector<64x32xf32>
    %c0_14 = arith.constant 0 : index
    %c0_15 = arith.constant 0 : index
    %c0_16 = arith.constant 0 : index
    %15 = vector.load %arg7[%c0_14, %c0_15, %c0_16] : memref<1x64x32xf32, #tpu.memory_space<vmem>>, vector<1x64x32xf32>
    %16 = vector.shape_cast %15 : vector<1x64x32xf32> to vector<64x32xf32>
    %17 = vector.shape_cast %14 : vector<64x32xf32> to vector<1x64x32xf32>
    tpu.vector_store %arg7[%c0_14, %c0_15, %c0_16], %17 {strides = array<i32>} : memref<1x64x32xf32, #tpu.memory_space<vmem>>, vector<1x64x32xf32>,
    return
  }
  func.func @transform_0(%arg0: i32) -> (i32, i32, i32) {
    %c0_i32 = arith.constant 0 : i32
    %c0_i32_0 = arith.constant 0 : i32
    %c0_i32_1 = arith.constant 0 : i32
    return %arg0, %c0_i32, %c0_i32_0 : i32, i32, i32
  }
  func.func @transform_1(%arg0: i32) -> (i32, i32) {
    %c0_i32 = arith.constant 0 : i32
    %c0_i32_0 = arith.constant 0 : i32
    %c0_i32_1 = arith.constant 0 : i32
    return %c0_i32, %c0_i32_0 : i32, i32
  }
  func.func @transform_2(%arg0: i32) -> (i32, i32) {
    %c0_i32 = arith.constant 0 : i32
    %c0_i32_0 = arith.constant 0 : i32
    %c0_i32_1 = arith.constant 0 : i32
    return %c0_i32, %c0_i32_0 : i32, i32
  }
  func.func @transform_3(%arg0: i32) -> (i32, i32, i32) {
    %c0_i32 = arith.constant 0 : i32
    %c0_i32_0 = arith.constant 0 : i32
    %c0_i32_1 = arith.constant 0 : i32
    return %arg0, %c0_i32, %c0_i32_0 : i32, i32, i32
  }
  func.func @transform_4(%arg0: i32) -> (i32, i32) {
    %c0_i32 = arith.constant 0 : i32
    %c0_i32_0 = arith.constant 0 : i32
    %c0_i32_1 = arith.constant 0 : i32
    return %c0_i32, %c0_i32_0 : i32, i32
  }
  func.func @transform_5(%arg0: i32) -> (i32, i32) {
    %c0_i32 = arith.constant 0 : i32
    %c0_i32_0 = arith.constant 0 : i32
    %c0_i32_1 = arith.constant 0 : i32
    return %c0_i32, %c0_i32_0 : i32, i32
  }
  func.func @transform_6(%arg0: i32) -> (i32, i32, i32) {
    %c0_i32 = arith.constant 0 : i32
    %c0_i32_0 = arith.constant 0 : i32
    %c0_i32_1 = arith.constant 0 : i32
    return %arg0, %c0_i32, %c0_i32_0 : i32, i32, i32
  }
}

module attributes {stable_mosaic.version = 11 : i64} {
  func.func @_t_selfattn_kernel(%arg0: i32, %arg1: memref<1x64x32xf32, #tpu.memory_space<vmem>>, %arg2: memref<1x32xf32, #tpu.memory_space<vmem>>, %arg3: memref<1x32xf32, #tpu.memory_space<vmem>>, %arg4: memref<32x32xbf16, #tpu.memory_space<vmem>>, %arg5: memref<1x32xf32, #tpu.memory_space<vmem>>, %arg6: memref<1x32xf32, #tpu.memory_space<vmem>>, %arg7: memref<1x32xf32, #tpu.memory_space<vmem>>, %arg8: memref<2x32x16xbf16, #tpu.memory_space<vmem>>, %arg9: memref<2x32x16xbf16, #tpu.memory_space<vmem>>, %arg10: memref<2x32x16xbf16, #tpu.memory_space<vmem>>, %arg11: memref<2x16x32xbf16, #tpu.memory_space<vmem>>, %arg12: memref<1x32xf32, #tpu.memory_space<vmem>>, %arg13: memref<1x64x32xf32, #tpu.memory_space<vmem>>) attributes {dimension_semantics = [#tpu.dimension_semantics<parallel>], iteration_bounds = array<i64: 2>, scalar_prefetch = 0 : i64, scratch_operands = 0 : i64, tpu.core_type = #tpu.core_type<tc>, window_params = [{transform_indices = @transform_0, window_bounds = array<i64: 1, 64, 32>}, {pipeline_mode = #tpu.pipeline_mode<synchronous>, transform_indices = @transform_1, window_bounds = array<i64: 1, 32>}, {pipeline_mode = #tpu.pipeline_mode<synchronous>, transform_indices = @transform_2, window_bounds = array<i64: 1, 32>}, {pipeline_mode = #tpu.pipeline_mode<synchronous>, transform_indices = @transform_3, window_bounds = array<i64: 32, 32>}, {pipeline_mode = #tpu.pipeline_mode<synchronous>, transform_indices = @transform_4, window_bounds = array<i64: 1, 32>}, {pipeline_mode = #tpu.pipeline_mode<synchronous>, transform_indices = @transform_5, window_bounds = array<i64: 1, 32>}, {pipeline_mode = #tpu.pipeline_mode<synchronous>, transform_indices = @transform_6, window_bounds = array<i64: 1, 32>}, {pipeline_mode = #tpu.pipeline_mode<synchronous>, transform_indices = @transform_7, window_bounds = array<i64: 2, 32, 16>}, {pipeline_mode = #tpu.pipeline_mode<synchronous>, transform_indices = @transform_8, window_bounds = array<i64: 2, 32, 16>}, {pipeline_mode = #tpu.pipeline_mode<synchronous>, transform_indices = @transform_9, window_bounds = array<i64: 2, 32, 16>}, {pipeline_mode = #tpu.pipeline_mode<synchronous>, transform_indices = @transform_10, window_bounds = array<i64: 2, 16, 32>}, {pipeline_mode = #tpu.pipeline_mode<synchronous>, transform_indices = @transform_11, window_bounds = array<i64: 1, 32>}, {transform_indices = @transform_12, window_bounds = array<i64: 1, 64, 32>}]} {
    %c0 = arith.constant 0 : index
    %c0_0 = arith.constant 0 : index
    %c0_1 = arith.constant 0 : index
    %0 = vector.load %arg1[%c0, %c0_0, %c0_1] : memref<1x64x32xf32, #tpu.memory_space<vmem>>, vector<1x64x32xf32>
    %1 = vector.shape_cast %0 : vector<1x64x32xf32> to vector<64x32xf32>
    %c0_2 = arith.constant 0 : index
    %c0_3 = arith.constant 0 : index
    %2 = vector.load %arg2[%c0_2, %c0_3] : memref<1x32xf32, #tpu.memory_space<vmem>>, vector<1x32xf32>
    %c0_4 = arith.constant 0 : index
    %c0_5 = arith.constant 0 : index
    %3 = vector.load %arg3[%c0_4, %c0_5] : memref<1x32xf32, #tpu.memory_space<vmem>>, vector<1x32xf32>
    %cst = arith.constant dense<0.000000e+00> : vector<32xf32>
    %4 = vector.multi_reduction <add>, %1, %cst [0] : vector<64x32xf32> to vector<32xf32>
    %5 = vector.shape_cast %4 : vector<32xf32> to vector<1x32xf32>
    %6 = arith.mulf %1, %1 : vector<64x32xf32>
    %cst_6 = arith.constant dense<0.000000e+00> : vector<32xf32>
    %7 = vector.multi_reduction <add>, %6, %cst_6 [0] : vector<64x32xf32> to vector<32xf32>
    %8 = vector.shape_cast %7 : vector<32xf32> to vector<1x32xf32>
    %9 = tpu.iota {dimensions = array<i32: 0>} : vector<32x8xi32>
    %10 = tpu.iota {dimensions = array<i32: 1>} : vector<32x8xi32>
    %c4_i32 = arith.constant 4 : i32
    %11 = vector.broadcast %c4_i32 : i32 to vector<32x8xi32>
    %12 = arith.muli %10, %11 : vector<32x8xi32>
    %13 = arith.cmpi sge, %9, %12 : vector<32x8xi32>
    %c4_i32_7 = arith.constant 4 : i32
    %14 = vector.broadcast %c4_i32_7 : i32 to vector<32x8xi32>
    %15 = arith.addi %12, %14 : vector<32x8xi32>
    %16 = arith.cmpi slt, %9, %15 : vector<32x8xi32>
    %17 = arith.andi %13, %16 : vector<32x8xi1>
    %18 = arith.extui %17 : vector<32x8xi1> to vector<32x8xi32>
    %19 = arith.sitofp %18 : vector<32x8xi32> to vector<32x8xf32>
    %20 = tpu.iota {dimensions = array<i32: 0>} : vector<8x32xi32>
    %21 = tpu.iota {dimensions = array<i32: 1>} : vector<8x32xi32>
    %c4_i32_8 = arith.constant 4 : i32
    %22 = vector.broadcast %c4_i32_8 : i32 to vector<8x32xi32>
    %23 = arith.muli %20, %22 : vector<8x32xi32>
    %24 = arith.cmpi sge, %21, %23 : vector<8x32xi32>
    %c4_i32_9 = arith.constant 4 : i32
    %25 = vector.broadcast %c4_i32_9 : i32 to vector<8x32xi32>
    %26 = arith.addi %23, %25 : vector<8x32xi32>
    %27 = arith.cmpi slt, %21, %26 : vector<8x32xi32>
    %28 = arith.andi %24, %27 : vector<8x32xi1>
    %29 = arith.extui %28 : vector<8x32xi1> to vector<8x32xi32>
    %30 = arith.sitofp %29 : vector<8x32xi32> to vector<8x32xf32>
    %cst_10 = arith.constant dense<0.000000e+00> : vector<1x8xf32>
    %31 = tpu.matmul %5, %19, %cst_10 {dimension_numbers = #tpu.dot_dimension_numbers<[1], [0], [0], [1], [0, 0, 1, 1], [], []>} : vector<1x32xf32>, vector<32x8xf32>, vector<1x8xf32> -> vector<1x8xf32>
    %cst_11 = arith.constant 2.560000e+02 : f32
    %32 = vector.broadcast %cst_11 : f32 to vector<1x8xf32>
    %33 = arith.divf %31, %32 : vector<1x8xf32>
    %cst_12 = arith.constant dense<0.000000e+00> : vector<1x8xf32>
    %34 = tpu.matmul %8, %19, %cst_12 {dimension_numbers = #tpu.dot_dimension_numbers<[1], [0], [0], [1], [0, 0, 1, 1], [], []>} : vector<1x32xf32>, vector<32x8xf32>, vector<1x8xf32> -> vector<1x8xf32>
    %cst_13 = arith.constant 2.560000e+02 : f32
    %35 = vector.broadcast %cst_13 : f32 to vector<1x8xf32>
    %36 = arith.divf %34, %35 : vector<1x8xf32>
    %37 = arith.mulf %33, %33 : vector<1x8xf32>
    %38 = arith.subf %36, %37 : vector<1x8xf32>
    %cst_14 = arith.constant 0.000000e+00 : f32
    %39 = vector.broadcast %cst_14 : f32 to vector<1x8xf32>
    %40 = arith.maximumf %38, %39 : vector<1x8xf32>
    %cst_15 = arith.constant dense<0.000000e+00> : vector<1x32xf32>
    %41 = tpu.matmul %33, %30, %cst_15 {dimension_numbers = #tpu.dot_dimension_numbers<[1], [0], [0], [1], [0, 0, 1, 1], [], []>} : vector<1x8xf32>, vector<8x32xf32>, vector<1x32xf32> -> vector<1x32xf32>
    %cst_16 = arith.constant dense<0.000000e+00> : vector<1x32xf32>
    %42 = tpu.matmul %40, %30, %cst_16 {dimension_numbers = #tpu.dot_dimension_numbers<[1], [0], [0], [1], [0, 0, 1, 1], [], []>} : vector<1x8xf32>, vector<8x32xf32>, vector<1x32xf32> -> vector<1x32xf32>
    %43 = vector.broadcast %41 : vector<1x32xf32> to vector<64x32xf32>
    %44 = arith.subf %1, %43 : vector<64x32xf32>
    %cst_17 = arith.constant 9.99999997E-7 : f32
    %45 = vector.broadcast %cst_17 : f32 to vector<1x32xf32>
    %46 = arith.addf %42, %45 : vector<1x32xf32>
    %47 = math.rsqrt %46 : vector<1x32xf32>
    %48 = vector.broadcast %47 : vector<1x32xf32> to vector<64x32xf32>
    %49 = arith.mulf %44, %48 : vector<64x32xf32>
    %50 = vector.broadcast %2 : vector<1x32xf32> to vector<64x32xf32>
    %51 = arith.mulf %49, %50 : vector<64x32xf32>
    %52 = vector.broadcast %3 : vector<1x32xf32> to vector<64x32xf32>
    %53 = arith.addf %51, %52 : vector<64x32xf32>
    %54 = arith.truncf %53 : vector<64x32xf32> to vector<64x32xbf16>
    %c0_18 = arith.constant 0 : index
    %c0_19 = arith.constant 0 : index
    %55 = vector.load %arg4[%c0_18, %c0_19] : memref<32x32xbf16, #tpu.memory_space<vmem>>, vector<32x32xbf16>
    %cst_20 = arith.constant dense<0.000000e+00> : vector<64x32xf32>
    %56 = tpu.matmul %54, %55, %cst_20 {dimension_numbers = #tpu.dot_dimension_numbers<[1], [0], [0], [1], [0, 0, 1, 1], [], []>} : vector<64x32xbf16>, vector<32x32xbf16>, vector<64x32xf32> -> vector<64x32xf32>
    %c0_21 = arith.constant 0 : index
    %c0_22 = arith.constant 0 : index
    %57 = vector.load %arg5[%c0_21, %c0_22] : memref<1x32xf32, #tpu.memory_space<vmem>>, vector<1x32xf32>
    %58 = vector.broadcast %57 : vector<1x32xf32> to vector<64x32xf32>
    %59 = arith.addf %56, %58 : vector<64x32xf32>
    %c0_23 = arith.constant 0 : index
    %c0_24 = arith.constant 0 : index
    %60 = vector.load %arg6[%c0_23, %c0_24] : memref<1x32xf32, #tpu.memory_space<vmem>>, vector<1x32xf32>
    %c0_25 = arith.constant 0 : index
    %c0_26 = arith.constant 0 : index
    %61 = vector.load %arg7[%c0_25, %c0_26] : memref<1x32xf32, #tpu.memory_space<vmem>>, vector<1x32xf32>
    %cst_27 = arith.constant dense<0.000000e+00> : vector<64xf32>
    %62 = vector.multi_reduction <add>, %59, %cst_27 [1] : vector<64x32xf32> to vector<64xf32>
    %63 = vector.shape_cast %62 : vector<64xf32> to vector<64x1xf32>
    %cst_28 = arith.constant 3.200000e+01 : f32
    %64 = vector.broadcast %cst_28 : f32 to vector<64x1xf32>
    %65 = arith.divf %63, %64 : vector<64x1xf32>
    %66 = vector.broadcast %65 : vector<64x1xf32> to vector<64x32xf32>
    %67 = arith.subf %59, %66 : vector<64x32xf32>
    %68 = arith.mulf %67, %67 : vector<64x32xf32>
    %cst_29 = arith.constant dense<0.000000e+00> : vector<64xf32>
    %69 = vector.multi_reduction <add>, %68, %cst_29 [1] : vector<64x32xf32> to vector<64xf32>
    %70 = vector.shape_cast %69 : vector<64xf32> to vector<64x1xf32>
    %cst_30 = arith.constant 3.200000e+01 : f32
    %71 = vector.broadcast %cst_30 : f32 to vector<64x1xf32>
    %72 = arith.divf %70, %71 : vector<64x1xf32>
    %cst_31 = arith.constant 9.99999974E-6 : f32
    %73 = vector.broadcast %cst_31 : f32 to vector<64x1xf32>
    %74 = arith.addf %72, %73 : vector<64x1xf32>
    %75 = math.rsqrt %74 : vector<64x1xf32>
    %76 = vector.broadcast %75 : vector<64x1xf32> to vector<64x32xf32>
    %77 = arith.mulf %67, %76 : vector<64x32xf32>
    %78 = vector.broadcast %60 : vector<1x32xf32> to vector<64x32xf32>
    %79 = arith.mulf %77, %78 : vector<64x32xf32>
    %80 = vector.broadcast %61 : vector<1x32xf32> to vector<64x32xf32>
    %81 = arith.addf %79, %80 : vector<64x32xf32>
    %82 = arith.truncf %81 : vector<64x32xf32> to vector<64x32xbf16>
    %83 = arith.truncf %81 : vector<64x32xf32> to vector<64x32xbf16>
    %c0_32 = arith.constant 0 : index
    %c0_33 = arith.constant 0 : index
    %c0_34 = arith.constant 0 : index
    %84 = vector.load %arg8[%c0_32, %c0_33, %c0_34] : memref<2x32x16xbf16, #tpu.memory_space<vmem>>, vector<1x32x16xbf16>
    %85 = vector.shape_cast %84 : vector<1x32x16xbf16> to vector<32x16xbf16>
    %cst_35 = arith.constant dense<0.000000e+00> : vector<64x16xf32>
    %86 = tpu.matmul %82, %85, %cst_35 {dimension_numbers = #tpu.dot_dimension_numbers<[1], [0], [0], [1], [0, 0, 1, 1], [], []>} : vector<64x32xbf16>, vector<32x16xbf16>, vector<64x16xf32> -> vector<64x16xf32>
    %cst_36 = arith.constant 2.500000e-01 : f32
    %87 = vector.broadcast %cst_36 : f32 to vector<64x16xf32>
    %88 = arith.mulf %86, %87 : vector<64x16xf32>
    %c0_37 = arith.constant 0 : index
    %c0_38 = arith.constant 0 : index
    %c0_39 = arith.constant 0 : index
    %89 = vector.load %arg9[%c0_37, %c0_38, %c0_39] : memref<2x32x16xbf16, #tpu.memory_space<vmem>>, vector<1x32x16xbf16>
    %90 = vector.shape_cast %89 : vector<1x32x16xbf16> to vector<32x16xbf16>
    %cst_40 = arith.constant dense<0.000000e+00> : vector<64x16xf32>
    %91 = tpu.matmul %83, %90, %cst_40 {dimension_numbers = #tpu.dot_dimension_numbers<[1], [0], [0], [1], [0, 0, 1, 1], [], []>} : vector<64x32xbf16>, vector<32x16xbf16>, vector<64x16xf32> -> vector<64x16xf32>
    %c0_41 = arith.constant 0 : index
    %c0_42 = arith.constant 0 : index
    %c0_43 = arith.constant 0 : index
    %92 = vector.load %arg10[%c0_41, %c0_42, %c0_43] : memref<2x32x16xbf16, #tpu.memory_space<vmem>>, vector<1x32x16xbf16>
    %93 = vector.shape_cast %92 : vector<1x32x16xbf16> to vector<32x16xbf16>
    %cst_44 = arith.constant dense<0.000000e+00> : vector<64x16xf32>
    %94 = tpu.matmul %83, %93, %cst_44 {dimension_numbers = #tpu.dot_dimension_numbers<[1], [0], [0], [1], [0, 0, 1, 1], [], []>} : vector<64x32xbf16>, vector<32x16xbf16>, vector<64x16xf32> -> vector<64x16xf32>
    %95 = arith.truncf %88 : vector<64x16xf32> to vector<64x16xbf16>
    %96 = arith.truncf %91 : vector<64x16xf32> to vector<64x16xbf16>
    %cst_45 = arith.constant dense<0.000000e+00> : vector<64x64xf32>
    %97 = tpu.matmul %95, %96, %cst_45 {dimension_numbers = #tpu.dot_dimension_numbers<[1], [1], [0], [0], [0, 0, 1, 0], [], []>} : vector<64x16xbf16>, vector<64x16xbf16>, vector<64x64xf32> -> vector<64x64xf32>
    %cst_46 = arith.constant dense<0xFF800000> : vector<64xf32>
    %98 = vector.multi_reduction <maximumf>, %97, %cst_46 [1] : vector<64x64xf32> to vector<64xf32>
    %99 = vector.shape_cast %98 : vector<64xf32> to vector<64x1xf32>
    %100 = vector.broadcast %99 : vector<64x1xf32> to vector<64x64xf32>
    %101 = arith.subf %97, %100 : vector<64x64xf32>
    %102 = math.exp %101 : vector<64x64xf32>
    %cst_47 = arith.constant dense<0.000000e+00> : vector<64xf32>
    %103 = vector.multi_reduction <add>, %102, %cst_47 [1] : vector<64x64xf32> to vector<64xf32>
    %104 = vector.shape_cast %103 : vector<64xf32> to vector<64x1xf32>
    %105 = tpu.reciprocal %104 {approx = true} : vector<64x1xf32> -> vector<64x1xf32>
    %106 = vector.broadcast %105 : vector<64x1xf32> to vector<64x64xf32>
    %107 = arith.mulf %102, %106 : vector<64x64xf32>
    %108 = arith.truncf %107 : vector<64x64xf32> to vector<64x64xbf16>
    %109 = arith.truncf %94 : vector<64x16xf32> to vector<64x16xbf16>
    %cst_48 = arith.constant dense<0.000000e+00> : vector<64x16xf32>
    %110 = tpu.matmul %108, %109, %cst_48 {dimension_numbers = #tpu.dot_dimension_numbers<[1], [0], [0], [1], [0, 0, 1, 1], [], []>} : vector<64x64xbf16>, vector<64x16xbf16>, vector<64x16xf32> -> vector<64x16xf32>
    %111 = arith.truncf %110 : vector<64x16xf32> to vector<64x16xbf16>
    %c0_49 = arith.constant 0 : index
    %c0_50 = arith.constant 0 : index
    %c0_51 = arith.constant 0 : index
    %112 = vector.load %arg11[%c0_49, %c0_50, %c0_51] : memref<2x16x32xbf16, #tpu.memory_space<vmem>>, vector<1x16x32xbf16>
    %113 = vector.shape_cast %112 : vector<1x16x32xbf16> to vector<16x32xbf16>
    %cst_52 = arith.constant dense<0.000000e+00> : vector<64x32xf32>
    %114 = tpu.matmul %111, %113, %cst_52 {dimension_numbers = #tpu.dot_dimension_numbers<[1], [0], [0], [1], [0, 0, 1, 1], [], []>} : vector<64x16xbf16>, vector<16x32xbf16>, vector<64x32xf32> -> vector<64x32xf32>
    %c1 = arith.constant 1 : index
    %c0_53 = arith.constant 0 : index
    %c0_54 = arith.constant 0 : index
    %115 = vector.load %arg8[%c1, %c0_53, %c0_54] : memref<2x32x16xbf16, #tpu.memory_space<vmem>>, vector<1x32x16xbf16>
    %116 = vector.shape_cast %115 : vector<1x32x16xbf16> to vector<32x16xbf16>
    %cst_55 = arith.constant dense<0.000000e+00> : vector<64x16xf32>
    %117 = tpu.matmul %82, %116, %cst_55 {dimension_numbers = #tpu.dot_dimension_numbers<[1], [0], [0], [1], [0, 0, 1, 1], [], []>} : vector<64x32xbf16>, vector<32x16xbf16>, vector<64x16xf32> -> vector<64x16xf32>
    %cst_56 = arith.constant 2.500000e-01 : f32
    %118 = vector.broadcast %cst_56 : f32 to vector<64x16xf32>
    %119 = arith.mulf %117, %118 : vector<64x16xf32>
    %c1_57 = arith.constant 1 : index
    %c0_58 = arith.constant 0 : index
    %c0_59 = arith.constant 0 : index
    %120 = vector.load %arg9[%c1_57, %c0_58, %c0_59] : memref<2x32x16xbf16, #tpu.memory_space<vmem>>, vector<1x32x16xbf16>
    %121 = vector.shape_cast %120 : vector<1x32x16xbf16> to vector<32x16xbf16>
    %cst_60 = arith.constant dense<0.000000e+00> : vector<64x16xf32>
    %122 = tpu.matmul %83, %121, %cst_60 {dimension_numbers = #tpu.dot_dimension_numbers<[1], [0], [0], [1], [0, 0, 1, 1], [], []>} : vector<64x32xbf16>, vector<32x16xbf16>, vector<64x16xf32> -> vector<64x16xf32>
    %c1_61 = arith.constant 1 : index
    %c0_62 = arith.constant 0 : index
    %c0_63 = arith.constant 0 : index
    %123 = vector.load %arg10[%c1_61, %c0_62, %c0_63] : memref<2x32x16xbf16, #tpu.memory_space<vmem>>, vector<1x32x16xbf16>
    %124 = vector.shape_cast %123 : vector<1x32x16xbf16> to vector<32x16xbf16>
    %cst_64 = arith.constant dense<0.000000e+00> : vector<64x16xf32>
    %125 = tpu.matmul %83, %124, %cst_64 {dimension_numbers = #tpu.dot_dimension_numbers<[1], [0], [0], [1], [0, 0, 1, 1], [], []>} : vector<64x32xbf16>, vector<32x16xbf16>, vector<64x16xf32> -> vector<64x16xf32>
    %126 = arith.truncf %119 : vector<64x16xf32> to vector<64x16xbf16>
    %127 = arith.truncf %122 : vector<64x16xf32> to vector<64x16xbf16>
    %cst_65 = arith.constant dense<0.000000e+00> : vector<64x64xf32>
    %128 = tpu.matmul %126, %127, %cst_65 {dimension_numbers = #tpu.dot_dimension_numbers<[1], [1], [0], [0], [0, 0, 1, 0], [], []>} : vector<64x16xbf16>, vector<64x16xbf16>, vector<64x64xf32> -> vector<64x64xf32>
    %cst_66 = arith.constant dense<0xFF800000> : vector<64xf32>
    %129 = vector.multi_reduction <maximumf>, %128, %cst_66 [1] : vector<64x64xf32> to vector<64xf32>
    %130 = vector.shape_cast %129 : vector<64xf32> to vector<64x1xf32>
    %131 = vector.broadcast %130 : vector<64x1xf32> to vector<64x64xf32>
    %132 = arith.subf %128, %131 : vector<64x64xf32>
    %133 = math.exp %132 : vector<64x64xf32>
    %cst_67 = arith.constant dense<0.000000e+00> : vector<64xf32>
    %134 = vector.multi_reduction <add>, %133, %cst_67 [1] : vector<64x64xf32> to vector<64xf32>
    %135 = vector.shape_cast %134 : vector<64xf32> to vector<64x1xf32>
    %136 = tpu.reciprocal %135 {approx = true} : vector<64x1xf32> -> vector<64x1xf32>
    %137 = vector.broadcast %136 : vector<64x1xf32> to vector<64x64xf32>
    %138 = arith.mulf %133, %137 : vector<64x64xf32>
    %139 = arith.truncf %138 : vector<64x64xf32> to vector<64x64xbf16>
    %140 = arith.truncf %125 : vector<64x16xf32> to vector<64x16xbf16>
    %cst_68 = arith.constant dense<0.000000e+00> : vector<64x16xf32>
    %141 = tpu.matmul %139, %140, %cst_68 {dimension_numbers = #tpu.dot_dimension_numbers<[1], [0], [0], [1], [0, 0, 1, 1], [], []>} : vector<64x64xbf16>, vector<64x16xbf16>, vector<64x16xf32> -> vector<64x16xf32>
    %142 = arith.truncf %141 : vector<64x16xf32> to vector<64x16xbf16>
    %c1_69 = arith.constant 1 : index
    %c0_70 = arith.constant 0 : index
    %c0_71 = arith.constant 0 : index
    %143 = vector.load %arg11[%c1_69, %c0_70, %c0_71] : memref<2x16x32xbf16, #tpu.memory_space<vmem>>, vector<1x16x32xbf16>
    %144 = vector.shape_cast %143 : vector<1x16x32xbf16> to vector<16x32xbf16>
    %cst_72 = arith.constant dense<0.000000e+00> : vector<64x32xf32>
    %145 = tpu.matmul %142, %144, %cst_72 {dimension_numbers = #tpu.dot_dimension_numbers<[1], [0], [0], [1], [0, 0, 1, 1], [], []>} : vector<64x16xbf16>, vector<16x32xbf16>, vector<64x32xf32> -> vector<64x32xf32>
    %146 = arith.addf %114, %145 : vector<64x32xf32>
    %c0_73 = arith.constant 0 : index
    %c0_74 = arith.constant 0 : index
    %147 = vector.load %arg12[%c0_73, %c0_74] : memref<1x32xf32, #tpu.memory_space<vmem>>, vector<1x32xf32>
    %148 = vector.broadcast %147 : vector<1x32xf32> to vector<64x32xf32>
    %149 = arith.addf %146, %148 : vector<64x32xf32>
    %150 = arith.addf %149, %59 : vector<64x32xf32>
    %c0_75 = arith.constant 0 : index
    %c0_76 = arith.constant 0 : index
    %c0_77 = arith.constant 0 : index
    %151 = vector.load %arg13[%c0_75, %c0_76, %c0_77] : memref<1x64x32xf32, #tpu.memory_space<vmem>>, vector<1x64x32xf32>
    %152 = vector.shape_cast %151 : vector<1x64x32xf32> to vector<64x32xf32>
    %153 = vector.shape_cast %150 : vector<64x32xf32> to vector<1x64x32xf32>
    tpu.vector_store %arg13[%c0_75, %c0_76, %c0_77], %153 {strides = array<i32>} : memref<1x64x32xf32, #tpu.memory_space<vmem>>, vector<1x64x32xf32>,
    return
  }
  func.func @transform_0(%arg0: i32) -> (i32, i32, i32) {
    %c0_i32 = arith.constant 0 : i32
    %c0_i32_0 = arith.constant 0 : i32
    %c0_i32_1 = arith.constant 0 : i32
    return %arg0, %c0_i32, %c0_i32_0 : i32, i32, i32
  }
  func.func @transform_1(%arg0: i32) -> (i32, i32) {
    %c0_i32 = arith.constant 0 : i32
    %c0_i32_0 = arith.constant 0 : i32
    %c0_i32_1 = arith.constant 0 : i32
    return %c0_i32, %c0_i32_0 : i32, i32
  }
  func.func @transform_2(%arg0: i32) -> (i32, i32) {
    %c0_i32 = arith.constant 0 : i32
    %c0_i32_0 = arith.constant 0 : i32
    %c0_i32_1 = arith.constant 0 : i32
    return %c0_i32, %c0_i32_0 : i32, i32
  }
  func.func @transform_3(%arg0: i32) -> (i32, i32) {
    %c0_i32 = arith.constant 0 : i32
    %c0_i32_0 = arith.constant 0 : i32
    %c0_i32_1 = arith.constant 0 : i32
    return %c0_i32, %c0_i32_0 : i32, i32
  }
  func.func @transform_4(%arg0: i32) -> (i32, i32) {
    %c0_i32 = arith.constant 0 : i32
    %c0_i32_0 = arith.constant 0 : i32
    %c0_i32_1 = arith.constant 0 : i32
    return %c0_i32, %c0_i32_0 : i32, i32
  }
  func.func @transform_5(%arg0: i32) -> (i32, i32) {
    %c0_i32 = arith.constant 0 : i32
    %c0_i32_0 = arith.constant 0 : i32
    %c0_i32_1 = arith.constant 0 : i32
    return %c0_i32, %c0_i32_0 : i32, i32
  }
  func.func @transform_6(%arg0: i32) -> (i32, i32) {
    %c0_i32 = arith.constant 0 : i32
    %c0_i32_0 = arith.constant 0 : i32
    %c0_i32_1 = arith.constant 0 : i32
    return %c0_i32, %c0_i32_0 : i32, i32
  }
  func.func @transform_7(%arg0: i32) -> (i32, i32, i32) {
    %c0_i32 = arith.constant 0 : i32
    %c0_i32_0 = arith.constant 0 : i32
    %c0_i32_1 = arith.constant 0 : i32
    %c0_i32_2 = arith.constant 0 : i32
    return %c0_i32, %c0_i32_0, %c0_i32_1 : i32, i32, i32
  }
  func.func @transform_8(%arg0: i32) -> (i32, i32, i32) {
    %c0_i32 = arith.constant 0 : i32
    %c0_i32_0 = arith.constant 0 : i32
    %c0_i32_1 = arith.constant 0 : i32
    %c0_i32_2 = arith.constant 0 : i32
    return %c0_i32, %c0_i32_0, %c0_i32_1 : i32, i32, i32
  }
  func.func @transform_9(%arg0: i32) -> (i32, i32, i32) {
    %c0_i32 = arith.constant 0 : i32
    %c0_i32_0 = arith.constant 0 : i32
    %c0_i32_1 = arith.constant 0 : i32
    %c0_i32_2 = arith.constant 0 : i32
    return %c0_i32, %c0_i32_0, %c0_i32_1 : i32, i32, i32
  }
  func.func @transform_10(%arg0: i32) -> (i32, i32, i32) {
    %c0_i32 = arith.constant 0 : i32
    %c0_i32_0 = arith.constant 0 : i32
    %c0_i32_1 = arith.constant 0 : i32
    %c0_i32_2 = arith.constant 0 : i32
    return %c0_i32, %c0_i32_0, %c0_i32_1 : i32, i32, i32
  }
  func.func @transform_11(%arg0: i32) -> (i32, i32) {
    %c0_i32 = arith.constant 0 : i32
    %c0_i32_0 = arith.constant 0 : i32
    %c0_i32_1 = arith.constant 0 : i32
    return %c0_i32, %c0_i32_0 : i32, i32
  }
  func.func @transform_12(%arg0: i32) -> (i32, i32, i32) {
    %c0_i32 = arith.constant 0 : i32
    %c0_i32_0 = arith.constant 0 : i32
    %c0_i32_1 = arith.constant 0 : i32
    return %arg0, %c0_i32, %c0_i32_0 : i32, i32, i32
  }
}

module attributes {stable_mosaic.version = 11 : i64} {
  func.func @_t_crossattn_kernel(%arg0: i32, %arg1: memref<1x64x32xf32, #tpu.memory_space<vmem>>, %arg2: memref<1x8x64xbf16, #tpu.memory_space<vmem>>, %arg3: memref<1x32xf32, #tpu.memory_space<vmem>>, %arg4: memref<1x32xf32, #tpu.memory_space<vmem>>, %arg5: memref<2x32x16xbf16, #tpu.memory_space<vmem>>, %arg6: memref<2x64x16xbf16, #tpu.memory_space<vmem>>, %arg7: memref<2x64x16xbf16, #tpu.memory_space<vmem>>, %arg8: memref<2x16x32xbf16, #tpu.memory_space<vmem>>, %arg9: memref<1x32xf32, #tpu.memory_space<vmem>>, %arg10: memref<1x64x32xf32, #tpu.memory_space<vmem>>) attributes {dimension_semantics = [#tpu.dimension_semantics<parallel>], iteration_bounds = array<i64: 2>, scalar_prefetch = 0 : i64, scratch_operands = 0 : i64, tpu.core_type = #tpu.core_type<tc>, window_params = [{transform_indices = @transform_0, window_bounds = array<i64: 1, 64, 32>}, {transform_indices = @transform_1, window_bounds = array<i64: 1, 8, 64>}, {pipeline_mode = #tpu.pipeline_mode<synchronous>, transform_indices = @transform_2, window_bounds = array<i64: 1, 32>}, {pipeline_mode = #tpu.pipeline_mode<synchronous>, transform_indices = @transform_3, window_bounds = array<i64: 1, 32>}, {pipeline_mode = #tpu.pipeline_mode<synchronous>, transform_indices = @transform_4, window_bounds = array<i64: 2, 32, 16>}, {pipeline_mode = #tpu.pipeline_mode<synchronous>, transform_indices = @transform_5, window_bounds = array<i64: 2, 64, 16>}, {pipeline_mode = #tpu.pipeline_mode<synchronous>, transform_indices = @transform_6, window_bounds = array<i64: 2, 64, 16>}, {pipeline_mode = #tpu.pipeline_mode<synchronous>, transform_indices = @transform_7, window_bounds = array<i64: 2, 16, 32>}, {pipeline_mode = #tpu.pipeline_mode<synchronous>, transform_indices = @transform_8, window_bounds = array<i64: 1, 32>}, {transform_indices = @transform_9, window_bounds = array<i64: 1, 64, 32>}]} {
    %c0 = arith.constant 0 : index
    %c0_0 = arith.constant 0 : index
    %c0_1 = arith.constant 0 : index
    %0 = vector.load %arg1[%c0, %c0_0, %c0_1] : memref<1x64x32xf32, #tpu.memory_space<vmem>>, vector<1x64x32xf32>
    %1 = vector.shape_cast %0 : vector<1x64x32xf32> to vector<64x32xf32>
    %c0_2 = arith.constant 0 : index
    %c0_3 = arith.constant 0 : index
    %2 = vector.load %arg3[%c0_2, %c0_3] : memref<1x32xf32, #tpu.memory_space<vmem>>, vector<1x32xf32>
    %c0_4 = arith.constant 0 : index
    %c0_5 = arith.constant 0 : index
    %3 = vector.load %arg4[%c0_4, %c0_5] : memref<1x32xf32, #tpu.memory_space<vmem>>, vector<1x32xf32>
    %cst = arith.constant dense<0.000000e+00> : vector<64xf32>
    %4 = vector.multi_reduction <add>, %1, %cst [1] : vector<64x32xf32> to vector<64xf32>
    %5 = vector.shape_cast %4 : vector<64xf32> to vector<64x1xf32>
    %cst_6 = arith.constant 3.200000e+01 : f32
    %6 = vector.broadcast %cst_6 : f32 to vector<64x1xf32>
    %7 = arith.divf %5, %6 : vector<64x1xf32>
    %8 = vector.broadcast %7 : vector<64x1xf32> to vector<64x32xf32>
    %9 = arith.subf %1, %8 : vector<64x32xf32>
    %10 = arith.mulf %9, %9 : vector<64x32xf32>
    %cst_7 = arith.constant dense<0.000000e+00> : vector<64xf32>
    %11 = vector.multi_reduction <add>, %10, %cst_7 [1] : vector<64x32xf32> to vector<64xf32>
    %12 = vector.shape_cast %11 : vector<64xf32> to vector<64x1xf32>
    %cst_8 = arith.constant 3.200000e+01 : f32
    %13 = vector.broadcast %cst_8 : f32 to vector<64x1xf32>
    %14 = arith.divf %12, %13 : vector<64x1xf32>
    %cst_9 = arith.constant 9.99999974E-6 : f32
    %15 = vector.broadcast %cst_9 : f32 to vector<64x1xf32>
    %16 = arith.addf %14, %15 : vector<64x1xf32>
    %17 = math.rsqrt %16 : vector<64x1xf32>
    %18 = vector.broadcast %17 : vector<64x1xf32> to vector<64x32xf32>
    %19 = arith.mulf %9, %18 : vector<64x32xf32>
    %20 = vector.broadcast %2 : vector<1x32xf32> to vector<64x32xf32>
    %21 = arith.mulf %19, %20 : vector<64x32xf32>
    %22 = vector.broadcast %3 : vector<1x32xf32> to vector<64x32xf32>
    %23 = arith.addf %21, %22 : vector<64x32xf32>
    %c0_10 = arith.constant 0 : index
    %c0_11 = arith.constant 0 : index
    %c0_12 = arith.constant 0 : index
    %24 = vector.load %arg2[%c0_10, %c0_11, %c0_12] : memref<1x8x64xbf16, #tpu.memory_space<vmem>>, vector<1x8x64xbf16>
    %25 = vector.shape_cast %24 : vector<1x8x64xbf16> to vector<8x64xbf16>
    %26 = arith.truncf %23 : vector<64x32xf32> to vector<64x32xbf16>
    %c0_13 = arith.constant 0 : index
    %c0_14 = arith.constant 0 : index
    %c0_15 = arith.constant 0 : index
    %27 = vector.load %arg5[%c0_13, %c0_14, %c0_15] : memref<2x32x16xbf16, #tpu.memory_space<vmem>>, vector<1x32x16xbf16>
    %28 = vector.shape_cast %27 : vector<1x32x16xbf16> to vector<32x16xbf16>
    %cst_16 = arith.constant dense<0.000000e+00> : vector<64x16xf32>
    %29 = tpu.matmul %26, %28, %cst_16 {dimension_numbers = #tpu.dot_dimension_numbers<[1], [0], [0], [1], [0, 0, 1, 1], [], []>} : vector<64x32xbf16>, vector<32x16xbf16>, vector<64x16xf32> -> vector<64x16xf32>
    %cst_17 = arith.constant 2.500000e-01 : f32
    %30 = vector.broadcast %cst_17 : f32 to vector<64x16xf32>
    %31 = arith.mulf %29, %30 : vector<64x16xf32>
    %c0_18 = arith.constant 0 : index
    %c0_19 = arith.constant 0 : index
    %c0_20 = arith.constant 0 : index
    %32 = vector.load %arg6[%c0_18, %c0_19, %c0_20] : memref<2x64x16xbf16, #tpu.memory_space<vmem>>, vector<1x64x16xbf16>
    %33 = vector.shape_cast %32 : vector<1x64x16xbf16> to vector<64x16xbf16>
    %cst_21 = arith.constant dense<0.000000e+00> : vector<8x16xf32>
    %34 = tpu.matmul %25, %33, %cst_21 {dimension_numbers = #tpu.dot_dimension_numbers<[1], [0], [0], [1], [0, 0, 1, 1], [], []>} : vector<8x64xbf16>, vector<64x16xbf16>, vector<8x16xf32> -> vector<8x16xf32>
    %c0_22 = arith.constant 0 : index
    %c0_23 = arith.constant 0 : index
    %c0_24 = arith.constant 0 : index
    %35 = vector.load %arg7[%c0_22, %c0_23, %c0_24] : memref<2x64x16xbf16, #tpu.memory_space<vmem>>, vector<1x64x16xbf16>
    %36 = vector.shape_cast %35 : vector<1x64x16xbf16> to vector<64x16xbf16>
    %cst_25 = arith.constant dense<0.000000e+00> : vector<8x16xf32>
    %37 = tpu.matmul %25, %36, %cst_25 {dimension_numbers = #tpu.dot_dimension_numbers<[1], [0], [0], [1], [0, 0, 1, 1], [], []>} : vector<8x64xbf16>, vector<64x16xbf16>, vector<8x16xf32> -> vector<8x16xf32>
    %38 = arith.truncf %31 : vector<64x16xf32> to vector<64x16xbf16>
    %39 = arith.truncf %34 : vector<8x16xf32> to vector<8x16xbf16>
    %cst_26 = arith.constant dense<0.000000e+00> : vector<64x8xf32>
    %40 = tpu.matmul %38, %39, %cst_26 {dimension_numbers = #tpu.dot_dimension_numbers<[1], [1], [0], [0], [0, 0, 1, 0], [], []>} : vector<64x16xbf16>, vector<8x16xbf16>, vector<64x8xf32> -> vector<64x8xf32>
    %cst_27 = arith.constant dense<0xFF800000> : vector<64xf32>
    %41 = vector.multi_reduction <maximumf>, %40, %cst_27 [1] : vector<64x8xf32> to vector<64xf32>
    %42 = vector.shape_cast %41 : vector<64xf32> to vector<64x1xf32>
    %43 = vector.broadcast %42 : vector<64x1xf32> to vector<64x8xf32>
    %44 = arith.subf %40, %43 : vector<64x8xf32>
    %45 = math.exp %44 : vector<64x8xf32>
    %cst_28 = arith.constant dense<0.000000e+00> : vector<64xf32>
    %46 = vector.multi_reduction <add>, %45, %cst_28 [1] : vector<64x8xf32> to vector<64xf32>
    %47 = vector.shape_cast %46 : vector<64xf32> to vector<64x1xf32>
    %48 = tpu.reciprocal %47 {approx = true} : vector<64x1xf32> -> vector<64x1xf32>
    %49 = vector.broadcast %48 : vector<64x1xf32> to vector<64x8xf32>
    %50 = arith.mulf %45, %49 : vector<64x8xf32>
    %51 = arith.truncf %50 : vector<64x8xf32> to vector<64x8xbf16>
    %52 = arith.truncf %37 : vector<8x16xf32> to vector<8x16xbf16>
    %cst_29 = arith.constant dense<0.000000e+00> : vector<64x16xf32>
    %53 = tpu.matmul %51, %52, %cst_29 {dimension_numbers = #tpu.dot_dimension_numbers<[1], [0], [0], [1], [0, 0, 1, 1], [], []>} : vector<64x8xbf16>, vector<8x16xbf16>, vector<64x16xf32> -> vector<64x16xf32>
    %54 = arith.truncf %53 : vector<64x16xf32> to vector<64x16xbf16>
    %c0_30 = arith.constant 0 : index
    %c0_31 = arith.constant 0 : index
    %c0_32 = arith.constant 0 : index
    %55 = vector.load %arg8[%c0_30, %c0_31, %c0_32] : memref<2x16x32xbf16, #tpu.memory_space<vmem>>, vector<1x16x32xbf16>
    %56 = vector.shape_cast %55 : vector<1x16x32xbf16> to vector<16x32xbf16>
    %cst_33 = arith.constant dense<0.000000e+00> : vector<64x32xf32>
    %57 = tpu.matmul %54, %56, %cst_33 {dimension_numbers = #tpu.dot_dimension_numbers<[1], [0], [0], [1], [0, 0, 1, 1], [], []>} : vector<64x16xbf16>, vector<16x32xbf16>, vector<64x32xf32> -> vector<64x32xf32>
    %c1 = arith.constant 1 : index
    %c0_34 = arith.constant 0 : index
    %c0_35 = arith.constant 0 : index
    %58 = vector.load %arg5[%c1, %c0_34, %c0_35] : memref<2x32x16xbf16, #tpu.memory_space<vmem>>, vector<1x32x16xbf16>
    %59 = vector.shape_cast %58 : vector<1x32x16xbf16> to vector<32x16xbf16>
    %cst_36 = arith.constant dense<0.000000e+00> : vector<64x16xf32>
    %60 = tpu.matmul %26, %59, %cst_36 {dimension_numbers = #tpu.dot_dimension_numbers<[1], [0], [0], [1], [0, 0, 1, 1], [], []>} : vector<64x32xbf16>, vector<32x16xbf16>, vector<64x16xf32> -> vector<64x16xf32>
    %cst_37 = arith.constant 2.500000e-01 : f32
    %61 = vector.broadcast %cst_37 : f32 to vector<64x16xf32>
    %62 = arith.mulf %60, %61 : vector<64x16xf32>
    %c1_38 = arith.constant 1 : index
    %c0_39 = arith.constant 0 : index
    %c0_40 = arith.constant 0 : index
    %63 = vector.load %arg6[%c1_38, %c0_39, %c0_40] : memref<2x64x16xbf16, #tpu.memory_space<vmem>>, vector<1x64x16xbf16>
    %64 = vector.shape_cast %63 : vector<1x64x16xbf16> to vector<64x16xbf16>
    %cst_41 = arith.constant dense<0.000000e+00> : vector<8x16xf32>
    %65 = tpu.matmul %25, %64, %cst_41 {dimension_numbers = #tpu.dot_dimension_numbers<[1], [0], [0], [1], [0, 0, 1, 1], [], []>} : vector<8x64xbf16>, vector<64x16xbf16>, vector<8x16xf32> -> vector<8x16xf32>
    %c1_42 = arith.constant 1 : index
    %c0_43 = arith.constant 0 : index
    %c0_44 = arith.constant 0 : index
    %66 = vector.load %arg7[%c1_42, %c0_43, %c0_44] : memref<2x64x16xbf16, #tpu.memory_space<vmem>>, vector<1x64x16xbf16>
    %67 = vector.shape_cast %66 : vector<1x64x16xbf16> to vector<64x16xbf16>
    %cst_45 = arith.constant dense<0.000000e+00> : vector<8x16xf32>
    %68 = tpu.matmul %25, %67, %cst_45 {dimension_numbers = #tpu.dot_dimension_numbers<[1], [0], [0], [1], [0, 0, 1, 1], [], []>} : vector<8x64xbf16>, vector<64x16xbf16>, vector<8x16xf32> -> vector<8x16xf32>
    %69 = arith.truncf %62 : vector<64x16xf32> to vector<64x16xbf16>
    %70 = arith.truncf %65 : vector<8x16xf32> to vector<8x16xbf16>
    %cst_46 = arith.constant dense<0.000000e+00> : vector<64x8xf32>
    %71 = tpu.matmul %69, %70, %cst_46 {dimension_numbers = #tpu.dot_dimension_numbers<[1], [1], [0], [0], [0, 0, 1, 0], [], []>} : vector<64x16xbf16>, vector<8x16xbf16>, vector<64x8xf32> -> vector<64x8xf32>
    %cst_47 = arith.constant dense<0xFF800000> : vector<64xf32>
    %72 = vector.multi_reduction <maximumf>, %71, %cst_47 [1] : vector<64x8xf32> to vector<64xf32>
    %73 = vector.shape_cast %72 : vector<64xf32> to vector<64x1xf32>
    %74 = vector.broadcast %73 : vector<64x1xf32> to vector<64x8xf32>
    %75 = arith.subf %71, %74 : vector<64x8xf32>
    %76 = math.exp %75 : vector<64x8xf32>
    %cst_48 = arith.constant dense<0.000000e+00> : vector<64xf32>
    %77 = vector.multi_reduction <add>, %76, %cst_48 [1] : vector<64x8xf32> to vector<64xf32>
    %78 = vector.shape_cast %77 : vector<64xf32> to vector<64x1xf32>
    %79 = tpu.reciprocal %78 {approx = true} : vector<64x1xf32> -> vector<64x1xf32>
    %80 = vector.broadcast %79 : vector<64x1xf32> to vector<64x8xf32>
    %81 = arith.mulf %76, %80 : vector<64x8xf32>
    %82 = arith.truncf %81 : vector<64x8xf32> to vector<64x8xbf16>
    %83 = arith.truncf %68 : vector<8x16xf32> to vector<8x16xbf16>
    %cst_49 = arith.constant dense<0.000000e+00> : vector<64x16xf32>
    %84 = tpu.matmul %82, %83, %cst_49 {dimension_numbers = #tpu.dot_dimension_numbers<[1], [0], [0], [1], [0, 0, 1, 1], [], []>} : vector<64x8xbf16>, vector<8x16xbf16>, vector<64x16xf32> -> vector<64x16xf32>
    %85 = arith.truncf %84 : vector<64x16xf32> to vector<64x16xbf16>
    %c1_50 = arith.constant 1 : index
    %c0_51 = arith.constant 0 : index
    %c0_52 = arith.constant 0 : index
    %86 = vector.load %arg8[%c1_50, %c0_51, %c0_52] : memref<2x16x32xbf16, #tpu.memory_space<vmem>>, vector<1x16x32xbf16>
    %87 = vector.shape_cast %86 : vector<1x16x32xbf16> to vector<16x32xbf16>
    %cst_53 = arith.constant dense<0.000000e+00> : vector<64x32xf32>
    %88 = tpu.matmul %85, %87, %cst_53 {dimension_numbers = #tpu.dot_dimension_numbers<[1], [0], [0], [1], [0, 0, 1, 1], [], []>} : vector<64x16xbf16>, vector<16x32xbf16>, vector<64x32xf32> -> vector<64x32xf32>
    %89 = arith.addf %57, %88 : vector<64x32xf32>
    %c0_54 = arith.constant 0 : index
    %c0_55 = arith.constant 0 : index
    %90 = vector.load %arg9[%c0_54, %c0_55] : memref<1x32xf32, #tpu.memory_space<vmem>>, vector<1x32xf32>
    %91 = vector.broadcast %90 : vector<1x32xf32> to vector<64x32xf32>
    %92 = arith.addf %89, %91 : vector<64x32xf32>
    %93 = arith.addf %92, %1 : vector<64x32xf32>
    %c0_56 = arith.constant 0 : index
    %c0_57 = arith.constant 0 : index
    %c0_58 = arith.constant 0 : index
    %94 = vector.load %arg10[%c0_56, %c0_57, %c0_58] : memref<1x64x32xf32, #tpu.memory_space<vmem>>, vector<1x64x32xf32>
    %95 = vector.shape_cast %94 : vector<1x64x32xf32> to vector<64x32xf32>
    %96 = vector.shape_cast %93 : vector<64x32xf32> to vector<1x64x32xf32>
    tpu.vector_store %arg10[%c0_56, %c0_57, %c0_58], %96 {strides = array<i32>} : memref<1x64x32xf32, #tpu.memory_space<vmem>>, vector<1x64x32xf32>,
    return
  }
  func.func @transform_0(%arg0: i32) -> (i32, i32, i32) {
    %c0_i32 = arith.constant 0 : i32
    %c0_i32_0 = arith.constant 0 : i32
    %c0_i32_1 = arith.constant 0 : i32
    return %arg0, %c0_i32, %c0_i32_0 : i32, i32, i32
  }
  func.func @transform_1(%arg0: i32) -> (i32, i32, i32) {
    %c0_i32 = arith.constant 0 : i32
    %c0_i32_0 = arith.constant 0 : i32
    %c0_i32_1 = arith.constant 0 : i32
    return %arg0, %c0_i32, %c0_i32_0 : i32, i32, i32
  }
  func.func @transform_2(%arg0: i32) -> (i32, i32) {
    %c0_i32 = arith.constant 0 : i32
    %c0_i32_0 = arith.constant 0 : i32
    %c0_i32_1 = arith.constant 0 : i32
    return %c0_i32, %c0_i32_0 : i32, i32
  }
  func.func @transform_3(%arg0: i32) -> (i32, i32) {
    %c0_i32 = arith.constant 0 : i32
    %c0_i32_0 = arith.constant 0 : i32
    %c0_i32_1 = arith.constant 0 : i32
    return %c0_i32, %c0_i32_0 : i32, i32
  }
  func.func @transform_4(%arg0: i32) -> (i32, i32, i32) {
    %c0_i32 = arith.constant 0 : i32
    %c0_i32_0 = arith.constant 0 : i32
    %c0_i32_1 = arith.constant 0 : i32
    %c0_i32_2 = arith.constant 0 : i32
    return %c0_i32, %c0_i32_0, %c0_i32_1 : i32, i32, i32
  }
  func.func @transform_5(%arg0: i32) -> (i32, i32, i32) {
    %c0_i32 = arith.constant 0 : i32
    %c0_i32_0 = arith.constant 0 : i32
    %c0_i32_1 = arith.constant 0 : i32
    %c0_i32_2 = arith.constant 0 : i32
    return %c0_i32, %c0_i32_0, %c0_i32_1 : i32, i32, i32
  }
  func.func @transform_6(%arg0: i32) -> (i32, i32, i32) {
    %c0_i32 = arith.constant 0 : i32
    %c0_i32_0 = arith.constant 0 : i32
    %c0_i32_1 = arith.constant 0 : i32
    %c0_i32_2 = arith.constant 0 : i32
    return %c0_i32, %c0_i32_0, %c0_i32_1 : i32, i32, i32
  }
  func.func @transform_7(%arg0: i32) -> (i32, i32, i32) {
    %c0_i32 = arith.constant 0 : i32
    %c0_i32_0 = arith.constant 0 : i32
    %c0_i32_1 = arith.constant 0 : i32
    %c0_i32_2 = arith.constant 0 : i32
    return %c0_i32, %c0_i32_0, %c0_i32_1 : i32, i32, i32
  }
  func.func @transform_8(%arg0: i32) -> (i32, i32) {
    %c0_i32 = arith.constant 0 : i32
    %c0_i32_0 = arith.constant 0 : i32
    %c0_i32_1 = arith.constant 0 : i32
    return %c0_i32, %c0_i32_0 : i32, i32
  }
  func.func @transform_9(%arg0: i32) -> (i32, i32, i32) {
    %c0_i32 = arith.constant 0 : i32
    %c0_i32_0 = arith.constant 0 : i32
    %c0_i32_1 = arith.constant 0 : i32
    return %arg0, %c0_i32, %c0_i32_0 : i32, i32, i32
  }
}

module attributes {stable_mosaic.version = 11 : i64} {
  func.func @_t_ff_kernel(%arg0: i32, %arg1: memref<1x64x32xf32, #tpu.memory_space<vmem>>, %arg2: memref<1x64x32xf32, #tpu.memory_space<vmem>>, %arg3: memref<1x32xf32, #tpu.memory_space<vmem>>, %arg4: memref<1x32xf32, #tpu.memory_space<vmem>>, %arg5: memref<32x256xbf16, #tpu.memory_space<vmem>>, %arg6: memref<1x256xf32, #tpu.memory_space<vmem>>, %arg7: memref<128x32xbf16, #tpu.memory_space<vmem>>, %arg8: memref<1x32xf32, #tpu.memory_space<vmem>>, %arg9: memref<32x32xbf16, #tpu.memory_space<vmem>>, %arg10: memref<1x32xf32, #tpu.memory_space<vmem>>, %arg11: memref<1x64x32xf32, #tpu.memory_space<vmem>>) attributes {dimension_semantics = [#tpu.dimension_semantics<parallel>], iteration_bounds = array<i64: 2>, scalar_prefetch = 0 : i64, scratch_operands = 0 : i64, tpu.core_type = #tpu.core_type<tc>, window_params = [{transform_indices = @transform_0, window_bounds = array<i64: 1, 64, 32>}, {transform_indices = @transform_1, window_bounds = array<i64: 1, 64, 32>}, {pipeline_mode = #tpu.pipeline_mode<synchronous>, transform_indices = @transform_2, window_bounds = array<i64: 1, 32>}, {pipeline_mode = #tpu.pipeline_mode<synchronous>, transform_indices = @transform_3, window_bounds = array<i64: 1, 32>}, {pipeline_mode = #tpu.pipeline_mode<synchronous>, transform_indices = @transform_4, window_bounds = array<i64: 32, 256>}, {pipeline_mode = #tpu.pipeline_mode<synchronous>, transform_indices = @transform_5, window_bounds = array<i64: 1, 256>}, {pipeline_mode = #tpu.pipeline_mode<synchronous>, transform_indices = @transform_6, window_bounds = array<i64: 128, 32>}, {pipeline_mode = #tpu.pipeline_mode<synchronous>, transform_indices = @transform_7, window_bounds = array<i64: 1, 32>}, {pipeline_mode = #tpu.pipeline_mode<synchronous>, transform_indices = @transform_8, window_bounds = array<i64: 32, 32>}, {pipeline_mode = #tpu.pipeline_mode<synchronous>, transform_indices = @transform_9, window_bounds = array<i64: 1, 32>}, {transform_indices = @transform_10, window_bounds = array<i64: 1, 64, 32>}]} {
    %c0 = arith.constant 0 : index
    %c0_0 = arith.constant 0 : index
    %c0_1 = arith.constant 0 : index
    %0 = vector.load %arg1[%c0, %c0_0, %c0_1] : memref<1x64x32xf32, #tpu.memory_space<vmem>>, vector<1x64x32xf32>
    %1 = vector.shape_cast %0 : vector<1x64x32xf32> to vector<64x32xf32>
    %c0_2 = arith.constant 0 : index
    %c0_3 = arith.constant 0 : index
    %2 = vector.load %arg3[%c0_2, %c0_3] : memref<1x32xf32, #tpu.memory_space<vmem>>, vector<1x32xf32>
    %c0_4 = arith.constant 0 : index
    %c0_5 = arith.constant 0 : index
    %3 = vector.load %arg4[%c0_4, %c0_5] : memref<1x32xf32, #tpu.memory_space<vmem>>, vector<1x32xf32>
    %cst = arith.constant dense<0.000000e+00> : vector<64xf32>
    %4 = vector.multi_reduction <add>, %1, %cst [1] : vector<64x32xf32> to vector<64xf32>
    %5 = vector.shape_cast %4 : vector<64xf32> to vector<64x1xf32>
    %cst_6 = arith.constant 3.200000e+01 : f32
    %6 = vector.broadcast %cst_6 : f32 to vector<64x1xf32>
    %7 = arith.divf %5, %6 : vector<64x1xf32>
    %8 = vector.broadcast %7 : vector<64x1xf32> to vector<64x32xf32>
    %9 = arith.subf %1, %8 : vector<64x32xf32>
    %10 = arith.mulf %9, %9 : vector<64x32xf32>
    %cst_7 = arith.constant dense<0.000000e+00> : vector<64xf32>
    %11 = vector.multi_reduction <add>, %10, %cst_7 [1] : vector<64x32xf32> to vector<64xf32>
    %12 = vector.shape_cast %11 : vector<64xf32> to vector<64x1xf32>
    %cst_8 = arith.constant 3.200000e+01 : f32
    %13 = vector.broadcast %cst_8 : f32 to vector<64x1xf32>
    %14 = arith.divf %12, %13 : vector<64x1xf32>
    %cst_9 = arith.constant 9.99999974E-6 : f32
    %15 = vector.broadcast %cst_9 : f32 to vector<64x1xf32>
    %16 = arith.addf %14, %15 : vector<64x1xf32>
    %17 = math.rsqrt %16 : vector<64x1xf32>
    %18 = vector.broadcast %17 : vector<64x1xf32> to vector<64x32xf32>
    %19 = arith.mulf %9, %18 : vector<64x32xf32>
    %20 = vector.broadcast %2 : vector<1x32xf32> to vector<64x32xf32>
    %21 = arith.mulf %19, %20 : vector<64x32xf32>
    %22 = vector.broadcast %3 : vector<1x32xf32> to vector<64x32xf32>
    %23 = arith.addf %21, %22 : vector<64x32xf32>
    %24 = arith.truncf %23 : vector<64x32xf32> to vector<64x32xbf16>
    %c0_10 = arith.constant 0 : index
    %c0_11 = arith.constant 0 : index
    %25 = vector.load %arg5[%c0_10, %c0_11] : memref<32x256xbf16, #tpu.memory_space<vmem>>, vector<32x256xbf16>
    %cst_12 = arith.constant dense<0.000000e+00> : vector<64x256xf32>
    %26 = tpu.matmul %24, %25, %cst_12 {dimension_numbers = #tpu.dot_dimension_numbers<[1], [0], [0], [1], [0, 0, 1, 1], [], []>} : vector<64x32xbf16>, vector<32x256xbf16>, vector<64x256xf32> -> vector<64x256xf32>
    %c0_13 = arith.constant 0 : index
    %c0_14 = arith.constant 0 : index
    %27 = vector.load %arg6[%c0_13, %c0_14] : memref<1x256xf32, #tpu.memory_space<vmem>>, vector<1x256xf32>
    %28 = vector.broadcast %27 : vector<1x256xf32> to vector<64x256xf32>
    %29 = arith.addf %26, %28 : vector<64x256xf32>
    %30 = vector.extract_strided_slice %29 {offsets = [0, 0], sizes = [64, 128], strides = [1, 1]} : vector<64x256xf32> to vector<64x128xf32>
    %31 = vector.extract_strided_slice %29 {offsets = [0, 128], sizes = [64, 128], strides = [1, 1]} : vector<64x256xf32> to vector<64x128xf32>
    %cst_15 = arith.constant 5.000000e-01 : f32
    %32 = vector.broadcast %cst_15 : f32 to vector<64x128xf32>
    %33 = arith.mulf %32, %31 : vector<64x128xf32>
    %cst_16 = arith.constant 0.707106769 : f32
    %34 = vector.broadcast %cst_16 : f32 to vector<64x128xf32>
    %35 = arith.mulf %31, %34 : vector<64x128xf32>
    %36 = math.absf %35 : vector<64x128xf32>
    %cst_17 = arith.constant 0.327591091 : f32
    %37 = vector.broadcast %cst_17 : f32 to vector<64x128xf32>
    %38 = arith.mulf %37, %36 : vector<64x128xf32>
    %cst_18 = arith.constant 1.000000e+00 : f32
    %39 = vector.broadcast %cst_18 : f32 to vector<64x128xf32>
    %40 = arith.addf %39, %38 : vector<64x128xf32>
    %cst_19 = arith.constant 1.000000e+00 : f32
    %41 = vector.broadcast %cst_19 : f32 to vector<64x128xf32>
    %42 = arith.divf %41, %40 : vector<64x128xf32>
    %cst_20 = arith.constant 1.06140542 : f32
    %43 = vector.broadcast %cst_20 : f32 to vector<64x128xf32>
    %44 = arith.mulf %43, %42 : vector<64x128xf32>
    %cst_21 = arith.constant -1.45315206 : f32
    %45 = vector.broadcast %cst_21 : f32 to vector<64x128xf32>
    %46 = arith.addf %44, %45 : vector<64x128xf32>
    %47 = arith.mulf %46, %42 : vector<64x128xf32>
    %cst_22 = arith.constant 1.42141378 : f32
    %48 = vector.broadcast %cst_22 : f32 to vector<64x128xf32>
    %49 = arith.addf %47, %48 : vector<64x128xf32>
    %50 = arith.mulf %49, %42 : vector<64x128xf32>
    %cst_23 = arith.constant -0.284496725 : f32
    %51 = vector.broadcast %cst_23 : f32 to vector<64x128xf32>
    %52 = arith.addf %50, %51 : vector<64x128xf32>
    %53 = arith.mulf %52, %42 : vector<64x128xf32>
    %cst_24 = arith.constant 0.254829586 : f32
    %54 = vector.broadcast %cst_24 : f32 to vector<64x128xf32>
    %55 = arith.addf %53, %54 : vector<64x128xf32>
    %56 = arith.mulf %55, %42 : vector<64x128xf32>
    %cst_25 = arith.constant 0.000000e+00 : f32
    %57 = vector.broadcast %cst_25 : f32 to vector<64x128xf32>
    %58 = arith.subf %57, %36 : vector<64x128xf32>
    %59 = arith.mulf %58, %36 : vector<64x128xf32>
    %60 = math.exp %59 : vector<64x128xf32>
    %61 = arith.mulf %56, %60 : vector<64x128xf32>
    %cst_26 = arith.constant 1.000000e+00 : f32
    %62 = vector.broadcast %cst_26 : f32 to vector<64x128xf32>
    %63 = arith.subf %62, %61 : vector<64x128xf32>
    %cst_27 = arith.constant 0.000000e+00 : f32
    %64 = vector.broadcast %cst_27 : f32 to vector<64x128xf32>
    %65 = arith.cmpf oge, %35, %64 : vector<64x128xf32>
    %cst_28 = arith.constant 0.000000e+00 : f32
    %66 = vector.broadcast %cst_28 : f32 to vector<64x128xf32>
    %67 = arith.subf %66, %63 : vector<64x128xf32>
    %68 = arith.select %65, %63, %67 : vector<64x128xi1>, vector<64x128xf32>
    %cst_29 = arith.constant 1.000000e+00 : f32
    %69 = vector.broadcast %cst_29 : f32 to vector<64x128xf32>
    %70 = arith.addf %69, %68 : vector<64x128xf32>
    %71 = arith.mulf %33, %70 : vector<64x128xf32>
    %72 = arith.mulf %30, %71 : vector<64x128xf32>
    %73 = arith.truncf %72 : vector<64x128xf32> to vector<64x128xbf16>
    %c0_30 = arith.constant 0 : index
    %c0_31 = arith.constant 0 : index
    %74 = vector.load %arg7[%c0_30, %c0_31] : memref<128x32xbf16, #tpu.memory_space<vmem>>, vector<128x32xbf16>
    %cst_32 = arith.constant dense<0.000000e+00> : vector<64x32xf32>
    %75 = tpu.matmul %73, %74, %cst_32 {dimension_numbers = #tpu.dot_dimension_numbers<[1], [0], [0], [1], [0, 0, 1, 1], [], []>} : vector<64x128xbf16>, vector<128x32xbf16>, vector<64x32xf32> -> vector<64x32xf32>
    %c0_33 = arith.constant 0 : index
    %c0_34 = arith.constant 0 : index
    %76 = vector.load %arg8[%c0_33, %c0_34] : memref<1x32xf32, #tpu.memory_space<vmem>>, vector<1x32xf32>
    %77 = vector.broadcast %76 : vector<1x32xf32> to vector<64x32xf32>
    %78 = arith.addf %75, %77 : vector<64x32xf32>
    %79 = arith.addf %78, %1 : vector<64x32xf32>
    %80 = arith.truncf %79 : vector<64x32xf32> to vector<64x32xbf16>
    %c0_35 = arith.constant 0 : index
    %c0_36 = arith.constant 0 : index
    %81 = vector.load %arg9[%c0_35, %c0_36] : memref<32x32xbf16, #tpu.memory_space<vmem>>, vector<32x32xbf16>
    %cst_37 = arith.constant dense<0.000000e+00> : vector<64x32xf32>
    %82 = tpu.matmul %80, %81, %cst_37 {dimension_numbers = #tpu.dot_dimension_numbers<[1], [0], [0], [1], [0, 0, 1, 1], [], []>} : vector<64x32xbf16>, vector<32x32xbf16>, vector<64x32xf32> -> vector<64x32xf32>
    %c0_38 = arith.constant 0 : index
    %c0_39 = arith.constant 0 : index
    %83 = vector.load %arg10[%c0_38, %c0_39] : memref<1x32xf32, #tpu.memory_space<vmem>>, vector<1x32xf32>
    %84 = vector.broadcast %83 : vector<1x32xf32> to vector<64x32xf32>
    %85 = arith.addf %82, %84 : vector<64x32xf32>
    %c0_40 = arith.constant 0 : index
    %c0_41 = arith.constant 0 : index
    %c0_42 = arith.constant 0 : index
    %86 = vector.load %arg2[%c0_40, %c0_41, %c0_42] : memref<1x64x32xf32, #tpu.memory_space<vmem>>, vector<1x64x32xf32>
    %87 = vector.shape_cast %86 : vector<1x64x32xf32> to vector<64x32xf32>
    %88 = arith.addf %85, %87 : vector<64x32xf32>
    %c0_43 = arith.constant 0 : index
    %c0_44 = arith.constant 0 : index
    %c0_45 = arith.constant 0 : index
    %89 = vector.load %arg11[%c0_43, %c0_44, %c0_45] : memref<1x64x32xf32, #tpu.memory_space<vmem>>, vector<1x64x32xf32>
    %90 = vector.shape_cast %89 : vector<1x64x32xf32> to vector<64x32xf32>
    %91 = vector.shape_cast %88 : vector<64x32xf32> to vector<1x64x32xf32>
    tpu.vector_store %arg11[%c0_43, %c0_44, %c0_45], %91 {strides = array<i32>} : memref<1x64x32xf32, #tpu.memory_space<vmem>>, vector<1x64x32xf32>,
    return
  }
  func.func @transform_0(%arg0: i32) -> (i32, i32, i32) {
    %c0_i32 = arith.constant 0 : i32
    %c0_i32_0 = arith.constant 0 : i32
    %c0_i32_1 = arith.constant 0 : i32
    return %arg0, %c0_i32, %c0_i32_0 : i32, i32, i32
  }
  func.func @transform_1(%arg0: i32) -> (i32, i32, i32) {
    %c0_i32 = arith.constant 0 : i32
    %c0_i32_0 = arith.constant 0 : i32
    %c0_i32_1 = arith.constant 0 : i32
    return %arg0, %c0_i32, %c0_i32_0 : i32, i32, i32
  }
  func.func @transform_2(%arg0: i32) -> (i32, i32) {
    %c0_i32 = arith.constant 0 : i32
    %c0_i32_0 = arith.constant 0 : i32
    %c0_i32_1 = arith.constant 0 : i32
    return %c0_i32, %c0_i32_0 : i32, i32
  }
  func.func @transform_3(%arg0: i32) -> (i32, i32) {
    %c0_i32 = arith.constant 0 : i32
    %c0_i32_0 = arith.constant 0 : i32
    %c0_i32_1 = arith.constant 0 : i32
    return %c0_i32, %c0_i32_0 : i32, i32
  }
  func.func @transform_4(%arg0: i32) -> (i32, i32) {
    %c0_i32 = arith.constant 0 : i32
    %c0_i32_0 = arith.constant 0 : i32
    %c0_i32_1 = arith.constant 0 : i32
    return %c0_i32, %c0_i32_0 : i32, i32
  }
  func.func @transform_5(%arg0: i32) -> (i32, i32) {
    %c0_i32 = arith.constant 0 : i32
    %c0_i32_0 = arith.constant 0 : i32
    %c0_i32_1 = arith.constant 0 : i32
    return %c0_i32, %c0_i32_0 : i32, i32
  }
  func.func @transform_6(%arg0: i32) -> (i32, i32) {
    %c0_i32 = arith.constant 0 : i32
    %c0_i32_0 = arith.constant 0 : i32
    %c0_i32_1 = arith.constant 0 : i32
    return %c0_i32, %c0_i32_0 : i32, i32
  }
  func.func @transform_7(%arg0: i32) -> (i32, i32) {
    %c0_i32 = arith.constant 0 : i32
    %c0_i32_0 = arith.constant 0 : i32
    %c0_i32_1 = arith.constant 0 : i32
    return %c0_i32, %c0_i32_0 : i32, i32
  }
  func.func @transform_8(%arg0: i32) -> (i32, i32) {
    %c0_i32 = arith.constant 0 : i32
    %c0_i32_0 = arith.constant 0 : i32
    %c0_i32_1 = arith.constant 0 : i32
    return %c0_i32, %c0_i32_0 : i32, i32
  }
  func.func @transform_9(%arg0: i32) -> (i32, i32) {
    %c0_i32 = arith.constant 0 : i32
    %c0_i32_0 = arith.constant 0 : i32
    %c0_i32_1 = arith.constant 0 : i32
    return %c0_i32, %c0_i32_0 : i32, i32
  }
  func.func @transform_10(%arg0: i32) -> (i32, i32, i32) {
    %c0_i32 = arith.constant 0 : i32
    %c0_i32_0 = arith.constant 0 : i32
    %c0_i32_1 = arith.constant 0 : i32
    return %arg0, %c0_i32, %c0_i32_0 : i32, i32, i32
  }
}

module attributes {stable_mosaic.version = 11 : i64} {
  func.func @_conv_bias_kernel(%arg0: i32, %arg1: memref<1x256x288xbf16, #tpu.memory_space<vmem>>, %arg2: memref<288x32xbf16, #tpu.memory_space<vmem>>, %arg3: memref<1x32xf32, #tpu.memory_space<vmem>>, %arg4: memref<1x256x32xf32, #tpu.memory_space<vmem>>) attributes {dimension_semantics = [#tpu.dimension_semantics<parallel>], iteration_bounds = array<i64: 2>, scalar_prefetch = 0 : i64, scratch_operands = 0 : i64, tpu.core_type = #tpu.core_type<tc>, window_params = [{transform_indices = @transform_0, window_bounds = array<i64: 1, 256, 288>}, {pipeline_mode = #tpu.pipeline_mode<synchronous>, transform_indices = @transform_1, window_bounds = array<i64: 288, 32>}, {pipeline_mode = #tpu.pipeline_mode<synchronous>, transform_indices = @transform_2, window_bounds = array<i64: 1, 32>}, {transform_indices = @transform_3, window_bounds = array<i64: 1, 256, 32>}]} {
    %c0 = arith.constant 0 : index
    %c0_0 = arith.constant 0 : index
    %c0_1 = arith.constant 0 : index
    %0 = vector.load %arg1[%c0, %c0_0, %c0_1] : memref<1x256x288xbf16, #tpu.memory_space<vmem>>, vector<1x256x288xbf16>
    %1 = vector.shape_cast %0 : vector<1x256x288xbf16> to vector<256x288xbf16>
    %c0_2 = arith.constant 0 : index
    %c0_3 = arith.constant 0 : index
    %2 = vector.load %arg2[%c0_2, %c0_3] : memref<288x32xbf16, #tpu.memory_space<vmem>>, vector<288x32xbf16>
    %cst = arith.constant dense<0.000000e+00> : vector<256x32xf32>
    %3 = tpu.matmul %1, %2, %cst {dimension_numbers = #tpu.dot_dimension_numbers<[1], [0], [0], [1], [0, 0, 1, 1], [], []>} : vector<256x288xbf16>, vector<288x32xbf16>, vector<256x32xf32> -> vector<256x32xf32>
    %c0_4 = arith.constant 0 : index
    %c0_5 = arith.constant 0 : index
    %4 = vector.load %arg3[%c0_4, %c0_5] : memref<1x32xf32, #tpu.memory_space<vmem>>, vector<1x32xf32>
    %5 = vector.broadcast %4 : vector<1x32xf32> to vector<256x32xf32>
    %6 = arith.addf %3, %5 : vector<256x32xf32>
    %c0_6 = arith.constant 0 : index
    %c0_7 = arith.constant 0 : index
    %c0_8 = arith.constant 0 : index
    %7 = vector.load %arg4[%c0_6, %c0_7, %c0_8] : memref<1x256x32xf32, #tpu.memory_space<vmem>>, vector<1x256x32xf32>
    %8 = vector.shape_cast %7 : vector<1x256x32xf32> to vector<256x32xf32>
    %9 = vector.shape_cast %6 : vector<256x32xf32> to vector<1x256x32xf32>
    tpu.vector_store %arg4[%c0_6, %c0_7, %c0_8], %9 {strides = array<i32>} : memref<1x256x32xf32, #tpu.memory_space<vmem>>, vector<1x256x32xf32>,
    return
  }
  func.func @transform_0(%arg0: i32) -> (i32, i32, i32) {
    %c0_i32 = arith.constant 0 : i32
    %c0_i32_0 = arith.constant 0 : i32
    %c0_i32_1 = arith.constant 0 : i32
    return %arg0, %c0_i32, %c0_i32_0 : i32, i32, i32
  }
  func.func @transform_1(%arg0: i32) -> (i32, i32) {
    %c0_i32 = arith.constant 0 : i32
    %c0_i32_0 = arith.constant 0 : i32
    %c0_i32_1 = arith.constant 0 : i32
    return %c0_i32, %c0_i32_0 : i32, i32
  }
  func.func @transform_2(%arg0: i32) -> (i32, i32) {
    %c0_i32 = arith.constant 0 : i32
    %c0_i32_0 = arith.constant 0 : i32
    %c0_i32_1 = arith.constant 0 : i32
    return %c0_i32, %c0_i32_0 : i32, i32
  }
  func.func @transform_3(%arg0: i32) -> (i32, i32, i32) {
    %c0_i32 = arith.constant 0 : i32
    %c0_i32_0 = arith.constant 0 : i32
    %c0_i32_1 = arith.constant 0 : i32
    return %arg0, %c0_i32, %c0_i32_0 : i32, i32, i32
  }
}

</mosaic_0001>

<bundles_post_ra>
// kernel: cross_attn_up_block.7
= control target key start
LH: loop header
LB: loop body
LE: loop exit
PB: predicated region body
PF: predicated region fallthrough
CT: control target
= control target key end

     0   :  { %s991_s12 = smov 0   ;;  %s1226_s0 = inlined_call_operand.vmem [shape: f32[2,64,64], index: 0, kind: input, shape index: {}]   ;;  %s1227_s1 = inlined_call_operand.vmem [shape: f32[1,64], index: 1, kind: input, shape index: {}]   ;;  %s1228_s2 = inlined_call_operand.vmem [shape: f32[1,64], index: 2, kind: input, shape index: {}]   ;;  %s1229_s3 = inlined_call_operand.vmem [shape: f32[2,64,64], index: 3, kind: output, shape index: {}]  }
   0x1 LB: > { %s763_s13 = sadd.s32 4294967295, %s964_s12   ;;  %p767_p0 = scmp.ge.s32.totalorder %s964_s12, 1  ;;  %s964_s12 = sphi %s991_s12, %s13_s12  }
   0x2   : > { %p137_p1 = scmp.lt.s32.totalorder %s964_s12, 3 }
   0x4   : > { %p138_p2 = pnand %p767_p0, %p137_p1 }
   0x5   : > { %v232_v0 = vlaneseq (!%p138_p2)  ;;  %p161_p3 = scmp.lt.s32.totalorder (!%p138_p2), %s763_s13, 1  ;;  %v966_v1 = vmov (!%p138_p2), 0.0|0.0   ;;  %vm967_vm0 = vmmov (!%p138_p2), 0   ;;  %v968_v4 = vmov (!%p138_p2), 0.0  }
   0x6   : > { %141 = sbr.rel (%p138_p2) target bundleno = 535 (0x217), region = 32  ;;  %887 = vmatprep.subr.bf16.mxu0 (!%p138_p2), %v966_v1  ;;  %899 = vmatprep.subr.bf16.mxu1 (!%p138_p2), %v966_v1  ;;  %vm181_vm3 = vcmask (!%p138_p2), 523264   ;;  %v969_v24 = vmov (!%p138_p2), 1.0|1.0  }
   0x7   : > { %v1001_v2 = vshrl.u32 (!%p138_p2), %v232_v0, 7  ;;  %v1003_v3 = vand.u32 (!%p138_p2), 127, %v232_v0  ;;  %855 = vmatprep.mubr.msk.f32.mxu0 (!%p138_p2), %vm967_vm0, %v968_v4  ;;  %874 = vmatprep.mubr.msk.f32.mxu1 (!%p138_p2), %vm967_vm0, %v968_v4 }
   0x9   : > { %v234_v5 = vadd.s32 (!%p138_p2), 8, %v1001_v2  ;;  %v1013_v6 = vmul.u32 (!%p138_p2), 8, %v1003_v3  ;;  %v235_v7 = vadd.s32 (!%p138_p2), 16, %v1001_v2  ;;  %v236_v8 = vadd.s32 (!%p138_p2), 24, %v1001_v2 }
   0xa   : > { %v237_v10 = vadd.s32 (!%p138_p2), 32, %v1001_v2  ;;  %v238_v11 = vadd.s32 (!%p138_p2), 40, %v1001_v2  ;;  %v239_v15 = vadd.s32 (!%p138_p2), 48, %v1001_v2  ;;  %v240_v17 = vadd.s32 (!%p138_p2), 56, %v1001_v2 }
   0xb   : > { %vm244_vm1 = vcmp.ge.s32.totalorder (!%p138_p2), %v1001_v2, %v1013_v6  ;;  %v1028_v9 = vadd.s32 (!%p138_p2), 8, %v1013_v6  ;;  %vm245_vm2 = vcmp.ge.s32.totalorder (!%p138_p2), %v234_v5, %v1013_v6  ;;  %vm246_vm7 = vcmp.ge.s32.totalorder (!%p138_p2), %v235_v7, %v1013_v6 }
   0xc   : > { %vm247_vm8 = vcmp.ge.s32.totalorder (!%p138_p2), %v236_v8, %v1013_v6  ;;  %vm248_vm13 = vcmp.ge.s32.totalorder (!%p138_p2), %v237_v10, %v1013_v6  ;;  %vm249_vm14 = vcmp.ge.s32.totalorder (!%p138_p2), %v238_v11, %v1013_v6 }
   0xd   : > { %s1245_s13 = smov (!%p161_p3, %s763_s13), 1  ;;  %vm253_vm4 = vcmp.lt.s32.totalorder %v1001_v2, %v1028_v9  ;;  %vm254_vm5 = vcmp.lt.s32.totalorder %v234_v5, %v1028_v9  ;;  %vm255_vm9 = vcmp.lt.s32.totalorder %v235_v7, %v1028_v9  ;;  %vm256_vm11 = vcmp.lt.s32.totalorder %v236_v8, %v1028_v9 }
   0xe   : > { %s815_s14 = sshll.u32 %s1245_s13, 6  ;;  %vm1046_vm6 = vmand %vm244_vm1, %vm253_vm4  ;;  %vm257_vm15 = vcmp.lt.s32.totalorder %v237_v10, %v1028_v9 }
   0xf   : > { %s1023_s17 = scalar_lea.vmem %s1226_s0, %s815_s14  ;;  %vm262_vm10 = vmand %vm245_vm2, %vm254_vm5  ;;  %vm258_vm2 = vcmp.lt.s32.totalorder %v238_v11, %v1028_v9  ;;  %s170_s24 = scalar_lea.vmem %s1229_s3, %s815_s14 }
  0x10   : > { %v1034_v12 = vld [vmem:[%s1023_s17] sm:$0xff]  ;;  %v1037_v13 = vld [vmem:[%s1023_s17 + $0x8] sm:$0xff]  ;;  %v1040_v14 = vld [vmem:[%s1023_s17 + $0x10] sm:$0xff] }
  0x11   : > { %v1055_v18 = vld [vmem:[%s1023_s17 + $0x18] sm:$0xff]  ;;  %v182_v19 = vsel %vm181_vm3, %v1034_v12, 0.0  ;;  %v183_v20 = vsel %vm181_vm3, %v1037_v13, 0.0  ;;  %v185_v21 = vsel %vm181_vm3, %v1040_v14, 0.0  ;;  %vm888_vm12 = vmpackc.low %vm262_vm10, %vm1046_vm6  ;;  %v1072_v22 = vld [vmem:[%s1023_s17 + $0x20] sm:$0xff]  ;;  %v203_v27 = vmul.f32 %v1034_v12, %v1034_v12 }
  0x12   : > { %v184_v23 = vadd.f32 %v183_v20, %v182_v19  ;;  %889 = vmatpush3.bf16.msk.msra.mxu0 %vm888_vm12, %v969_v24  ;;  %901 = vmatpush3.bf16.msk.msra.mxu1 %vm888_vm12, %v969_v24  ;;  %vm1078_vm1 = vmand %vm246_vm7, %vm255_vm9  ;;  %v187_v26 = vsel %vm181_vm3, %v1055_v18, 0.0  ;;  %v204_v28 = vmul.f32 %v1037_v13, %v1037_v13  ;;  %v1100_v30 = vld [vmem:[%s1023_s17 + $0x28] sm:$0xff]  ;;  %v205_v32 = vmul.f32 %v1040_v14, %v1040_v14  ;;  %v1125_v37 = vld [vmem:[%s1023_s17 + $0x30] sm:$0xff] }
  0x13   : > { %890 = vmatprep.subr.bf16.mxu0 %v966_v1  ;;  %vm1094_vm4 = vmand %vm247_vm8, %vm256_vm11  ;;  %902 = vmatprep.subr.bf16.mxu1 %v966_v1  ;;  %v206_v33 = vmul.f32 %v1055_v18, %v1055_v18  ;;  %vm250_vm6 = vcmp.ge.s32.totalorder %v239_v15, %v1013_v6  ;;  %vm259_vm7 = vcmp.lt.s32.totalorder %v239_v15, %v1028_v9  ;;  %v189_v34 = vsel %vm181_vm3, %v1072_v22, 0.0  ;;  %v1149_v45 = vld [vmem:[%s1023_s17 + $0x38] sm:$0xff] }
  0x14   : > { %v186_v31 = vadd.f32 %v185_v21, %v184_v23  ;;  %vm891_vm5 = vmpackc.low %vm1094_vm4, %vm1078_vm1  ;;  %v207_v35 = vmul.f32 %v1072_v22, %v1072_v22  ;;  %v211_v39 = vsel %vm181_vm3, %v203_v27, 0.0  ;;  %v212_v40 = vsel %vm181_vm3, %v204_v28, 0.0 }
  0x15   : > { %vm1120_vm8 = vmand %vm248_vm13, %vm257_vm15  ;;  %v214_v41 = vsel %vm181_vm3, %v205_v32, 0.0  ;;  %vm251_vm10 = vcmp.ge.s32.totalorder %v240_v17, %v1013_v6  ;;  %vm260_vm11 = vcmp.lt.s32.totalorder %v240_v17, %v1028_v9  ;;  %v191_v43 = vsel %vm181_vm3, %v1100_v30, 0.0 }
  0x16   : > { %v188_v38 = vadd.f32 %v187_v26, %v186_v31  ;;  %892 = vmatpush3.bf16.msk.msra.mxu0 %vm891_vm5, %v969_v24  ;;  %904 = vmatpush3.bf16.msk.msra.mxu1 %vm891_vm5, %v969_v24  ;;  %vm1134_vm9 = vmand %vm249_vm14, %vm258_vm2  ;;  %v213_v44 = vadd.f32 %v212_v40, %v211_v39  ;;  %v208_v47 = vmul.f32 %v1100_v30, %v1100_v30  ;;  %v216_v48 = vsel %vm181_vm3, %v206_v33, 0.0 }
  0x17   : > { %893 = vmatprep.subr.bf16.mxu0 %v966_v1  ;;  %vm894_vm12 = vmpackc.low %vm1134_vm9, %vm1120_vm8  ;;  %905 = vmatprep.subr.bf16.mxu1 %v966_v1  ;;  %v193_v50 = vsel %vm181_vm3, %v1125_v37, 0.0  ;;  %v209_v54 = vmul.f32 %v1125_v37, %v1125_v37  ;;  %v218_v55 = vsel %vm181_vm3, %v207_v35, 0.0  ;;  %v195_v56 = vsel %vm181_vm3, %v1149_v45, 0.0 }
  0x18   : > { %v190_v46 = vadd.f32 %v189_v34, %v188_v38  ;;  %vm1158_vm13 = vmand %vm250_vm6, %vm259_vm7  ;;  %v215_v51 = vadd.f32 %v214_v41, %v213_v44  ;;  %v210_v59 = vmul.f32 %v1149_v45, %v1149_v45  ;;  %v220_v60 = vsel %vm181_vm3, %v208_v47, 0.0 }
  0x19   : > { %vm1164_vm14 = vmand %vm251_vm10, %vm260_vm11  ;;  %v222_v63 = vsel %vm181_vm3, %v209_v54, 0.0  ;;  %v970_v26 = vmov 1.0   ;;  %vm444_vm5 = vcmask 64512   ;;  %v520_v41 = vsub.s32 0, %v1001_v2 }
  0x1a   : > { %v192_v53 = vadd.f32 %v191_v43, %v190_v46  ;;  %895 = vmatpush3.bf16.msk.msra.mxu0 %vm894_vm12, %v969_v24  ;;  %907 = vmatpush3.bf16.msk.msra.mxu1 %vm894_vm12, %v969_v24  ;;  %v217_v57 = vadd.f32 %v216_v48, %v215_v51  ;;  %vm897_vm15 = vmpackc.low %vm1164_vm14, %vm1158_vm13  ;;  %v224_v6 = vsel %vm181_vm3, %v210_v59, 0.0 }
  0x1b   : > { %896 = vmatprep.subr.bf16.mxu0 %v966_v1  ;;  %908 = vmatprep.subr.bf16.mxu1 %v966_v1 }
  0x1c   : > { %v194_v58 = vadd.f32 %v193_v50, %v192_v53  ;;  %v219_v61 = vadd.f32 %v218_v55, %v217_v57 }
  0x1e   : > { %v196_v62 = vadd.f32 %v195_v56, %v194_v58  ;;  %898 = vmatpush3.bf16.msk.msra.mxu0 %vm897_vm15, %v969_v24  ;;  %910 = vmatpush3.bf16.msk.msra.mxu1 %vm897_vm15, %v969_v24  ;;  %v221_v0 = vadd.f32 %v220_v60, %v219_v61  ;;  %v285_v24 = vmul.u32 8, %v1001_v2  ;;  %v803_v2 = vld [vmem:[%s1227_s1] ss:$0 sm:$0xff] }
  0x1f   : > { %877 = vmatprep.subr.mxu0 %v968_v4  ;;  %882 = vmatprep.subr.mxu1 %v968_v4 }
  0x20   : > { %v197_v5 = vrot.slane %v196_v62, 4  ;;  %v223_v1 = vadd.f32 %v222_v63, %v221_v0  ;;  %v287_v25 = vadd.s32 8, %v285_v24  ;;  %vm286_vm1 = vcmp.ge.s32.totalorder %v1003_v3, %v285_v24 }
  0x22   : > { %v198_v7 = vadd.f32 %v197_v5, %v196_v62  ;;  %v225_v8 = vadd.f32 %v224_v6, %v223_v1  ;;  %vm288_vm2 = vcmp.lt.s32.totalorder %v1003_v3, %v287_v25 }
  0x23   : > { %vm289_vm4 = vmand %vm286_vm1, %vm288_vm2 }
  0x24   : > { %v199_v9 = vrot.slane %v198_v7, 2  ;;  %v226_v10 = vrot.slane %v225_v8, 4 }
  0x26   : > { %v200_v11 = vadd.f32 %v199_v9, %v198_v7  ;;  %v227_v15 = vadd.f32 %v226_v10, %v225_v8 }
  0x28   : > { %v201_v16 = vrot.slane %v200_v11, 1  ;;  %v228_v17 = vrot.slane %v227_v15, 2 }
  0x2a   : > { %v202_v19 = vadd.f32 %v201_v16, %v200_v11  ;;  %v229_v20 = vadd.f32 %v228_v17, %v227_v15 }
  0x2c   : > { %856 = vmatmul.mubr.msk.f32.vlgmr.msra.gmra.mrb[0].mxu0 %vm181_vm3, %v202_v19  ;;  %v230_v21 = vrot.slane %v229_v20, 1 }
  0x2d   : > { %879 = vmatprep.mubr.msk.f32.mxu0 %vm967_vm0, %v968_v4  ;;  %878 = vmatpush3.msk.msra.mxu0 %vm289_vm4, %v970_v26 }
  0x2e   : > { %v231_v23 = vadd.f32 %v230_v21, %v229_v20 }
  0x30   : > { %875 = vmatmul.mubr.msk.f32.vlgmr.msra.gmra.mrb[0].mxu1 %vm181_vm3, %v231_v23 }
  0x31   : > { %884 = vmatprep.mubr.msk.f32.mxu1 %vm967_vm0, %v968_v4  ;;  %883 = vmatpush3.msk.msra.mxu1 %vm289_vm4, %v970_v26 }
  0xff   : > { %v361_v27 = vpop.f32.mrb[0].mxu0 }
 0x100   : > { %v366_v28 = vmul.f32 0.001953125, %v361_v27  ;;  %v857_v29 = vpop.f32.mrb[1].mxu0 }
 0x102   : > { %880 = vmatmul.mubr.msk.f32.vlgmr.msra.gmra.mrb[2].mxu0 %vm444_vm5, %v366_v28  ;;  %v441_v31 = vmul.f32 %v366_v28, %v366_v28 }
 0x103   : > { %v436_v32 = vpop.f32.mrb[0].mxu1 }
 0x104   : > { %v440_v33 = vmul.f32 0.001953125, %v436_v32  ;;  %v876_v4 = vpop.f32.mrb[1].mxu1 }
 0x106   : > { %v442_v34 = vsub.f32 %v440_v33, %v441_v31 }
 0x108   : > { %v443_v35 = vmax.f32 %v442_v34, 0.0 }
 0x10a   : > { %885 = vmatmul.mubr.msk.f32.vlgmr.msra.gmra.mrb[2].mxu1 %vm444_vm5, %v443_v35 }
 0x1d5   : > { %v514_v36 = vpop.f32.mrb[2].mxu0 }
 0x1d6   : > { %v881_v38 = vpop.f32.mrb[3].mxu0  ;;  %v521_v42 = vrot.slane %v514_v36, %v520_v41 }
 0x1d8   : > { %v522_v44 = vsub.f32 %v1034_v12, %v521_v42  ;;  %v523_v46 = vsub.f32 %v1037_v13, %v521_v42  ;;  %v524_v47 = vsub.f32 %v1040_v14, %v521_v42  ;;  %v525_v48 = vsub.f32 %v1055_v18, %v521_v42  ;;  %v804_v14 = vld [vmem:[%s1228_s2] ss:$0 sm:$0xff] }
 0x1d9   : > { %v526_v50 = vsub.f32 %v1072_v22, %v521_v42  ;;  %v527_v51 = vsub.f32 %v1100_v30, %v521_v42  ;;  %v528_v52 = vsub.f32 %v1125_v37, %v521_v42  ;;  %v529_v53 = vsub.f32 %v1149_v45, %v521_v42 }
 0x1dd   : > { %v599_v39 = vpop.f32.mrb[2].mxu1 }
 0x1de   : > { %v600_v3 = vadd.f32 1e-06, %v599_v39  ;;  %v886_v40 = vpop.f32.mrb[3].mxu1 }
 0x1e0   : > { %924 = vrsqrt.f32 %v600_v3 }
 0x1ea   : > { %v925_v43 = vpop.eup %924 }
 0x1eb   : > { %v607_v49 = vrot.slane %v925_v43, %v520_v41 }
 0x1ed   : > { %v608_v12 = vmul.f32 %v607_v49, %v522_v44  ;;  %v609_v54 = vmul.f32 %v607_v49, %v523_v46  ;;  %v610_v13 = vmul.f32 %v607_v49, %v524_v47  ;;  %v611_v55 = vmul.f32 %v607_v49, %v525_v48 }
 0x1ee   : > { %v612_v18 = vmul.f32 %v607_v49, %v526_v50  ;;  %v613_v22 = vmul.f32 %v607_v49, %v527_v51  ;;  %v614_v56 = vmul.f32 %v607_v49, %v528_v52  ;;  %v615_v30 = vmul.f32 %v607_v49, %v529_v53 }
 0x1ef   : > { %v622_v57 = vmul.f32 %v803_v2, %v608_v12  ;;  %v623_v37 = vmul.f32 %v803_v2, %v609_v54  ;;  %v624_v58 = vmul.f32 %v803_v2, %v610_v13  ;;  %v625_v45 = vmul.f32 %v803_v2, %v611_v55 }
 0x1f0   : > { %v626_v59 = vmul.f32 %v803_v2, %v612_v18  ;;  %v627_v60 = vmul.f32 %v803_v2, %v613_v22  ;;  %v628_v61 = vmul.f32 %v803_v2, %v614_v56  ;;  %v629_v62 = vmul.f32 %v803_v2, %v615_v30 }
 0x1f1   : > { %v636_v63 = vadd.f32 %v804_v14, %v622_v57  ;;  %v637_v0 = vadd.f32 %v804_v14, %v623_v37  ;;  %v638_v5 = vadd.f32 %v804_v14, %v624_v58  ;;  %v639_v6 = vadd.f32 %v804_v14, %v625_v45 }
 0x1f2   : > { %v640_v1 = vadd.f32 %v804_v14, %v626_v59  ;;  %v641_v7 = vadd.f32 %v804_v14, %v627_v60  ;;  %v642_v8 = vadd.f32 %v804_v14, %v628_v61  ;;  %v643_v15 = vadd.f32 %v804_v14, %v629_v62 }
 0x1f3   : > { %v805_v9 = vmul.f32 -1.442695, %v636_v63  ;;  %v806_v10 = vmul.f32 -1.442695, %v637_v0  ;;  %v807_v11 = vmul.f32 -1.442695, %v638_v5 }
 0x1f4   : > { %v808_v16 = vmul.f32 -1.442695, %v639_v6  ;;  %v809_v17 = vmul.f32 -1.442695, %v640_v1  ;;  %v810_v19 = vmul.f32 -1.442695, %v641_v7 }
 0x1f5   : > { %926 = vpow2.f32 %v805_v9  ;;  %v811_v20 = vmul.f32 -1.442695, %v642_v8  ;;  %v812_v21 = vmul.f32 -1.442695, %v643_v15 }
 0x1f6   : > { %928 = vpow2.f32 %v806_v10 }
 0x1f7   : > { %930 = vpow2.f32 %v807_v11 }
 0x1f8   : > { %932 = vpow2.f32 %v808_v16 }
 0x1f9   : > { %934 = vpow2.f32 %v809_v17 }
 0x1fa   : > { %936 = vpow2.f32 %v810_v19 }
 0x1fb   : > { %938 = vpow2.f32 %v811_v20 }
 0x1fc   : > { %940 = vpow2.f32 %v812_v21 }
 0x1ff   : > { %v927_v23 = vpop.eup %926 }
 0x200   : > { %v929_v24 = vpop.eup %928  ;;  %v668_v25 = vadd.f32 1.0, %v927_v23 }
 0x201   : > { %v931_v26 = vpop.eup %930  ;;  %v669_v27 = vadd.f32 1.0, %v929_v24 }
 0x202   : > { %v933_v28 = vpop.eup %932  ;;  %v670_v29 = vadd.f32 1.0, %v931_v26  ;;  %942 = vrcp.f32 %v668_v25 }
 0x203   : > { %v935_v31 = vpop.eup %934  ;;  %v671_v32 = vadd.f32 1.0, %v933_v28  ;;  %944 = vrcp.f32 %v669_v27 }
 0x204   : > { %v937_v33 = vpop.eup %936  ;;  %v672_v4 = vadd.f32 1.0, %v935_v31  ;;  %946 = vrcp.f32 %v670_v29 }
 0x205   : > { %v939_v34 = vpop.eup %938  ;;  %v673_v35 = vadd.f32 1.0, %v937_v33  ;;  %948 = vrcp.f32 %v671_v32 }
 0x206   : > { %v941_v36 = vpop.eup %940  ;;  %v674_v38 = vadd.f32 1.0, %v939_v34  ;;  %950 = vrcp.f32 %v672_v4 }
 0x207   : > { %v675_v39 = vadd.f32 1.0, %v941_v36  ;;  %952 = vrcp.f32 %v673_v35 }
 0x208   : > { %954 = vrcp.f32 %v674_v38 }
 0x209   : > { %956 = vrcp.f32 %v675_v39 }
 0x20c   : > { %v943_v3 = vpop.eup %942 }
 0x20d   : > { %v945_v40 = vpop.eup %944  ;;  %v692_v41 = vmul.f32 %v943_v3, %v636_v63 }
 0x20e   : > { %v947_v42 = vpop.eup %946  ;;  %v693_v43 = vmul.f32 %v945_v40, %v637_v0 }
 0x20f   : > { %v949_v44 = vpop.eup %948  ;;  %v694_v46 = vmul.f32 %v947_v42, %v638_v5  ;;  %700 = vst.msk [vmem:[%s170_s24] sm:$0xff] %vm181_vm3, %v692_v41 }
 0x210   : > { %v951_v47 = vpop.eup %950  ;;  %v695_v48 = vmul.f32 %v949_v44, %v639_v6  ;;  %701 = vst.msk [vmem:[%s170_s24 + $0x8] sm:$0xff] %vm181_vm3, %v693_v43 }
 0x211   : > { %v953_v49 = vpop.eup %952  ;;  %v696_v50 = vmul.f32 %v951_v47, %v640_v1  ;;  %702 = vst.msk [vmem:[%s170_s24 + $0x10] sm:$0xff] %vm181_vm3, %v694_v46 }
 0x212   : > { %v955_v51 = vpop.eup %954  ;;  %v697_v52 = vmul.f32 %v953_v49, %v641_v7  ;;  %703 = vst.msk [vmem:[%s170_s24 + $0x18] sm:$0xff] %vm181_vm3, %v695_v48 }
 0x213   : > { %v957_v53 = vpop.eup %956  ;;  %v698_v2 = vmul.f32 %v955_v51, %v642_v8  ;;  %704 = vst.msk [vmem:[%s170_s24 + $0x20] sm:$0xff] %vm181_vm3, %v696_v50 }
 0x214   : > { %v699_v12 = vmul.f32 %v957_v53, %v643_v15  ;;  %705 = vst.msk [vmem:[%s170_s24 + $0x28] sm:$0xff] %vm181_vm3, %v697_v52 }
 0x215   : > { %706 = vst.msk [vmem:[%s170_s24 + $0x30] sm:$0xff] %vm181_vm3, %v698_v2 }
 0x216   : > { %707 = vst.msk [vmem:[%s170_s24 + $0x38] sm:$0xff] %vm181_vm3, %v699_v12 }
 0x217 PF: > { %s13_s12 = sadd.s32 1, %s964_s12  }
 0x218   : > { %p10_p4 = scmp.ge.s32.totalorder %s13_s12, 4  }
 0x21a   :  { %12 = sbr.rel (!%p10_p4) target bundleno = 1 (0x1), region = 62 }

// kernel: cross_attn_up_block.8
= control target key start
LH: loop header
LB: loop body
LE: loop exit
PB: predicated region body
PF: predicated region fallthrough
CT: control target
= control target key end

     0   :  { %s2078_s27 = smov 0   ;;  %s2375_s0 = inlined_call_operand.vmem [shape: bf16[2,64,576], index: 0, kind: input, shape index: {}]   ;;  %s2376_s1 = inlined_call_operand.vmem [shape: bf16[576,32], index: 1, kind: input, shape index: {}]   ;;  %s2377_s2 = inlined_call_operand.vmem [shape: f32[1,32], index: 2, kind: input, shape index: {}]   ;;  %s2378_s3 = inlined_call_operand.vmem [shape: f32[2,1,64], index: 3, kind: input, shape index: {}]   ;;  %s2379_s4 = inlined_call_operand.vmem [shape: bf16[64,32], index: 4, kind: input, shape index: {}]   ;;  %s2380_s5 = inlined_call_operand.vmem [shape: f32[1,32], index: 5, kind: input, shape index: {}]   ;;  %s2381_s6 = inlined_call_operand.vmem [shape: f32[1,32], index: 6, kind: input, shape index: {}]   ;;  %s2382_s7 = inlined_call_operand.vmem [shape: f32[1,32], index: 7, kind: input, shape index: {}]   ;;  %s2383_s8 = inlined_call_operand.vmem [shape: f32[2,64,32], index: 8, kind: output, shape index: {}]  }
   0x1 LB: > { %s1614_s28 = sadd.s32 4294967295, %s2026_s27   ;;  %p1618_p0 = scmp.ge.s32.totalorder %s2026_s27, 1  ;;  %s2026_s27 = sphi %s2078_s27, %s18_s27  }
   0x2   : > { %p270_p1 = scmp.lt.s32.totalorder %s2026_s27, 3 }
   0x4   : > { %p271_p2 = pnand %p1618_p0, %p270_p1 }
   0x5   : > { %v1914_v0 = vld [vmem:[%s2376_s1 + $0x40] sm:$0xff] (!%p271_p2)   ;;  %v1918_v4 = vld [vmem:[%s2376_s1 + $0x48] sm:$0xff] (!%p271_p2)   ;;  %v1922_v8 = vld [vmem:[%s2376_s1 + $0x50] sm:$0xff] (!%p271_p2)   ;;  %p307_p3 = scmp.lt.s32.totalorder (!%p271_p2), %s1614_s28, 1  ;;  %v2028_v36 = vmov (!%p271_p2), 0.0   ;;  %vm740_vm0 = vcmask (!%p271_p2), 523264  }
   0x6   : > { %274 = sbr.rel (%p271_p2) target bundleno = 808 (0x328), region = 52  ;;  %v1915_v1 = vld [vmem:[%s2376_s1 + $0xc0] sm:$0xff] (!%p271_p2)   ;;  %1721 = vmatprep.subr.bf16.mxu0 (!%p271_p2), %v1914_v0  ;;  %v1919_v5 = vld [vmem:[%s2376_s1 + $0xc8] sm:$0xff] (!%p271_p2)   ;;  %v1923_v9 = vld [vmem:[%s2376_s1 + $0xd0] sm:$0xff] (!%p271_p2)   ;;  %vm2029_vm1 = vmmov (!%p271_p2), 0  }
   0x7   : > { %v1916_v2 = vld [vmem:[%s2376_s1] sm:$0xff] (!%p271_p2)   ;;  %1761 = vmatprep.subr.bf16.mxu1 (!%p271_p2), %v1915_v1  ;;  %v1920_v6 = vld [vmem:[%s2376_s1 + $0x8] sm:$0xff] (!%p271_p2)   ;;  %v1924_v10 = vld [vmem:[%s2376_s1 + $0x10] sm:$0xff] (!%p271_p2)  }
   0x8   : > { %v1917_v3 = vld [vmem:[%s2376_s1 + $0x80] sm:$0xff] (!%p271_p2)   ;;  %1722 = vmatpush3.bf16.msra.mxu0 (!%p271_p2), %v1916_v2  ;;  %v1921_v7 = vld [vmem:[%s2376_s1 + $0x88] sm:$0xff] (!%p271_p2)   ;;  %v1925_v11 = vld [vmem:[%s2376_s1 + $0x90] sm:$0xff] (!%p271_p2)  }
   0x9   : > { %1762 = vmatpush3.bf16.msra.mxu1 (!%p271_p2), %v1917_v3  ;;  %1723 = vmatprep.subr.bf16.mxu0 (!%p271_p2), %v1918_v4  ;;  %v1926_v12 = vld [vmem:[%s2376_s1 + $0x58] sm:$0xff] (!%p271_p2)   ;;  %v1930_v16 = vld [vmem:[%s2376_s1 + $0x60] sm:$0xff] (!%p271_p2)   ;;  %v1934_v20 = vld [vmem:[%s2376_s1 + $0x68] sm:$0xff] (!%p271_p2)   ;;  %v1033_v4 = vlaneseq (!%p271_p2) }
   0xa   : > { %1763 = vmatprep.subr.bf16.mxu1 (!%p271_p2), %v1919_v5  ;;  %v1927_v13 = vld [vmem:[%s2376_s1 + $0xd8] sm:$0xff] (!%p271_p2)   ;;  %v1931_v17 = vld [vmem:[%s2376_s1 + $0xe0] sm:$0xff] (!%p271_p2)   ;;  %v1935_v21 = vld [vmem:[%s2376_s1 + $0xe8] sm:$0xff] (!%p271_p2)  }
   0xb   : > { %v1928_v14 = vld [vmem:[%s2376_s1 + $0x18] sm:$0xff] (!%p271_p2)   ;;  %v1932_v18 = vld [vmem:[%s2376_s1 + $0x20] sm:$0xff] (!%p271_p2)   ;;  %v1936_v22 = vld [vmem:[%s2376_s1 + $0x28] sm:$0xff] (!%p271_p2)   ;;  %v2257_v5 = vand.u32 (!%p271_p2), 127, %v1033_v4 }
   0xc   : > { %1724 = vmatpush3.bf16.msra.mxu0 (!%p271_p2), %v1920_v6  ;;  %v1929_v15 = vld [vmem:[%s2376_s1 + $0x98] sm:$0xff] (!%p271_p2)   ;;  %v1933_v19 = vld [vmem:[%s2376_s1 + $0xa0] sm:$0xff] (!%p271_p2)   ;;  %v1937_v23 = vld [vmem:[%s2376_s1 + $0xa8] sm:$0xff] (!%p271_p2)   ;;  %v2259_v6 = vshrl.u32 (!%p271_p2), %v1033_v4, 7 }
   0xd   : > { %1764 = vmatpush3.bf16.msra.mxu1 %v1921_v7  ;;  %1725 = vmatprep.subr.bf16.mxu0 %v1922_v8  ;;  %s2385_s28 = smov (!%p307_p3, %s1614_s28), 1  ;;  %v1938_v24 = vld [vmem:[%s2376_s1 + $0x70] sm:$0xff]   ;;  %v1942_v28 = vld [vmem:[%s2376_s1 + $0x78] sm:$0xff]   ;;  %v1952_v37 = vld [vmem:[%s2376_s1 + $0x100] sm:$0xff]   ;;  %v1105_v7 = vmul.u32 4, %v2257_v5 }
   0xe   : > { %1765 = vmatprep.subr.bf16.mxu1 %v1923_v9  ;;  %v1939_v25 = vld [vmem:[%s2376_s1 + $0xf0] sm:$0xff]   ;;  %s1900_s19 = smul.u32 160, %s2385_s28  ;;  %v1943_v29 = vld [vmem:[%s2376_s1 + $0xf8] sm:$0xff]   ;;  %v1953_v38 = vld [vmem:[%s2379_s4] sm:$0xff]   ;;  %s314_s12 = scalar_lea.vmem %s2378_s3, %s2385_s28  ;;  %v1100_v8 = vadd.s32 8, %v2259_v6 }
   0xf   : > { %v1940_v26 = vld [vmem:[%s2376_s1 + $0x30] sm:$0xff]   ;;  %v1944_v30 = vld [vmem:[%s2376_s1 + $0x38] sm:$0xff]   ;;  %v1960_v43 = vld [vmem:[%s2376_s1 + $0x108] sm:$0xff]   ;;  %v1110_v9 = vadd.s32 4, %v1105_v7  ;;  %vm1106_vm2 = vcmp.ge.s32.totalorder %v2259_v6, %v1105_v7  ;;  %s1720_s22 = sshll.u32 %s2385_s28, 6 }
  0x10   : > { %1726 = vmatpush3.bf16.msra.mxu0 %v1924_v10  ;;  %v1941_v27 = vld [vmem:[%s2376_s1 + $0xb0] sm:$0xff]   ;;  %s2186_s10 = scalar_lea.vmem %s2375_s0, %s1900_s19  ;;  %v1945_v31 = vld [vmem:[%s2376_s1 + $0xb8] sm:$0xff]   ;;  %v1961_v44 = vld [vmem:[%s2379_s4 + $0x8] sm:$0xff]   ;;  %vm1107_vm3 = vcmp.ge.s32.totalorder %v1100_v8, %v1105_v7  ;;  %v2030_v10 = vmov 0.0|0.0   ;;  %s319_s25 = scalar_lea.vmem %s2383_s8, %s1720_s22 }
  0x11   : > { %1766 = vmatpush3.bf16.msra.mxu1 %v1925_v11  ;;  %1727 = vmatprep.subr.bf16.mxu0 %v1926_v12  ;;  %v1946_v32 = vld [vmem:[%s2186_s10] ss:$20 sps:$4 sm:$0xff]   ;;  %v1948_v33 = vld [vmem:[%s2186_s10 + $0x4] ss:$20 sps:$4 sm:$0xff]   ;;  %v1949_v34 = vld [vmem:[%s2186_s10 + $0x8] ss:$20 sps:$4 sm:$0xff]   ;;  %vm1111_vm4 = vcmp.lt.s32.totalorder %v2259_v6, %v1110_v9  ;;  %vm1112_vm5 = vcmp.lt.s32.totalorder %v1100_v8, %v1110_v9 }
  0x12   : > { %1767 = vmatprep.subr.bf16.mxu1 %v1927_v13  ;;  %v1951_v35 = vld [vmem:[%s2186_s10 + $0xc] ss:$20 sps:$4 sm:$0xff]   ;;  %785 = vmatprep.mubr.bf16.mxu0 %v1948_v33  ;;  %v1956_v40 = vld [vmem:[%s2186_s10 + $0x34] ss:$20 sps:$4 sm:$0xff]   ;;  %v1959_v42 = vld [vmem:[%s2186_s10 + $0x30] ss:$20 sps:$4 sm:$0xff]  }
  0x13   : > { %850 = vmatprep.mubr.bf16.mxu1 %v1951_v35  ;;  %v1954_v39 = vld [vmem:[%s2186_s10 + $0x2c] ss:$20 sps:$4 sm:$0xff]   ;;  %v1958_v41 = vld [vmem:[%s2186_s10 + $0x28] ss:$20 sps:$4 sm:$0xff]   ;;  %v1968_v47 = vld [vmem:[%s2376_s1 + $0x110] sm:$0xff]   ;;  %v1101_v11 = vadd.s32 16, %v2259_v6 }
  0x14   : > { %1728 = vmatpush3.bf16.msra.mxu0 %v1928_v14  ;;  %v1962_v45 = vld [vmem:[%s2186_s10 + $0x54] ss:$20 sps:$4 sm:$0xff]   ;;  %v1964_v46 = vld [vmem:[%s2186_s10 + $0x5c] ss:$20 sps:$4 sm:$0xff]   ;;  %v1967_v50 = vld [vmem:[%s2186_s10 + $0x58] ss:$20 sps:$4 sm:$0xff]  }
  0x15   : > { %1768 = vmatpush3.bf16.msra.mxu1 %v1929_v15  ;;  %1729 = vmatprep.subr.bf16.mxu0 %v1930_v16  ;;  %v1969_v48 = vld [vmem:[%s2379_s4 + $0x10] sm:$0xff]   ;;  %v1972_v52 = vld [vmem:[%s2186_s10 + $0x84] ss:$20 sps:$4 sm:$0xff]   ;;  %v948_v55 = vld [vmem:[%s314_s12] sm:$0x1]  ;;  %v1102_v12 = vadd.s32 24, %v2259_v6  ;;  %vm1108_vm9 = vcmp.ge.s32.totalorder %v1101_v11, %v1105_v7  ;;  %vm1113_vm11 = vcmp.lt.s32.totalorder %v1101_v11, %v1110_v9 }
  0x16   : > { %1769 = vmatprep.subr.bf16.mxu1 %v1931_v17  ;;  %v1966_v49 = vld [vmem:[%s2186_s10 + $0x50] ss:$20 sps:$4 sm:$0xff]   ;;  %v1976_v53 = vld [vmem:[%s2376_s1 + $0x118] sm:$0xff]   ;;  %v1683_v56 = vmul.f32 -1.442695, %v948_v55  ;;  %vm1115_vm6 = vmand %vm1106_vm2, %vm1111_vm4 }
  0x17   : > { %v1970_v51 = vld [vmem:[%s2186_s10 + $0x7c] ss:$20 sps:$4 sm:$0xff]   ;;  %v1974_v57 = vld [vmem:[%s2186_s10 + $0x78] ss:$20 sps:$4 sm:$0xff]   ;;  %v1975_v58 = vld [vmem:[%s2186_s10 + $0x80] ss:$20 sps:$4 sm:$0xff]   ;;  %vm1109_vm10 = vcmp.ge.s32.totalorder %v1102_v12, %v1105_v7  ;;  %vm1114_vm12 = vcmp.lt.s32.totalorder %v1102_v12, %v1110_v9 }
  0x18   : > { %1730 = vmatpush3.bf16.msra.mxu0 %v1932_v18  ;;  %v1977_v54 = vld [vmem:[%s2379_s4 + $0x18] sm:$0xff]   ;;  %1982 = vpow2.f32 %v1683_v56  ;;  %v1978_v59 = vld [vmem:[%s2186_s10 + $0x10] ss:$20 sps:$4 sm:$0xff]   ;;  %v1980_v62 = vld [vmem:[%s2186_s10 + $0x60] ss:$20 sps:$4 sm:$0xff]  }
  0x19   : > { %1770 = vmatpush3.bf16.msra.mxu1 %v1933_v19  ;;  %1731 = vmatprep.subr.bf16.mxu0 %v1934_v20  ;;  %v1979_v60 = vld [vmem:[%s2186_s10 + $0x38] ss:$20 sps:$4 sm:$0xff]   ;;  %v1981_v0 = vld [vmem:[%s2186_s10 + $0x88] ss:$20 sps:$4 sm:$0xff]   ;;  %vm1116_vm7 = vmand %vm1107_vm3, %vm1112_vm5  ;;  %v2031_v13 = vmov 1.0|1.0  }
  0x1a   : > { %1771 = vmatprep.subr.bf16.mxu1 %v1935_v21  ;;  %vm1889_vm8 = vmpackc.low %vm1116_vm7, %vm1115_vm6  ;;  %v1622_v16 = vld [vmem:[%s2377_s2] ss:$0 sm:$0xff]  ;;  %vm1286_vm5 = vcmask 64512  }
  0x1b   : > { %vm1117_vm13 = vmand %vm1108_vm9, %vm1113_vm11 }
  0x1c   : > { %1732 = vmatpush3.bf16.msra.mxu0 %v1936_v22  ;;  %vm1118_vm14 = vmand %vm1109_vm10, %vm1114_vm12 }
  0x1d   : > { %1772 = vmatpush3.bf16.msra.mxu1 %v1937_v23  ;;  %1733 = vmatprep.subr.bf16.mxu0 %v1938_v24  ;;  %vm1892_vm15 = vmpackc.low %vm1118_vm14, %vm1117_vm13 }
  0x1e   : > { %1773 = vmatprep.subr.bf16.mxu1 %v1939_v25 }
  0x20   : > { %1734 = vmatpush3.bf16.msra.mxu0 %v1940_v26 }
  0x21   : > { %1774 = vmatpush3.bf16.msra.mxu1 %v1941_v27  ;;  %1735 = vmatprep.subr.bf16.mxu0 %v1942_v28 }
  0x22   : > { %1775 = vmatprep.subr.bf16.mxu1 %v1943_v29  ;;  %v1983_v61 = vpop.eup %1982 }
  0x23   : > { %v952_v63 = vadd.f32 1.0, %v1983_v61 }
  0x24   : > { %1736 = vmatpush3.bf16.msra.mxu0 %v1944_v30 }
  0x25   : > { %1776 = vmatpush3.bf16.msra.mxu1 %v1945_v31  ;;  %1828 = vmatprep.subr.bf16.mxu0 %v1952_v37  ;;  %1984 = vrcp.f32 %v952_v63 }
  0x26   : > { %1844 = vmatprep.subr.bf16.mxu1 %v2028_v36 }
  0x27   : > { %786 = vmatmul.mubr.bf16.vlgmr.msra.gmra.mrb[0].mxu0 %v1946_v32 }
  0x28   : > { %851 = vmatmul.mubr.bf16.vlgmr.msra.gmra.mrb[0].mxu1 %v1949_v34  ;;  %1829 = vmatpush3.bf16.msra.mxu0 %v1952_v37 }
  0x29   : > { %1845 = vmatpush3.bf16.msra.mxu1 %v1953_v38  ;;  %793 = vmatprep.mubr.bf16.mxu0 %v1954_v39 }
  0x2a   : > { %1846 = vmatprep.subr.bf16.mxu1 %v2028_v36  ;;  %858 = vmatprep.mubr.bf16.mxu1 %v1956_v40 }
  0x2b   : > { %1830 = vmatprep.subr.bf16.mxu0 %v1960_v43 }
  0x2c   : > { %1831 = vmatpush3.bf16.msra.mxu0 %v1960_v43 }
  0x2d   : > { %1847 = vmatpush3.bf16.msra.mxu1 %v1961_v44  ;;  %1832 = vmatprep.subr.bf16.mxu0 %v1968_v47 }
  0x2e   : > { %1848 = vmatprep.subr.bf16.mxu1 %v2028_v36 }
  0x2f   : > { %794 = vmatmul.mubr.bf16.gmra.mrb[4].mxu0 %v1958_v41  ;;  %v1985_v1 = vpop.eup %1984 }
  0x30   : > { %859 = vmatmul.mubr.bf16.gmra.mrb[4].mxu1 %v1959_v42  ;;  %801 = vmatprep.mubr.bf16.mxu0 %v1962_v45  ;;  %v955_v2 = vmul.f32 %v1985_v1, %v948_v55 }
  0x31   : > { %866 = vmatprep.mubr.bf16.mxu1 %v1964_v46  ;;  %1833 = vmatpush3.bf16.msra.mxu0 %v1968_v47 }
  0x32   : > { %1849 = vmatpush3.bf16.msra.mxu1 %v1969_v48  ;;  %1834 = vmatprep.subr.bf16.mxu0 %v1976_v53  ;;  %v956_v3 = vpack.c.bf16 %v955_v2, %v955_v2 }
  0x33   : > { %1850 = vmatprep.subr.bf16.mxu1 %v2028_v36 }
  0x35   : > { %1835 = vmatpush3.bf16.msra.mxu0 %v1976_v53 }
  0x36   : > { %1851 = vmatpush3.bf16.msra.mxu1 %v1977_v54  ;;  %1894 = vmatprep.subr.bf16.mxu0 %v2030_v10 }
  0x37   : > { %802 = vmatmul.mubr.bf16.gmra.mrb[8].mxu0 %v1966_v49  ;;  %1888 = vmatprep.subr.bf16.mxu1 %v2030_v10 }
  0x38   : > { %867 = vmatmul.mubr.bf16.gmra.mrb[8].mxu1 %v1967_v50  ;;  %809 = vmatprep.mubr.bf16.mxu0 %v1970_v51 }
  0x39   : > { %874 = vmatprep.mubr.bf16.mxu1 %v1972_v52 }
  0x3f   : > { %810 = vmatmul.mubr.bf16.gmra.mrb[12].mxu0 %v1974_v57 }
  0x40   : > { %875 = vmatmul.mubr.bf16.gmra.mrb[12].mxu1 %v1975_v58  ;;  %1836 = vmatprep.mubr.msk.bf16.mxu0 %vm740_vm0, %v1978_v59 }
  0x41   : > { %1852 = vmatprep.mubr.msk.bf16.mxu1 %vm2029_vm1, %v2028_v36 }
  0x47   : > { %1837 = vmatmul.mubr.msk.bf16.vlgmr.msra.gmra.mrb[16].mxu0 %vm740_vm0, %v1979_v60 }
  0x48   : > { %1840 = vmatprep.mubr.msk.bf16.mxu0 %vm740_vm0, %v1980_v62  ;;  %1853 = vmatmul.mubr.msk.bf16.vlgmr.msra.gmra.mrb[16].mxu1 %vm740_vm0, %v956_v3 }
  0x49   : > { %1864 = vmatprep.mubr.msk.f32.mxu1 %vm2029_vm1, %v2028_v36  ;;  %1896 = vmatpush3.bf16.msk.msra.mxu0 %vm1889_vm8, %v2031_v13 }
  0x4a   : > { %1890 = vmatpush3.bf16.msk.msra.mxu1 %vm1889_vm8, %v2031_v13  ;;  %1897 = vmatprep.subr.bf16.mxu0 %v2030_v10 }
  0x4b   : > { %1891 = vmatprep.subr.bf16.mxu1 %v2030_v10 }
  0x4d   : > { %1899 = vmatpush3.bf16.msk.msra.mxu0 %vm1892_vm15, %v2031_v13 }
  0x4e   : > { %1893 = vmatpush3.bf16.msk.msra.mxu1 %vm1892_vm15, %v2031_v13 }
  0x4f   : > { %1841 = vmatmul.mubr.msk.bf16.gmra.mrb[20].mxu0 %vm740_vm0, %v1981_v0  ;;  %1878 = vmatprep.subr.mxu1 %v2028_v36  ;;  %vm1047_vm0 = vcmask 261120  }
  0x50   : > { %1875 = vmatprep.mubr.msk.f32.mxu0 %vm2029_vm1, %v2028_v36 }
  0xfa   : > { %v1737_v14 = vpop.f32.mrb[0].mxu0 }
  0xfb   : > { %v1777_v15 = vpop.f32.mrb[0].mxu1  ;;  %v1738_v17 = vpop.f32.mrb[1].mxu0 }
  0xfc   : > { %v1739_v18 = vadd.f32 %v1738_v17, %v1737_v14  ;;  %v1778_v19 = vpop.f32.mrb[1].mxu1  ;;  %v1740_v20 = vpop.f32.mrb[2].mxu0 }
  0xfd   : > { %v1779_v21 = vadd.f32 %v1778_v19, %v1777_v15  ;;  %v1780_v22 = vpop.f32.mrb[2].mxu1  ;;  %v1741_v23 = vpop.f32.mrb[3].mxu0 }
  0xfe   : > { %v788_v24 = vadd.f32 %v1739_v18, %v1622_v16  ;;  %v1742_v25 = vadd.f32 %v1741_v23, %v1740_v20  ;;  %v1781_v26 = vpop.f32.mrb[3].mxu1 }
  0xff   : > { %v1782_v27 = vadd.f32 %v1781_v26, %v1780_v22 }
 0x100   : > { %v791_v28 = vadd.f32 %v1742_v25, %v1622_v16  ;;  %v853_v29 = vadd.f32 %v1779_v21, %v788_v24 }
 0x102   : > { %v1743_v30 = vpop.f32.mrb[4].mxu0  ;;  %v856_v31 = vadd.f32 %v1782_v27, %v791_v28 }
 0x103   : > { %v1783_v32 = vpop.f32.mrb[4].mxu1  ;;  %v1744_v33 = vpop.f32.mrb[5].mxu0 }
 0x104   : > { %v1745_v34 = vadd.f32 %v1744_v33, %v1743_v30  ;;  %v1784_v35 = vpop.f32.mrb[5].mxu1  ;;  %v1746_v37 = vpop.f32.mrb[6].mxu0 }
 0x105   : > { %v1785_v38 = vadd.f32 %v1784_v35, %v1783_v32  ;;  %v1786_v39 = vpop.f32.mrb[6].mxu1  ;;  %v1747_v40 = vpop.f32.mrb[7].mxu0 }
 0x106   : > { %v796_v41 = vadd.f32 %v1745_v34, %v1622_v16  ;;  %v1748_v42 = vadd.f32 %v1747_v40, %v1746_v37  ;;  %v1787_v43 = vpop.f32.mrb[7].mxu1 }
 0x107   : > { %v1788_v44 = vadd.f32 %v1787_v43, %v1786_v39 }
 0x108   : > { %v799_v45 = vadd.f32 %v1748_v42, %v1622_v16  ;;  %v861_v46 = vadd.f32 %v1785_v38, %v796_v41  ;;  %v2275_v38 = vsub.s32 0, %v2259_v6 }
 0x10a   : > { %v1749_v47 = vpop.f32.mrb[8].mxu0  ;;  %v864_v48 = vadd.f32 %v1788_v44, %v799_v45 }
 0x10b   : > { %v1789_v49 = vpop.f32.mrb[8].mxu1  ;;  %v1750_v50 = vpop.f32.mrb[9].mxu0 }
 0x10c   : > { %v1751_v51 = vadd.f32 %v1750_v50, %v1749_v47  ;;  %v1790_v52 = vpop.f32.mrb[9].mxu1  ;;  %v1752_v53 = vpop.f32.mrb[10].mxu0 }
 0x10d   : > { %v1791_v54 = vadd.f32 %v1790_v52, %v1789_v49  ;;  %v1792_v55 = vpop.f32.mrb[10].mxu1  ;;  %v1753_v56 = vpop.f32.mrb[11].mxu0 }
 0x10e   : > { %v804_v57 = vadd.f32 %v1751_v51, %v1622_v16  ;;  %v1754_v58 = vadd.f32 %v1753_v56, %v1752_v53  ;;  %v1793_v59 = vpop.f32.mrb[11].mxu1 }
 0x10f   : > { %v1794_v60 = vadd.f32 %v1793_v59, %v1792_v55 }
 0x110   : > { %v807_v61 = vadd.f32 %v1754_v58, %v1622_v16  ;;  %v869_v62 = vadd.f32 %v1791_v54, %v804_v57 }
 0x112   : > { %v1755_v63 = vpop.f32.mrb[12].mxu0  ;;  %v872_v0 = vadd.f32 %v1794_v60, %v807_v61 }
 0x113   : > { %v1795_v1 = vpop.f32.mrb[12].mxu1  ;;  %v1756_v2 = vpop.f32.mrb[13].mxu0 }
 0x114   : > { %v1757_v3 = vadd.f32 %v1756_v2, %v1755_v63  ;;  %v1796_v4 = vpop.f32.mrb[13].mxu1  ;;  %v1758_v7 = vpop.f32.mrb[14].mxu0 }
 0x115   : > { %v1797_v8 = vadd.f32 %v1796_v4, %v1795_v1  ;;  %v1798_v9 = vpop.f32.mrb[14].mxu1  ;;  %v1759_v10 = vpop.f32.mrb[15].mxu0 }
 0x116   : > { %v812_v11 = vadd.f32 %v1757_v3, %v1622_v16  ;;  %v1760_v12 = vadd.f32 %v1759_v10, %v1758_v7  ;;  %v1799_v13 = vpop.f32.mrb[15].mxu1 }
 0x117   : > { %v1800_v14 = vadd.f32 %v1799_v13, %v1798_v9 }
 0x118   : > { %v815_v15 = vadd.f32 %v1760_v12, %v1622_v16  ;;  %v877_v17 = vadd.f32 %v1797_v8, %v812_v11  ;;  %v965_v16 = vld [vmem:[%s2380_s5] sm:$0x1] }
 0x11a   : > { %v1838_v18 = vpop.f32.mrb[16].mxu0  ;;  %v880_v19 = vadd.f32 %v1800_v14, %v815_v15 }
 0x11b   : > { %v926_v20 = vadd.f32 %v1838_v18, %v861_v46  ;;  %v917_v21 = vpop.f32.mrb[17].mxu0 }
 0x11c   : > { %v918_v22 = vadd.f32 %v917_v21, %v853_v29  ;;  %v1839_v23 = vpop.f32.mrb[18].mxu0  ;;  %v1027_v29 = vpop.f32.mrb[16].mxu1 }
 0x11d   : > { %v929_v24 = vadd.f32 %v1839_v23, %v864_v48  ;;  %v920_v25 = vpop.f32.mrb[19].mxu0  ;;  %v1028_v39 = vadd.f32 %v1027_v29, %v965_v16  ;;  %v1854_v40 = vpop.f32.mrb[17].mxu1 }
 0x11e   : > { %v921_v26 = vadd.f32 %v920_v25, %v856_v31  ;;  %v1030_v41 = vpop.f32.mrb[18].mxu1 }
 0x11f   : > { %v1036_v31 = vrot.slane %v1028_v39, %v2275_v38  ;;  %v1855_v42 = vpop.f32.mrb[19].mxu1 }
 0x121   : > { %v2278_v43 = vadd.f32 %v1036_v31, %v918_v22  ;;  %v2280_v44 = vadd.f32 %v1036_v31, %v929_v24  ;;  %v2282_v45 = vadd.f32 %v1036_v31, %v921_v26  ;;  %v2284_v46 = vadd.f32 %v1036_v31, %v926_v20 }
 0x122   : > { %v1842_v27 = vpop.f32.mrb[20].mxu0 }
 0x123   : > { %v942_v28 = vadd.f32 %v1842_v27, %v877_v17  ;;  %v933_v30 = vpop.f32.mrb[21].mxu0  ;;  %v1048_v51 = vsel %vm1047_vm0, %v2278_v43, 0.0  ;;  %v1069_v52 = vmul.f32 %v2278_v43, %v2278_v43  ;;  %v1049_v53 = vsel %vm1047_vm0, %v2282_v45, 0.0 }
 0x124   : > { %v934_v32 = vadd.f32 %v933_v30, %v869_v62  ;;  %v1843_v33 = vpop.f32.mrb[22].mxu0  ;;  %v1070_v54 = vmul.f32 %v2282_v45, %v2282_v45  ;;  %v1071_v55 = vmul.f32 %v2284_v46, %v2284_v46  ;;  %v1050_v57 = vadd.f32 %v1049_v53, %v1048_v51 }
 0x125   : > { %v945_v34 = vadd.f32 %v1843_v33, %v880_v19  ;;  %v936_v35 = vpop.f32.mrb[23].mxu0  ;;  %v2286_v47 = vadd.f32 %v1036_v31, %v942_v28  ;;  %v1077_v56 = vsel %vm1047_vm0, %v1069_v52, 0.0  ;;  %v1072_v58 = vmul.f32 %v2280_v44, %v2280_v44 }
 0x126   : > { %v937_v37 = vadd.f32 %v936_v35, %v872_v0  ;;  %v2288_v48 = vadd.f32 %v1036_v31, %v934_v32  ;;  %v1051_v59 = vsel %vm1047_vm0, %v2284_v46, 0.0  ;;  %v1078_v60 = vsel %vm1047_vm0, %v1070_v54, 0.0 }
 0x127   : > { %v2290_v49 = vadd.f32 %v1036_v31, %v945_v34  ;;  %v1052_v61 = vadd.f32 %v1051_v59, %v1050_v57  ;;  %v1079_v62 = vadd.f32 %v1078_v60, %v1077_v56  ;;  %v1053_v0 = vsel %vm1047_vm0, %v2280_v44, 0.0 }
 0x128   : > { %v2292_v50 = vadd.f32 %v1036_v31, %v937_v37  ;;  %v1073_v63 = vmul.f32 %v2288_v48, %v2288_v48  ;;  %v1080_v1 = vsel %vm1047_vm0, %v1071_v55, 0.0  ;;  %v1055_v2 = vsel %vm1047_vm0, %v2288_v48, 0.0 }
 0x129   : > { %v1081_v4 = vadd.f32 %v1080_v1, %v1079_v62  ;;  %v1054_v7 = vadd.f32 %v1053_v0, %v1052_v61  ;;  %v1082_v8 = vsel %vm1047_vm0, %v1072_v58, 0.0  ;;  %v1075_v13 = vmul.f32 %v2286_v47, %v2286_v47 }
 0x12a   : > { %v1074_v3 = vmul.f32 %v2292_v50, %v2292_v50  ;;  %v1084_v9 = vsel %vm1047_vm0, %v1073_v63, 0.0  ;;  %v1057_v10 = vsel %vm1047_vm0, %v2292_v50, 0.0  ;;  %v1059_v18 = vsel %vm1047_vm0, %v2286_v47, 0.0 }
 0x12b   : > { %v1056_v11 = vadd.f32 %v1055_v2, %v1054_v7  ;;  %v1083_v12 = vadd.f32 %v1082_v8, %v1081_v4  ;;  %v1076_v19 = vmul.f32 %v2290_v49, %v2290_v49  ;;  %v1088_v22 = vsel %vm1047_vm0, %v1075_v13, 0.0 }
 0x12c   : > { %v1086_v14 = vsel %vm1047_vm0, %v1074_v3, 0.0  ;;  %v1061_v23 = vsel %vm1047_vm0, %v2290_v49, 0.0  ;;  %v1127_v31 = vmul.u32 4, %v2259_v6  ;;  %v2032_v51 = vmov 1.0  }
 0x12d   : > { %v1085_v15 = vadd.f32 %v1084_v9, %v1083_v12  ;;  %v1058_v17 = vadd.f32 %v1057_v10, %v1056_v11  ;;  %v1090_v26 = vsel %vm1047_vm0, %v1076_v19, 0.0 }
 0x12e   : > { %v1129_v42 = vadd.s32 4, %v1127_v31  ;;  %vm1128_vm2 = vcmp.ge.s32.totalorder %v2257_v5, %v1127_v31 }
 0x12f   : > { %v1060_v20 = vadd.f32 %v1059_v18, %v1058_v17  ;;  %v1087_v21 = vadd.f32 %v1086_v14, %v1085_v15 }
 0x130   : > { %vm1130_vm3 = vcmp.lt.s32.totalorder %v2257_v5, %v1129_v42 }
 0x131   : > { %v1062_v24 = vadd.f32 %v1061_v23, %v1060_v20  ;;  %v1089_v25 = vadd.f32 %v1088_v22, %v1087_v21  ;;  %vm1131_vm4 = vmand %vm1128_vm2, %vm1130_vm3 }
 0x133   : > { %v1063_v27 = vrot.slane %v1062_v24, 4  ;;  %v1091_v28 = vadd.f32 %v1090_v26, %v1089_v25 }
 0x135   : > { %v1064_v30 = vadd.f32 %v1063_v27, %v1062_v24  ;;  %v1092_v32 = vrot.slane %v1091_v28, 4 }
 0x137   : > { %v1093_v33 = vadd.f32 %v1092_v32, %v1091_v28  ;;  %v1065_v34 = vrot.slane %v1064_v30, 2 }
 0x139   : > { %v1094_v35 = vrot.slane %v1093_v33, 2  ;;  %v1066_v37 = vadd.f32 %v1065_v34, %v1064_v30 }
 0x13b   : > { %v1095_v16 = vadd.f32 %v1094_v35, %v1093_v33  ;;  %v1067_v29 = vrot.slane %v1066_v37, 1 }
 0x13d   : > { %v1068_v39 = vadd.f32 %v1067_v29, %v1066_v37  ;;  %v1096_v40 = vrot.slane %v1095_v16, 1 }
 0x13f   : > { %1865 = vmatmul.mubr.msk.f32.vlgmr.msra.gmra.mrb[20].mxu1 %vm1047_vm0, %v1068_v39  ;;  %v1097_v41 = vadd.f32 %v1096_v40, %v1095_v16 }
 0x140   : > { %1880 = vmatprep.mubr.msk.f32.mxu1 %vm2029_vm1, %v2028_v36  ;;  %1879 = vmatpush3.msk.msra.mxu1 %vm1131_vm4, %v2032_v51 }
 0x141   : > { %1876 = vmatmul.mubr.msk.f32.vlgmr.msra.gmra.mrb[24].mxu0 %vm1047_vm0, %v1097_v41  ;;  %1883 = vmatprep.subr.mxu1 %v2028_v36 }
 0x212   : > { %v1203_v52 = vpop.f32.mrb[20].mxu1 }
 0x213   : > { %v1208_v53 = vmul.f32 0.00390625, %v1203_v52  ;;  %v1866_v54 = vpop.f32.mrb[21].mxu1 }
 0x214   : > { %v1278_v55 = vpop.f32.mrb[24].mxu0 }
 0x215   : > { %v1283_v56 = vmul.f32 %v1208_v53, %v1208_v53  ;;  %v1282_v57 = vmul.f32 0.00390625, %v1278_v55  ;;  %v1877_v58 = vpop.f32.mrb[25].mxu0  ;;  %1881 = vmatmul.mubr.msk.f32.vlgmr.msra.gmra.mrb[22].mxu1 %vm1286_vm5, %v1208_v53 }
 0x216   : > { %1884 = vmatpush3.msk.msra.mxu1 %vm1131_vm4, %v2032_v51  ;;  %1885 = vmatprep.mubr.msk.f32.mxu1 %vm2029_vm1, %v2028_v36 }
 0x217   : > { %v1284_v6 = vsub.f32 %v1282_v57, %v1283_v56 }
 0x219   : > { %v1285_v5 = vmax.f32 %v1284_v6, 0.0 }
 0x21b   : > { %1886 = vmatmul.mubr.msk.f32.vlgmr.msra.gmra.mrb[24].mxu1 %vm1286_vm5, %v1285_v5 }
 0x2e8   : > { %v1356_v59 = vpop.f32.mrb[22].mxu1 }
 0x2e9   : > { %v1882_v60 = vpop.f32.mrb[23].mxu1  ;;  %v1363_v0 = vrot.slane %v1356_v59, %v2275_v38 }
 0x2eb   : > { %v1364_v2 = vsub.f32 %v2278_v43, %v1363_v0  ;;  %v1365_v3 = vsub.f32 %v2282_v45, %v1363_v0  ;;  %v1366_v4 = vsub.f32 %v2284_v46, %v1363_v0  ;;  %v1367_v36 = vsub.f32 %v2280_v44, %v1363_v0  ;;  %v1708_v43 = vld [vmem:[%s2381_s6] ss:$0 sm:$0xff] }
 0x2ec   : > { %v1368_v8 = vsub.f32 %v2288_v48, %v1363_v0  ;;  %v1369_v9 = vsub.f32 %v2292_v50, %v1363_v0  ;;  %v1370_v10 = vsub.f32 %v2286_v47, %v1363_v0  ;;  %v1371_v11 = vsub.f32 %v2290_v49, %v1363_v0 }
 0x2ee   : > { %v1441_v61 = vpop.f32.mrb[24].mxu1 }
 0x2ef   : > { %v1442_v62 = vadd.f32 1e-06, %v1441_v61  ;;  %v1887_v63 = vpop.f32.mrb[25].mxu1 }
 0x2f1   : > { %1986 = vrsqrt.f32 %v1442_v62 }
 0x2fb   : > { %v1987_v1 = vpop.eup %1986 }
 0x2fc   : > { %v1449_v7 = vrot.slane %v1987_v1, %v2275_v38  ;;  %v1709_v38 = vld [vmem:[%s2382_s7] ss:$0 sm:$0xff] }
 0x2fe   : > { %v1450_v12 = vmul.f32 %v1449_v7, %v1364_v2  ;;  %v1451_v45 = vmul.f32 %v1449_v7, %v1365_v3  ;;  %v1452_v13 = vmul.f32 %v1449_v7, %v1366_v4  ;;  %v1453_v46 = vmul.f32 %v1449_v7, %v1367_v36 }
 0x2ff   : > { %v1454_v44 = vmul.f32 %v1449_v7, %v1368_v8  ;;  %v1455_v48 = vmul.f32 %v1449_v7, %v1369_v9  ;;  %v1456_v14 = vmul.f32 %v1449_v7, %v1370_v10  ;;  %v1457_v50 = vmul.f32 %v1449_v7, %v1371_v11 }
 0x300   : > { %v1464_v15 = vmul.f32 %v1708_v43, %v1450_v12  ;;  %v1465_v47 = vmul.f32 %v1708_v43, %v1451_v45  ;;  %v1466_v17 = vmul.f32 %v1708_v43, %v1452_v13  ;;  %v1467_v49 = vmul.f32 %v1708_v43, %v1453_v46 }
 0x301   : > { %v1468_v18 = vmul.f32 %v1708_v43, %v1454_v44  ;;  %v1469_v19 = vmul.f32 %v1708_v43, %v1455_v48  ;;  %v1470_v20 = vmul.f32 %v1708_v43, %v1456_v14  ;;  %v1471_v21 = vmul.f32 %v1708_v43, %v1457_v50 }
 0x302   : > { %v1478_v22 = vadd.f32 %v1709_v38, %v1464_v15  ;;  %v1479_v23 = vadd.f32 %v1709_v38, %v1465_v47  ;;  %v1480_v24 = vadd.f32 %v1709_v38, %v1466_v17  ;;  %v1481_v25 = vadd.f32 %v1709_v38, %v1467_v49 }
 0x303   : > { %v1482_v26 = vadd.f32 %v1709_v38, %v1468_v18  ;;  %v1483_v27 = vadd.f32 %v1709_v38, %v1469_v19  ;;  %v1484_v28 = vadd.f32 %v1709_v38, %v1470_v20  ;;  %v1485_v34 = vadd.f32 %v1709_v38, %v1471_v21 }
 0x304   : > { %v1710_v30 = vmul.f32 -1.442695, %v1478_v22  ;;  %v1711_v32 = vmul.f32 -1.442695, %v1479_v23  ;;  %v1712_v33 = vmul.f32 -1.442695, %v1480_v24 }
 0x305   : > { %v1713_v35 = vmul.f32 -1.442695, %v1481_v25  ;;  %v1714_v37 = vmul.f32 -1.442695, %v1482_v26  ;;  %v1715_v16 = vmul.f32 -1.442695, %v1483_v27 }
 0x306   : > { %1988 = vpow2.f32 %v1710_v30  ;;  %v1716_v29 = vmul.f32 -1.442695, %v1484_v28  ;;  %v1717_v39 = vmul.f32 -1.442695, %v1485_v34 }
 0x307   : > { %1990 = vpow2.f32 %v1711_v32 }
 0x308   : > { %1992 = vpow2.f32 %v1712_v33 }
 0x309   : > { %1994 = vpow2.f32 %v1713_v35 }
 0x30a   : > { %1996 = vpow2.f32 %v1714_v37 }
 0x30b   : > { %1998 = vpow2.f32 %v1715_v16 }
 0x30c   : > { %2000 = vpow2.f32 %v1716_v29 }
 0x30d   : > { %2002 = vpow2.f32 %v1717_v39 }
 0x310   : > { %v1989_v40 = vpop.eup %1988 }
 0x311   : > { %v1991_v41 = vpop.eup %1990  ;;  %v1510_v31 = vadd.f32 1.0, %v1989_v40 }
 0x312   : > { %v1993_v42 = vpop.eup %1992  ;;  %v1511_v51 = vadd.f32 1.0, %v1991_v41 }
 0x313   : > { %v1995_v52 = vpop.eup %1994  ;;  %v1512_v53 = vadd.f32 1.0, %v1993_v42  ;;  %2004 = vrcp.f32 %v1510_v31 }
 0x314   : > { %v1997_v54 = vpop.eup %1996  ;;  %v1513_v55 = vadd.f32 1.0, %v1995_v52  ;;  %2006 = vrcp.f32 %v1511_v51 }
 0x315   : > { %v1999_v56 = vpop.eup %1998  ;;  %v1514_v57 = vadd.f32 1.0, %v1997_v54  ;;  %2008 = vrcp.f32 %v1512_v53 }
 0x316   : > { %v2001_v58 = vpop.eup %2000  ;;  %v1515_v6 = vadd.f32 1.0, %v1999_v56  ;;  %2010 = vrcp.f32 %v1513_v55 }
 0x317   : > { %v2003_v5 = vpop.eup %2002  ;;  %v1516_v59 = vadd.f32 1.0, %v2001_v58  ;;  %2012 = vrcp.f32 %v1514_v57 }
 0x318   : > { %v1517_v60 = vadd.f32 1.0, %v2003_v5  ;;  %2014 = vrcp.f32 %v1515_v6 }
 0x319   : > { %2016 = vrcp.f32 %v1516_v59 }
 0x31a   : > { %2018 = vrcp.f32 %v1517_v60 }
 0x31d   : > { %v2005_v61 = vpop.eup %2004 }
 0x31e   : > { %v2007_v62 = vpop.eup %2006  ;;  %v1534_v63 = vmul.f32 %v2005_v61, %v1478_v22 }
 0x31f   : > { %v2009_v0 = vpop.eup %2008  ;;  %v1535_v1 = vmul.f32 %v2007_v62, %v1479_v23 }
 0x320   : > { %v2011_v2 = vpop.eup %2010  ;;  %v1536_v3 = vmul.f32 %v2009_v0, %v1480_v24  ;;  %1542 = vst.msk [vmem:[%s319_s25] sm:$0xff] %vm1047_vm0, %v1534_v63 }
 0x321   : > { %v2013_v4 = vpop.eup %2012  ;;  %v1537_v36 = vmul.f32 %v2011_v2, %v1481_v25  ;;  %1543 = vst.msk [vmem:[%s319_s25 + $0x8] sm:$0xff] %vm1047_vm0, %v1535_v1 }
 0x322   : > { %v2015_v7 = vpop.eup %2014  ;;  %v1538_v8 = vmul.f32 %v2013_v4, %v1482_v26  ;;  %1544 = vst.msk [vmem:[%s319_s25 + $0x10] sm:$0xff] %vm1047_vm0, %v1536_v3 }
 0x323   : > { %v2017_v9 = vpop.eup %2016  ;;  %v1539_v10 = vmul.f32 %v2015_v7, %v1483_v27  ;;  %1545 = vst.msk [vmem:[%s319_s25 + $0x18] sm:$0xff] %vm1047_vm0, %v1537_v36 }
 0x324   : > { %v2019_v11 = vpop.eup %2018  ;;  %v1540_v43 = vmul.f32 %v2017_v9, %v1484_v28  ;;  %1546 = vst.msk [vmem:[%s319_s25 + $0x20] sm:$0xff] %vm1047_vm0, %v1538_v8 }
 0x325   : > { %v1541_v12 = vmul.f32 %v2019_v11, %v1485_v34  ;;  %1547 = vst.msk [vmem:[%s319_s25 + $0x28] sm:$0xff] %vm1047_vm0, %v1539_v10 }
 0x326   : > { %1548 = vst.msk [vmem:[%s319_s25 + $0x30] sm:$0xff] %vm1047_vm0, %v1540_v43 }
 0x327   : > { %1549 = vst.msk [vmem:[%s319_s25 + $0x38] sm:$0xff] %vm1047_vm0, %v1541_v12 }
 0x328 PF: > { %s18_s27 = sadd.s32 1, %s2026_s27  }
 0x329   : > { %p15_p4 = scmp.ge.s32.totalorder %s18_s27, 4  }
 0x32b   :  { %17 = sbr.rel (!%p15_p4) target bundleno = 1 (0x1), region = 85 }

// kernel: cross_attn_up_block.9
= control target key start
LH: loop header
LB: loop body
LE: loop exit
PB: predicated region body
PF: predicated region fallthrough
CT: control target
= control target key end

     0   :  { %s1133_s21 = smov 0   ;;  %s1270_s0 = inlined_call_operand.vmem [shape: bf16[2,64,288], index: 0, kind: input, shape index: {}]   ;;  %s1271_s1 = inlined_call_operand.vmem [shape: bf16[288,32], index: 1, kind: input, shape index: {}]   ;;  %s1272_s2 = inlined_call_operand.vmem [shape: f32[1,32], index: 2, kind: input, shape index: {}]   ;;  %s1273_s3 = inlined_call_operand.vmem [shape: bf16[2,64,64], index: 3, kind: input, shape index: {}]   ;;  %s1274_s4 = inlined_call_operand.vmem [shape: bf16[64,32], index: 4, kind: input, shape index: {}]   ;;  %s1275_s5 = inlined_call_operand.vmem [shape: f32[1,32], index: 5, kind: input, shape index: {}]   ;;  %s1276_s6 = inlined_call_operand.vmem [shape: f32[2,64,32], index: 6, kind: output, shape index: {}]  }
   0x1 LB: > { %s871_s22 = sadd.s32 4294967295, %s1096_s21   ;;  %p875_p0 = scmp.ge.s32.totalorder %s1096_s21, 1  ;;  %s1096_s21 = sphi %s1133_s21, %s16_s21  }
   0x2   : > { %p222_p1 = scmp.lt.s32.totalorder %s1096_s21, 3 }
   0x4   : > { %p223_p2 = pnand %p875_p0, %p222_p1 }
   0x5   : > { %v1048_v0 = vld [vmem:[%s1271_s1 + $0x40] sm:$0xff] (!%p223_p2)   ;;  %p257_p3 = scmp.lt.s32.totalorder (!%p223_p2), %s871_s22, 1  ;;  %v1050_v2 = vld [vmem:[%s1271_s1 + $0x48] sm:$0xff] (!%p223_p2)   ;;  %v1052_v4 = vld [vmem:[%s1271_s1 + $0x50] sm:$0xff] (!%p223_p2)   ;;  %vm500_vm0 = vcmask (!%p223_p2), 261120   ;;  %vm710_vm1 = vcmask (!%p223_p2), 523264  }
   0x6   : > { %226 = sbr.rel (%p223_p2) target bundleno = 286 (0x11e), region = 44  ;;  %v1049_v1 = vld [vmem:[%s1271_s1] sm:$0xff] (!%p223_p2)   ;;  %933 = vmatprep.subr.bf16.mxu0 (!%p223_p2), %v1048_v0  ;;  %v1051_v3 = vld [vmem:[%s1271_s1 + $0x8] sm:$0xff] (!%p223_p2)   ;;  %v1053_v6 = vld [vmem:[%s1271_s1 + $0x10] sm:$0xff] (!%p223_p2)  }
   0x7   : > { %934 = vmatpush3.bf16.msra.mxu0 (!%p223_p2), %v1049_v1  ;;  %v1054_v5 = vld [vmem:[%s1271_s1 + $0x80] sm:$0xff] (!%p223_p2)   ;;  %v1055_v7 = vld [vmem:[%s1271_s1 + $0x58] sm:$0xff] (!%p223_p2)   ;;  %v1057_v8 = vld [vmem:[%s1271_s1 + $0x88] sm:$0xff] (!%p223_p2)  }
   0x8   : > { %935 = vmatprep.subr.bf16.mxu0 (!%p223_p2), %v1050_v2  ;;  %987 = vmatprep.subr.bf16.mxu1 (!%p223_p2), %v1054_v5  ;;  %v1056_v9 = vld [vmem:[%s1271_s1 + $0x18] sm:$0xff] (!%p223_p2)   ;;  %v1058_v10 = vld [vmem:[%s1271_s1 + $0x60] sm:$0xff] (!%p223_p2)   ;;  %v1063_v15 = vld [vmem:[%s1271_s1 + $0x68] sm:$0xff] (!%p223_p2)  }
   0x9   : > { %988 = vmatpush3.bf16.msra.mxu1 (!%p223_p2), %v1054_v5  ;;  %v1062_v13 = vld [vmem:[%s1274_s4] sm:$0xff] (!%p223_p2)   ;;  %v1065_v16 = vld [vmem:[%s1274_s4 + $0x8] sm:$0xff] (!%p223_p2)   ;;  %v1066_v18 = vld [vmem:[%s1271_s1 + $0x70] sm:$0xff] (!%p223_p2)  }
   0xa   : > { %989 = vmatprep.subr.bf16.mxu1 (!%p223_p2), %v1057_v8  ;;  %v1059_v14 = vld [vmem:[%s1271_s1 + $0x20] sm:$0xff] (!%p223_p2)   ;;  %v1064_v17 = vld [vmem:[%s1271_s1 + $0x28] sm:$0xff] (!%p223_p2)   ;;  %v1070_v21 = vld [vmem:[%s1274_s4 + $0x10] sm:$0xff] (!%p223_p2)  }
   0xb   : > { %936 = vmatpush3.bf16.msra.mxu0 (!%p223_p2), %v1051_v3  ;;  %v1067_v22 = vld [vmem:[%s1271_s1 + $0x30] sm:$0xff] (!%p223_p2)   ;;  %v1071_v23 = vld [vmem:[%s1271_s1 + $0x78] sm:$0xff] (!%p223_p2)   ;;  %v881_v42 = vld [vmem:[%s1272_s2] ss:$0 sm:$0xff] (!%p223_p2) }
   0xc   : > { %937 = vmatprep.subr.bf16.mxu0 (!%p223_p2), %v1052_v4  ;;  %v1072_v24 = vld [vmem:[%s1271_s1 + $0x38] sm:$0xff] (!%p223_p2)   ;;  %v916_v50 = vld [vmem:[%s1275_s5] ss:$0 sm:$0xff] (!%p223_p2) }
   0xd   : > { %s1278_s22 = smov (!%p257_p3, %s871_s22), 1  ;;  %990 = vmatpush3.bf16.msra.mxu1 %v1057_v8  ;;  %v1076_v26 = vld [vmem:[%s1274_s4 + $0x18] sm:$0xff]  }
   0xe   : > { %s1039_s9 = smul.u32 96, %s1278_s22  ;;  %999 = vmatprep.subr.bf16.mxu1 %v1062_v13  ;;  %s931_s17 = sshll.u32 %s1278_s22, 5 }
   0xf   : > { %938 = vmatpush3.bf16.msra.mxu0 %v1053_v6  ;;  %s266_s29 = scalar_lea.vmem %s1273_s3, %s931_s17  ;;  %s932_s10 = sshll.u32 %s1278_s22, 6 }
  0x10   : > { %s1174_s20 = scalar_lea.vmem %s1270_s0, %s1039_s9  ;;  %939 = vmatprep.subr.bf16.mxu0 %v1055_v7  ;;  %v1077_v27 = vld [vmem:[%s266_s29] sm:$0xff]   ;;  %v1078_v28 = vld [vmem:[%s266_s29 + $0x8] sm:$0xff]   ;;  %v1082_v31 = vld [vmem:[%s266_s29 + $0x10] sm:$0xff]   ;;  %s1249_s14 = scalar_lea.vmem %s1276_s6, %s932_s10 }
  0x11   : > { %v1060_v11 = vld [vmem:[%s1174_s20 + $0x8] ss:$12 sps:$4 sm:$0xff]   ;;  %v1061_v12 = vld [vmem:[%s1174_s20 + $0x20] ss:$12 sps:$4 sm:$0xff]   ;;  %v1068_v19 = vld [vmem:[%s1174_s20 + $0x38] ss:$12 sps:$4 sm:$0xff]  }
  0x12   : > { %991 = vmatprep.mubr.msk.bf16.mxu1 %vm500_vm0, %v1060_v11  ;;  %v1069_v20 = vld [vmem:[%s1174_s20 + $0x50] ss:$12 sps:$4 sm:$0xff]   ;;  %v1073_v29 = vld [vmem:[%s1174_s20] ss:$12 sps:$4 sm:$0xff]   ;;  %v1081_v33 = vld [vmem:[%s1174_s20 + $0x18] ss:$12 sps:$4 sm:$0xff]  }
  0x13   : > { %940 = vmatpush3.bf16.msra.mxu0 %v1056_v9  ;;  %992 = vmatmul.mubr.msk.bf16.vlgmr.msra.gmra.mrb[0].mxu1 %vm500_vm0, %v1061_v12  ;;  %v1075_v25 = vld [vmem:[%s1174_s20 + $0x4] ss:$12 sps:$4 sm:$0xff]   ;;  %v1079_v30 = vld [vmem:[%s1174_s20 + $0x1c] ss:$12 sps:$4 sm:$0xff]   ;;  %v1084_v34 = vld [vmem:[%s1174_s20 + $0x34] ss:$12 sps:$4 sm:$0xff]  }
  0x14   : > { %941 = vmatprep.subr.bf16.mxu0 %v1058_v10  ;;  %1000 = vmatpush3.bf16.msra.mxu1 %v1062_v13  ;;  %v1083_v32 = vld [vmem:[%s266_s29 + $0x18] sm:$0xff]   ;;  %v1089_v37 = vld [vmem:[%s1174_s20 + $0x48] ss:$12 sps:$4 sm:$0xff]  }
  0x15   : > { %1001 = vmatprep.subr.bf16.mxu1 %v1065_v16  ;;  %995 = vmatprep.mubr.msk.bf16.mxu1 %vm500_vm0, %v1068_v19  ;;  %v1086_v35 = vld [vmem:[%s1174_s20 + $0x30] ss:$12 sps:$4 sm:$0xff]   ;;  %v1087_v36 = vld [vmem:[%s1174_s20 + $0x4c] ss:$12 sps:$4 sm:$0xff]  }
  0x16   : > { %545 = vmatprep.mubr.bf16.mxu0 %v1075_v25 }
  0x17   : > { %942 = vmatpush3.bf16.msra.mxu0 %v1059_v14 }
  0x18   : > { %943 = vmatprep.subr.bf16.mxu0 %v1063_v15  ;;  %1002 = vmatpush3.bf16.msra.mxu1 %v1065_v16 }
  0x19   : > { %1003 = vmatprep.subr.bf16.mxu1 %v1070_v21 }
  0x1b   : > { %944 = vmatpush3.bf16.msra.mxu0 %v1064_v17  ;;  %996 = vmatmul.mubr.msk.bf16.gmra.mrb[4].mxu1 %vm500_vm0, %v1069_v20 }
  0x1c   : > { %945 = vmatprep.subr.bf16.mxu0 %v1066_v18  ;;  %1004 = vmatpush3.bf16.msra.mxu1 %v1070_v21 }
  0x1d   : > { %1005 = vmatprep.subr.bf16.mxu1 %v1076_v26  ;;  %1007 = vmatprep.mubr.msk.bf16.mxu1 %vm710_vm1, %v1077_v27 }
  0x1f   : > { %946 = vmatpush3.bf16.msra.mxu0 %v1067_v22 }
  0x20   : > { %947 = vmatprep.subr.bf16.mxu0 %v1071_v23  ;;  %1006 = vmatpush3.bf16.msra.mxu1 %v1076_v26 }
  0x23   : > { %948 = vmatpush3.bf16.msra.mxu0 %v1072_v24  ;;  %1008 = vmatmul.mubr.msk.bf16.vlgmr.msra.gmra.mrb[0].mxu1 %vm710_vm1, %v1078_v28 }
  0x24   : > { %1011 = vmatprep.mubr.msk.bf16.mxu1 %vm710_vm1, %v1082_v31 }
  0x26   : > { %546 = vmatmul.mubr.bf16.vlgmr.msra.gmra.mrb[0].mxu0 %v1073_v29 }
  0x27   : > { %553 = vmatprep.mubr.bf16.mxu0 %v1079_v30 }
  0x2b   : > { %1012 = vmatmul.mubr.msk.bf16.gmra.mrb[4].mxu1 %vm710_vm1, %v1083_v32 }
  0x2e   : > { %554 = vmatmul.mubr.bf16.gmra.mrb[4].mxu0 %v1081_v33 }
  0x2f   : > { %561 = vmatprep.mubr.bf16.mxu0 %v1084_v34 }
  0x36   : > { %562 = vmatmul.mubr.bf16.gmra.mrb[8].mxu0 %v1086_v35 }
  0x37   : > { %569 = vmatprep.mubr.bf16.mxu0 %v1087_v36 }
  0x3e   : > { %570 = vmatmul.mubr.bf16.gmra.mrb[12].mxu0 %v1089_v37 }
  0xf6   : > { %v1009_v38 = vpop.f32.mrb[0].mxu1 }
  0xf7   : > { %v757_v40 = vpop.f32.mrb[1].mxu1 }
  0xf8   : > { %v1010_v43 = vpop.f32.mrb[2].mxu1 }
  0xf9   : > { %v949_v39 = vpop.f32.mrb[0].mxu0  ;;  %v760_v46 = vpop.f32.mrb[3].mxu1 }
  0xfa   : > { %v950_v41 = vpop.f32.mrb[1].mxu0 }
  0xfb   : > { %v951_v44 = vadd.f32 %v950_v41, %v949_v39  ;;  %v952_v45 = vpop.f32.mrb[2].mxu0 }
  0xfc   : > { %v953_v47 = vpop.f32.mrb[3].mxu0 }
  0xfd   : > { %v954_v48 = vadd.f32 %v953_v47, %v952_v45  ;;  %v548_v49 = vadd.f32 %v951_v44, %v881_v42 }
  0xfe   : > { %v1013_v53 = vpop.f32.mrb[4].mxu1 }
  0xff   : > { %v551_v51 = vadd.f32 %v954_v48, %v881_v42  ;;  %v1017_v52 = vadd.f32 %v757_v40, %v548_v49  ;;  %v773_v57 = vpop.f32.mrb[5].mxu1 }
 0x100   : > { %v1014_v59 = vpop.f32.mrb[6].mxu1 }
 0x101   : > { %v1018_v54 = vadd.f32 %v1017_v52, %v916_v50  ;;  %v1021_v55 = vadd.f32 %v916_v50, %v551_v51  ;;  %v955_v56 = vpop.f32.mrb[4].mxu0  ;;  %v776_v63 = vpop.f32.mrb[7].mxu1 }
 0x102   : > { %v956_v58 = vpop.f32.mrb[5].mxu0 }
 0x103   : > { %796 = vst.msk [vmem:[%s1249_s14] sm:$0xff] %vm500_vm0, %v1018_v54  ;;  %v1022_v60 = vadd.f32 %v1021_v55, %v760_v46  ;;  %v957_v61 = vadd.f32 %v956_v58, %v955_v56  ;;  %v958_v62 = vpop.f32.mrb[6].mxu0 }
 0x104   : > { %v959_v0 = vpop.f32.mrb[7].mxu0 }
 0x105   : > { %797 = vst.msk [vmem:[%s1249_s14 + $0x8] sm:$0xff] %vm500_vm0, %v1022_v60  ;;  %v556_v1 = vadd.f32 %v957_v61, %v881_v42  ;;  %v960_v2 = vadd.f32 %v959_v0, %v958_v62 }
 0x107   : > { %v1015_v3 = vadd.f32 %v1009_v38, %v556_v1  ;;  %v559_v4 = vadd.f32 %v960_v2, %v881_v42 }
 0x109   : > { %v1016_v5 = vadd.f32 %v1015_v3, %v916_v50  ;;  %v1019_v6 = vadd.f32 %v916_v50, %v559_v4  ;;  %v961_v7 = vpop.f32.mrb[8].mxu0 }
 0x10a   : > { %v962_v8 = vpop.f32.mrb[9].mxu0 }
 0x10b   : > { %798 = vst.msk [vmem:[%s1249_s14 + $0x10] sm:$0xff] %vm500_vm0, %v1016_v5  ;;  %v1020_v9 = vadd.f32 %v1019_v6, %v1010_v43  ;;  %v963_v10 = vadd.f32 %v962_v8, %v961_v7  ;;  %v964_v11 = vpop.f32.mrb[10].mxu0 }
 0x10c   : > { %v965_v12 = vpop.f32.mrb[11].mxu0 }
 0x10d   : > { %799 = vst.msk [vmem:[%s1249_s14 + $0x18] sm:$0xff] %vm500_vm0, %v1020_v9  ;;  %v564_v13 = vadd.f32 %v963_v10, %v881_v42  ;;  %v966_v14 = vadd.f32 %v965_v12, %v964_v11 }
 0x10f   : > { %v1025_v15 = vadd.f32 %v916_v50, %v564_v13  ;;  %v567_v16 = vadd.f32 %v966_v14, %v881_v42 }
 0x111   : > { %v1026_v17 = vadd.f32 %v1025_v15, %v773_v57  ;;  %v1029_v18 = vadd.f32 %v916_v50, %v567_v16  ;;  %v967_v19 = vpop.f32.mrb[12].mxu0 }
 0x112   : > { %v968_v20 = vpop.f32.mrb[13].mxu0 }
 0x113   : > { %800 = vst.msk [vmem:[%s1249_s14 + $0x20] sm:$0xff] %vm500_vm0, %v1026_v17  ;;  %v1030_v21 = vadd.f32 %v1029_v18, %v776_v63  ;;  %v969_v22 = vadd.f32 %v968_v20, %v967_v19  ;;  %v970_v23 = vpop.f32.mrb[14].mxu0 }
 0x114   : > { %v971_v24 = vpop.f32.mrb[15].mxu0 }
 0x115   : > { %801 = vst.msk [vmem:[%s1249_s14 + $0x28] sm:$0xff] %vm500_vm0, %v1030_v21  ;;  %v572_v25 = vadd.f32 %v969_v22, %v881_v42  ;;  %v972_v26 = vadd.f32 %v971_v24, %v970_v23 }
 0x117   : > { %v1023_v27 = vadd.f32 %v916_v50, %v572_v25  ;;  %v575_v28 = vadd.f32 %v972_v26, %v881_v42 }
 0x119   : > { %v1024_v29 = vadd.f32 %v1023_v27, %v1013_v53  ;;  %v1027_v30 = vadd.f32 %v916_v50, %v575_v28 }
 0x11b   : > { %802 = vst.msk [vmem:[%s1249_s14 + $0x30] sm:$0xff] %vm500_vm0, %v1024_v29  ;;  %v1028_v31 = vadd.f32 %v1027_v30, %v1014_v59 }
 0x11d   : > { %803 = vst.msk [vmem:[%s1249_s14 + $0x38] sm:$0xff] %vm500_vm0, %v1028_v31 }
 0x11e PF: > { %s16_s21 = sadd.s32 1, %s1096_s21  }
 0x11f   : > { %p13_p4 = scmp.ge.s32.totalorder %s16_s21, 4  }
 0x121   :  { %15 = sbr.rel (!%p13_p4) target bundleno = 1 (0x1), region = 77 }

// kernel: cross_attn_up_block.10
= control target key start
LH: loop header
LB: loop body
LE: loop exit
PB: predicated region body
PF: predicated region fallthrough
CT: control target
= control target key end

     0   :  { %s3066_s21 = smov 0   ;;  %s3589_s0 = inlined_call_operand.vmem [shape: f32[2,64,32], index: 0, kind: input, shape index: {}]   ;;  %s3590_s1 = inlined_call_operand.vmem [shape: f32[1,32], index: 1, kind: input, shape index: {}]   ;;  %s3591_s2 = inlined_call_operand.vmem [shape: f32[1,32], index: 2, kind: input, shape index: {}]   ;;  %s3592_s3 = inlined_call_operand.vmem [shape: bf16[32,32], index: 3, kind: input, shape index: {}]   ;;  %s3593_s4 = inlined_call_operand.vmem [shape: f32[1,32], index: 4, kind: input, shape index: {}]   ;;  %s3594_s5 = inlined_call_operand.vmem [shape: f32[1,32], index: 5, kind: input, shape index: {}]   ;;  %s3595_s6 = inlined_call_operand.vmem [shape: f32[1,32], index: 6, kind: input, shape index: {}]   ;;  %s3596_s7 = inlined_call_operand.vmem [shape: bf16[2,32,16], index: 7, kind: input, shape index: {}]   ;;  %s3597_s8 = inlined_call_operand.vmem [shape: bf16[2,32,16], index: 8, kind: input, shape index: {}]   ;;  %s3598_s9 = inlined_call_operand.vmem [shape: bf16[2,32,16], index: 9, kind: input, shape index: {}]   ;;  %s3599_s10 = inlined_call_operand.vmem [shape: bf16[2,16,32], index: 10, kind: input, shape index: {}]   ;;  %s3600_s11 = inlined_call_operand.vmem [shape: f32[1,32], index: 11, kind: input, shape index: {}]   ;;  %s3601_s12 = inlined_call_operand.vmem [shape: f32[2,64,32], index: 12, kind: output, shape index: {}]  }
   0x1 LB: > { %s2431_s22 = sadd.s32 4294967295, %s2994_s21   ;;  %p2435_p0 = scmp.ge.s32.totalorder %s2994_s21, 1  ;;  %s2994_s21 = sphi %s3066_s21, %s22_s21  }
   0x2   : > { %p362_p1 = scmp.lt.s32.totalorder %s2994_s21, 3 }
   0x4   : > { %p363_p2 = pnand %p2435_p0, %p362_p1 }
   0x5   : > { %v476_v0 = vlaneseq (!%p363_p2)  ;;  %p404_p3 = scmp.lt.s32.totalorder (!%p363_p2), %s2431_s22, 1  ;;  %v2996_v1 = vmov (!%p363_p2), 0.0|0.0   ;;  %vm2997_vm0 = vmmov (!%p363_p2), 0   ;;  %v2998_v4 = vmov (!%p363_p2), 0.0  }
   0x6   : > { %366 = sbr.rel (%p363_p2) target bundleno = 3061 (0xbf5), region = 68  ;;  %2849 = vmatprep.subr.bf16.mxu0 (!%p363_p2), %v2996_v1  ;;  %2657 = vmatprep.mubr.msk.f32.mxu0 (!%p363_p2), %vm2997_vm0, %v2998_v4  ;;  %vm425_vm1 = vcmask (!%p363_p2), 261120   ;;  %v2999_v31 = vmov (!%p363_p2), 1.0|1.0  }
   0x7   : > { %v3075_v2 = vshrl.u32 (!%p363_p2), %v476_v0, 7  ;;  %v3077_v3 = vand.u32 (!%p363_p2), 127, %v476_v0  ;;  %2676 = vmatprep.subr.mxu1 (!%p363_p2), %v2998_v4  ;;  %2678 = vmatprep.mubr.msk.f32.mxu1 (!%p363_p2), %vm2997_vm0, %v2998_v4 }
   0x9   : > { %v478_v5 = vadd.s32 (!%p363_p2), 8, %v3075_v2  ;;  %v483_v6 = vmul.u32 (!%p363_p2), 4, %v3077_v3  ;;  %v479_v7 = vadd.s32 (!%p363_p2), 16, %v3075_v2  ;;  %v480_v8 = vadd.s32 (!%p363_p2), 24, %v3075_v2 }
   0xa   : > { %v505_v18 = vmul.u32 (!%p363_p2), 4, %v3075_v2 }
   0xb   : > { %vm484_vm2 = vcmp.ge.s32.totalorder (!%p363_p2), %v3075_v2, %v483_v6  ;;  %v488_v9 = vadd.s32 (!%p363_p2), 4, %v483_v6  ;;  %vm485_vm3 = vcmp.ge.s32.totalorder (!%p363_p2), %v478_v5, %v483_v6  ;;  %vm486_vm7 = vcmp.ge.s32.totalorder (!%p363_p2), %v479_v7, %v483_v6 }
   0xc   : > { %vm487_vm8 = vcmp.ge.s32.totalorder (!%p363_p2), %v480_v8, %v483_v6 }
   0xd   : > { %s3611_s22 = smov (!%p404_p3, %s2431_s22), 1  ;;  %vm489_vm4 = vcmp.lt.s32.totalorder %v3075_v2, %v488_v9  ;;  %vm490_vm5 = vcmp.lt.s32.totalorder %v478_v5, %v488_v9  ;;  %vm491_vm9 = vcmp.lt.s32.totalorder %v479_v7, %v488_v9  ;;  %vm492_vm11 = vcmp.lt.s32.totalorder %v480_v8, %v488_v9 }
   0xe   : > { %s2549_s23 = sshll.u32 %s3611_s22, 6  ;;  %vm3114_vm6 = vmand %vm484_vm2, %vm489_vm4  ;;  %vm506_vm2 = vcmp.ge.s32.totalorder %v3077_v3, %v505_v18 }
   0xf   : > { %s408_s26 = scalar_lea.vmem %s3589_s0, %s2549_s23  ;;  %vm3125_vm10 = vmand %vm485_vm3, %vm490_vm5  ;;  %vm664_vm5 = vcmask 64512   ;;  %s413_s28 = scalar_lea.vmem %s3601_s12, %s2549_s23 }
  0x10   : > { %v3097_v10 = vld [vmem:[%s408_s26] sm:$0xff]  ;;  %v3099_v11 = vld [vmem:[%s408_s26 + $0x8] sm:$0xff]  ;;  %v3101_v12 = vld [vmem:[%s408_s26 + $0x10] sm:$0xff] }
  0x11   : > { %v3103_v13 = vld [vmem:[%s408_s26 + $0x18] sm:$0xff]  ;;  %v426_v14 = vsel %vm425_vm1, %v3097_v10, 0.0  ;;  %v427_v15 = vsel %vm425_vm1, %v3099_v11, 0.0  ;;  %v3110_v16 = vld [vmem:[%s408_s26 + $0x20] sm:$0xff]  ;;  %v429_v17 = vsel %vm425_vm1, %v3101_v12, 0.0  ;;  %v3118_v19 = vld [vmem:[%s408_s26 + $0x28] sm:$0xff]  ;;  %v447_v25 = vmul.f32 %v3097_v10, %v3097_v10 }
  0x12   : > { %v3120_v20 = vld [vmem:[%s408_s26 + $0x30] sm:$0xff]  ;;  %v3122_v21 = vld [vmem:[%s408_s26 + $0x38] sm:$0xff]  ;;  %v428_v22 = vadd.f32 %v427_v15, %v426_v14  ;;  %v431_v24 = vsel %vm425_vm1, %v3103_v13, 0.0  ;;  %v448_v26 = vmul.f32 %v3099_v11, %v3099_v11  ;;  %vm2850_vm12 = vmpackc.low %vm3125_vm10, %vm3114_vm6  ;;  %v449_v28 = vmul.f32 %v3101_v12, %v3101_v12 }
  0x13   : > { %v450_v29 = vmul.f32 %v3103_v13, %v3103_v13  ;;  %v451_v30 = vmul.f32 %v3110_v16, %v3110_v16  ;;  %2851 = vmatpush3.bf16.msk.msra.mxu0 %vm2850_vm12, %v2999_v31  ;;  %vm3152_vm13 = vmand %vm486_vm7, %vm491_vm9  ;;  %v433_v33 = vsel %vm425_vm1, %v3110_v16, 0.0  ;;  %v455_v34 = vsel %vm425_vm1, %v447_v25, 0.0 }
  0x14   : > { %v430_v27 = vadd.f32 %v429_v17, %v428_v22  ;;  %2852 = vmatprep.subr.bf16.mxu0 %v2996_v1  ;;  %vm3162_vm14 = vmand %vm487_vm8, %vm492_vm11  ;;  %v456_v37 = vsel %vm425_vm1, %v448_v26, 0.0  ;;  %v458_v38 = vsel %vm425_vm1, %v449_v28, 0.0  ;;  %v435_v39 = vsel %vm425_vm1, %v3118_v19, 0.0 }
  0x15   : > { %vm2853_vm15 = vmpackc.low %vm3162_vm14, %vm3152_vm13  ;;  %v437_v40 = vsel %vm425_vm1, %v3120_v20, 0.0  ;;  %v439_v41 = vsel %vm425_vm1, %v3122_v21, 0.0  ;;  %v457_v42 = vadd.f32 %v456_v37, %v455_v34  ;;  %v452_v44 = vmul.f32 %v3118_v19, %v3118_v19 }
  0x16   : > { %v432_v36 = vadd.f32 %v431_v24, %v430_v27  ;;  %v460_v45 = vsel %vm425_vm1, %v450_v29, 0.0  ;;  %v462_v46 = vsel %vm425_vm1, %v451_v30, 0.0  ;;  %v453_v49 = vmul.f32 %v3120_v20, %v3120_v20 }
  0x17   : > { %2854 = vmatpush3.bf16.msk.msra.mxu0 %vm2853_vm15, %v2999_v31  ;;  %v459_v47 = vadd.f32 %v458_v38, %v457_v42  ;;  %v454_v52 = vmul.f32 %v3122_v21, %v3122_v21  ;;  %v464_v53 = vsel %vm425_vm1, %v452_v44, 0.0  ;;  %v507_v22 = vadd.s32 4, %v505_v18 }
  0x18   : > { %v434_v43 = vadd.f32 %v433_v33, %v432_v36  ;;  %2855 = vmatprep.subr.bf16.mxu0 %v2996_v1  ;;  %v466_v56 = vsel %vm425_vm1, %v453_v49, 0.0  ;;  %v740_v37 = vsub.s32 0, %v3075_v2  ;;  %vm1468_vm6 = vcmask 523264  }
  0x19   : > { %v461_v50 = vadd.f32 %v460_v45, %v459_v47  ;;  %v468_v59 = vsel %vm425_vm1, %v454_v52, 0.0  ;;  %vm508_vm3 = vcmp.lt.s32.totalorder %v3077_v3, %v507_v22  ;;  %v2890_v3 = vld [vmem:[%s3592_s3] sm:$0xff]  }
  0x1a   : > { %v436_v48 = vadd.f32 %v435_v39, %v434_v43  ;;  %vm509_vm4 = vmand %vm506_vm2, %vm508_vm3  ;;  %v2459_v45 = vld [vmem:[%s3590_s1] ss:$0 sm:$0xff] }
  0x1b   : > { %v463_v54 = vadd.f32 %v462_v46, %v461_v50 }
  0x1c   : > { %v438_v51 = vadd.f32 %v437_v40, %v436_v48 }
  0x1d   : > { %v465_v57 = vadd.f32 %v464_v53, %v463_v54 }
  0x1e   : > { %v440_v55 = vadd.f32 %v439_v41, %v438_v51 }
  0x1f   : > { %v467_v60 = vadd.f32 %v466_v56, %v465_v57 }
  0x20   : > { %v441_v58 = vrot.slane %v440_v55, 4 }
  0x21   : > { %v469_v62 = vadd.f32 %v468_v59, %v467_v60 }
  0x22   : > { %v442_v61 = vadd.f32 %v441_v58, %v440_v55 }
  0x23   : > { %v470_v0 = vrot.slane %v469_v62, 4 }
  0x24   : > { %v443_v63 = vrot.slane %v442_v61, 2 }
  0x25   : > { %v471_v6 = vadd.f32 %v470_v0, %v469_v62 }
  0x26   : > { %v444_v5 = vadd.f32 %v443_v63, %v442_v61 }
  0x27   : > { %v472_v8 = vrot.slane %v471_v6, 2 }
  0x28   : > { %v445_v7 = vrot.slane %v444_v5, 1 }
  0x29   : > { %v473_v14 = vadd.f32 %v472_v8, %v471_v6 }
  0x2a   : > { %v446_v9 = vadd.f32 %v445_v7, %v444_v5 }
  0x2b   : > { %v474_v15 = vrot.slane %v473_v14, 1 }
  0x2c   : > { %2658 = vmatmul.mubr.msk.f32.vlgmr.msra.gmra.mrb[0].mxu0 %vm425_vm1, %v446_v9 }
  0x2d   : > { %2857 = vmatpush3.bf16.msk.msra.mxu0 %vm2850_vm12, %v2999_v31  ;;  %2668 = vmatprep.mubr.msk.f32.mxu0 %vm2997_vm0, %v2998_v4  ;;  %v475_v17 = vadd.f32 %v474_v15, %v473_v14  ;;  %v2461_v14 = vld [vmem:[%s3593_s4] ss:$0 sm:$0xff] }
  0x2e   : > { %2858 = vmatprep.subr.bf16.mxu0 %v2996_v1  ;;  %v3000_v1 = vmov 1.0  }
  0x2f   : > { %2677 = vmatpush3.msk.msra.mxu1 %vm509_vm4, %v3000_v1 }
  0x31   : > { %2860 = vmatpush3.bf16.msk.msra.mxu0 %vm2853_vm15, %v2999_v31  ;;  %v2891_v31 = vld [vmem:[%s3592_s3 + $0x8] sm:$0xff]  }
  0x32   : > { %2671 = vmatprep.subr.mxu0 %v2998_v4 }
  0x34   : > { %2669 = vmatmul.mubr.msk.f32.vlgmr.msra.gmra.mrb[2].mxu0 %vm425_vm1, %v475_v17 }
  0x35   : > { %2673 = vmatprep.mubr.msk.f32.mxu0 %vm2997_vm0, %v2998_v4  ;;  %2672 = vmatpush3.msk.msra.mxu0 %vm509_vm4, %v3000_v1  ;;  %vm1378_vm0 = vcmask 130048  }
  0x36   : > { %2681 = vmatprep.subr.bf16.mxu0 %v2890_v3 }
  0xff   : > { %v581_v23 = vpop.f32.mrb[0].mxu0 }
 0x100   : > { %v586_v24 = vmul.f32 0.00390625, %v581_v23  ;;  %v2659_v25 = vpop.f32.mrb[1].mxu0 }
 0x102   : > { %2674 = vmatmul.mubr.msk.f32.vlgmr.msra.gmra.mrb[4].mxu0 %vm664_vm5, %v586_v24  ;;  %v661_v27 = vmul.f32 %v586_v24, %v586_v24 }
 0x103   : > { %2682 = vmatpush3.bf16.msra.mxu0 %v2890_v3 }
 0x104   : > { %2683 = vmatprep.subr.bf16.mxu0 %v2891_v31 }
 0x107   : > { %v656_v26 = vpop.f32.mrb[2].mxu0  ;;  %2684 = vmatpush3.bf16.msra.mxu0 %v2891_v31 }
 0x108   : > { %v660_v28 = vmul.f32 0.00390625, %v656_v26  ;;  %v2670_v4 = vpop.f32.mrb[3].mxu0 }
 0x10a   : > { %v662_v29 = vsub.f32 %v660_v28, %v661_v27 }
 0x10c   : > { %v663_v30 = vmax.f32 %v662_v29, 0.0 }
 0x10e   : > { %2679 = vmatmul.mubr.msk.f32.vlgmr.msra.gmra.mrb[0].mxu1 %vm664_vm5, %v663_v30 }
 0x1d5   : > { %v734_v32 = vpop.f32.mrb[4].mxu0 }
 0x1d6   : > { %v2675_v33 = vpop.f32.mrb[5].mxu0  ;;  %v741_v38 = vrot.slane %v734_v32, %v740_v37 }
 0x1d8   : > { %v742_v40 = vsub.f32 %v3097_v10, %v741_v38  ;;  %v743_v42 = vsub.f32 %v3099_v11, %v741_v38  ;;  %v744_v43 = vsub.f32 %v3101_v12, %v741_v38  ;;  %v745_v44 = vsub.f32 %v3103_v13, %v741_v38  ;;  %v2460_v12 = vld [vmem:[%s3591_s2] ss:$0 sm:$0xff] }
 0x1d9   : > { %v746_v46 = vsub.f32 %v3110_v16, %v741_v38  ;;  %v747_v47 = vsub.f32 %v3118_v19, %v741_v38  ;;  %v748_v2 = vsub.f32 %v3120_v20, %v741_v38  ;;  %v749_v48 = vsub.f32 %v3122_v21, %v741_v38 }
 0x1e1   : > { %v819_v34 = vpop.f32.mrb[0].mxu1 }
 0x1e2   : > { %v820_v35 = vadd.f32 1e-06, %v819_v34  ;;  %v2680_v36 = vpop.f32.mrb[1].mxu1 }
 0x1e4   : > { %2906 = vrsqrt.f32 %v820_v35 }
 0x1ee   : > { %v2907_v39 = vpop.eup %2906 }
 0x1ef   : > { %v827_v41 = vrot.slane %v2907_v39, %v740_v37 }
 0x1f1   : > { %v828_v10 = vmul.f32 %v827_v41, %v742_v40  ;;  %v829_v49 = vmul.f32 %v827_v41, %v743_v42  ;;  %v830_v50 = vmul.f32 %v827_v41, %v744_v43  ;;  %v831_v11 = vmul.f32 %v827_v41, %v745_v44 }
 0x1f2   : > { %v832_v13 = vmul.f32 %v827_v41, %v746_v46  ;;  %v833_v51 = vmul.f32 %v827_v41, %v747_v47  ;;  %v834_v52 = vmul.f32 %v827_v41, %v748_v2  ;;  %v835_v53 = vmul.f32 %v827_v41, %v749_v48 }
 0x1f3   : > { %v842_v54 = vmul.f32 %v2459_v45, %v828_v10  ;;  %v843_v16 = vmul.f32 %v2459_v45, %v829_v49  ;;  %v844_v55 = vmul.f32 %v2459_v45, %v830_v50  ;;  %v845_v19 = vmul.f32 %v2459_v45, %v831_v11 }
 0x1f4   : > { %v846_v56 = vmul.f32 %v2459_v45, %v832_v13  ;;  %v847_v20 = vmul.f32 %v2459_v45, %v833_v51  ;;  %v848_v57 = vmul.f32 %v2459_v45, %v834_v52  ;;  %v849_v21 = vmul.f32 %v2459_v45, %v835_v53 }
 0x1f5   : > { %v856_v58 = vadd.f32 %v2460_v12, %v842_v54  ;;  %v857_v59 = vadd.f32 %v2460_v12, %v843_v16  ;;  %v858_v60 = vadd.f32 %v2460_v12, %v844_v55  ;;  %v859_v61 = vadd.f32 %v2460_v12, %v845_v19 }
 0x1f6   : > { %v860_v62 = vadd.f32 %v2460_v12, %v846_v56  ;;  %v861_v63 = vadd.f32 %v2460_v12, %v847_v20  ;;  %v862_v0 = vadd.f32 %v2460_v12, %v848_v57  ;;  %v863_v5 = vadd.f32 %v2460_v12, %v849_v21 }
 0x1f7   : > { %v864_v6 = vpack.c.bf16 %v857_v59, %v856_v58  ;;  %v865_v7 = vpack.c.bf16 %v859_v61, %v858_v60 }
 0x1f8   : > { %v866_v8 = vpack.c.bf16 %v861_v63, %v860_v62  ;;  %v867_v9 = vpack.c.bf16 %v863_v5, %v862_v0 }
 0x1f9   : > { %2685 = vmatprep.mubr.msk.bf16.mxu0 %vm425_vm1, %v864_v6 }
 0x1fa   : > { %2686 = vmatmul.mubr.msk.bf16.vlgmr.msra.gmra.mrb[8].mxu0 %vm425_vm1, %v865_v7 }
 0x1fb   : > { %2689 = vmatprep.mubr.msk.bf16.mxu0 %vm425_vm1, %v866_v8 }
 0x202   : > { %2690 = vmatmul.mubr.msk.bf16.gmra.mrb[12].mxu0 %vm425_vm1, %v867_v9 }
 0x2cd   : > { %v2687_v15 = vpop.f32.mrb[8].mxu0 }
 0x2ce   : > { %v3244_v17 = vadd.f32 %v2687_v15, %v2461_v14  ;;  %v937_v18 = vpop.f32.mrb[9].mxu0  ;;  %v2892_v15 = vld [vmem:[%s3597_s8] sm:$0xff]  }
 0x2cf   : > { %v3246_v22 = vadd.f32 %v2461_v14, %v937_v18  ;;  %v2688_v1 = vpop.f32.mrb[10].mxu0  ;;  %v2894_v18 = vld [vmem:[%s3596_s7] sm:$0xff]   ;;  %2705 = vmatprep.subr.bf16.mxu0 %v2892_v15 }
 0x2d0   : > { %v3248_v23 = vadd.f32 %v2688_v1, %v2461_v14  ;;  %v940_v24 = vpop.f32.mrb[11].mxu0  ;;  %v976_v25 = vsel %vm425_vm1, %v3244_v17, 0.0  ;;  %2693 = vmatprep.subr.bf16.mxu1 %v2894_v18  ;;  %2706 = vmatpush3.bf16.msra.mxu0 %v2892_v15  ;;  %v2893_v1 = vld [vmem:[%s3597_s8 + $0x8] sm:$0xff]  }
 0x2d1   : > { %v3252_v26 = vadd.f32 %v2461_v14, %v940_v24  ;;  %977 = vadd.xlane.f32.xlu1 %v976_v25  ;;  %v970_v27 = vsel %vm425_vm1, %v3246_v22, 0.0  ;;  %2694 = vmatpush3.bf16.msra.mxu1 %v2894_v18  ;;  %v2895_v24 = vld [vmem:[%s3596_s7 + $0x8] sm:$0xff]   ;;  %v3339_v25 = vld [vmem:[%s3598_s9] sm:$0xff]  }
 0x2d2   : > { %971 = vadd.xlane.f32.xlu0 %v970_v27  ;;  %v979_v28 = vsel %vm425_vm1, %v3248_v23, 0.0  ;;  %2707 = vmatprep.subr.bf16.mxu0 %v2893_v1 }
 0x2d3   : > { %v973_v29 = vsel %vm425_vm1, %v3252_v26, 0.0  ;;  %2695 = vmatprep.subr.bf16.mxu1 %v2895_v24 }
 0x2d4   : > { %2708 = vmatpush3.bf16.msra.mxu0 %v2893_v1 }
 0x2d5   : > { %980 = vadd.xlane.f32.xlu1 %v979_v28  ;;  %v2691_v4 = vpop.f32.mrb[12].mxu0  ;;  %2696 = vmatpush3.bf16.msra.mxu1 %v2895_v24 }
 0x2d6   : > { %v953_v30 = vpop.f32.mrb[13].mxu0  ;;  %974 = vadd.xlane.f32.xlu0 %v973_v29  ;;  %v3262_v33 = vadd.f32 %v2691_v4, %v2461_v14  ;;  %2717 = vmatprep.subr.bf16.mxu1 %v3339_v25 }
 0x2d7   : > { %v3260_v3 = vadd.f32 %v2461_v14, %v953_v30  ;;  %v2692_v31 = vpop.f32.mrb[14].mxu0 }
 0x2d8   : > { %v956_v32 = vpop.f32.mrb[15].mxu0  ;;  %v3268_v36 = vadd.f32 %v2692_v31, %v2461_v14  ;;  %v988_v38 = vsel %vm425_vm1, %v3262_v33, 0.0 }
 0x2d9   : > { %v3264_v34 = vadd.f32 %v2461_v14, %v956_v32  ;;  %v982_v35 = vsel %vm425_vm1, %v3260_v3, 0.0 }
 0x2da   : > { %983 = vadd.xlane.f32.xlu0 %v982_v35  ;;  %v991_v39 = vsel %vm425_vm1, %v3268_v36, 0.0 }
 0x2db   : > { %v985_v37 = vsel %vm425_vm1, %v3264_v34, 0.0 }
 0x2dc   : > { %986 = vadd.xlane.f32.xlu1 %v985_v37 }
 0x2de   : > { %989 = vadd.xlane.f32.xlu0 %v988_v38 }
 0x2e0   : > { %992 = vadd.xlane.f32.xlu1 %v991_v39 }
 0x35e   : > { %v978_v40 = vpop.xlane.xlu1 %977 }
 0x35f   : > { %v997_v41 = vmul.f32 0.03125, %v978_v40  ;;  %v972_v42 = vpop.xlane.xlu0 %971 }
 0x360   : > { %v995_v43 = vmul.f32 0.03125, %v972_v42 }
 0x361   : > { %v3277_v44 = vsub.f32 %v3244_v17, %v997_v41 }
 0x362   : > { %v3280_v45 = vsub.f32 %v3246_v22, %v995_v43  ;;  %v981_v46 = vpop.xlane.xlu1 %980 }
 0x363   : > { %v998_v47 = vmul.f32 0.03125, %v981_v46  ;;  %v975_v2 = vpop.xlane.xlu0 %974  ;;  %v1013_v12 = vmul.f32 %v3277_v44, %v3277_v44 }
 0x364   : > { %v996_v48 = vmul.f32 0.03125, %v975_v2  ;;  %v1011_v10 = vmul.f32 %v3280_v45, %v3280_v45 }
 0x365   : > { %v3285_v49 = vsub.f32 %v3248_v23, %v998_v47  ;;  %v1025_v19 = vsel %vm425_vm1, %v1013_v12, 0.0 }
 0x366   : > { %v3288_v50 = vsub.f32 %v3252_v26, %v996_v48  ;;  %v1019_v11 = vsel %vm425_vm1, %v1011_v10, 0.0 }
 0x367   : > { %1020 = vadd.xlane.f32.xlu0 %v1019_v11  ;;  %v984_v13 = vpop.xlane.xlu0 %983  ;;  %v1014_v54 = vmul.f32 %v3285_v49, %v3285_v49 }
 0x368   : > { %v999_v51 = vmul.f32 0.03125, %v984_v13  ;;  %v1012_v52 = vmul.f32 %v3288_v50, %v3288_v50 }
 0x369   : > { %v987_v53 = vpop.xlane.xlu1 %986  ;;  %v1028_v60 = vsel %vm425_vm1, %v1014_v54, 0.0 }
 0x36a   : > { %v3298_v16 = vsub.f32 %v3260_v3, %v999_v51  ;;  %v1000_v55 = vmul.f32 0.03125, %v987_v53  ;;  %v1022_v56 = vsel %vm425_vm1, %v1012_v52, 0.0  ;;  %v2468_v52 = vld [vmem:[%s3594_s5] ss:$0 sm:$0xff] }
 0x36b   : > { %1026 = vadd.xlane.f32.xlu0 %v1025_v19  ;;  %1023 = vadd.xlane.f32.xlu1 %v1022_v56  ;;  %v990_v20 = vpop.xlane.xlu0 %989 }
 0x36c   : > { %v3303_v57 = vsub.f32 %v3264_v34, %v1000_v55  ;;  %v1001_v21 = vmul.f32 0.03125, %v990_v20  ;;  %v1015_v58 = vmul.f32 %v3298_v16, %v3298_v16 }
 0x36d   : > { %v993_v59 = vpop.xlane.xlu1 %992 }
 0x36e   : > { %v3309_v61 = vsub.f32 %v3262_v33, %v1001_v21  ;;  %v1002_v62 = vmul.f32 0.03125, %v993_v59  ;;  %v1031_v63 = vsel %vm425_vm1, %v1015_v58, 0.0  ;;  %v1016_v0 = vmul.f32 %v3303_v57, %v3303_v57  ;;  %v2469_v21 = vld [vmem:[%s3595_s6] ss:$0 sm:$0xff] }
 0x36f   : > { %1029 = vadd.xlane.f32.xlu1 %v1028_v60  ;;  %1032 = vadd.xlane.f32.xlu0 %v1031_v63 }
 0x370   : > { %v3315_v5 = vsub.f32 %v3268_v36, %v1002_v62  ;;  %v1017_v6 = vmul.f32 %v3309_v61, %v3309_v61  ;;  %v1034_v7 = vsel %vm425_vm1, %v1016_v0, 0.0 }
 0x372   : > { %v1037_v8 = vsel %vm425_vm1, %v1017_v6, 0.0  ;;  %v1018_v9 = vmul.f32 %v3315_v5, %v3315_v5 }
 0x373   : > { %1035 = vadd.xlane.f32.xlu1 %v1034_v7  ;;  %1038 = vadd.xlane.f32.xlu0 %v1037_v8 }
 0x374   : > { %v1040_v14 = vsel %vm425_vm1, %v1018_v9, 0.0 }
 0x377   : > { %1041 = vadd.xlane.f32.xlu1 %v1040_v14 }
 0x3f4   : > { %v1021_v27 = vpop.xlane.xlu0 %1020 }
 0x3f5   : > { %v1043_v28 = vmul.f32 0.03125, %v1021_v27  ;;  %v2897_v27 = vld [vmem:[%s3598_s9 + $0x8] sm:$0xff]  }
 0x3f7   : > { %v1051_v4 = vadd.f32 1e-05, %v1043_v28 }
 0x3f8   : > { %v1024_v29 = vpop.xlane.xlu1 %1023  ;;  %v1027_v30 = vpop.xlane.xlu0 %1026 }
 0x3f9   : > { %2908 = vrsqrt.f32 %v1051_v4  ;;  %v1044_v31 = vmul.f32 0.03125, %v1024_v29  ;;  %v1045_v32 = vmul.f32 0.03125, %v1027_v30 }
 0x3fb   : > { %v1052_v35 = vadd.f32 1e-05, %v1044_v31  ;;  %v1053_v37 = vadd.f32 1e-05, %v1045_v32 }
 0x3fc   : > { %v1030_v38 = vpop.xlane.xlu1 %1029  ;;  %v1033_v39 = vpop.xlane.xlu0 %1032 }
 0x3fd   : > { %2910 = vrsqrt.f32 %v1052_v35  ;;  %v1046_v40 = vmul.f32 0.03125, %v1030_v38  ;;  %v1047_v41 = vmul.f32 0.03125, %v1033_v39 }
 0x3fe   : > { %2912 = vrsqrt.f32 %v1053_v37 }
 0x3ff   : > { %v1054_v42 = vadd.f32 1e-05, %v1046_v40  ;;  %v1055_v43 = vadd.f32 1e-05, %v1047_v41 }
 0x400   : > { %v1036_v46 = vpop.xlane.xlu1 %1035  ;;  %v1039_v47 = vpop.xlane.xlu0 %1038 }
 0x401   : > { %2914 = vrsqrt.f32 %v1054_v42  ;;  %v1048_v2 = vmul.f32 0.03125, %v1036_v46  ;;  %v1049_v48 = vmul.f32 0.03125, %v1039_v47 }
 0x402   : > { %2916 = vrsqrt.f32 %v1055_v43 }
 0x403   : > { %v2909_v10 = vpop.eup %2908  ;;  %v1056_v11 = vadd.f32 1e-05, %v1048_v2  ;;  %v1057_v12 = vadd.f32 1e-05, %v1049_v48 }
 0x404   : > { %v1067_v13 = vmul.f32 %v2909_v10, %v3280_v45  ;;  %v1042_v51 = vpop.xlane.xlu1 %1041 }
 0x405   : > { %2918 = vrsqrt.f32 %v1056_v11  ;;  %v1050_v53 = vmul.f32 0.03125, %v1042_v51 }
 0x406   : > { %2920 = vrsqrt.f32 %v1057_v12  ;;  %v1081_v56 = vmul.f32 %v2468_v52, %v1067_v13 }
 0x407   : > { %v2911_v54 = vpop.eup %2910  ;;  %v1058_v55 = vadd.f32 1e-05, %v1050_v53 }
 0x408   : > { %v2913_v19 = vpop.eup %2912  ;;  %v1068_v20 = vmul.f32 %v2911_v54, %v3288_v50  ;;  %v1095_v62 = vadd.f32 %v2469_v21, %v1081_v56 }
 0x409   : > { %v1069_v45 = vmul.f32 %v2913_v19, %v3277_v44  ;;  %2922 = vrsqrt.f32 %v1058_v55 }
 0x40a   : > { %v1082_v58 = vmul.f32 %v2468_v52, %v1068_v20 }
 0x40b   : > { %v2915_v59 = vpop.eup %2914  ;;  %v1083_v0 = vmul.f32 %v2468_v52, %v1069_v45 }
 0x40c   : > { %v2917_v60 = vpop.eup %2916  ;;  %v1096_v63 = vadd.f32 %v2469_v21, %v1082_v58  ;;  %v1070_v6 = vmul.f32 %v2915_v59, %v3285_v49 }
 0x40d   : > { %v1071_v7 = vmul.f32 %v2917_v60, %v3298_v16  ;;  %v1097_v18 = vadd.f32 %v2469_v21, %v1083_v0 }
 0x40e   : > { %v1084_v8 = vmul.f32 %v2468_v52, %v1070_v6  ;;  %v3353_v9 = vpack.c.bf16 %v1096_v63, %v1095_v62 }
 0x40f   : > { %v2919_v50 = vpop.eup %2918  ;;  %v1085_v14 = vmul.f32 %v2468_v52, %v1071_v7 }
 0x410   : > { %v2921_v15 = vpop.eup %2920  ;;  %v1098_v1 = vadd.f32 %v2469_v21, %v1084_v8  ;;  %v1072_v44 = vmul.f32 %v2919_v50, %v3303_v57  ;;  %2697 = vmatprep.mubr.msk.bf16.mxu1 %vm425_vm1, %v3353_v9  ;;  %2709 = vmatprep.mubr.msk.bf16.mxu0 %vm425_vm1, %v3353_v9 }
 0x411   : > { %v1073_v49 = vmul.f32 %v2921_v15, %v3309_v61  ;;  %v1099_v4 = vadd.f32 %v2469_v21, %v1085_v14 }
 0x412   : > { %v1086_v24 = vmul.f32 %v2468_v52, %v1072_v44  ;;  %v3361_v16 = vpack.c.bf16 %v1098_v1, %v1097_v18 }
 0x413   : > { %v2923_v28 = vpop.eup %2922  ;;  %v1087_v30 = vmul.f32 %v2468_v52, %v1073_v49 }
 0x414   : > { %v1100_v29 = vadd.f32 %v2469_v21, %v1086_v24  ;;  %v1074_v57 = vmul.f32 %v2923_v28, %v3315_v5  ;;  %2698 = vmatmul.mubr.msk.bf16.vlgmr.msra.gmra.mrb[4].mxu1 %vm425_vm1, %v3361_v16  ;;  %2710 = vmatmul.mubr.msk.bf16.vlgmr.msra.gmra.mrb[16].mxu0 %vm425_vm1, %v3361_v16 }
 0x415   : > { %2718 = vmatpush3.bf16.msra.mxu1 %v3339_v25  ;;  %v1101_v32 = vadd.f32 %v2469_v21, %v1087_v30  ;;  %v2898_v30 = vld [vmem:[%s3597_s8 + $0x10] sm:$0xff]  }
 0x416   : > { %v1088_v61 = vmul.f32 %v2468_v52, %v1074_v57  ;;  %v3372_v31 = vpack.c.bf16 %v1100_v29, %v1099_v4  ;;  %2719 = vmatprep.subr.bf16.mxu1 %v2897_v27 }
 0x418   : > { %v1102_v35 = vadd.f32 %v2469_v21, %v1088_v61  ;;  %2701 = vmatprep.mubr.msk.bf16.mxu1 %vm425_vm1, %v3372_v31  ;;  %2713 = vmatprep.mubr.msk.bf16.mxu0 %vm425_vm1, %v3372_v31  ;;  %v2899_v61 = vld [vmem:[%s3597_s8 + $0x18] sm:$0xff]  }
 0x419   : > { %2720 = vmatpush3.bf16.msra.mxu1 %v2897_v27 }
 0x41a   : > { %v3378_v5 = vpack.c.bf16 %v1102_v35, %v1101_v32 }
 0x41c   : > { %2702 = vmatmul.mubr.msk.bf16.gmra.mrb[8].mxu1 %vm425_vm1, %v3378_v5  ;;  %2714 = vmatmul.mubr.msk.bf16.gmra.mrb[20].mxu0 %vm425_vm1, %v3378_v5 }
 0x41d   : > { %2721 = vmatprep.mubr.msk.bf16.mxu1 %vm425_vm1, %v3353_v9 }
 0x424   : > { %2722 = vmatmul.mubr.msk.bf16.vlgmr.msra.gmra.mrb[12].mxu1 %vm425_vm1, %v3361_v16 }
 0x425   : > { %2725 = vmatprep.mubr.msk.bf16.mxu1 %vm425_vm1, %v3372_v31 }
 0x42c   : > { %2726 = vmatmul.mubr.msk.bf16.gmra.mrb[16].mxu1 %vm425_vm1, %v3378_v5 }
 0x4e7   : > { %v2699_v25 = vpop.f32.mrb[4].mxu1  ;;  %v2711_v37 = vpop.f32.mrb[16].mxu0 }
 0x4e8   : > { %v1169_v38 = vpop.f32.mrb[5].mxu1  ;;  %v1258_v39 = vpop.f32.mrb[17].mxu0  ;;  %v3392_v42 = vmul.f32 0.25, %v2699_v25 }
 0x4e9   : > { %v2700_v40 = vpop.f32.mrb[6].mxu1  ;;  %v2712_v41 = vpop.f32.mrb[18].mxu0  ;;  %v1200_v48 = vmul.f32 0.25, %v1169_v38 }
 0x4ea   : > { %v3394_v43 = vmul.f32 0.25, %v2700_v40  ;;  %v1375_v46 = vpack.c.bf16 %v2712_v41, %v2711_v37  ;;  %v1172_v47 = vpop.f32.mrb[7].mxu1  ;;  %v1261_v2 = vpop.f32.mrb[19].mxu0 }
 0x4eb   : > { %v1201_v10 = vmul.f32 0.25, %v1172_v47  ;;  %v1374_v11 = vpack.c.bf16 %v1261_v2, %v1258_v39 }
 0x4ec   : > { %v1371_v12 = vpack.c.bf16 %v3394_v43, %v3392_v42  ;;  %v1395_v6 = vsel %vm1378_vm0, %v1375_v46, 0 }
 0x4ed   : > { %v1370_v13 = vpack.c.bf16 %v1201_v10, %v1200_v48  ;;  %v1392_v51 = vsel %vm1378_vm0, %v1374_v11, 0  ;;  %2869 = vmatprep.subr.msk.bf16.mxu0 %vm1378_vm0, %v1374_v11 }
 0x4ee   : > { %2730 = vmatpush3.bf16.xpose.msra.mxu0 %v1392_v51 }
 0x4ef   : > { %v2703_v52 = vpop.f32.mrb[8].mxu1  ;;  %v2715_v53 = vpop.f32.mrb[20].mxu0  ;;  %2870 = vmatprep.subr.msk.bf16.mxu0 %vm1378_vm0, %v1375_v46  ;;  %2737 = vmatprep.mubr.msk.bf16.mxu0 %vm1378_vm0, %v1370_v13 }
 0x4f0   : > { %v1185_v54 = vpop.f32.mrb[9].mxu1  ;;  %v1274_v55 = vpop.f32.mrb[21].mxu0  ;;  %v1206_v20 = vmul.f32 0.25, %v2703_v52 }
 0x4f1   : > { %v2704_v19 = vpop.f32.mrb[10].mxu1  ;;  %v2716_v56 = vpop.f32.mrb[22].mxu0  ;;  %v1204_v60 = vmul.f32 0.25, %v1185_v54 }
 0x4f2   : > { %v1207_v21 = vmul.f32 0.25, %v2704_v19  ;;  %v1377_v45 = vpack.c.bf16 %v2716_v56, %v2715_v53  ;;  %v1188_v58 = vpop.f32.mrb[11].mxu1  ;;  %v1277_v59 = vpop.f32.mrb[23].mxu0 }
 0x4f3   : > { %v1205_v62 = vmul.f32 0.25, %v1188_v58  ;;  %v1376_v63 = vpack.c.bf16 %v1277_v59, %v1274_v55 }
 0x4f4   : > { %v1373_v0 = vpack.c.bf16 %v1207_v21, %v1206_v20  ;;  %v1401_v57 = vsel %vm1378_vm0, %v1377_v45, 0 }
 0x4f5   : > { %v1372_v7 = vpack.c.bf16 %v1205_v62, %v1204_v60  ;;  %v1398_v44 = vsel %vm1378_vm0, %v1376_v63, 0 }
 0x4f6   : > { %2732 = vmatpush3.bf16.xpose.msra.mxu0 %v1395_v6 }
 0x4f7   : > { %v2723_v8 = vpop.f32.mrb[12].mxu1  ;;  %2871 = vmatprep.subr.msk.bf16.mxu0 %vm1378_vm0, %v1376_v63 }
 0x4f8   : > { %v1339_v50 = vpop.f32.mrb[13].mxu1 }
 0x4f9   : > { %v2724_v14 = vpop.f32.mrb[14].mxu1 }
 0x4fa   : > { %v1562_v15 = vpack.c.bf16 %v2724_v14, %v2723_v8  ;;  %v1342_v18 = vpop.f32.mrb[15].mxu1 }
 0x4fb   : > { %v1561_v1 = vpack.c.bf16 %v1342_v18, %v1339_v50 }
 0x4fd   : > { %2745 = vmatprep.subr.bf16.mxu1 %v1561_v1 }
 0x4fe   : > { %2734 = vmatpush3.bf16.xpose.msra.mxu0 %v1398_v44  ;;  %2746 = vmatpush3.bf16.msra.mxu1 %v1561_v1 }
 0x4ff   : > { %v2727_v49 = vpop.f32.mrb[16].mxu1  ;;  %2872 = vmatprep.subr.msk.bf16.mxu0 %vm1378_vm0, %v1377_v45  ;;  %2747 = vmatprep.subr.bf16.mxu1 %v1562_v15 }
 0x500   : > { %v1355_v24 = vpop.f32.mrb[17].mxu1 }
 0x501   : > { %v2728_v27 = vpop.f32.mrb[18].mxu1 }
 0x502   : > { %v1564_v28 = vpack.c.bf16 %v2728_v27, %v2727_v49  ;;  %v1358_v4 = vpop.f32.mrb[19].mxu1  ;;  %2748 = vmatpush3.bf16.msra.mxu1 %v1562_v15 }
 0x503   : > { %v1563_v29 = vpack.c.bf16 %v1358_v4, %v1355_v24 }
 0x505   : > { %2749 = vmatprep.subr.bf16.mxu1 %v1563_v29 }
 0x506   : > { %2736 = vmatpush3.bf16.xpose.msra.mxu0 %v1401_v57  ;;  %2750 = vmatpush3.bf16.msra.mxu1 %v1563_v29 }
 0x507   : > { %2751 = vmatprep.subr.bf16.mxu1 %v1564_v28  ;;  %2773 = vmatprep.subr.bf16.mxu0 %v2898_v30 }
 0x50a   : > { %2752 = vmatpush3.bf16.msra.mxu1 %v1564_v28 }
 0x50d   : > { %2738 = vmatmul.mubr.msk.bf16.vlgmr.msra.gmra.mrb[24].mxu0 %vm1378_vm0, %v1371_v12 }
 0x50e   : > { %2741 = vmatprep.mubr.msk.bf16.mxu0 %vm1378_vm0, %v1372_v7  ;;  %2774 = vmatpush3.bf16.msra.mxu0 %v2898_v30 }
 0x50f   : > { %2775 = vmatprep.subr.bf16.mxu0 %v2899_v61 }
 0x512   : > { %2776 = vmatpush3.bf16.msra.mxu0 %v2899_v61 }
 0x515   : > { %2742 = vmatmul.mubr.msk.bf16.gmra.mrb[28].mxu0 %vm1378_vm0, %v1373_v0 }
 0x516   : > { %2777 = vmatprep.mubr.msk.bf16.mxu0 %vm425_vm1, %v3353_v9 }
 0x51d   : > { %2778 = vmatmul.mubr.msk.bf16.vlgmr.msra.gmra.mrb[32].mxu0 %vm425_vm1, %v3361_v16 }
 0x51e   : > { %2781 = vmatprep.mubr.msk.bf16.mxu0 %vm425_vm1, %v3372_v31 }
 0x525   : > { %2782 = vmatmul.mubr.msk.bf16.gmra.mrb[36].mxu0 %vm425_vm1, %v3378_v5 }
 0x5e0   : > { %v2739_v32 = vpop.f32.mrb[24].mxu0 }
 0x5e1   : > { %v1437_v35 = vpop.f32.mrb[25].mxu0  ;;  %v1475_v40 = vsel %vm1468_vm6, %v2739_v32, -inf }
 0x5e2   : > { %v2740_v25 = vpop.f32.mrb[26].mxu0  ;;  %v1469_v37 = vsel %vm1468_vm6, %v1437_v35, -inf }
 0x5e3   : > { %1470 = vmax.xlane.f32.xlu0 %v1469_v37  ;;  %v1440_v38 = vpop.f32.mrb[27].mxu0  ;;  %v1478_v42 = vsel %vm1468_vm6, %v2740_v25, -inf }
 0x5e4   : > { %v1472_v39 = vsel %vm1468_vm6, %v1440_v38, -inf }
 0x5e5   : > { %1473 = vmax.xlane.f32.xlu1 %v1472_v39 }
 0x5e7   : > { %1476 = vmax.xlane.f32.xlu0 %v1475_v40 }
 0x5e8   : > { %v3427_v41 = vpop.f32.mrb[28].mxu0 }
 0x5e9   : > { %1479 = vmax.xlane.f32.xlu1 %v1478_v42  ;;  %v1453_v43 = vpop.f32.mrb[29].mxu0  ;;  %v1487_v10 = vsel %vm1468_vm6, %v3427_v41, -inf }
 0x5ea   : > { %v3430_v46 = vpop.f32.mrb[30].mxu0  ;;  %v1481_v47 = vsel %vm1468_vm6, %v1453_v43, -inf }
 0x5eb   : > { %1482 = vmax.xlane.f32.xlu0 %v1481_v47  ;;  %v1456_v2 = vpop.f32.mrb[31].mxu0  ;;  %v1490_v12 = vsel %vm1468_vm6, %v3430_v46, -inf }
 0x5ec   : > { %v1484_v48 = vsel %vm1468_vm6, %v1456_v2, -inf }
 0x5ed   : > { %1485 = vmax.xlane.f32.xlu1 %v1484_v48 }
 0x5ef   : > { %1488 = vmax.xlane.f32.xlu0 %v1487_v10 }
 0x5f0   : > { %v2779_v11 = vpop.f32.mrb[32].mxu0 }
 0x5f1   : > { %v1789_v13 = vpop.f32.mrb[33].mxu0  ;;  %1491 = vmax.xlane.f32.xlu1 %v1490_v12 }
 0x5f2   : > { %v2780_v51 = vpop.f32.mrb[34].mxu0 }
 0x5f3   : > { %v1907_v52 = vpack.c.bf16 %v2780_v51, %v2779_v11  ;;  %v1792_v53 = vpop.f32.mrb[35].mxu0 }
 0x5f4   : > { %v1906_v54 = vpack.c.bf16 %v1792_v53, %v1789_v13  ;;  %v2900_v53 = vld [vmem:[%s3596_s7 + $0x10] sm:$0xff]  }
 0x5f5   : > { %v1926_v59 = vsel %vm1378_vm0, %v1907_v52, 0  ;;  %2761 = vmatprep.subr.bf16.mxu1 %v2900_v53 }
 0x5f6   : > { %v1923_v55 = vsel %vm1378_vm0, %v1906_v54, 0  ;;  %2873 = vmatprep.subr.msk.bf16.mxu0 %vm1378_vm0, %v1906_v54 }
 0x5f7   : > { %2798 = vmatpush3.bf16.xpose.msra.mxu0 %v1923_v55 }
 0x5f8   : > { %v2783_v19 = vpop.f32.mrb[36].mxu0  ;;  %2874 = vmatprep.subr.msk.bf16.mxu0 %vm1378_vm0, %v1907_v52 }
 0x5f9   : > { %v1805_v56 = vpop.f32.mrb[37].mxu0 }
 0x5fa   : > { %v2784_v20 = vpop.f32.mrb[38].mxu0 }
 0x5fb   : > { %v1909_v21 = vpack.c.bf16 %v2784_v20, %v2783_v19  ;;  %v1808_v45 = vpop.f32.mrb[39].mxu0 }
 0x5fc   : > { %v1908_v58 = vpack.c.bf16 %v1808_v45, %v1805_v56 }
 0x5fd   : > { %v1932_v62 = vsel %vm1378_vm0, %v1909_v21, 0 }
 0x5fe   : > { %v1929_v60 = vsel %vm1378_vm0, %v1908_v58, 0 }
 0x5ff   : > { %2800 = vmatpush3.bf16.xpose.msra.mxu0 %v1926_v59 }
 0x600   : > { %2875 = vmatprep.subr.msk.bf16.mxu0 %vm1378_vm0, %v1908_v58 }
 0x607   : > { %2802 = vmatpush3.bf16.xpose.msra.mxu0 %v1929_v60 }
 0x608   : > { %2876 = vmatprep.subr.msk.bf16.mxu0 %vm1378_vm0, %v1909_v21 }
 0x60f   : > { %2804 = vmatpush3.bf16.xpose.msra.mxu0 %v1932_v62 }
 0x670   : > { %v1471_v63 = vpop.xlane.xlu0 %1470 }
 0x671   : > { %v1493_v0 = vsub.f32 %v1437_v35, %v1471_v63 }
 0x672   : > { %v1474_v6 = vpop.xlane.xlu1 %1473 }
 0x673   : > { %v1501_v7 = vmul.f32 1.442695, %v1493_v0  ;;  %v1494_v8 = vsub.f32 %v1440_v38, %v1474_v6 }
 0x674   : > { %v1477_v50 = vpop.xlane.xlu0 %1476 }
 0x675   : > { %2924 = vpow2.f32 %v1501_v7  ;;  %v1503_v14 = vmul.f32 1.442695, %v1494_v8  ;;  %v1495_v15 = vsub.f32 %v2739_v32, %v1477_v50 }
 0x676   : > { %v1480_v18 = vpop.xlane.xlu1 %1479 }
 0x677   : > { %2926 = vpow2.f32 %v1503_v14  ;;  %v1505_v1 = vmul.f32 1.442695, %v1495_v15  ;;  %v1496_v44 = vsub.f32 %v2740_v25, %v1480_v18  ;;  %v2901_v18 = vld [vmem:[%s3596_s7 + $0x18] sm:$0xff]  }
 0x678   : > { %v1483_v49 = vpop.xlane.xlu0 %1482 }
 0x679   : > { %2928 = vpow2.f32 %v1505_v1  ;;  %v1507_v24 = vmul.f32 1.442695, %v1496_v44  ;;  %v1497_v27 = vsub.f32 %v1453_v43, %v1483_v49 }
 0x67a   : > { %v1486_v28 = vpop.xlane.xlu1 %1485 }
 0x67b   : > { %2930 = vpow2.f32 %v1507_v24  ;;  %v1509_v4 = vmul.f32 1.442695, %v1497_v27  ;;  %v1498_v29 = vsub.f32 %v1456_v2, %v1486_v28  ;;  %v2902_v28 = vld [vmem:[%s3598_s9 + $0x10] sm:$0xff]  }
 0x67c   : > { %v1489_v30 = vpop.xlane.xlu0 %1488 }
 0x67d   : > { %2932 = vpow2.f32 %v1509_v4  ;;  %v1511_v57 = vmul.f32 1.442695, %v1498_v29  ;;  %v1499_v61 = vsub.f32 %v3427_v41, %v1489_v30 }
 0x67e   : > { %v1492_v35 = vpop.xlane.xlu1 %1491 }
 0x67f   : > { %v2925_v37 = vpop.eup %2924  ;;  %2934 = vpow2.f32 %v1511_v57  ;;  %v1513_v32 = vmul.f32 1.442695, %v1499_v61  ;;  %v1500_v38 = vsub.f32 %v3430_v46, %v1492_v35  ;;  %v2903_v61 = vld [vmem:[%s3598_s9 + $0x18] sm:$0xff]  }
 0x680   : > { %v1517_v25 = vsel %vm1468_vm6, %v2925_v37, 0.0 }
 0x681   : > { %v2927_v39 = vpop.eup %2926  ;;  %2936 = vpow2.f32 %v1513_v32  ;;  %v1515_v40 = vmul.f32 1.442695, %v1500_v38  ;;  %1518 = vadd.xlane.f32.xlu0 %v1517_v25 }
 0x682   : > { %v1520_v42 = vsel %vm1468_vm6, %v2927_v39, 0.0 }
 0x683   : > { %v2929_v43 = vpop.eup %2928  ;;  %2938 = vpow2.f32 %v1515_v40  ;;  %1521 = vadd.xlane.f32.xlu1 %v1520_v42 }
 0x684   : > { %v1523_v47 = vsel %vm1468_vm6, %v2929_v43, 0.0 }
 0x685   : > { %v2931_v41 = vpop.eup %2930  ;;  %1524 = vadd.xlane.f32.xlu0 %v1523_v47 }
 0x686   : > { %v1526_v2 = vsel %vm1468_vm6, %v2931_v41, 0.0 }
 0x687   : > { %v2933_v48 = vpop.eup %2932  ;;  %1527 = vadd.xlane.f32.xlu1 %v1526_v2 }
 0x688   : > { %v1529_v46 = vsel %vm1468_vm6, %v2933_v48, 0.0 }
 0x689   : > { %v2935_v10 = vpop.eup %2934  ;;  %1530 = vadd.xlane.f32.xlu0 %v1529_v46 }
 0x68a   : > { %v1532_v11 = vsel %vm1468_vm6, %v2935_v10, 0.0 }
 0x68b   : > { %v2937_v12 = vpop.eup %2936  ;;  %1533 = vadd.xlane.f32.xlu1 %v1532_v11 }
 0x68c   : > { %v1535_v13 = vsel %vm1468_vm6, %v2937_v12, 0.0 }
 0x68d   : > { %v2939_v51 = vpop.eup %2938  ;;  %1536 = vadd.xlane.f32.xlu0 %v1535_v13 }
 0x68e   : > { %v1538_v52 = vsel %vm1468_vm6, %v2939_v51, 0.0 }
 0x68f   : > { %1539 = vadd.xlane.f32.xlu1 %v1538_v52 }
 0x70e   : > { %v1519_v54 = vpop.xlane.xlu0 %1518 }
 0x70f   : > { %2940 = vrcp.f32 %v1519_v54 }
 0x710   : > { %v1522_v55 = vpop.xlane.xlu1 %1521 }
 0x711   : > { %2942 = vrcp.f32 %v1522_v55 }
 0x712   : > { %v1525_v19 = vpop.xlane.xlu0 %1524 }
 0x713   : > { %2944 = vrcp.f32 %v1525_v19 }
 0x714   : > { %v1528_v56 = vpop.xlane.xlu1 %1527 }
 0x715   : > { %2946 = vrcp.f32 %v1528_v56 }
 0x716   : > { %v1531_v20 = vpop.xlane.xlu0 %1530 }
 0x717   : > { %2948 = vrcp.f32 %v1531_v20 }
 0x718   : > { %v1534_v21 = vpop.xlane.xlu1 %1533 }
 0x719   : > { %v2941_v45 = vpop.eup %2940  ;;  %2950 = vrcp.f32 %v1534_v21 }
 0x71a   : > { %v1537_v58 = vpop.xlane.xlu0 %1536  ;;  %v1549_v62 = vmul.f32 %v2941_v45, %v2925_v37 }
 0x71b   : > { %v2943_v59 = vpop.eup %2942  ;;  %2952 = vrcp.f32 %v1537_v58 }
 0x71c   : > { %v1540_v60 = vpop.xlane.xlu1 %1539  ;;  %v1550_v63 = vmul.f32 %v2943_v59, %v2927_v39 }
 0x71d   : > { %v2945_v0 = vpop.eup %2944  ;;  %2954 = vrcp.f32 %v1540_v60 }
 0x71e   : > { %v1557_v6 = vpack.c.bf16 %v1550_v63, %v1549_v62  ;;  %v1551_v8 = vmul.f32 %v2945_v0, %v2929_v43 }
 0x71f   : > { %v2947_v7 = vpop.eup %2946 }
 0x720   : > { %v1552_v50 = vmul.f32 %v2947_v7, %v2931_v41  ;;  %2753 = vmatprep.mubr.msk.bf16.mxu1 %vm1468_vm6, %v1557_v6 }
 0x721   : > { %v2949_v14 = vpop.eup %2948 }
 0x722   : > { %v1558_v15 = vpack.c.bf16 %v1552_v50, %v1551_v8  ;;  %v1553_v44 = vmul.f32 %v2949_v14, %v2933_v48 }
 0x723   : > { %v2951_v1 = vpop.eup %2950 }
 0x724   : > { %2754 = vmatmul.mubr.msk.bf16.vlgmr.msra.gmra.mrb[20].mxu1 %vm1468_vm6, %v1558_v15  ;;  %v1554_v49 = vmul.f32 %v2951_v1, %v2935_v10 }
 0x725   : > { %v2953_v24 = vpop.eup %2952  ;;  %2762 = vmatpush3.bf16.msra.mxu1 %v2900_v53 }
 0x726   : > { %v1559_v27 = vpack.c.bf16 %v1554_v49, %v1553_v44  ;;  %2763 = vmatprep.subr.bf16.mxu1 %v2901_v18  ;;  %v1555_v29 = vmul.f32 %v2953_v24, %v2937_v12 }
 0x727   : > { %v2955_v4 = vpop.eup %2954 }
 0x728   : > { %2757 = vmatprep.mubr.msk.bf16.mxu1 %vm1468_vm6, %v1559_v27  ;;  %v1556_v30 = vmul.f32 %v2955_v4, %v2939_v51 }
 0x729   : > { %2764 = vmatpush3.bf16.msra.mxu1 %v2901_v18 }
 0x72a   : > { %v1560_v57 = vpack.c.bf16 %v1556_v30, %v1555_v29  ;;  %2785 = vmatprep.subr.bf16.mxu1 %v2902_v28 }
 0x72c   : > { %2758 = vmatmul.mubr.msk.bf16.gmra.mrb[24].mxu1 %vm1468_vm6, %v1560_v57 }
 0x72d   : > { %2765 = vmatprep.mubr.msk.bf16.mxu1 %vm425_vm1, %v3353_v9 }
 0x734   : > { %2766 = vmatmul.mubr.msk.bf16.vlgmr.msra.gmra.mrb[28].mxu1 %vm425_vm1, %v3361_v16 }
 0x735   : > { %2769 = vmatprep.mubr.msk.bf16.mxu1 %vm425_vm1, %v3372_v31  ;;  %2786 = vmatpush3.bf16.msra.mxu1 %v2902_v28 }
 0x736   : > { %2787 = vmatprep.subr.bf16.mxu1 %v2903_v61 }
 0x739   : > { %2788 = vmatpush3.bf16.msra.mxu1 %v2903_v61 }
 0x73c   : > { %2770 = vmatmul.mubr.msk.bf16.gmra.mrb[32].mxu1 %vm425_vm1, %v3378_v5 }
 0x73d   : > { %2789 = vmatprep.mubr.msk.bf16.mxu1 %vm425_vm1, %v3353_v9 }
 0x744   : > { %2790 = vmatmul.mubr.msk.bf16.vlgmr.msra.gmra.mrb[36].mxu1 %vm425_vm1, %v3361_v16 }
 0x745   : > { %2793 = vmatprep.mubr.msk.bf16.mxu1 %vm425_vm1, %v3372_v31 }
 0x74c   : > { %2794 = vmatmul.mubr.msk.bf16.gmra.mrb[40].mxu1 %vm425_vm1, %v3378_v5 }
 0x7f7   : > { %v3488_v35 = vpop.f32.mrb[20].mxu1 }
 0x7f8   : > { %v3490_v37 = vpop.f32.mrb[21].mxu1 }
 0x7f9   : > { %v3492_v32 = vpop.f32.mrb[22].mxu1 }
 0x7fa   : > { %v1643_v38 = vpack.c.bf16 %v3492_v32, %v3488_v35  ;;  %v3496_v25 = vpop.f32.mrb[23].mxu1 }
 0x7fb   : > { %v1642_v9 = vpack.c.bf16 %v3496_v25, %v3490_v37  ;;  %v2546_v37 = vld [vmem:[%s3600_s11] ss:$0 sm:$0xff] }
 0x7ff   : > { %v3500_v16 = vpop.f32.mrb[24].mxu1 }
 0x800   : > { %v3502_v31 = vpop.f32.mrb[25].mxu1 }
 0x801   : > { %v3504_v39 = vpop.f32.mrb[26].mxu1 }
 0x802   : > { %v1645_v5 = vpack.c.bf16 %v3504_v39, %v3500_v16  ;;  %v3508_v40 = vpop.f32.mrb[27].mxu1 }
 0x803   : > { %v1644_v42 = vpack.c.bf16 %v3508_v40, %v3502_v31 }
 0x807   : > { %v2767_v43 = vpop.f32.mrb[28].mxu1 }
 0x808   : > { %v1699_v47 = vpop.f32.mrb[29].mxu1  ;;  %v1732_v2 = vmul.f32 0.25, %v2767_v43 }
 0x809   : > { %v2768_v41 = vpop.f32.mrb[30].mxu1  ;;  %v1730_v10 = vmul.f32 0.25, %v1699_v47 }
 0x80a   : > { %v1733_v48 = vmul.f32 0.25, %v2768_v41  ;;  %v1702_v46 = vpop.f32.mrb[31].mxu1 }
 0x80b   : > { %v1731_v11 = vmul.f32 0.25, %v1702_v46 }
 0x80c   : > { %v1903_v12 = vpack.c.bf16 %v1733_v48, %v1732_v2 }
 0x80d   : > { %v1902_v13 = vpack.c.bf16 %v1731_v11, %v1730_v10 }
 0x80f   : > { %v2771_v51 = vpop.f32.mrb[32].mxu1  ;;  %2805 = vmatprep.mubr.msk.bf16.mxu0 %vm1378_vm0, %v1902_v13 }
 0x810   : > { %v1715_v52 = vpop.f32.mrb[33].mxu1  ;;  %2806 = vmatmul.mubr.msk.bf16.vlgmr.msra.gmra.mrb[40].mxu0 %vm1378_vm0, %v1903_v12  ;;  %v1736_v54 = vmul.f32 0.25, %v2771_v51 }
 0x811   : > { %v2772_v53 = vpop.f32.mrb[34].mxu1  ;;  %v1734_v56 = vmul.f32 0.25, %v1715_v52 }
 0x812   : > { %v1737_v55 = vmul.f32 0.25, %v2772_v53  ;;  %v1718_v19 = vpop.f32.mrb[35].mxu1 }
 0x813   : > { %v1735_v20 = vmul.f32 0.25, %v1718_v19 }
 0x814   : > { %v1905_v21 = vpack.c.bf16 %v1737_v55, %v1736_v54 }
 0x815   : > { %v1904_v45 = vpack.c.bf16 %v1735_v20, %v1734_v56 }
 0x817   : > { %v2791_v58 = vpop.f32.mrb[36].mxu1  ;;  %2809 = vmatprep.mubr.msk.bf16.mxu0 %vm1378_vm0, %v1904_v45 }
 0x818   : > { %v1871_v59 = vpop.f32.mrb[37].mxu1  ;;  %2810 = vmatmul.mubr.msk.bf16.gmra.mrb[44].mxu0 %vm1378_vm0, %v1905_v21 }
 0x819   : > { %v2792_v60 = vpop.f32.mrb[38].mxu1 }
 0x81a   : > { %v2092_v62 = vpack.c.bf16 %v2792_v60, %v2791_v58  ;;  %v1874_v63 = vpop.f32.mrb[39].mxu1 }
 0x81b   : > { %v2091_v0 = vpack.c.bf16 %v1874_v63, %v1871_v59 }
 0x81d   : > { %2813 = vmatprep.subr.bf16.mxu1 %v2091_v0 }
 0x81e   : > { %2814 = vmatpush3.bf16.msra.mxu1 %v2091_v0 }
 0x81f   : > { %v2795_v6 = vpop.f32.mrb[40].mxu1  ;;  %2815 = vmatprep.subr.bf16.mxu1 %v2092_v62 }
 0x820   : > { %v1887_v7 = vpop.f32.mrb[41].mxu1 }
 0x821   : > { %v2796_v8 = vpop.f32.mrb[42].mxu1 }
 0x822   : > { %v2094_v50 = vpack.c.bf16 %v2796_v8, %v2795_v6  ;;  %v1890_v14 = vpop.f32.mrb[43].mxu1  ;;  %2816 = vmatpush3.bf16.msra.mxu1 %v2092_v62 }
 0x823   : > { %v2093_v15 = vpack.c.bf16 %v1890_v14, %v1887_v7 }
 0x825   : > { %2817 = vmatprep.subr.bf16.mxu1 %v2093_v15 }
 0x826   : > { %2818 = vmatpush3.bf16.msra.mxu1 %v2093_v15 }
 0x827   : > { %2819 = vmatprep.subr.bf16.mxu1 %v2094_v50 }
 0x82a   : > { %2820 = vmatpush3.bf16.msra.mxu1 %v2094_v50 }
 0x8e3   : > { %v2807_v18 = vpop.f32.mrb[40].mxu0 }
 0x8e4   : > { %v1968_v1 = vpop.f32.mrb[41].mxu0  ;;  %v2005_v28 = vsel %vm1468_vm6, %v2807_v18, -inf }
 0x8e5   : > { %v2808_v44 = vpop.f32.mrb[42].mxu0  ;;  %v1999_v49 = vsel %vm1468_vm6, %v1968_v1, -inf }
 0x8e6   : > { %2000 = vmax.xlane.f32.xlu0 %v1999_v49  ;;  %v1971_v24 = vpop.f32.mrb[43].mxu0  ;;  %v2008_v29 = vsel %vm1468_vm6, %v2808_v44, -inf }
 0x8e7   : > { %v2002_v27 = vsel %vm1468_vm6, %v1971_v24, -inf }
 0x8e8   : > { %2003 = vmax.xlane.f32.xlu1 %v2002_v27 }
 0x8ea   : > { %2006 = vmax.xlane.f32.xlu0 %v2005_v28 }
 0x8eb   : > { %v2811_v4 = vpop.f32.mrb[44].mxu0 }
 0x8ec   : > { %2009 = vmax.xlane.f32.xlu1 %v2008_v29  ;;  %v1984_v30 = vpop.f32.mrb[45].mxu0  ;;  %v2017_v41 = vsel %vm1468_vm6, %v2811_v4, -inf }
 0x8ed   : > { %v2812_v57 = vpop.f32.mrb[46].mxu0  ;;  %v2011_v61 = vsel %vm1468_vm6, %v1984_v30, -inf }
 0x8ee   : > { %2012 = vmax.xlane.f32.xlu0 %v2011_v61  ;;  %v1987_v43 = vpop.f32.mrb[47].mxu0  ;;  %v2020_v2 = vsel %vm1468_vm6, %v2812_v57, -inf }
 0x8ef   : > { %v2014_v47 = vsel %vm1468_vm6, %v1987_v43, -inf }
 0x8f0   : > { %2015 = vmax.xlane.f32.xlu1 %v2014_v47 }
 0x8f2   : > { %2018 = vmax.xlane.f32.xlu0 %v2017_v41 }
 0x8f4   : > { %2021 = vmax.xlane.f32.xlu1 %v2020_v2 }
 0x973   : > { %v2001_v48 = vpop.xlane.xlu0 %2000 }
 0x974   : > { %v2023_v46 = vsub.f32 %v1968_v1, %v2001_v48 }
 0x975   : > { %v2004_v10 = vpop.xlane.xlu1 %2003 }
 0x976   : > { %v2031_v11 = vmul.f32 1.442695, %v2023_v46  ;;  %v2024_v12 = vsub.f32 %v1971_v24, %v2004_v10 }
 0x977   : > { %v2007_v13 = vpop.xlane.xlu0 %2006 }
 0x978   : > { %2956 = vpow2.f32 %v2031_v11  ;;  %v2033_v51 = vmul.f32 1.442695, %v2024_v12  ;;  %v2025_v52 = vsub.f32 %v2807_v18, %v2007_v13 }
 0x979   : > { %v2010_v53 = vpop.xlane.xlu1 %2009 }
 0x97a   : > { %2958 = vpow2.f32 %v2033_v51  ;;  %v2035_v54 = vmul.f32 1.442695, %v2025_v52  ;;  %v2026_v55 = vsub.f32 %v2808_v44, %v2010_v53 }
 0x97b   : > { %v2013_v19 = vpop.xlane.xlu0 %2012 }
 0x97c   : > { %2960 = vpow2.f32 %v2035_v54  ;;  %v2037_v56 = vmul.f32 1.442695, %v2026_v55  ;;  %v2027_v20 = vsub.f32 %v1984_v30, %v2013_v19 }
 0x97d   : > { %v2016_v21 = vpop.xlane.xlu1 %2015 }
 0x97e   : > { %2962 = vpow2.f32 %v2037_v56  ;;  %v2039_v45 = vmul.f32 1.442695, %v2027_v20  ;;  %v2028_v58 = vsub.f32 %v1987_v43, %v2016_v21  ;;  %v2904_v43 = vld [vmem:[%s3599_s10 + $0x8] sm:$0xff]  }
 0x97f   : > { %v2019_v59 = vpop.xlane.xlu0 %2018  ;;  %2829 = vmatprep.subr.bf16.mxu1 %v2904_v43 }
 0x980   : > { %2964 = vpow2.f32 %v2039_v45  ;;  %v2041_v60 = vmul.f32 1.442695, %v2028_v58  ;;  %v2029_v62 = vsub.f32 %v2811_v4, %v2019_v59 }
 0x981   : > { %v2022_v63 = vpop.xlane.xlu1 %2021 }
 0x982   : > { %v2957_v0 = vpop.eup %2956  ;;  %2966 = vpow2.f32 %v2041_v60  ;;  %v2043_v6 = vmul.f32 1.442695, %v2029_v62  ;;  %v2030_v7 = vsub.f32 %v2812_v57, %v2022_v63 }
 0x983   : > { %v2047_v8 = vsel %vm1468_vm6, %v2957_v0, 0.0 }
 0x984   : > { %v2959_v50 = vpop.eup %2958  ;;  %2968 = vpow2.f32 %v2043_v6  ;;  %v2045_v14 = vmul.f32 1.442695, %v2030_v7  ;;  %2048 = vadd.xlane.f32.xlu0 %v2047_v8 }
 0x985   : > { %v2050_v15 = vsel %vm1468_vm6, %v2959_v50, 0.0 }
 0x986   : > { %v2961_v18 = vpop.eup %2960  ;;  %2970 = vpow2.f32 %v2045_v14  ;;  %2051 = vadd.xlane.f32.xlu1 %v2050_v15 }
 0x987   : > { %v2053_v1 = vsel %vm1468_vm6, %v2961_v18, 0.0 }
 0x988   : > { %v2963_v44 = vpop.eup %2962  ;;  %2054 = vadd.xlane.f32.xlu0 %v2053_v1 }
 0x989   : > { %v2056_v49 = vsel %vm1468_vm6, %v2963_v44, 0.0 }
 0x98a   : > { %v2965_v24 = vpop.eup %2964  ;;  %2057 = vadd.xlane.f32.xlu1 %v2056_v49 }
 0x98b   : > { %v2059_v27 = vsel %vm1468_vm6, %v2965_v24, 0.0 }
 0x98c   : > { %v2967_v28 = vpop.eup %2966  ;;  %2060 = vadd.xlane.f32.xlu0 %v2059_v27 }
 0x98d   : > { %v2062_v4 = vsel %vm1468_vm6, %v2967_v28, 0.0 }
 0x98e   : > { %v2969_v29 = vpop.eup %2968  ;;  %2063 = vadd.xlane.f32.xlu1 %v2062_v4 }
 0x98f   : > { %v2065_v30 = vsel %vm1468_vm6, %v2969_v29, 0.0 }
 0x990   : > { %v2971_v57 = vpop.eup %2970  ;;  %2066 = vadd.xlane.f32.xlu0 %v2065_v30 }
 0x991   : > { %v2068_v61 = vsel %vm1468_vm6, %v2971_v57, 0.0 }
 0x992   : > { %2069 = vadd.xlane.f32.xlu1 %v2068_v61 }
 0xa11   : > { %v2049_v47 = vpop.xlane.xlu0 %2048 }
 0xa12   : > { %2972 = vrcp.f32 %v2049_v47 }
 0xa13   : > { %v2052_v41 = vpop.xlane.xlu1 %2051 }
 0xa14   : > { %2974 = vrcp.f32 %v2052_v41 }
 0xa15   : > { %v2055_v2 = vpop.xlane.xlu0 %2054 }
 0xa16   : > { %2976 = vrcp.f32 %v2055_v2 }
 0xa17   : > { %v2058_v48 = vpop.xlane.xlu1 %2057 }
 0xa18   : > { %2978 = vrcp.f32 %v2058_v48 }
 0xa19   : > { %v2061_v46 = vpop.xlane.xlu0 %2060 }
 0xa1a   : > { %2980 = vrcp.f32 %v2061_v46 }
 0xa1b   : > { %v2064_v10 = vpop.xlane.xlu1 %2063 }
 0xa1c   : > { %v2973_v11 = vpop.eup %2972  ;;  %2982 = vrcp.f32 %v2064_v10 }
 0xa1d   : > { %v2067_v12 = vpop.xlane.xlu0 %2066  ;;  %v2079_v52 = vmul.f32 %v2973_v11, %v2957_v0 }
 0xa1e   : > { %v2975_v13 = vpop.eup %2974  ;;  %2984 = vrcp.f32 %v2067_v12 }
 0xa1f   : > { %v2070_v51 = vpop.xlane.xlu1 %2069  ;;  %v2080_v53 = vmul.f32 %v2975_v13, %v2959_v50  ;;  %v2905_v50 = vld [vmem:[%s3599_s10] sm:$0xff]  }
 0xa20   : > { %v2977_v54 = vpop.eup %2976  ;;  %2986 = vrcp.f32 %v2070_v51 }
 0xa21   : > { %v2087_v55 = vpack.c.bf16 %v2080_v53, %v2079_v52  ;;  %v2081_v56 = vmul.f32 %v2977_v54, %v2961_v18 }
 0xa22   : > { %v2979_v19 = vpop.eup %2978 }
 0xa23   : > { %v2082_v20 = vmul.f32 %v2979_v19, %v2963_v44  ;;  %2821 = vmatprep.mubr.msk.bf16.mxu1 %vm1468_vm6, %v2087_v55 }
 0xa24   : > { %v2981_v21 = vpop.eup %2980 }
 0xa25   : > { %v2088_v45 = vpack.c.bf16 %v2082_v20, %v2081_v56  ;;  %v2083_v59 = vmul.f32 %v2981_v21, %v2965_v24 }
 0xa26   : > { %v2983_v58 = vpop.eup %2982 }
 0xa27   : > { %2822 = vmatmul.mubr.msk.bf16.vlgmr.msra.gmra.mrb[44].mxu1 %vm1468_vm6, %v2088_v45  ;;  %v2084_v60 = vmul.f32 %v2983_v58, %v2967_v28 }
 0xa28   : > { %v2985_v62 = vpop.eup %2984  ;;  %2830 = vmatpush3.bf16.msra.mxu1 %v2904_v43 }
 0xa29   : > { %v2089_v63 = vpack.c.bf16 %v2084_v60, %v2083_v59  ;;  %v2085_v6 = vmul.f32 %v2985_v62, %v2969_v29  ;;  %2839 = vmatprep.subr.bf16.mxu1 %v2905_v50 }
 0xa2a   : > { %v2987_v0 = vpop.eup %2986 }
 0xa2b   : > { %2825 = vmatprep.mubr.msk.bf16.mxu1 %vm1468_vm6, %v2089_v63  ;;  %v2086_v7 = vmul.f32 %v2987_v0, %v2971_v57 }
 0xa2d   : > { %v2090_v8 = vpack.c.bf16 %v2086_v7, %v2085_v6 }
 0xa2f   : > { %2826 = vmatmul.mubr.msk.bf16.gmra.mrb[48].mxu1 %vm1468_vm6, %v2090_v8 }
 0xafa   : > { %v2823_v14 = vpop.f32.mrb[44].mxu1 }
 0xafb   : > { %v2141_v15 = vpop.f32.mrb[45].mxu1 }
 0xafc   : > { %v2824_v18 = vpop.f32.mrb[46].mxu1 }
 0xafd   : > { %v2173_v1 = vpack.c.bf16 %v2824_v18, %v2823_v14  ;;  %v2144_v44 = vpop.f32.mrb[47].mxu1 }
 0xafe   : > { %v2172_v49 = vpack.c.bf16 %v2144_v44, %v2141_v15 }
 0xb00   : > { %2831 = vmatprep.mubr.msk.bf16.mxu1 %vm1378_vm0, %v2172_v49 }
 0xb01   : > { %2832 = vmatmul.mubr.msk.bf16.vlgmr.msra.gmra.mrb[52].mxu1 %vm1378_vm0, %v2173_v1 }
 0xb02   : > { %2840 = vmatpush3.bf16.msra.mxu1 %v2905_v50  ;;  %v2827_v24 = vpop.f32.mrb[48].mxu1 }
 0xb03   : > { %v2157_v27 = vpop.f32.mrb[49].mxu1 }
 0xb04   : > { %v2828_v28 = vpop.f32.mrb[50].mxu1 }
 0xb05   : > { %v2175_v4 = vpack.c.bf16 %v2828_v28, %v2827_v24  ;;  %v2160_v29 = vpop.f32.mrb[51].mxu1 }
 0xb06   : > { %v2174_v30 = vpack.c.bf16 %v2160_v29, %v2157_v27 }
 0xb08   : > { %2835 = vmatprep.mubr.msk.bf16.mxu1 %vm1378_vm0, %v2174_v30 }
 0xb09   : > { %2836 = vmatmul.mubr.msk.bf16.gmra.mrb[56].mxu1 %vm1378_vm0, %v2175_v4 }
 0xb0a   : > { %2841 = vmatprep.mubr.msk.bf16.mxu1 %vm1378_vm0, %v1642_v9 }
 0xb11   : > { %2842 = vmatmul.mubr.msk.bf16.vlgmr.msra.gmra.mrb[52].mxu1 %vm1378_vm0, %v1643_v38 }
 0xb12   : > { %2845 = vmatprep.mubr.msk.bf16.mxu1 %vm1378_vm0, %v1644_v42 }
 0xb19   : > { %2846 = vmatmul.mubr.msk.bf16.gmra.mrb[56].mxu1 %vm1378_vm0, %v1645_v5 }
 0xbe4   : > { %v2843_v25 = vpop.f32.mrb[52].mxu1 }
 0xbe5   : > { %v2354_v9 = vadd.f32 %v2843_v25, %v2546_v37  ;;  %v2314_v57 = vpop.f32.mrb[53].mxu1 }
 0xbe6   : > { %v2352_v35 = vadd.f32 %v2546_v37, %v2314_v57  ;;  %v2844_v32 = vpop.f32.mrb[54].mxu1 }
 0xbe7   : > { %v2362_v38 = vadd.f32 %v2354_v9, %v3244_v17  ;;  %v2355_v31 = vadd.f32 %v2844_v32, %v2546_v37  ;;  %v2317_v16 = vpop.f32.mrb[55].mxu1 }
 0xbe8   : > { %v2360_v39 = vadd.f32 %v2352_v35, %v3246_v22  ;;  %v2353_v5 = vadd.f32 %v2546_v37, %v2317_v16 }
 0xbe9   : > { %2370 = vst.msk [vmem:[%s413_s28 + $0x10] sm:$0xff] %vm425_vm1, %v2362_v38  ;;  %v2363_v40 = vadd.f32 %v2355_v31, %v3248_v23 }
 0xbea   : > { %2368 = vst.msk [vmem:[%s413_s28] sm:$0xff] %vm425_vm1, %v2360_v39  ;;  %v2361_v42 = vadd.f32 %v2353_v5, %v3252_v26 }
 0xbeb   : > { %2371 = vst.msk [vmem:[%s413_s28 + $0x18] sm:$0xff] %vm425_vm1, %v2363_v40 }
 0xbec   : > { %2369 = vst.msk [vmem:[%s413_s28 + $0x8] sm:$0xff] %vm425_vm1, %v2361_v42  ;;  %v2847_v61 = vpop.f32.mrb[56].mxu1 }
 0xbed   : > { %v2358_v43 = vadd.f32 %v2847_v61, %v2546_v37  ;;  %v2330_v17 = vpop.f32.mrb[57].mxu1 }
 0xbee   : > { %v2356_v47 = vadd.f32 %v2546_v37, %v2330_v17  ;;  %v2848_v41 = vpop.f32.mrb[58].mxu1 }
 0xbef   : > { %v2366_v22 = vadd.f32 %v2358_v43, %v3262_v33  ;;  %v2359_v2 = vadd.f32 %v2848_v41, %v2546_v37  ;;  %v2333_v48 = vpop.f32.mrb[59].mxu1 }
 0xbf0   : > { %v2364_v46 = vadd.f32 %v2356_v47, %v3260_v3  ;;  %v2357_v23 = vadd.f32 %v2546_v37, %v2333_v48 }
 0xbf1   : > { %2374 = vst.msk [vmem:[%s413_s28 + $0x30] sm:$0xff] %vm425_vm1, %v2366_v22  ;;  %v2367_v26 = vadd.f32 %v2359_v2, %v3268_v36 }
 0xbf2   : > { %2372 = vst.msk [vmem:[%s413_s28 + $0x20] sm:$0xff] %vm425_vm1, %v2364_v46  ;;  %v2365_v10 = vadd.f32 %v2357_v23, %v3264_v34 }
 0xbf3   : > { %2375 = vst.msk [vmem:[%s413_s28 + $0x38] sm:$0xff] %vm425_vm1, %v2367_v26 }
 0xbf4   : > { %2373 = vst.msk [vmem:[%s413_s28 + $0x28] sm:$0xff] %vm425_vm1, %v2365_v10 }
 0xbf5 PF: > { %s22_s21 = sadd.s32 1, %s2994_s21  }
 0xbf6   : > { %p19_p4 = scmp.ge.s32.totalorder %s22_s21, 4  }
 0xbf8   :  { %21 = sbr.rel (!%p19_p4) target bundleno = 1 (0x1), region = 102 }

// kernel: cross_attn_up_block.12
= control target key start
LH: loop header
LB: loop body
LE: loop exit
PB: predicated region body
PF: predicated region fallthrough
CT: control target
= control target key end

     0   :  { %s1450_s13 = smov 0   ;;  %s1836_s0 = inlined_call_operand.vmem [shape: f32[2,64,32], index: 0, kind: input, shape index: {}]   ;;  %s1837_s1 = inlined_call_operand.vmem [shape: f32[2,64,32], index: 1, kind: input, shape index: {}]   ;;  %s1838_s2 = inlined_call_operand.vmem [shape: f32[1,32], index: 2, kind: input, shape index: {}]   ;;  %s1839_s3 = inlined_call_operand.vmem [shape: f32[1,32], index: 3, kind: input, shape index: {}]   ;;  %s1840_s4 = inlined_call_operand.vmem [shape: bf16[32,256], index: 4, kind: input, shape index: {}]   ;;  %s1841_s5 = inlined_call_operand.vmem [shape: f32[1,256], index: 5, kind: input, shape index: {}]   ;;  %s1842_s6 = inlined_call_operand.vmem [shape: bf16[128,32], index: 6, kind: input, shape index: {}]   ;;  %s1843_s7 = inlined_call_operand.vmem [shape: f32[1,32], index: 7, kind: input, shape index: {}]   ;;  %s1844_s8 = inlined_call_operand.vmem [shape: bf16[32,32], index: 8, kind: input, shape index: {}]   ;;  %s1845_s9 = inlined_call_operand.vmem [shape: f32[1,32], index: 9, kind: input, shape index: {}]   ;;  %s1846_s10 = inlined_call_operand.vmem [shape: f32[2,64,32], index: 10, kind: output, shape index: {}]  }
   0x1 LB: > { %s1217_s14 = sadd.s32 4294967295, %s1392_s13   ;;  %p1221_p0 = scmp.ge.s32.totalorder %s1392_s13, 1  ;;  %s1392_s13 = sphi %s1450_s13, %s20_s13  }
   0x2   : > { %p322_p1 = scmp.lt.s32.totalorder %s1392_s13, 3 }
   0x4   : > { %p323_p2 = pnand %p1221_p0, %p322_p1 }
   0x6   : > { %326 = sbr.rel (%p323_p2) target bundleno = 1074 (0x432), region = 60 }
   0xd   : > { %p365_p3 = scmp.lt.s32.totalorder %s1217_s14, 1  ;;  %vm391_vm0 = vcmask 261120   ;;  %v1322_v56 = vld [vmem:[%s1840_s4 + $0x4] ss:$8 sps:$4 sm:$0xff]   ;;  %v1324_v57 = vld [vmem:[%s1840_s4] ss:$8 sps:$4 sm:$0xff]  }
   0xe   : > { %577 = vmatprep.subr.bf16.mxu0 %v1322_v56  ;;  %v1325_v58 = vld [vmem:[%s1840_s4 + $0x14] ss:$8 sps:$4 sm:$0xff]   ;;  %v1327_v59 = vld [vmem:[%s1840_s4 + $0x10] ss:$8 sps:$4 sm:$0xff]   ;;  %v1394_v60 = vmov 0  }
   0xf   : > { %s1851_s14 = smov (!%p365_p3, %s1217_s14), 1  ;;  %578 = vmatpush1.bf16.msra.mxu0 %v1324_v57  ;;  %609 = vmatprep.mubr.bf16.mxu0 %v1394_v60 }
  0x10   : > { %s1458_s15 = sshll.u32 %s1851_s14, 6  ;;  %579 = vmatprep.subr.bf16.mxu0 %v1325_v58 }
  0x11   : > { %s369_s18 = scalar_lea.vmem %s1836_s0, %s1458_s15  ;;  %s1798_s21 = scalar_lea.vmem %s1837_s1, %s1458_s15 }
  0x12   : > { %v1464_v0 = vld [vmem:[%s369_s18] sm:$0xff]  ;;  %v1466_v1 = vld [vmem:[%s369_s18 + $0x10] sm:$0xff]  ;;  %v1468_v2 = vld [vmem:[%s369_s18 + $0x8] sm:$0xff]  ;;  %s1809_s26 = scalar_lea.vmem %s1846_s10, %s1458_s15 }
  0x13   : > { %v392_v3 = vsel %vm391_vm0, %v1464_v0, 0.0  ;;  %v398_v4 = vsel %vm391_vm0, %v1466_v1, 0.0  ;;  %v1474_v5 = vld [vmem:[%s369_s18 + $0x18] sm:$0xff]  ;;  %v395_v6 = vsel %vm391_vm0, %v1468_v2, 0.0  ;;  %v1478_v7 = vld [vmem:[%s369_s18 + $0x20] sm:$0xff]  ;;  %v1482_v9 = vld [vmem:[%s369_s18 + $0x28] sm:$0xff]  ;;  %580 = vmatpush1.bf16.msra.mxu0 %v1327_v59 }
  0x14   : > { %393 = vadd.xlane.f32.xlu0 %v392_v3  ;;  %399 = vadd.xlane.f32.xlu1 %v398_v4  ;;  %v401_v8 = vsel %vm391_vm0, %v1474_v5, 0.0  ;;  %1848 = vst [vmem:[#allocation2_spill] sm:$0xff] %v1482_v9  ;;  %v404_v10 = vsel %vm391_vm0, %v1478_v7, 0.0  ;;  %v407_v11 = vsel %vm391_vm0, %v1482_v9, 0.0  ;;  %v1488_v12 = vld [vmem:[%s369_s18 + $0x30] sm:$0xff]  ;;  %v1490_v13 = vld [vmem:[%s369_s18 + $0x38] sm:$0xff] }
  0x15   : > { %v410_v14 = vsel %vm391_vm0, %v1488_v12, 0.0  ;;  %v413_v15 = vsel %vm391_vm0, %v1490_v13, 0.0 }
  0x18   : > { %396 = vadd.xlane.f32.xlu0 %v395_v6  ;;  %402 = vadd.xlane.f32.xlu1 %v401_v8 }
  0x1c   : > { %405 = vadd.xlane.f32.xlu0 %v404_v10  ;;  %408 = vadd.xlane.f32.xlu1 %v407_v11 }
  0x20   : > { %411 = vadd.xlane.f32.xlu0 %v410_v14  ;;  %414 = vadd.xlane.f32.xlu1 %v413_v15 }
  0xa1   : > { %v394_v16 = vpop.xlane.xlu0 %393  ;;  %v400_v17 = vpop.xlane.xlu1 %399 }
  0xa2   : > { %v417_v18 = vmul.f32 0.03125, %v394_v16  ;;  %v419_v19 = vmul.f32 0.03125, %v400_v17 }
  0xa4   : > { %v1497_v20 = vsub.f32 %v1464_v0, %v417_v18  ;;  %v1500_v21 = vsub.f32 %v1466_v1, %v419_v19 }
  0xa5   : > { %v397_v22 = vpop.xlane.xlu0 %396  ;;  %v403_v23 = vpop.xlane.xlu1 %402 }
  0xa6   : > { %v418_v24 = vmul.f32 0.03125, %v397_v22  ;;  %v420_v25 = vmul.f32 0.03125, %v403_v23  ;;  %v433_v26 = vmul.f32 %v1497_v20, %v1497_v20  ;;  %v435_v27 = vmul.f32 %v1500_v21, %v1500_v21 }
  0xa8   : > { %v1507_v28 = vsub.f32 %v1468_v2, %v418_v24  ;;  %v1510_v29 = vsub.f32 %v1474_v5, %v420_v25  ;;  %v441_v30 = vsel %vm391_vm0, %v433_v26, 0.0  ;;  %v447_v33 = vsel %vm391_vm0, %v435_v27, 0.0 }
  0xa9   : > { %442 = vadd.xlane.f32.xlu0 %v441_v30  ;;  %v406_v31 = vpop.xlane.xlu0 %405  ;;  %v409_v32 = vpop.xlane.xlu1 %408 }
  0xaa   : > { %v421_v34 = vmul.f32 0.03125, %v406_v31  ;;  %v422_v35 = vmul.f32 0.03125, %v409_v32  ;;  %v434_v36 = vmul.f32 %v1507_v28, %v1507_v28  ;;  %v436_v37 = vmul.f32 %v1510_v29, %v1510_v29  ;;  %v1228_v32 = vld [vmem:[%s1838_s2] ss:$0 sm:$0xff] }
  0xac   : > { %v1519_v38 = vsub.f32 %v1478_v7, %v421_v34  ;;  %v1522_v39 = vsub.f32 %v1482_v9, %v422_v35  ;;  %v444_v40 = vsel %vm391_vm0, %v434_v36, 0.0  ;;  %v450_v43 = vsel %vm391_vm0, %v436_v37, 0.0 }
  0xad   : > { %448 = vadd.xlane.f32.xlu0 %v447_v33  ;;  %445 = vadd.xlane.f32.xlu1 %v444_v40  ;;  %v412_v41 = vpop.xlane.xlu0 %411  ;;  %v415_v42 = vpop.xlane.xlu1 %414 }
  0xae   : > { %v423_v44 = vmul.f32 0.03125, %v412_v41  ;;  %v424_v45 = vmul.f32 0.03125, %v415_v42  ;;  %v437_v46 = vmul.f32 %v1519_v38, %v1519_v38  ;;  %v438_v47 = vmul.f32 %v1522_v39, %v1522_v39 }
  0xb0   : > { %v1531_v48 = vsub.f32 %v1488_v12, %v423_v44  ;;  %v1534_v49 = vsub.f32 %v1490_v13, %v424_v45  ;;  %v453_v50 = vsel %vm391_vm0, %v437_v46, 0.0  ;;  %v456_v51 = vsel %vm391_vm0, %v438_v47, 0.0 }
  0xb1   : > { %451 = vadd.xlane.f32.xlu1 %v450_v43  ;;  %454 = vadd.xlane.f32.xlu0 %v453_v50 }
  0xb2   : > { %v439_v52 = vmul.f32 %v1531_v48, %v1531_v48  ;;  %v440_v53 = vmul.f32 %v1534_v49, %v1534_v49 }
  0xb4   : > { %v459_v54 = vsel %vm391_vm0, %v439_v52, 0.0  ;;  %v462_v55 = vsel %vm391_vm0, %v440_v53, 0.0 }
  0xb5   : > { %457 = vadd.xlane.f32.xlu1 %v456_v51  ;;  %460 = vadd.xlane.f32.xlu0 %v459_v54 }
  0xb9   : > { %463 = vadd.xlane.f32.xlu1 %v462_v55 }
 0x136   : > { %v443_v61 = vpop.xlane.xlu0 %442 }
 0x137   : > { %v465_v62 = vmul.f32 0.03125, %v443_v61 }
 0x139   : > { %v473_v63 = vadd.f32 1e-05, %v465_v62 }
 0x13a   : > { %v446_v3 = vpop.xlane.xlu1 %445  ;;  %v449_v4 = vpop.xlane.xlu0 %448 }
 0x13b   : > { %1338 = vrsqrt.f32 %v473_v63  ;;  %v466_v6 = vmul.f32 0.03125, %v446_v3  ;;  %v467_v8 = vmul.f32 0.03125, %v449_v4 }
 0x13d   : > { %v474_v10 = vadd.f32 1e-05, %v466_v6  ;;  %v475_v11 = vadd.f32 1e-05, %v467_v8 }
 0x13e   : > { %v452_v14 = vpop.xlane.xlu1 %451  ;;  %v455_v15 = vpop.xlane.xlu0 %454 }
 0x13f   : > { %1340 = vrsqrt.f32 %v474_v10  ;;  %v468_v16 = vmul.f32 0.03125, %v452_v14  ;;  %v469_v18 = vmul.f32 0.03125, %v455_v15  ;;  %v1331_v14 = vld [vmem:[%s1842_s6 + $0x18] sm:$0xff]   ;;  %v1332_v15 = vld [vmem:[%s1842_s6 + $0x20] sm:$0xff]  }
 0x140   : > { %1342 = vrsqrt.f32 %v475_v11 }
 0x141   : > { %v476_v17 = vadd.f32 1e-05, %v468_v16  ;;  %v477_v24 = vadd.f32 1e-05, %v469_v18  ;;  %v1333_v16 = vld [vmem:[%s1842_s6 + $0x28] sm:$0xff]   ;;  %v1335_v18 = vld [vmem:[%s1842_s6 + $0x38] sm:$0xff]  }
 0x142   : > { %v458_v19 = vpop.xlane.xlu1 %457  ;;  %v461_v27 = vpop.xlane.xlu0 %460 }
 0x143   : > { %1344 = vrsqrt.f32 %v476_v17  ;;  %v470_v22 = vmul.f32 0.03125, %v458_v19  ;;  %v471_v34 = vmul.f32 0.03125, %v461_v27  ;;  %v1334_v17 = vld [vmem:[%s1842_s6 + $0x30] sm:$0xff]   ;;  %v1336_v19 = vld [vmem:[%s1844_s8] sm:$0xff]  }
 0x144   : > { %1301 = vmatprep.subr.bf16.mxu0 %v1336_v19 }
 0x145   : > { %v1339_v23 = vpop.eup %1338  ;;  %v478_v25 = vadd.f32 1e-05, %v470_v22  ;;  %v479_v43 = vadd.f32 1e-05, %v471_v34  ;;  %v535_v22 = vlaneseq }
 0x146   : > { %v489_v26 = vmul.f32 %v1339_v23, %v1497_v20  ;;  %v464_v30 = vpop.xlane.xlu1 %463  ;;  %v1229_v20 = vld [vmem:[%s1839_s3] ss:$0 sm:$0xff] }
 0x147   : > { %1346 = vrsqrt.f32 %v478_v25  ;;  %v472_v31 = vmul.f32 0.03125, %v464_v30  ;;  %v536_v23 = vshrl.u32 %v535_v22, 7  ;;  %v533_v25 = vld [vmem:[%s1841_s5] sm:$0x3] }
 0x148   : > { %1348 = vrsqrt.f32 %v477_v24  ;;  %v503_v36 = vmul.f32 %v1228_v32, %v489_v26 }
 0x149   : > { %v1341_v33 = vpop.eup %1340  ;;  %v480_v40 = vadd.f32 1e-05, %v472_v31  ;;  %v541_v24 = vsub.s32 1, %v536_v23 }
 0x14a   : > { %v490_v35 = vmul.f32 %v1341_v33, %v1507_v28  ;;  %v1343_v37 = vpop.eup %1342  ;;  %v517_v46 = vadd.f32 %v1229_v20, %v503_v36 }
 0x14b   : > { %v491_v44 = vmul.f32 %v1343_v37, %v1500_v21  ;;  %1350 = vrsqrt.f32 %v480_v40  ;;  %v1608_v26 = vrot.slane %v533_v25, %v541_v24 }
 0x14c   : > { %v504_v41 = vmul.f32 %v1228_v32, %v490_v35  ;;  %1352 = vrsqrt.f32 %v479_v43 }
 0x14d   : > { %v1345_v42 = vpop.eup %1344  ;;  %v505_v52 = vmul.f32 %v1228_v32, %v491_v44 }
 0x14e   : > { %v492_v45 = vmul.f32 %v1345_v42, %v1510_v29  ;;  %v518_v47 = vadd.f32 %v1229_v20, %v504_v41 }
 0x14f   : > { %v519_v56 = vadd.f32 %v1229_v20, %v505_v52  ;;  %v537_v52 = vsub.s32 0, %v536_v23 }
 0x150   : > { %v525_v50 = vpack.c.bf16 %v518_v47, %v517_v46  ;;  %v506_v51 = vmul.f32 %v1228_v32, %v492_v45 }
 0x151   : > { %v1347_v28 = vpop.eup %1346 }
 0x152   : > { %1234 = vmatmul.mubr.msk.bf16.vlgmr.msra.gmra.mrb[0].mxu0 %vm391_vm0, %v525_v50  ;;  %v1349_v53 = vpop.eup %1348  ;;  %v494_v54 = vmul.f32 %v1347_v28, %v1522_v39  ;;  %v520_v55 = vadd.f32 %v1229_v20, %v506_v51 }
 0x153   : > { %619 = vmatprep.mubr.bf16.mxu0 %v1394_v60  ;;  %v493_v21 = vmul.f32 %v1349_v53, %v1519_v38  ;;  %1302 = vmatpush3.bf16.msra.mxu0 %v1336_v19 }
 0x154   : > { %v526_v29 = vpack.c.bf16 %v520_v55, %v519_v56  ;;  %v508_v57 = vmul.f32 %v1228_v32, %v494_v54 }
 0x155   : > { %v1351_v58 = vpop.eup %1350  ;;  %v507_v59 = vmul.f32 %v1228_v32, %v493_v21 }
 0x156   : > { %v1353_v61 = vpop.eup %1352  ;;  %v496_v62 = vmul.f32 %v1351_v58, %v1534_v49  ;;  %v522_v63 = vadd.f32 %v1229_v20, %v508_v57  ;;  %v1328_v49 = vld [vmem:[%s1842_s6] sm:$0xff]  }
 0x157   : > { %v495_v3 = vmul.f32 %v1353_v61, %v1531_v48  ;;  %v521_v4 = vadd.f32 %v1229_v20, %v507_v59  ;;  %1277 = vmatprep.subr.bf16.mxu1 %v1328_v49  ;;  %v1329_v48 = vld [vmem:[%s1842_s6 + $0x8] sm:$0xff]   ;;  %v1633_v61 = vrot.slane %v533_v25, %v537_v52 }
 0x158   : > { %v510_v6 = vmul.f32 %v1228_v32, %v496_v62  ;;  %1278 = vmatpush3.bf16.msra.mxu1 %v1328_v49 }
 0x159   : > { %v527_v39 = vpack.c.bf16 %v522_v63, %v521_v4  ;;  %v509_v38 = vmul.f32 %v1228_v32, %v495_v3  ;;  %1279 = vmatprep.subr.bf16.mxu1 %v1329_v48 }
 0x15a   : > { %1235 = vmatmul.mubr.msk.bf16.gmra.mrb[4].mxu0 %vm391_vm0, %v526_v29  ;;  %v524_v8 = vadd.f32 %v1229_v20, %v510_v6 }
 0x15b   : > { %629 = vmatprep.mubr.bf16.mxu0 %v1394_v60  ;;  %v523_v10 = vadd.f32 %v1229_v20, %v509_v38 }
 0x15c   : > { %1280 = vmatpush3.bf16.msra.mxu1 %v1329_v48 }
 0x15d   : > { %v528_v11 = vpack.c.bf16 %v524_v8, %v523_v10 }
 0x162   : > { %1236 = vmatmul.mubr.msk.bf16.gmra.mrb[8].mxu0 %vm391_vm0, %v527_v39 }
 0x163   : > { %639 = vmatprep.mubr.bf16.mxu0 %v1394_v60  ;;  %v1330_v60 = vld [vmem:[%s1842_s6 + $0x10] sm:$0xff]  }
 0x164   : > { %1281 = vmatprep.subr.bf16.mxu1 %v1330_v60 }
 0x165   : > { %1282 = vmatpush3.bf16.msra.mxu1 %v1330_v60 }
 0x166   : > { %1283 = vmatprep.subr.bf16.mxu1 %v1331_v14 }
 0x169   : > { %1284 = vmatpush3.bf16.msra.mxu1 %v1331_v14 }
 0x16a   : > { %1237 = vmatmul.mubr.msk.bf16.gmra.mrb[12].mxu0 %vm391_vm0, %v528_v11  ;;  %1285 = vmatprep.subr.bf16.mxu1 %v1332_v15 }
 0x16d   : > { %1286 = vmatpush3.bf16.msra.mxu1 %v1332_v15 }
 0x16e   : > { %1287 = vmatprep.subr.bf16.mxu1 %v1333_v16 }
 0x171   : > { %1288 = vmatpush3.bf16.msra.mxu1 %v1333_v16 }
 0x172   : > { %1289 = vmatprep.subr.bf16.mxu1 %v1334_v17 }
 0x175   : > { %1290 = vmatpush3.bf16.msra.mxu1 %v1334_v17 }
 0x176   : > { %1291 = vmatprep.subr.bf16.mxu1 %v1335_v18 }
 0x179   : > { %1292 = vmatpush3.bf16.msra.mxu1 %v1335_v18 }
 0x225   : > { %v611_v27 = vpop.f32.mrb[0].mxu0 }
 0x226   : > { %v613_v30 = vpop.f32.mrb[1].mxu0  ;;  %v1645_v49 = vadd.f32 %v611_v27, %v1633_v61 }
 0x227   : > { %v614_v31 = vadd.f32 %v613_v30, %v1608_v26  ;;  %v615_v32 = vpop.f32.mrb[2].mxu0 }
 0x228   : > { %v617_v33 = vpop.f32.mrb[3].mxu0  ;;  %v1648_v48 = vadd.f32 %v615_v32, %v1633_v61 }
 0x229   : > { %v1611_v34 = vmul.f32 0.70710677, %v614_v31  ;;  %v618_v35 = vadd.f32 %v617_v33, %v1608_v26  ;;  %v1658_v22 = vmul.f32 0.5, %v614_v31 }
 0x22b   : > { %v666_v36 = vand.u32 2147483647, %v1611_v34  ;;  %v1615_v37 = vmul.f32 0.70710677, %v618_v35  ;;  %v1660_v23 = vmul.f32 0.5, %v618_v35  ;;  %vm826_vm1 = vcmp.ge.f32.partialorder %v1611_v34, 0.0 }
 0x22d   : > { %v674_v40 = vmul.f32 0.3275911, %v666_v36  ;;  %v667_v20 = vand.u32 2147483647, %v1615_v37  ;;  %v621_v41 = vpop.f32.mrb[4].mxu0  ;;  %v778_v29 = vsub.f32 0.0, %v666_v36 }
 0x22e   : > { %v623_v44 = vpop.f32.mrb[5].mxu0  ;;  %v1663_v24 = vadd.f32 %v621_v41, %v1633_v61  ;;  %vm827_vm2 = vcmp.ge.f32.partialorder %v1615_v37, 0.0 }
 0x22f   : > { %v682_v42 = vadd.f32 1.0, %v674_v40  ;;  %v675_v43 = vmul.f32 0.3275911, %v667_v20  ;;  %v624_v45 = vadd.f32 %v623_v44, %v1608_v26  ;;  %v625_v46 = vpop.f32.mrb[6].mxu0  ;;  %v779_v3 = vsub.f32 0.0, %v667_v20 }
 0x230   : > { %v627_v50 = vpop.f32.mrb[7].mxu0  ;;  %v786_v8 = vmul.f32 %v778_v29, %v666_v36  ;;  %v1674_v31 = vadd.f32 %v625_v46, %v1633_v61 }
 0x231   : > { %1354 = vrcp.f32 %v682_v42  ;;  %v683_v47 = vadd.f32 1.0, %v675_v43  ;;  %v1619_v51 = vmul.f32 0.70710677, %v624_v45  ;;  %v628_v28 = vadd.f32 %v627_v50, %v1608_v26 }
 0x232   : > { %v787_v15 = vmul.f32 %v779_v3, %v667_v20  ;;  %v794_v30 = vmul.f32 1.442695, %v786_v8  ;;  %v1671_v20 = vmul.f32 0.5, %v624_v45 }
 0x233   : > { %1356 = vrcp.f32 %v683_v47  ;;  %v668_v53 = vand.u32 2147483647, %v1619_v51  ;;  %v1623_v54 = vmul.f32 0.70710677, %v628_v28  ;;  %vm828_vm3 = vcmp.ge.f32.partialorder %v1619_v51, 0.0 }
 0x234   : > { %v796_v43 = vmul.f32 1.442695, %v787_v15 }
 0x235   : > { %v1625_v55 = vpop.f32.mrb[8].mxu0  ;;  %v676_v21 = vmul.f32 0.3275911, %v668_v53  ;;  %v669_v57 = vand.u32 2147483647, %v1623_v54  ;;  %v780_v16 = vsub.f32 0.0, %v668_v53 }
 0x236   : > { %v633_v56 = vpop.f32.mrb[9].mxu0  ;;  %vm829_vm4 = vcmp.ge.f32.partialorder %v1623_v54, 0.0 }
 0x237   : > { %v1629_v58 = vadd.f32 %v633_v56, %v1608_v26  ;;  %v1631_v59 = vpop.f32.mrb[10].mxu0  ;;  %v684_v62 = vadd.f32 1.0, %v676_v21  ;;  %v677_v4 = vmul.f32 0.3275911, %v669_v57  ;;  %v788_v44 = vmul.f32 %v780_v16, %v668_v53 }
 0x238   : > { %v637_v63 = vpop.f32.mrb[11].mxu0  ;;  %v781_v50 = vsub.f32 0.0, %v669_v57 }
 0x239   : > { %v1636_v39 = vmul.f32 0.70710677, %v1629_v58  ;;  %1358 = vrcp.f32 %v684_v62  ;;  %v1639_v6 = vadd.f32 %v637_v63, %v1608_v26  ;;  %v685_v10 = vadd.f32 1.0, %v677_v4 }
 0x23a   : > { %v1687_v63 = vmul.f32 0.5, %v628_v28 }
 0x23b   : > { %v1641_v38 = vpop.eup %1354  ;;  %v670_v11 = vand.u32 2147483647, %v1636_v39  ;;  %v1651_v60 = vmul.f32 0.70710677, %v1639_v6  ;;  %1360 = vrcp.f32 %v685_v10  ;;  %v798_v10 = vmul.f32 1.442695, %v788_v44 }
 0x23c   : > { %v706_v14 = vmul.f32 1.0614054, %v1641_v38  ;;  %vm830_vm5 = vcmp.ge.f32.partialorder %v1636_v39, 0.0 }
 0x23d   : > { %v678_v17 = vmul.f32 0.3275911, %v670_v11  ;;  %v1654_v18 = vpop.f32.mrb[12].mxu0  ;;  %v1656_v19 = vpop.eup %1356  ;;  %v671_v25 = vand.u32 2147483647, %v1651_v60  ;;  %v782_v56 = vsub.f32 0.0, %v670_v11 }
 0x23e   : > { %v643_v27 = vpop.f32.mrb[13].mxu0  ;;  %v714_v40 = vadd.f32 -1.4531521, %v706_v14  ;;  %v707_v41 = vmul.f32 1.0614054, %v1656_v19  ;;  %v789_v14 = vmul.f32 %v781_v50, %v669_v57  ;;  %vm831_vm6 = vcmp.ge.f32.partialorder %v1651_v60, 0.0 }
 0x23f   : > { %v686_v32 = vadd.f32 1.0, %v678_v17  ;;  %v1667_v33 = vadd.f32 %v643_v27, %v1608_v26  ;;  %v1669_v36 = vpop.f32.mrb[14].mxu0  ;;  %v679_v35 = vmul.f32 0.3275911, %v671_v25  ;;  %v783_v53 = vsub.f32 0.0, %v671_v25 }
 0x240   : > { %v647_v42 = vpop.f32.mrb[15].mxu0  ;;  %v715_v45 = vadd.f32 -1.4531521, %v707_v41  ;;  %v722_v29 = vmul.f32 %v1641_v38, %v714_v40  ;;  %v790_v27 = vmul.f32 %v782_v56, %v670_v11  ;;  %v800_v56 = vmul.f32 1.442695, %v789_v14 }
 0x241   : > { %1362 = vrcp.f32 %v686_v32  ;;  %v1678_v47 = vmul.f32 0.70710677, %v1667_v33  ;;  %v687_v52 = vadd.f32 1.0, %v679_v35  ;;  %v1681_v21 = vadd.f32 %v647_v42, %v1608_v26 }
 0x242   : > { %1364 = vpow2.f32 %v794_v30  ;;  %v723_v8 = vmul.f32 %v1656_v19, %v715_v45  ;;  %v730_v16 = vadd.f32 1.4214138, %v722_v29  ;;  %v791_v35 = vmul.f32 %v783_v53, %v671_v25 }
 0x243   : > { %v672_v46 = vand.u32 2147483647, %v1678_v47  ;;  %v1685_v62 = vpop.eup %1358  ;;  %1366 = vrcp.f32 %v687_v52  ;;  %v1690_v3 = vmul.f32 0.70710677, %v1681_v21  ;;  %vm832_vm7 = vcmp.ge.f32.partialorder %v1678_v47, 0.0 }
 0x244   : > { %1368 = vpow2.f32 %v796_v43  ;;  %v708_v26 = vmul.f32 1.0614054, %v1685_v62  ;;  %v731_v32 = vadd.f32 1.4214138, %v723_v8  ;;  %v738_v41 = vmul.f32 %v1641_v38, %v730_v16 }
 0x245   : > { %v680_v4 = vmul.f32 0.3275911, %v672_v46  ;;  %v673_v15 = vand.u32 2147483647, %v1690_v3  ;;  %v1695_v17 = vpop.eup %1360  ;;  %v784_v44 = vsub.f32 0.0, %v672_v46  ;;  %vm833_vm8 = vcmp.ge.f32.partialorder %v1690_v3, 0.0 }
 0x246   : > { %v716_v28 = vadd.f32 -1.4531521, %v708_v26  ;;  %v709_v40 = vmul.f32 1.0614054, %v1695_v17  ;;  %v739_v57 = vmul.f32 %v1656_v19, %v731_v32  ;;  %v746_v29 = vadd.f32 -0.28449672, %v738_v41 }
 0x247   : > { %v688_v30 = vadd.f32 1.0, %v680_v4  ;;  %v681_v42 = vmul.f32 0.3275911, %v673_v15  ;;  %v785_v45 = vsub.f32 0.0, %v673_v15  ;;  %v802_v8 = vmul.f32 1.442695, %v790_v27 }
 0x248   : > { %v724_v43 = vmul.f32 %v1685_v62, %v716_v28  ;;  %v717_v50 = vadd.f32 -1.4531521, %v709_v40  ;;  %v747_v4 = vadd.f32 -0.28449672, %v739_v57  ;;  %v754_v32 = vmul.f32 %v1641_v38, %v746_v29  ;;  %v1337_v3 = vld [vmem:[%s1844_s8 + $0x8] sm:$0xff]  }
 0x249   : > { %1370 = vrcp.f32 %v688_v30  ;;  %v689_v52 = vadd.f32 1.0, %v681_v42  ;;  %v792_v30 = vmul.f32 %v784_v44, %v672_v46  ;;  %v804_v14 = vmul.f32 1.442695, %v791_v35  ;;  %1303 = vmatprep.subr.bf16.mxu0 %v1337_v3 }
 0x24a   : > { %v732_v11 = vadd.f32 1.4214138, %v724_v43  ;;  %1372 = vpow2.f32 %v798_v10  ;;  %v725_v25 = vmul.f32 %v1695_v17, %v717_v50  ;;  %v755_v40 = vmul.f32 %v1656_v19, %v747_v4  ;;  %1304 = vmatpush3.bf16.msra.mxu0 %v1337_v3 }
 0x24b   : > { %v1701_v26 = vpop.eup %1362  ;;  %1374 = vrcp.f32 %v689_v52  ;;  %v793_v43 = vmul.f32 %v785_v45, %v673_v15  ;;  %v762_v52 = vadd.f32 0.2548296, %v754_v32  ;;  %v806_v4 = vmul.f32 1.442695, %v792_v30 }
 0x24c   : > { %v710_v53 = vmul.f32 1.0614054, %v1701_v26  ;;  %v1365_v16 = vpop.eup %1364  ;;  %v740_v28 = vmul.f32 %v1685_v62, %v732_v11  ;;  %v733_v41 = vadd.f32 1.4214138, %v725_v25  ;;  %1376 = vpow2.f32 %v800_v56 }
 0x24d   : > { %v1708_v42 = vpop.eup %1366  ;;  %1378 = vpow2.f32 %v802_v8  ;;  %v763_v44 = vadd.f32 0.2548296, %v755_v40  ;;  %v770_v15 = vmul.f32 %v1641_v38, %v762_v52  ;;  %v808_v56 = vmul.f32 1.442695, %v793_v43 }
 0x24e   : > { %v718_v10 = vadd.f32 -1.4531521, %v710_v53  ;;  %v1369_v57 = vpop.eup %1368  ;;  %v748_v50 = vadd.f32 -0.28449672, %v740_v28  ;;  %v711_v27 = vmul.f32 1.0614054, %v1708_v42  ;;  %v741_v9 = vmul.f32 %v1695_v17, %v733_v41 }
 0x24f   : > { %v771_v25 = vmul.f32 %v1656_v19, %v763_v44  ;;  %1380 = vpow2.f32 %v804_v14  ;;  %v810_v32 = vmul.f32 %v1365_v16, %v770_v15 }
 0x250   : > { %v726_v46 = vmul.f32 %v1701_v26, %v718_v10  ;;  %v756_v29 = vmul.f32 %v1685_v62, %v748_v50  ;;  %v719_v11 = vadd.f32 -1.4531521, %v711_v27  ;;  %v749_v35 = vadd.f32 -0.28449672, %v741_v9 }
 0x251   : > { %v811_v9 = vmul.f32 %v1369_v57, %v771_v25  ;;  %1382 = vpow2.f32 %v806_v4  ;;  %v818_v43 = vsub.f32 1.0, %v810_v32 }
 0x252   : > { %v734_v45 = vadd.f32 1.4214138, %v726_v46  ;;  %v764_v28 = vadd.f32 0.2548296, %v756_v29  ;;  %v727_v8 = vmul.f32 %v1708_v42, %v719_v11  ;;  %v757_v30 = vmul.f32 %v1695_v17, %v749_v35 }
 0x253   : > { %v1718_v53 = vpop.eup %1370  ;;  %1384 = vpow2.f32 %v808_v56  ;;  %v819_v57 = vsub.f32 1.0, %v811_v9  ;;  %v834_v4 = vsub.f32 0.0, %v818_v43 }
 0x254   : > { %v742_v38 = vmul.f32 %v1701_v26, %v734_v45  ;;  %v712_v40 = vmul.f32 1.0614054, %v1718_v53  ;;  %v1373_v41 = vpop.eup %1372  ;;  %v772_v10 = vmul.f32 %v1685_v62, %v764_v28  ;;  %v735_v19 = vadd.f32 1.4214138, %v727_v8 }
 0x255   : > { %v1726_v50 = vpop.eup %1374  ;;  %v765_v27 = vadd.f32 0.2548296, %v757_v30  ;;  %v835_v56 = vsub.f32 0.0, %v819_v57 }
 0x256   : > { %v750_v14 = vadd.f32 -0.28449672, %v742_v38  ;;  %v720_v16 = vadd.f32 -1.4531521, %v712_v40  ;;  %v812_v52 = vmul.f32 %v1373_v41, %v772_v10  ;;  %v743_v46 = vmul.f32 %v1708_v42, %v735_v19  ;;  %v1377_v15 = vpop.eup %1376 }
 0x257   : > { %v713_v44 = vmul.f32 1.0614054, %v1726_v50  ;;  %v773_v29 = vmul.f32 %v1695_v17, %v765_v27  ;;  %v1379_v28 = vpop.eup %1378  ;;  %v842_v38 = vsel %vm826_vm1, %v818_v43, %v834_v4  ;;  %v843_v41 = vsel %vm827_vm2, %v819_v57, %v835_v56 }
 0x258   : > { %v758_v62 = vmul.f32 %v1701_v26, %v750_v14  ;;  %v728_v11 = vmul.f32 %v1718_v53, %v720_v16  ;;  %v820_v35 = vsub.f32 1.0, %v812_v52  ;;  %v751_v45 = vadd.f32 -0.28449672, %v743_v46 }
 0x259   : > { %v721_v25 = vadd.f32 -1.4531521, %v713_v44  ;;  %v813_v8 = vmul.f32 %v1377_v15, %v773_v29  ;;  %v850_v14 = vadd.f32 1.0, %v842_v38  ;;  %v1381_v16 = vpop.eup %1380  ;;  %v851_v46 = vadd.f32 1.0, %v843_v41 }
 0x25a   : > { %v766_v32 = vadd.f32 0.2548296, %v758_v62  ;;  %v736_v30 = vadd.f32 1.4214138, %v728_v11  ;;  %v836_v40 = vsub.f32 0.0, %v820_v35  ;;  %v759_v17 = vmul.f32 %v1708_v42, %v751_v45 }
 0x25b   : > { %v729_v9 = vmul.f32 %v1726_v50, %v721_v25  ;;  %v821_v10 = vsub.f32 1.0, %v813_v8  ;;  %v1383_v4 = vpop.eup %1382  ;;  %v859_v15 = vmul.f32 %v851_v46, %v1660_v23 }
 0x25c   : > { %v774_v19 = vmul.f32 %v1701_v26, %v766_v32  ;;  %v744_v27 = vmul.f32 %v1718_v53, %v736_v30  ;;  %v844_v52 = vsel %vm828_vm3, %v820_v35, %v836_v40  ;;  %v767_v34 = vadd.f32 0.2548296, %v759_v17 }
 0x25d   : > { %v737_v43 = vadd.f32 1.4214138, %v729_v9  ;;  %v852_v44 = vadd.f32 1.0, %v844_v52  ;;  %v837_v29 = vsub.f32 0.0, %v821_v10  ;;  %v858_v26 = vmul.f32 %v850_v14, %v1658_v22  ;;  %v1385_v45 = vpop.eup %1384 }
 0x25e   : > { %v814_v62 = vmul.f32 %v1379_v28, %v774_v19  ;;  %v752_v11 = vadd.f32 -0.28449672, %v744_v27  ;;  %v775_v37 = vmul.f32 %v1708_v42, %v767_v34  ;;  %v867_v22 = vmul.f32 %v859_v15, %v1648_v48 }
 0x25f   : > { %v745_v57 = vmul.f32 %v1726_v50, %v737_v43  ;;  %v860_v51 = vmul.f32 %v852_v44, %v1671_v20  ;;  %v845_v35 = vsel %vm829_vm4, %v821_v10, %v837_v29  ;;  %v866_v42 = vmul.f32 %v858_v26, %v1645_v49 }
 0x260   : > { %v822_v25 = vsub.f32 1.0, %v814_v62  ;;  %v760_v56 = vmul.f32 %v1718_v53, %v752_v11  ;;  %v853_v28 = vadd.f32 1.0, %v845_v35  ;;  %v815_v8 = vmul.f32 %v1381_v16, %v775_v37 }
 0x261   : > { %v753_v32 = vadd.f32 -0.28449672, %v745_v57  ;;  %v868_v23 = vmul.f32 %v860_v51, %v1663_v24  ;;  %v654_v17 = vmul.f32 0.5, %v1629_v58  ;;  %v874_v10 = vpack.c.bf16 %v867_v22, %v866_v42 }
 0x262   : > { %v838_v30 = vsub.f32 0.0, %v822_v25  ;;  %v768_v38 = vadd.f32 0.2548296, %v760_v56  ;;  %v861_v40 = vmul.f32 %v853_v28, %v1687_v63  ;;  %v823_v54 = vsub.f32 1.0, %v815_v8 }
 0x263   : > { %v761_v20 = vmul.f32 %v1726_v50, %v753_v32  ;;  %v632_v24 = vadd.f32 %v1625_v55, %v1633_v61  ;;  %1293 = vmatprep.mubr.bf16.mxu1 %v874_v10  ;;  %v642_v37 = vadd.f32 %v1654_v18, %v1633_v61  ;;  %v1238_v18 = vld [vmem:[%s1843_s7] ss:$0 sm:$0xff] }
 0x264   : > { %v846_v9 = vsel %vm830_vm5, %v822_v25, %v838_v30  ;;  %v776_v41 = vmul.f32 %v1718_v53, %v768_v38  ;;  %v839_v19 = vsub.f32 0.0, %v823_v54  ;;  %v869_v48 = vmul.f32 %v861_v40, %v1674_v31 }
 0x265   : > { %v854_v49 = vadd.f32 1.0, %v846_v9  ;;  %v769_v27 = vadd.f32 0.2548296, %v761_v20  ;;  %v655_v53 = vmul.f32 0.5, %v1639_v6  ;;  %v636_v31 = vadd.f32 %v1631_v59, %v1633_v61 }
 0x266   : > { %v816_v39 = vmul.f32 %v1383_v4, %v776_v41  ;;  %v847_v14 = vsel %vm831_vm6, %v823_v54, %v839_v19  ;;  %v875_v16 = vpack.c.bf16 %v869_v48, %v868_v23  ;;  %v657_v59 = vmul.f32 0.5, %v1681_v21  ;;  %v1849_v19 = vld [vmem:[#allocation2_spill] sm:$0xff] }
 0x267   : > { %v862_v63 = vmul.f32 %v854_v49, %v654_v17  ;;  %v777_v58 = vmul.f32 %v1726_v50, %v769_v27  ;;  %v855_v52 = vadd.f32 1.0, %v847_v14  ;;  %v656_v50 = vmul.f32 0.5, %v1667_v33  ;;  %v1126_v14 = vld [vmem:[%s1798_s21] sm:$0xff] }
 0x268   : > { %v824_v34 = vsub.f32 1.0, %v816_v39  ;;  %1294 = vmatmul.mubr.bf16.vlgmr.msra.gmra.mrb[0].mxu1 %v875_v16 }
 0x269   : > { %v817_v43 = vmul.f32 %v1385_v45, %v777_v58  ;;  %v870_v46 = vmul.f32 %v862_v63, %v632_v24  ;;  %v863_v55 = vmul.f32 %v855_v52, %v655_v53  ;;  %v646_v45 = vadd.f32 %v1669_v36, %v1633_v61  ;;  %v1129_v53 = vld [vmem:[%s1798_s21 + $0x18] sm:$0xff] }
 0x26a   : > { %v840_v44 = vsub.f32 0.0, %v824_v34 }
 0x26b   : > { %v825_v60 = vsub.f32 1.0, %v817_v43  ;;  %v871_v62 = vmul.f32 %v863_v55, %v636_v31 }
 0x26c   : > { %v848_v29 = vsel %vm832_vm7, %v824_v34, %v840_v44 }
 0x26d   : > { %v856_v11 = vadd.f32 1.0, %v848_v29  ;;  %v841_v4 = vsub.f32 0.0, %v825_v60  ;;  %v876_v6 = vpack.c.bf16 %v871_v62, %v870_v46  ;;  %v1127_v46 = vld [vmem:[%s1798_s21 + $0x8] sm:$0xff]  ;;  %v1132_v62 = vld [vmem:[%s1798_s21 + $0x30] sm:$0xff] }
 0x26f   : > { %v864_v57 = vmul.f32 %v856_v11, %v656_v50  ;;  %v849_v26 = vsel %vm833_vm8, %v825_v60, %v841_v4  ;;  %1297 = vmatprep.mubr.bf16.mxu1 %v876_v6  ;;  %v1130_v4 = vld [vmem:[%s1798_s21 + $0x20] sm:$0xff] }
 0x270   : > { %v857_v15 = vadd.f32 1.0, %v849_v26 }
 0x271   : > { %v872_v47 = vmul.f32 %v864_v57, %v642_v37  ;;  %v1133_v57 = vld [vmem:[%s1798_s21 + $0x38] sm:$0xff] }
 0x272   : > { %v865_v51 = vmul.f32 %v857_v15, %v657_v59 }
 0x274   : > { %v873_v33 = vmul.f32 %v865_v51, %v646_v45 }
 0x276   : > { %v877_v35 = vpack.c.bf16 %v873_v33, %v872_v47  ;;  %v1131_v47 = vld [vmem:[%s1798_s21 + $0x28] sm:$0xff] }
 0x278   : > { %1298 = vmatmul.mubr.bf16.gmra.mrb[4].mxu1 %v877_v35 }
 0x33b   : > { %v1295_v21 = vpop.f32.mrb[0].mxu1 }
 0x33c   : > { %v992_v25 = vadd.f32 %v1295_v21, %v1238_v18  ;;  %v983_v56 = vpop.f32.mrb[1].mxu1 }
 0x33d   : > { %v984_v28 = vadd.f32 %v1238_v18, %v983_v56  ;;  %v1296_v8 = vpop.f32.mrb[2].mxu1 }
 0x33e   : > { %v995_v61 = vadd.f32 %v1296_v8, %v1238_v18  ;;  %v986_v36 = vpop.f32.mrb[3].mxu1  ;;  %v1016_v42 = vadd.f32 %v992_v25, %v1466_v1 }
 0x33f   : > { %v987_v32 = vadd.f32 %v1238_v18, %v986_v36  ;;  %v1014_v38 = vadd.f32 %v984_v28, %v1464_v0 }
 0x340   : > { %v1017_v30 = vadd.f32 %v995_v61, %v1474_v5 }
 0x341   : > { %v1015_v22 = vadd.f32 %v987_v32, %v1468_v2 }
 0x342   : > { %v1023_v23 = vpack.c.bf16 %v1017_v30, %v1016_v42 }
 0x343   : > { %v1022_v40 = vpack.c.bf16 %v1015_v22, %v1014_v38 }
 0x345   : > { %1305 = vmatprep.mubr.msk.bf16.mxu0 %vm391_vm0, %v1022_v40 }
 0x346   : > { %1306 = vmatmul.mubr.msk.bf16.vlgmr.msra.gmra.mrb[16].mxu0 %vm391_vm0, %v1023_v23 }
 0x34b   : > { %v1299_v54 = vpop.f32.mrb[4].mxu1 }
 0x34c   : > { %v1008_v20 = vadd.f32 %v1299_v54, %v1238_v18  ;;  %v999_v17 = vpop.f32.mrb[5].mxu1 }
 0x34d   : > { %v1000_v9 = vadd.f32 %v1238_v18, %v999_v17  ;;  %v1300_v41 = vpop.f32.mrb[6].mxu1 }
 0x34e   : > { %v1011_v10 = vadd.f32 %v1300_v41, %v1238_v18  ;;  %v1002_v1 = vpop.f32.mrb[7].mxu1  ;;  %v1020_v0 = vadd.f32 %v1008_v20, %v1488_v12 }
 0x34f   : > { %v1003_v49 = vadd.f32 %v1238_v18, %v1002_v1  ;;  %v1018_v5 = vadd.f32 %v1000_v9, %v1478_v7  ;;  %v1247_v7 = vld [vmem:[%s1845_s9] ss:$0 sm:$0xff] }
 0x350   : > { %v1021_v2 = vadd.f32 %v1011_v10, %v1490_v13  ;;  %v1128_v13 = vld [vmem:[%s1798_s21 + $0x10] sm:$0xff] }
 0x351   : > { %v1019_v27 = vadd.f32 %v1003_v49, %v1849_v19 }
 0x352   : > { %v1025_v48 = vpack.c.bf16 %v1021_v2, %v1020_v0 }
 0x353   : > { %v1024_v24 = vpack.c.bf16 %v1019_v27, %v1018_v5 }
 0x355   : > { %1309 = vmatprep.mubr.msk.bf16.mxu0 %vm391_vm0, %v1024_v24 }
 0x356   : > { %1310 = vmatmul.mubr.msk.bf16.gmra.mrb[20].mxu0 %vm391_vm0, %v1025_v48 }
 0x419   : > { %v1307_v12 = vpop.f32.mrb[16].mxu0 }
 0x41a   : > { %v1104_v39 = vadd.f32 %v1307_v12, %v1247_v7  ;;  %v1095_v63 = vpop.f32.mrb[17].mxu0 }
 0x41b   : > { %v1096_v58 = vadd.f32 %v1247_v7, %v1095_v63  ;;  %v1308_v16 = vpop.f32.mrb[18].mxu0 }
 0x41c   : > { %v1136_v52 = vadd.f32 %v1128_v13, %v1104_v39  ;;  %v1107_v34 = vadd.f32 %v1308_v16, %v1247_v7  ;;  %v1098_v43 = vpop.f32.mrb[19].mxu0 }
 0x41d   : > { %v1134_v31 = vadd.f32 %v1126_v14, %v1096_v58  ;;  %v1099_v55 = vadd.f32 %v1247_v7, %v1098_v43 }
 0x41e   : > { %1144 = vst.msk [vmem:[%s1809_s26 + $0x10] sm:$0xff] %vm391_vm0, %v1136_v52  ;;  %v1137_v44 = vadd.f32 %v1129_v53, %v1107_v34 }
 0x41f   : > { %1142 = vst.msk [vmem:[%s1809_s26] sm:$0xff] %vm391_vm0, %v1134_v31  ;;  %v1135_v60 = vadd.f32 %v1127_v46, %v1099_v55 }
 0x420   : > { %1145 = vst.msk [vmem:[%s1809_s26 + $0x18] sm:$0xff] %vm391_vm0, %v1137_v44 }
 0x421   : > { %1143 = vst.msk [vmem:[%s1809_s26 + $0x8] sm:$0xff] %vm391_vm0, %v1135_v60 }
 0x429   : > { %v1311_v29 = vpop.f32.mrb[20].mxu0 }
 0x42a   : > { %v1120_v50 = vadd.f32 %v1311_v29, %v1247_v7  ;;  %v1111_v11 = vpop.f32.mrb[21].mxu0 }
 0x42b   : > { %v1112_v6 = vadd.f32 %v1247_v7, %v1111_v11  ;;  %v1312_v37 = vpop.f32.mrb[22].mxu0 }
 0x42c   : > { %v1140_v26 = vadd.f32 %v1132_v62, %v1120_v50  ;;  %v1123_v59 = vadd.f32 %v1312_v37, %v1247_v7  ;;  %v1114_v15 = vpop.f32.mrb[23].mxu0 }
 0x42d   : > { %v1138_v45 = vadd.f32 %v1130_v4, %v1112_v6  ;;  %v1115_v51 = vadd.f32 %v1247_v7, %v1114_v15 }
 0x42e   : > { %1148 = vst.msk [vmem:[%s1809_s26 + $0x30] sm:$0xff] %vm391_vm0, %v1140_v26  ;;  %v1141_v33 = vadd.f32 %v1133_v57, %v1123_v59 }
 0x42f   : > { %1146 = vst.msk [vmem:[%s1809_s26 + $0x20] sm:$0xff] %vm391_vm0, %v1138_v45  ;;  %v1139_v35 = vadd.f32 %v1131_v47, %v1115_v51 }
 0x430   : > { %1149 = vst.msk [vmem:[%s1809_s26 + $0x38] sm:$0xff] %vm391_vm0, %v1141_v33 }
 0x431   : > { %1147 = vst.msk [vmem:[%s1809_s26 + $0x28] sm:$0xff] %vm391_vm0, %v1139_v35 }
 0x432 PF: > { %s20_s13 = sadd.s32 1, %s1392_s13  }
 0x433   : > { %p17_p4 = scmp.ge.s32.totalorder %s20_s13, 4  }
 0x435   :  { %19 = sbr.rel (!%p17_p4) target bundleno = 1 (0x1), region = 93 }

// kernel: cross_attn_up_block.11
= control target key start
LH: loop header
LB: loop body
LE: loop exit
PB: predicated region body
PF: predicated region fallthrough
CT: control target
= control target key end

     0   :  { %s2264_s30 = smov 0   ;;  %s2653_s0 = inlined_call_operand.vmem [shape: f32[2,64,32], index: 0, kind: input, shape index: {}]   ;;  %s2654_s1 = inlined_call_operand.vmem [shape: bf16[2,8,64], index: 1, kind: input, shape index: {}]   ;;  %s2655_s2 = inlined_call_operand.vmem [shape: f32[1,32], index: 2, kind: input, shape index: {}]   ;;  %s2656_s3 = inlined_call_operand.vmem [shape: f32[1,32], index: 3, kind: input, shape index: {}]   ;;  %s2657_s4 = inlined_call_operand.vmem [shape: bf16[2,32,16], index: 4, kind: input, shape index: {}]   ;;  %s2658_s5 = inlined_call_operand.vmem [shape: bf16[2,64,16], index: 5, kind: input, shape index: {}]   ;;  %s2659_s6 = inlined_call_operand.vmem [shape: bf16[2,64,16], index: 6, kind: input, shape index: {}]   ;;  %s2660_s7 = inlined_call_operand.vmem [shape: bf16[2,16,32], index: 7, kind: input, shape index: {}]   ;;  %s2661_s8 = inlined_call_operand.vmem [shape: f32[1,32], index: 8, kind: input, shape index: {}]   ;;  %s2662_s9 = inlined_call_operand.vmem [shape: f32[2,64,32], index: 9, kind: output, shape index: {}]  }
   0x1 LB: > { %s1781_s10 = sadd.s32 4294967295, %s2210_s30   ;;  %p1785_p0 = scmp.ge.s32.totalorder %s2210_s30, 1  ;;  %s2210_s30 = sphi %s2264_s30, %s19_s30  }
   0x2   : > { %p296_p1 = scmp.lt.s32.totalorder %s2210_s30, 3 }
   0x4   : > { %p297_p2 = pnand %p1785_p0, %p296_p1 }
   0x5   : > { %p336_p3 = scmp.lt.s32.totalorder (!%p297_p2), %s1781_s10, 1  ;;  %vm361_vm0 = vcmask (!%p297_p2), 261120   ;;  %v2094_v56 = vld [vmem:[%s2657_s4] sm:$0xff] (!%p297_p2)   ;;  %v2095_v57 = vld [vmem:[%s2657_s4 + $0x8] sm:$0xff] (!%p297_p2)   ;;  %v2212_v58 = vmov (!%p297_p2), 0.0   ;;  %vm2213_vm1 = vmmov (!%p297_p2), 0  }
   0x6   : > { %300 = sbr.rel (%p297_p2) target bundleno = 2348 (0x92c), region = 56  ;;  %1940 = vmatprep.subr.bf16.mxu1 (!%p297_p2), %v2094_v56  ;;  %1964 = vmatprep.subr.bf16.mxu0 (!%p297_p2), %v2212_v58  ;;  %vm633_vm2 = vcmask (!%p297_p2), 523264   ;;  %vm754_vm3 = vcmask (!%p297_p2), 130048   ;;  %vm835_vm4 = vcmask (!%p297_p2), 64512   ;;  %vm941_vm5 = vcmask (!%p297_p2), 1043456  }
   0x7   : > { %1941 = vmatpush3.bf16.msra.mxu1 (!%p297_p2), %v2094_v56  ;;  %1972 = vmatprep.mubr.msk.bf16.mxu0 (!%p297_p2), %vm2213_vm1, %v2212_v58 }
   0x8   : > { %1942 = vmatprep.subr.bf16.mxu1 (!%p297_p2), %v2095_v57 }
   0xb   : > { %1943 = vmatpush3.bf16.msra.mxu1 (!%p297_p2), %v2095_v57 }
   0xc   : > { %1952 = vmatprep.subr.bf16.mxu1 (!%p297_p2), %v2212_v58 }
   0xd   : > { %s2664_s10 = smov (!%p336_p3, %s1781_s10), 1 }
   0xe   : > { %s1876_s11 = sshll.u32 %s2664_s10, 6  ;;  %s1788_s29 = sshll.u32 %s2664_s10, 2 }
   0xf   : > { %s2280_s14 = scalar_lea.vmem %s2653_s0, %s1876_s11  ;;  %s344_s17 = scalar_lea.vmem %s2654_s1, %s1788_s29 }
  0x10   : > { %v351_v0 = vld [vmem:[%s2280_s14] sm:$0xff]  ;;  %v353_v1 = vld [vmem:[%s2280_s14 + $0x10] sm:$0xff]  ;;  %v352_v2 = vld [vmem:[%s2280_s14 + $0x8] sm:$0xff]  ;;  %s2624_s20 = scalar_lea.vmem %s2662_s9, %s1876_s11 }
  0x11   : > { %v362_v3 = vsel %vm361_vm0, %v351_v0, 0.0  ;;  %v368_v4 = vsel %vm361_vm0, %v353_v1, 0.0  ;;  %v354_v5 = vld [vmem:[%s2280_s14 + $0x18] sm:$0xff]  ;;  %v355_v6 = vld [vmem:[%s2280_s14 + $0x20] sm:$0xff]  ;;  %v356_v7 = vld [vmem:[%s2280_s14 + $0x28] sm:$0xff]  ;;  %v365_v8 = vsel %vm361_vm0, %v352_v2, 0.0 }
  0x12   : > { %363 = vadd.xlane.f32.xlu0 %v362_v3  ;;  %369 = vadd.xlane.f32.xlu1 %v368_v4  ;;  %v371_v9 = vsel %vm361_vm0, %v354_v5, 0.0  ;;  %v374_v10 = vsel %vm361_vm0, %v355_v6, 0.0  ;;  %v377_v11 = vsel %vm361_vm0, %v356_v7, 0.0  ;;  %v357_v12 = vld [vmem:[%s2280_s14 + $0x30] sm:$0xff]  ;;  %v358_v13 = vld [vmem:[%s2280_s14 + $0x38] sm:$0xff] }
  0x13   : > { %v380_v14 = vsel %vm361_vm0, %v357_v12, 0.0  ;;  %v383_v15 = vsel %vm361_vm0, %v358_v13, 0.0 }
  0x16   : > { %366 = vadd.xlane.f32.xlu0 %v365_v8  ;;  %372 = vadd.xlane.f32.xlu1 %v371_v9 }
  0x1a   : > { %375 = vadd.xlane.f32.xlu0 %v374_v10  ;;  %378 = vadd.xlane.f32.xlu1 %v377_v11 }
  0x1e   : > { %381 = vadd.xlane.f32.xlu0 %v380_v14  ;;  %384 = vadd.xlane.f32.xlu1 %v383_v15 }
  0x9f   : > { %v364_v16 = vpop.xlane.xlu0 %363  ;;  %v370_v17 = vpop.xlane.xlu1 %369 }
  0xa0   : > { %v387_v18 = vmul.f32 0.03125, %v364_v16  ;;  %v389_v19 = vmul.f32 0.03125, %v370_v17 }
  0xa2   : > { %v2298_v20 = vsub.f32 %v351_v0, %v387_v18  ;;  %v2300_v21 = vsub.f32 %v353_v1, %v389_v19 }
  0xa3   : > { %v367_v22 = vpop.xlane.xlu0 %366  ;;  %v373_v23 = vpop.xlane.xlu1 %372 }
  0xa4   : > { %v388_v24 = vmul.f32 0.03125, %v367_v22  ;;  %v390_v25 = vmul.f32 0.03125, %v373_v23  ;;  %v403_v26 = vmul.f32 %v2298_v20, %v2298_v20  ;;  %v405_v27 = vmul.f32 %v2300_v21, %v2300_v21  ;;  %v1791_v22 = vld [vmem:[%s2655_s2] ss:$0 sm:$0xff] }
  0xa6   : > { %v2306_v28 = vsub.f32 %v352_v2, %v388_v24  ;;  %v2308_v29 = vsub.f32 %v354_v5, %v390_v25  ;;  %v411_v30 = vsel %vm361_vm0, %v403_v26, 0.0  ;;  %v417_v33 = vsel %vm361_vm0, %v405_v27, 0.0 }
  0xa7   : > { %412 = vadd.xlane.f32.xlu0 %v411_v30  ;;  %v376_v31 = vpop.xlane.xlu0 %375  ;;  %v379_v32 = vpop.xlane.xlu1 %378 }
  0xa8   : > { %v391_v34 = vmul.f32 0.03125, %v376_v31  ;;  %v392_v35 = vmul.f32 0.03125, %v379_v32  ;;  %v404_v36 = vmul.f32 %v2306_v28, %v2306_v28  ;;  %v406_v37 = vmul.f32 %v2308_v29, %v2308_v29 }
  0xaa   : > { %v2316_v38 = vsub.f32 %v355_v6, %v391_v34  ;;  %v2318_v39 = vsub.f32 %v356_v7, %v392_v35  ;;  %v414_v40 = vsel %vm361_vm0, %v404_v36, 0.0  ;;  %v420_v43 = vsel %vm361_vm0, %v406_v37, 0.0 }
  0xab   : > { %418 = vadd.xlane.f32.xlu0 %v417_v33  ;;  %415 = vadd.xlane.f32.xlu1 %v414_v40  ;;  %v382_v41 = vpop.xlane.xlu0 %381  ;;  %v385_v42 = vpop.xlane.xlu1 %384 }
  0xac   : > { %v393_v44 = vmul.f32 0.03125, %v382_v41  ;;  %v394_v45 = vmul.f32 0.03125, %v385_v42  ;;  %v407_v46 = vmul.f32 %v2316_v38, %v2316_v38  ;;  %v408_v47 = vmul.f32 %v2318_v39, %v2318_v39 }
  0xae   : > { %v2326_v48 = vsub.f32 %v357_v12, %v393_v44  ;;  %v2328_v49 = vsub.f32 %v358_v13, %v394_v45  ;;  %v423_v50 = vsel %vm361_vm0, %v407_v46, 0.0  ;;  %v426_v51 = vsel %vm361_vm0, %v408_v47, 0.0  ;;  %v2096_v47 = vld [vmem:[%s2658_s5] sm:$0xff]  }
  0xaf   : > { %421 = vadd.xlane.f32.xlu1 %v420_v43  ;;  %424 = vadd.xlane.f32.xlu0 %v423_v50 }
  0xb0   : > { %v409_v52 = vmul.f32 %v2326_v48, %v2326_v48  ;;  %v410_v53 = vmul.f32 %v2328_v49, %v2328_v49 }
  0xb2   : > { %v429_v54 = vsel %vm361_vm0, %v409_v52, 0.0  ;;  %v432_v55 = vsel %vm361_vm0, %v410_v53, 0.0 }
  0xb3   : > { %427 = vadd.xlane.f32.xlu1 %v426_v51  ;;  %430 = vadd.xlane.f32.xlu0 %v429_v54 }
  0xb7   : > { %433 = vadd.xlane.f32.xlu1 %v432_v55 }
 0x134   : > { %v413_v59 = vpop.xlane.xlu0 %412 }
 0x135   : > { %v435_v60 = vmul.f32 0.03125, %v413_v59  ;;  %v2098_v59 = vld [vmem:[%s2658_s5 + $0x10] sm:$0xff]  }
 0x137   : > { %v443_v61 = vadd.f32 1e-05, %v435_v60 }
 0x138   : > { %v416_v62 = vpop.xlane.xlu1 %415  ;;  %v419_v63 = vpop.xlane.xlu0 %418 }
 0x139   : > { %2116 = vrsqrt.f32 %v443_v61  ;;  %v436_v0 = vmul.f32 0.03125, %v416_v62  ;;  %v437_v1 = vmul.f32 0.03125, %v419_v63  ;;  %v2099_v61 = vld [vmem:[%s2658_s5 + $0x18] sm:$0xff]   ;;  %v2396_v62 = vld [vmem:[%s344_s17] sm:$0xf] }
 0x13b   : > { %v444_v2 = vadd.f32 1e-05, %v436_v0  ;;  %v445_v3 = vadd.f32 1e-05, %v437_v1 }
 0x13c   : > { %v422_v4 = vpop.xlane.xlu1 %421  ;;  %v425_v5 = vpop.xlane.xlu0 %424 }
 0x13d   : > { %2118 = vrsqrt.f32 %v444_v2  ;;  %v438_v6 = vmul.f32 0.03125, %v422_v4  ;;  %v439_v7 = vmul.f32 0.03125, %v425_v5 }
 0x13e   : > { %2120 = vrsqrt.f32 %v445_v3 }
 0x13f   : > { %v446_v8 = vadd.f32 1e-05, %v438_v6  ;;  %v447_v9 = vadd.f32 1e-05, %v439_v7 }
 0x140   : > { %v428_v10 = vpop.xlane.xlu1 %427  ;;  %v431_v11 = vpop.xlane.xlu0 %430 }
 0x141   : > { %2122 = vrsqrt.f32 %v446_v8  ;;  %v440_v12 = vmul.f32 0.03125, %v428_v10  ;;  %v441_v13 = vmul.f32 0.03125, %v431_v11 }
 0x142   : > { %2124 = vrsqrt.f32 %v447_v9 }
 0x143   : > { %v2117_v14 = vpop.eup %2116  ;;  %v448_v15 = vadd.f32 1e-05, %v440_v12  ;;  %v449_v16 = vadd.f32 1e-05, %v441_v13 }
 0x144   : > { %v434_v17 = vpop.xlane.xlu1 %433  ;;  %v459_v18 = vmul.f32 %v2117_v14, %v2298_v20  ;;  %v1792_v20 = vld [vmem:[%s2656_s3] ss:$0 sm:$0xff] }
 0x145   : > { %2126 = vrsqrt.f32 %v448_v15  ;;  %v442_v19 = vmul.f32 0.03125, %v434_v17 }
 0x146   : > { %2128 = vrsqrt.f32 %v449_v16  ;;  %v473_v27 = vmul.f32 %v1791_v22, %v459_v18 }
 0x147   : > { %v2119_v23 = vpop.eup %2118  ;;  %v450_v24 = vadd.f32 1e-05, %v442_v19 }
 0x148   : > { %v2121_v25 = vpop.eup %2120  ;;  %v460_v26 = vmul.f32 %v2119_v23, %v2306_v28  ;;  %v487_v35 = vadd.f32 %v1792_v20, %v473_v27 }
 0x149   : > { %v461_v30 = vmul.f32 %v2121_v25, %v2300_v21  ;;  %2130 = vrsqrt.f32 %v450_v24  ;;  %v2100_v24 = vld [vmem:[%s2657_s4 + $0x10] sm:$0xff]  }
 0x14a   : > { %v474_v31 = vmul.f32 %v1791_v22, %v460_v26 }
 0x14b   : > { %v2123_v32 = vpop.eup %2122  ;;  %v475_v37 = vmul.f32 %v1791_v22, %v461_v30  ;;  %v2101_v30 = vld [vmem:[%s2657_s4 + $0x18] sm:$0xff]  }
 0x14c   : > { %v2125_v33 = vpop.eup %2124  ;;  %v462_v34 = vmul.f32 %v2123_v32, %v2308_v29  ;;  %v488_v36 = vadd.f32 %v1792_v20, %v474_v31  ;;  %v2103_v31 = vld [vmem:[%s2659_s6 + $0x8] sm:$0xff]   ;;  %v2104_v32 = vld [vmem:[%s2659_s6 + $0x10] sm:$0xff]  }
 0x14d   : > { %v463_v40 = vmul.f32 %v2125_v33, %v2316_v38  ;;  %v489_v44 = vadd.f32 %v1792_v20, %v475_v37  ;;  %v2105_v33 = vld [vmem:[%s2659_s6 + $0x18] sm:$0xff]  }
 0x14e   : > { %v2359_v41 = vpack.c.bf16 %v488_v36, %v487_v35  ;;  %v476_v28 = vmul.f32 %v1791_v22, %v462_v34 }
 0x14f   : > { %v2127_v42 = vpop.eup %2126  ;;  %v477_v46 = vmul.f32 %v1791_v22, %v463_v40 }
 0x150   : > { %v2129_v21 = vpop.eup %2128  ;;  %v464_v43 = vmul.f32 %v2127_v42, %v2318_v39  ;;  %1944 = vmatprep.mubr.msk.bf16.mxu1 %vm361_vm0, %v2359_v41  ;;  %v490_v45 = vadd.f32 %v1792_v20, %v476_v28 }
 0x151   : > { %v465_v29 = vmul.f32 %v2129_v21, %v2326_v48  ;;  %v491_v39 = vadd.f32 %v1792_v20, %v477_v46  ;;  %v2097_v48 = vld [vmem:[%s2658_s5 + $0x8] sm:$0xff]  }
 0x152   : > { %v2368_v38 = vpack.c.bf16 %v490_v45, %v489_v44  ;;  %v478_v50 = vmul.f32 %v1791_v22, %v464_v43 }
 0x153   : > { %v2131_v51 = vpop.eup %2130  ;;  %v479_v54 = vmul.f32 %v1791_v22, %v465_v29 }
 0x154   : > { %v466_v52 = vmul.f32 %v2131_v51, %v2328_v49  ;;  %1945 = vmatmul.mubr.msk.bf16.vlgmr.msra.gmra.mrb[0].mxu1 %vm361_vm0, %v2368_v38  ;;  %v492_v53 = vadd.f32 %v1792_v20, %v478_v50 }
 0x155   : > { %1953 = vmatpush3.bf16.msra.mxu1 %v2096_v47  ;;  %v493_v49 = vadd.f32 %v1792_v20, %v479_v54 }
 0x156   : > { %v2376_v55 = vpack.c.bf16 %v492_v53, %v491_v39  ;;  %1954 = vmatprep.subr.bf16.mxu1 %v2212_v58  ;;  %v480_v56 = vmul.f32 %v1791_v22, %v466_v52 }
 0x158   : > { %1948 = vmatprep.mubr.msk.bf16.mxu1 %vm361_vm0, %v2376_v55  ;;  %v494_v57 = vadd.f32 %v1792_v20, %v480_v56  ;;  %v2102_v20 = vld [vmem:[%s2659_s6] sm:$0xff]  }
 0x159   : > { %1955 = vmatpush3.bf16.msra.mxu1 %v2097_v48  ;;  %1965 = vmatpush3.bf16.msra.mxu0 %v2102_v20 }
 0x15a   : > { %v499_v60 = vpack.c.bf16 %v494_v57, %v493_v49  ;;  %1956 = vmatprep.subr.bf16.mxu1 %v2212_v58  ;;  %1966 = vmatprep.subr.bf16.mxu0 %v2212_v58 }
 0x15c   : > { %1949 = vmatmul.mubr.msk.bf16.gmra.mrb[4].mxu1 %vm361_vm0, %v499_v60 }
 0x15d   : > { %1957 = vmatpush3.bf16.msra.mxu1 %v2098_v59  ;;  %1960 = vmatprep.mubr.msk.bf16.mxu1 %vm2213_vm1, %v2212_v58 }
 0x15e   : > { %1958 = vmatprep.subr.bf16.mxu1 %v2212_v58  ;;  %1967 = vmatpush3.bf16.msra.mxu0 %v2103_v31 }
 0x15f   : > { %1968 = vmatprep.subr.bf16.mxu0 %v2212_v58 }
 0x161   : > { %1959 = vmatpush3.bf16.msra.mxu1 %v2099_v61 }
 0x162   : > { %1969 = vmatpush3.bf16.msra.mxu0 %v2104_v32 }
 0x163   : > { %1970 = vmatprep.subr.bf16.mxu0 %v2212_v58 }
 0x164   : > { %1961 = vmatmul.mubr.msk.bf16.vlgmr.msra.gmra.mrb[8].mxu1 %vm633_vm2, %v2396_v62 }
 0x166   : > { %1971 = vmatpush3.bf16.msra.mxu0 %v2105_v33 }
 0x169   : > { %1973 = vmatmul.mubr.msk.bf16.vlgmr.msra.gmra.mrb[0].mxu0 %vm633_vm2, %v2396_v62 }
 0x227   : > { %v1946_v63 = vpop.f32.mrb[0].mxu1 }
 0x228   : > { %v562_v0 = vpop.f32.mrb[1].mxu1  ;;  %v595_v2 = vmul.f32 0.25, %v1946_v63 }
 0x229   : > { %v1947_v1 = vpop.f32.mrb[2].mxu1  ;;  %v593_v5 = vmul.f32 0.25, %v562_v0 }
 0x22a   : > { %v596_v3 = vmul.f32 0.25, %v1947_v1  ;;  %v565_v4 = vpop.f32.mrb[3].mxu1 }
 0x22b   : > { %v594_v6 = vmul.f32 0.25, %v565_v4 }
 0x22c   : > { %v750_v7 = vpack.c.bf16 %v596_v3, %v595_v2 }
 0x22d   : > { %v749_v8 = vpack.c.bf16 %v594_v6, %v593_v5 }
 0x22f   : > { %v1950_v9 = vpop.f32.mrb[4].mxu1  ;;  %1978 = vmatprep.mubr.msk.bf16.mxu1 %vm754_vm3, %v749_v8 }
 0x230   : > { %v578_v10 = vpop.f32.mrb[5].mxu1  ;;  %v599_v12 = vmul.f32 0.25, %v1950_v9 }
 0x231   : > { %v1951_v11 = vpop.f32.mrb[6].mxu1  ;;  %v597_v15 = vmul.f32 0.25, %v578_v10 }
 0x232   : > { %v600_v13 = vmul.f32 0.25, %v1951_v11  ;;  %v581_v14 = vpop.f32.mrb[7].mxu1 }
 0x233   : > { %v598_v16 = vmul.f32 0.25, %v581_v14 }
 0x234   : > { %v752_v17 = vpack.c.bf16 %v600_v13, %v599_v12 }
 0x235   : > { %v751_v18 = vpack.c.bf16 %v598_v16, %v597_v15 }
 0x237   : > { %v671_v19 = vpop.f32.mrb[8].mxu1 }
 0x238   : > { %v753_v22 = vpack.c.bf16 %v671_v19, %v671_v19  ;;  %v1962_v23 = vpop.f32.mrb[9].mxu1 }
 0x239   : > { %v674_v25 = vpop.f32.mrb[10].mxu1 }
 0x23a   : > { %v768_v26 = vsel %vm754_vm3, %v753_v22, 0  ;;  %v1963_v27 = vpop.f32.mrb[11].mxu1  ;;  %2080 = vmatprep.subr.msk.bf16.mxu1 %vm754_vm3, %v753_v22 }
 0x23b   : > { %1977 = vmatpush3.bf16.xpose.msra.mxu1 %v768_v26 }
 0x23c   : > { %1996 = vmatprep.subr.bf16.mxu1 %v2100_v24 }
 0x242   : > { %1979 = vmatmul.mubr.msk.bf16.vlgmr.msra.gmra.mrb[12].mxu1 %vm754_vm3, %v750_v7 }
 0x243   : > { %1982 = vmatprep.mubr.msk.bf16.mxu1 %vm754_vm3, %v751_v18  ;;  %1997 = vmatpush3.bf16.msra.mxu1 %v2100_v24 }
 0x244   : > { %1998 = vmatprep.subr.bf16.mxu1 %v2101_v30 }
 0x247   : > { %1999 = vmatpush3.bf16.msra.mxu1 %v2101_v30 }
 0x248   : > { %2020 = vmatprep.subr.bf16.mxu1 %v2212_v58 }
 0x24a   : > { %1983 = vmatmul.mubr.msk.bf16.gmra.mrb[16].mxu1 %vm754_vm3, %v752_v17 }
 0x24b   : > { %2000 = vmatprep.mubr.msk.bf16.mxu1 %vm361_vm0, %v2359_v41 }
 0x252   : > { %2001 = vmatmul.mubr.msk.bf16.vlgmr.msra.gmra.mrb[20].mxu1 %vm361_vm0, %v2368_v38 }
 0x253   : > { %2004 = vmatprep.mubr.msk.bf16.mxu1 %vm361_vm0, %v2376_v55 }
 0x25a   : > { %2005 = vmatmul.mubr.msk.bf16.gmra.mrb[24].mxu1 %vm361_vm0, %v499_v60 }
 0x25b   : > { %2028 = vmatprep.mubr.msk.bf16.mxu1 %vm2213_vm1, %v2212_v58 }
 0x315   : > { %v1980_v34 = vpop.f32.mrb[12].mxu1 }
 0x316   : > { %v804_v35 = vpop.f32.mrb[13].mxu1  ;;  %v842_v28 = vsel %vm835_vm4, %v1980_v34, -inf }
 0x317   : > { %v1981_v36 = vpop.f32.mrb[14].mxu1  ;;  %v836_v37 = vsel %vm835_vm4, %v804_v35, -inf }
 0x318   : > { %837 = vmax.xlane.f32.xlu0 %v836_v37  ;;  %v807_v40 = vpop.f32.mrb[15].mxu1  ;;  %v845_v21 = vsel %vm835_vm4, %v1981_v36, -inf }
 0x319   : > { %v839_v41 = vsel %vm835_vm4, %v807_v40, -inf }
 0x31a   : > { %840 = vmax.xlane.f32.xlu1 %v839_v41 }
 0x31c   : > { %843 = vmax.xlane.f32.xlu0 %v842_v28 }
 0x31d   : > { %v1984_v42 = vpop.f32.mrb[16].mxu1 }
 0x31e   : > { %846 = vmax.xlane.f32.xlu1 %v845_v21  ;;  %v820_v43 = vpop.f32.mrb[17].mxu1  ;;  %v854_v47 = vsel %vm835_vm4, %v1984_v42, -inf }
 0x31f   : > { %v2443_v44 = vpop.f32.mrb[18].mxu1  ;;  %v848_v45 = vsel %vm835_vm4, %v820_v43, -inf }
 0x320   : > { %849 = vmax.xlane.f32.xlu0 %v848_v45  ;;  %v823_v46 = vpop.f32.mrb[19].mxu1  ;;  %v857_v50 = vsel %vm835_vm4, %v2443_v44, -inf }
 0x321   : > { %v851_v29 = vsel %vm835_vm4, %v823_v46, -inf }
 0x322   : > { %852 = vmax.xlane.f32.xlu1 %v851_v29 }
 0x324   : > { %855 = vmax.xlane.f32.xlu0 %v854_v47  ;;  %v743_v47 = vpop.f32.mrb[0].mxu0 }
 0x325   : > { %v2002_v38 = vpop.f32.mrb[20].mxu1 }
 0x326   : > { %v1067_v51 = vpop.f32.mrb[21].mxu1  ;;  %858 = vmax.xlane.f32.xlu1 %v857_v50  ;;  %v2450_v39 = vmul.f32 0.25, %v2002_v38  ;;  %v1974_v38 = vpop.f32.mrb[1].mxu0 }
 0x327   : > { %v2003_v52 = vpop.f32.mrb[22].mxu1  ;;  %v2454_v48 = vmul.f32 0.25, %v1067_v51  ;;  %v746_v50 = vpop.f32.mrb[2].mxu0 }
 0x328   : > { %v2452_v53 = vmul.f32 0.25, %v2003_v52  ;;  %v1070_v54 = vpop.f32.mrb[23].mxu1  ;;  %v1975_v51 = vpop.f32.mrb[3].mxu0  ;;  %v928_v52 = vpack.c.bf16 %v743_v47, %v743_v47 }
 0x329   : > { %v2456_v55 = vmul.f32 0.25, %v1070_v54  ;;  %v2110_v51 = vld [vmem:[%s2659_s6 + $0x20] sm:$0xff]  }
 0x32a   : > { %v1253_v56 = vpack.c.bf16 %v2452_v53, %v2450_v39  ;;  %v943_v54 = vsel %vm941_vm5, %v928_v52, 0  ;;  %2081 = vmatprep.subr.msk.bf16.mxu0 %vm941_vm5, %v928_v52  ;;  %2021 = vmatpush3.bf16.msra.mxu1 %v2110_v51  ;;  %v2111_v39 = vld [vmem:[%s2659_s6 + $0x28] sm:$0xff]   ;;  %v2112_v53 = vld [vmem:[%s2659_s6 + $0x30] sm:$0xff]  }
 0x32b   : > { %v1252_v49 = vpack.c.bf16 %v2456_v55, %v2454_v48  ;;  %1987 = vmatpush3.bf16.msra.mxu0 %v943_v54  ;;  %2022 = vmatprep.subr.bf16.mxu1 %v2212_v58 }
 0x32c   : > { %2008 = vmatprep.subr.bf16.mxu0 %v2212_v58 }
 0x32d   : > { %v2006_v57 = vpop.f32.mrb[24].mxu1 }
 0x32e   : > { %v1083_v59 = vpop.f32.mrb[25].mxu1  ;;  %v2462_v61 = vmul.f32 0.25, %v2006_v57  ;;  %2023 = vmatpush3.bf16.msra.mxu1 %v2111_v39 }
 0x32f   : > { %v2007_v60 = vpop.f32.mrb[26].mxu1  ;;  %v2466_v1 = vmul.f32 0.25, %v1083_v59  ;;  %2024 = vmatprep.subr.bf16.mxu1 %v2212_v58 }
 0x330   : > { %v2464_v63 = vmul.f32 0.25, %v2007_v60  ;;  %v1086_v0 = vpop.f32.mrb[27].mxu1 }
 0x331   : > { %v2468_v2 = vmul.f32 0.25, %v1086_v0 }
 0x332   : > { %v1255_v3 = vpack.c.bf16 %v2464_v63, %v2462_v61  ;;  %2025 = vmatpush3.bf16.msra.mxu1 %v2112_v53 }
 0x333   : > { %v1254_v4 = vpack.c.bf16 %v2468_v2, %v2466_v1  ;;  %2026 = vmatprep.subr.bf16.mxu1 %v2212_v58 }
 0x3a5   : > { %v838_v5 = vpop.xlane.xlu0 %837 }
 0x3a6   : > { %v860_v6 = vsub.f32 %v804_v35, %v838_v5 }
 0x3a7   : > { %v841_v7 = vpop.xlane.xlu1 %840 }
 0x3a8   : > { %v868_v8 = vmul.f32 1.442695, %v860_v6  ;;  %v861_v9 = vsub.f32 %v807_v40, %v841_v7 }
 0x3a9   : > { %v844_v10 = vpop.xlane.xlu0 %843 }
 0x3aa   : > { %2132 = vpow2.f32 %v868_v8  ;;  %v870_v11 = vmul.f32 1.442695, %v861_v9  ;;  %v862_v12 = vsub.f32 %v1980_v34, %v844_v10 }
 0x3ab   : > { %v847_v13 = vpop.xlane.xlu1 %846 }
 0x3ac   : > { %2134 = vpow2.f32 %v870_v11  ;;  %v872_v14 = vmul.f32 1.442695, %v862_v12  ;;  %v863_v15 = vsub.f32 %v1981_v36, %v847_v13 }
 0x3ad   : > { %v850_v16 = vpop.xlane.xlu0 %849 }
 0x3ae   : > { %2136 = vpow2.f32 %v872_v14  ;;  %v874_v17 = vmul.f32 1.442695, %v863_v15  ;;  %v864_v18 = vsub.f32 %v820_v43, %v850_v16 }
 0x3af   : > { %v853_v19 = vpop.xlane.xlu1 %852 }
 0x3b0   : > { %2138 = vpow2.f32 %v874_v17  ;;  %v876_v22 = vmul.f32 1.442695, %v864_v18  ;;  %v865_v23 = vsub.f32 %v823_v46, %v853_v19  ;;  %v2106_v19 = vld [vmem:[%s2658_s5 + $0x20] sm:$0xff]  }
 0x3b1   : > { %v856_v24 = vpop.xlane.xlu0 %855 }
 0x3b2   : > { %2140 = vpow2.f32 %v876_v22  ;;  %v878_v25 = vmul.f32 1.442695, %v865_v23  ;;  %v866_v26 = vsub.f32 %v1984_v42, %v856_v24 }
 0x3b3   : > { %v859_v27 = vpop.xlane.xlu1 %858 }
 0x3b4   : > { %v2133_v30 = vpop.eup %2132  ;;  %2142 = vpow2.f32 %v878_v25  ;;  %v880_v20 = vmul.f32 1.442695, %v866_v26  ;;  %v867_v31 = vsub.f32 %v2443_v44, %v859_v27  ;;  %v2107_v27 = vld [vmem:[%s2658_s5 + $0x28] sm:$0xff]  }
 0x3b5   : > { %v884_v32 = vsel %vm835_vm4, %v2133_v30, 0.0 }
 0x3b6   : > { %v2135_v33 = vpop.eup %2134  ;;  %2144 = vpow2.f32 %v880_v20  ;;  %v882_v34 = vmul.f32 1.442695, %v867_v31  ;;  %885 = vadd.xlane.f32.xlu0 %v884_v32 }
 0x3b7   : > { %v887_v35 = vsel %vm835_vm4, %v2135_v33, 0.0 }
 0x3b8   : > { %v2137_v36 = vpop.eup %2136  ;;  %2146 = vpow2.f32 %v882_v34  ;;  %888 = vadd.xlane.f32.xlu1 %v887_v35  ;;  %v2109_v35 = vld [vmem:[%s2658_s5 + $0x38] sm:$0xff]  }
 0x3b9   : > { %v890_v37 = vsel %vm835_vm4, %v2137_v36, 0.0 }
 0x3ba   : > { %v2139_v40 = vpop.eup %2138  ;;  %891 = vadd.xlane.f32.xlu0 %v890_v37 }
 0x3bb   : > { %v893_v41 = vsel %vm835_vm4, %v2139_v40, 0.0 }
 0x3bc   : > { %v2141_v28 = vpop.eup %2140  ;;  %894 = vadd.xlane.f32.xlu1 %v893_v41 }
 0x3bd   : > { %v896_v42 = vsel %vm835_vm4, %v2141_v28, 0.0 }
 0x3be   : > { %v2143_v21 = vpop.eup %2142  ;;  %897 = vadd.xlane.f32.xlu0 %v896_v42 }
 0x3bf   : > { %v899_v43 = vsel %vm835_vm4, %v2143_v21, 0.0 }
 0x3c0   : > { %v2145_v44 = vpop.eup %2144  ;;  %900 = vadd.xlane.f32.xlu1 %v899_v43 }
 0x3c1   : > { %v902_v45 = vsel %vm835_vm4, %v2145_v44, 0.0 }
 0x3c2   : > { %v2147_v46 = vpop.eup %2146  ;;  %903 = vadd.xlane.f32.xlu0 %v902_v45 }
 0x3c3   : > { %v905_v29 = vsel %vm835_vm4, %v2147_v46, 0.0 }
 0x3c4   : > { %906 = vadd.xlane.f32.xlu1 %v905_v29 }
 0x443   : > { %v886_v57 = vpop.xlane.xlu0 %885 }
 0x444   : > { %2148 = vrcp.f32 %v886_v57 }
 0x445   : > { %v889_v59 = vpop.xlane.xlu1 %888 }
 0x446   : > { %2150 = vrcp.f32 %v889_v59 }
 0x447   : > { %v892_v60 = vpop.xlane.xlu0 %891 }
 0x448   : > { %2152 = vrcp.f32 %v892_v60 }
 0x449   : > { %v895_v0 = vpop.xlane.xlu1 %894 }
 0x44a   : > { %2154 = vrcp.f32 %v895_v0 }
 0x44b   : > { %v898_v5 = vpop.xlane.xlu0 %897 }
 0x44c   : > { %2156 = vrcp.f32 %v898_v5 }
 0x44d   : > { %v901_v6 = vpop.xlane.xlu1 %900 }
 0x44e   : > { %v2149_v7 = vpop.eup %2148  ;;  %2158 = vrcp.f32 %v901_v6 }
 0x44f   : > { %v904_v8 = vpop.xlane.xlu0 %903  ;;  %v916_v11 = vmul.f32 %v2149_v7, %v2133_v30 }
 0x450   : > { %v2151_v9 = vpop.eup %2150  ;;  %2160 = vrcp.f32 %v904_v8 }
 0x451   : > { %v907_v10 = vpop.xlane.xlu1 %906  ;;  %v917_v12 = vmul.f32 %v2151_v9, %v2135_v33  ;;  %v2108_v33 = vld [vmem:[%s2658_s5 + $0x30] sm:$0xff]  }
 0x452   : > { %v2153_v13 = vpop.eup %2152  ;;  %2162 = vrcp.f32 %v907_v10 }
 0x453   : > { %v924_v14 = vpack.c.bf16 %v917_v12, %v916_v11  ;;  %v918_v16 = vmul.f32 %v2153_v13, %v2137_v36 }
 0x454   : > { %v2155_v15 = vpop.eup %2154 }
 0x455   : > { %v919_v17 = vmul.f32 %v2155_v15, %v2139_v40  ;;  %1988 = vmatprep.mubr.msk.bf16.mxu0 %vm835_vm4, %v924_v14 }
 0x456   : > { %v2157_v18 = vpop.eup %2156 }
 0x457   : > { %v925_v22 = vpack.c.bf16 %v919_v17, %v918_v16  ;;  %v920_v24 = vmul.f32 %v2157_v18, %v2141_v28 }
 0x458   : > { %v2159_v23 = vpop.eup %2158 }
 0x459   : > { %1989 = vmatmul.mubr.msk.bf16.vlgmr.msra.gmra.mrb[4].mxu0 %vm835_vm4, %v925_v22  ;;  %v921_v25 = vmul.f32 %v2159_v23, %v2143_v21 }
 0x45a   : > { %v2161_v26 = vpop.eup %2160  ;;  %2009 = vmatpush3.bf16.msra.mxu0 %v2106_v19 }
 0x45b   : > { %v926_v30 = vpack.c.bf16 %v921_v25, %v920_v24  ;;  %2010 = vmatprep.subr.bf16.mxu0 %v2212_v58  ;;  %v922_v31 = vmul.f32 %v2161_v26, %v2145_v44 }
 0x45c   : > { %v2163_v20 = vpop.eup %2162 }
 0x45d   : > { %1992 = vmatprep.mubr.msk.bf16.mxu0 %vm835_vm4, %v926_v30  ;;  %v923_v32 = vmul.f32 %v2163_v20, %v2147_v46 }
 0x45e   : > { %2011 = vmatpush3.bf16.msra.mxu0 %v2107_v27 }
 0x45f   : > { %v927_v34 = vpack.c.bf16 %v923_v32, %v922_v31  ;;  %2012 = vmatprep.subr.bf16.mxu0 %v2212_v58 }
 0x461   : > { %1993 = vmatmul.mubr.msk.bf16.gmra.mrb[8].mxu0 %vm835_vm4, %v927_v34 }
 0x462   : > { %2013 = vmatpush3.bf16.msra.mxu0 %v2108_v33  ;;  %2016 = vmatprep.mubr.msk.bf16.mxu0 %vm2213_vm1, %v2212_v58 }
 0x463   : > { %2014 = vmatprep.subr.bf16.mxu0 %v2212_v58 }
 0x466   : > { %2015 = vmatpush3.bf16.msra.mxu0 %v2109_v35 }
 0x469   : > { %2017 = vmatmul.mubr.msk.bf16.vlgmr.msra.gmra.mrb[12].mxu0 %vm633_vm2, %v2396_v62 }
 0x46a   : > { %2034 = vmatprep.mubr.msk.bf16.mxu0 %vm754_vm3, %v1252_v49 }
 0x52c   : > { %v2513_v36 = vpop.f32.mrb[4].mxu0 }
 0x52d   : > { %v2515_v37 = vpop.f32.mrb[5].mxu0 }
 0x52e   : > { %v2517_v40 = vpop.f32.mrb[6].mxu0 }
 0x52f   : > { %v1011_v41 = vpack.c.bf16 %v2517_v40, %v2513_v36  ;;  %v2521_v28 = vpop.f32.mrb[7].mxu0 }
 0x530   : > { %v1010_v42 = vpack.c.bf16 %v2521_v28, %v2515_v37  ;;  %v1873_v37 = vld [vmem:[%s2661_s8] ss:$0 sm:$0xff] }
 0x534   : > { %v2525_v21 = vpop.f32.mrb[8].mxu0 }
 0x535   : > { %v2527_v43 = vpop.f32.mrb[9].mxu0 }
 0x536   : > { %v2529_v48 = vpop.f32.mrb[10].mxu0 }
 0x537   : > { %v1013_v55 = vpack.c.bf16 %v2529_v48, %v2525_v21  ;;  %v2533_v49 = vpop.f32.mrb[11].mxu0  ;;  %v2196_v21 = vld [vmem:[%s2280_s14 + $0x10] sm:$0xff] }
 0x538   : > { %v1012_v44 = vpack.c.bf16 %v2533_v49, %v2527_v43  ;;  %v2197_v49 = vld [vmem:[%s2280_s14] sm:$0xff] }
 0x53c   : > { %v1173_v45 = vpop.f32.mrb[12].mxu0 }
 0x53d   : > { %v1256_v46 = vpack.c.bf16 %v1173_v45, %v1173_v45  ;;  %v2018_v29 = vpop.f32.mrb[13].mxu0 }
 0x53e   : > { %v1176_v47 = vpop.f32.mrb[14].mxu0 }
 0x53f   : > { %v1270_v38 = vsel %vm754_vm3, %v1256_v46, 0  ;;  %v2019_v50 = vpop.f32.mrb[15].mxu0  ;;  %2082 = vmatprep.subr.msk.bf16.mxu0 %vm754_vm3, %v1256_v46 }
 0x540   : > { %2033 = vmatpush3.bf16.xpose.msra.mxu0 %v1270_v38 }
 0x547   : > { %2035 = vmatmul.mubr.msk.bf16.vlgmr.msra.gmra.mrb[16].mxu0 %vm754_vm3, %v1253_v56  ;;  %v2113_v56 = vld [vmem:[%s2659_s6 + $0x38] sm:$0xff]  }
 0x548   : > { %2038 = vmatprep.mubr.msk.bf16.mxu0 %vm754_vm3, %v1254_v4  ;;  %2027 = vmatpush3.bf16.msra.mxu1 %v2113_v56 }
 0x54b   : > { %2029 = vmatmul.mubr.msk.bf16.vlgmr.msra.gmra.mrb[28].mxu1 %vm633_vm2, %v2396_v62 }
 0x54f   : > { %2039 = vmatmul.mubr.msk.bf16.gmra.mrb[20].mxu0 %vm754_vm3, %v1255_v3 }
 0x61a   : > { %v2036_v61 = vpop.f32.mrb[16].mxu0 }
 0x61b   : > { %v1306_v63 = vpop.f32.mrb[17].mxu0  ;;  %v1343_v52 = vsel %vm835_vm4, %v2036_v61, -inf }
 0x61c   : > { %v2037_v1 = vpop.f32.mrb[18].mxu0  ;;  %v1337_v2 = vsel %vm835_vm4, %v1306_v63, -inf }
 0x61d   : > { %1338 = vmax.xlane.f32.xlu0 %v1337_v2  ;;  %v1309_v3 = vpop.f32.mrb[19].mxu0  ;;  %v1346_v58 = vsel %vm835_vm4, %v2037_v1, -inf }
 0x61e   : > { %v1340_v4 = vsel %vm835_vm4, %v1309_v3, -inf }
 0x61f   : > { %1341 = vmax.xlane.f32.xlu1 %v1340_v4 }
 0x621   : > { %1344 = vmax.xlane.f32.xlu0 %v1343_v52 }
 0x622   : > { %v2040_v54 = vpop.f32.mrb[20].mxu0 }
 0x623   : > { %1347 = vmax.xlane.f32.xlu1 %v1346_v58  ;;  %v1322_v57 = vpop.f32.mrb[21].mxu0  ;;  %v1355_v5 = vsel %vm835_vm4, %v2040_v54, -inf }
 0x624   : > { %v2041_v59 = vpop.f32.mrb[22].mxu0  ;;  %v1349_v62 = vsel %vm835_vm4, %v1322_v57, -inf }
 0x625   : > { %1350 = vmax.xlane.f32.xlu0 %v1349_v62  ;;  %v1325_v60 = vpop.f32.mrb[23].mxu0  ;;  %v1358_v6 = vsel %vm835_vm4, %v2041_v59, -inf }
 0x626   : > { %v1352_v0 = vsel %vm835_vm4, %v1325_v60, -inf }
 0x627   : > { %1353 = vmax.xlane.f32.xlu1 %v1352_v0 }
 0x629   : > { %1356 = vmax.xlane.f32.xlu0 %v1355_v5 }
 0x62b   : > { %1359 = vmax.xlane.f32.xlu1 %v1358_v6 }
 0x6aa   : > { %v1339_v7 = vpop.xlane.xlu0 %1338 }
 0x6ab   : > { %v1361_v8 = vsub.f32 %v1306_v63, %v1339_v7 }
 0x6ac   : > { %v1342_v9 = vpop.xlane.xlu1 %1341 }
 0x6ad   : > { %v1369_v10 = vmul.f32 1.442695, %v1361_v8  ;;  %v1362_v11 = vsub.f32 %v1309_v3, %v1342_v9  ;;  %v1246_v3 = vpop.f32.mrb[28].mxu1 }
 0x6ae   : > { %v1345_v12 = vpop.xlane.xlu0 %1344  ;;  %v2030_v4 = vpop.f32.mrb[29].mxu1  ;;  %v1429_v58 = vpack.c.bf16 %v1246_v3, %v1246_v3 }
 0x6af   : > { %2164 = vpow2.f32 %v1369_v10  ;;  %v1371_v13 = vmul.f32 1.442695, %v1362_v11  ;;  %v1363_v14 = vsub.f32 %v2036_v61, %v1345_v12  ;;  %v1249_v52 = vpop.f32.mrb[30].mxu1 }
 0x6b0   : > { %v1348_v15 = vpop.xlane.xlu1 %1347  ;;  %2083 = vmatprep.subr.msk.bf16.mxu1 %vm941_vm5, %v1429_v58 }
 0x6b1   : > { %2166 = vpow2.f32 %v1371_v13  ;;  %v1373_v16 = vmul.f32 1.442695, %v1363_v14  ;;  %v1364_v17 = vsub.f32 %v2037_v1, %v1348_v15 }
 0x6b2   : > { %v1351_v18 = vpop.xlane.xlu0 %1350 }
 0x6b3   : > { %2168 = vpow2.f32 %v1373_v16  ;;  %v1375_v19 = vmul.f32 1.442695, %v1364_v17  ;;  %v1365_v22 = vsub.f32 %v1322_v57, %v1351_v18  ;;  %v1443_v57 = vsel %vm941_vm5, %v1429_v58, 0 }
 0x6b4   : > { %v1354_v23 = vpop.xlane.xlu1 %1353  ;;  %2043 = vmatpush3.bf16.msra.mxu1 %v1443_v57 }
 0x6b5   : > { %2170 = vpow2.f32 %v1375_v19  ;;  %v1377_v24 = vmul.f32 1.442695, %v1365_v22  ;;  %v1366_v25 = vsub.f32 %v1325_v60, %v1354_v23 }
 0x6b6   : > { %v1357_v26 = vpop.xlane.xlu0 %1356 }
 0x6b7   : > { %2172 = vpow2.f32 %v1377_v24  ;;  %v1379_v27 = vmul.f32 1.442695, %v1366_v25  ;;  %v1367_v30 = vsub.f32 %v2040_v54, %v1357_v26  ;;  %v2031_v54 = vpop.f32.mrb[31].mxu1 }
 0x6b8   : > { %v1360_v20 = vpop.xlane.xlu1 %1359 }
 0x6b9   : > { %v2165_v31 = vpop.eup %2164  ;;  %2174 = vpow2.f32 %v1379_v27  ;;  %v1381_v32 = vmul.f32 1.442695, %v1367_v30  ;;  %v1368_v33 = vsub.f32 %v2041_v59, %v1360_v20  ;;  %v2114_v59 = vld [vmem:[%s2660_s7 + $0x8] sm:$0xff]  }
 0x6ba   : > { %v1385_v34 = vsel %vm835_vm4, %v2165_v31, 0.0  ;;  %2052 = vmatprep.subr.bf16.mxu0 %v2114_v59 }
 0x6bb   : > { %v2167_v35 = vpop.eup %2166  ;;  %2176 = vpow2.f32 %v1381_v32  ;;  %v1383_v45 = vmul.f32 1.442695, %v1368_v33  ;;  %1386 = vadd.xlane.f32.xlu0 %v1385_v34  ;;  %2053 = vmatpush3.bf16.msra.mxu0 %v2114_v59  ;;  %v2115_v33 = vld [vmem:[%s2660_s7] sm:$0xff]   ;;  %v2200_v59 = vld [vmem:[%s2280_s14 + $0x30] sm:$0xff] }
 0x6bc   : > { %v1388_v46 = vsel %vm835_vm4, %v2167_v35, 0.0  ;;  %2062 = vmatprep.subr.bf16.mxu0 %v2115_v33 }
 0x6bd   : > { %v2169_v29 = vpop.eup %2168  ;;  %2178 = vpow2.f32 %v1383_v45  ;;  %1389 = vadd.xlane.f32.xlu1 %v1388_v46 }
 0x6be   : > { %v1391_v47 = vsel %vm835_vm4, %v2169_v29, 0.0 }
 0x6bf   : > { %v2171_v38 = vpop.eup %2170  ;;  %1392 = vadd.xlane.f32.xlu0 %v1391_v47 }
 0x6c0   : > { %v1394_v50 = vsel %vm835_vm4, %v2171_v38, 0.0 }
 0x6c1   : > { %v2173_v51 = vpop.eup %2172  ;;  %1395 = vadd.xlane.f32.xlu1 %v1394_v50 }
 0x6c2   : > { %v1397_v39 = vsel %vm835_vm4, %v2173_v51, 0.0 }
 0x6c3   : > { %v2175_v53 = vpop.eup %2174  ;;  %1398 = vadd.xlane.f32.xlu0 %v1397_v39 }
 0x6c4   : > { %v1400_v56 = vsel %vm835_vm4, %v2175_v53, 0.0 }
 0x6c5   : > { %v2177_v61 = vpop.eup %2176  ;;  %1401 = vadd.xlane.f32.xlu1 %v1400_v56 }
 0x6c6   : > { %v1403_v63 = vsel %vm835_vm4, %v2177_v61, 0.0 }
 0x6c7   : > { %v2179_v1 = vpop.eup %2178  ;;  %1404 = vadd.xlane.f32.xlu0 %v1403_v63  ;;  %v2198_v63 = vld [vmem:[%s2280_s14 + $0x18] sm:$0xff] }
 0x6c8   : > { %v1406_v2 = vsel %vm835_vm4, %v2179_v1, 0.0 }
 0x6c9   : > { %1407 = vadd.xlane.f32.xlu1 %v1406_v2  ;;  %v2199_v2 = vld [vmem:[%s2280_s14 + $0x8] sm:$0xff] }
 0x748   : > { %v1387_v62 = vpop.xlane.xlu0 %1386 }
 0x749   : > { %2180 = vrcp.f32 %v1387_v62 }
 0x74a   : > { %v1390_v60 = vpop.xlane.xlu1 %1389 }
 0x74b   : > { %2182 = vrcp.f32 %v1390_v60 }
 0x74c   : > { %v1393_v0 = vpop.xlane.xlu0 %1392 }
 0x74d   : > { %2184 = vrcp.f32 %v1393_v0 }
 0x74e   : > { %v1396_v5 = vpop.xlane.xlu1 %1395 }
 0x74f   : > { %2186 = vrcp.f32 %v1396_v5  ;;  %v2201_v5 = vld [vmem:[%s2280_s14 + $0x20] sm:$0xff] }
 0x750   : > { %v1399_v6 = vpop.xlane.xlu0 %1398 }
 0x751   : > { %2188 = vrcp.f32 %v1399_v6 }
 0x752   : > { %v1402_v7 = vpop.xlane.xlu1 %1401 }
 0x753   : > { %v2181_v8 = vpop.eup %2180  ;;  %2190 = vrcp.f32 %v1402_v7 }
 0x754   : > { %v1405_v9 = vpop.xlane.xlu0 %1404  ;;  %v1417_v12 = vmul.f32 %v2181_v8, %v2165_v31  ;;  %v2202_v8 = vld [vmem:[%s2280_s14 + $0x38] sm:$0xff] }
 0x755   : > { %v2183_v10 = vpop.eup %2182  ;;  %2192 = vrcp.f32 %v1405_v9 }
 0x756   : > { %v1408_v11 = vpop.xlane.xlu1 %1407  ;;  %v1418_v13 = vmul.f32 %v2183_v10, %v2167_v35  ;;  %v2203_v10 = vld [vmem:[%s2280_s14 + $0x28] sm:$0xff] }
 0x757   : > { %v2185_v14 = vpop.eup %2184  ;;  %2194 = vrcp.f32 %v1408_v11 }
 0x758   : > { %v1425_v15 = vpack.c.bf16 %v1418_v13, %v1417_v12  ;;  %v1419_v17 = vmul.f32 %v2185_v14, %v2169_v29 }
 0x759   : > { %v2187_v16 = vpop.eup %2186 }
 0x75a   : > { %v1420_v18 = vmul.f32 %v2187_v16, %v2171_v38  ;;  %2044 = vmatprep.mubr.msk.bf16.mxu1 %vm835_vm4, %v1425_v15 }
 0x75b   : > { %v2189_v19 = vpop.eup %2188 }
 0x75c   : > { %v1426_v22 = vpack.c.bf16 %v1420_v18, %v1419_v17  ;;  %v1421_v24 = vmul.f32 %v2189_v19, %v2173_v51 }
 0x75d   : > { %v2191_v23 = vpop.eup %2190 }
 0x75e   : > { %2045 = vmatmul.mubr.msk.bf16.vlgmr.msra.gmra.mrb[32].mxu1 %vm835_vm4, %v1426_v22  ;;  %v1422_v25 = vmul.f32 %v2191_v23, %v2175_v53 }
 0x75f   : > { %v2193_v26 = vpop.eup %2192 }
 0x760   : > { %v1427_v27 = vpack.c.bf16 %v1422_v25, %v1421_v24  ;;  %v1423_v20 = vmul.f32 %v2193_v26, %v2177_v61 }
 0x761   : > { %v2195_v30 = vpop.eup %2194 }
 0x762   : > { %2048 = vmatprep.mubr.msk.bf16.mxu1 %vm835_vm4, %v1427_v27  ;;  %v1424_v31 = vmul.f32 %v2195_v30, %v2179_v1 }
 0x764   : > { %v1428_v32 = vpack.c.bf16 %v1424_v31, %v1423_v20 }
 0x766   : > { %2049 = vmatmul.mubr.msk.bf16.gmra.mrb[36].mxu1 %vm835_vm4, %v1428_v32 }
 0x831   : > { %v2046_v34 = vpop.f32.mrb[32].mxu1 }
 0x832   : > { %v1479_v35 = vpop.f32.mrb[33].mxu1 }
 0x833   : > { %v2047_v45 = vpop.f32.mrb[34].mxu1 }
 0x834   : > { %v1511_v46 = vpack.c.bf16 %v2047_v45, %v2046_v34  ;;  %v1482_v29 = vpop.f32.mrb[35].mxu1 }
 0x835   : > { %v1510_v47 = vpack.c.bf16 %v1482_v29, %v1479_v35 }
 0x837   : > { %2054 = vmatprep.mubr.msk.bf16.mxu0 %vm754_vm3, %v1510_v47 }
 0x838   : > { %2055 = vmatmul.mubr.msk.bf16.vlgmr.msra.gmra.mrb[24].mxu0 %vm754_vm3, %v1511_v46 }
 0x839   : > { %v2050_v38 = vpop.f32.mrb[36].mxu1  ;;  %2063 = vmatpush3.bf16.msra.mxu0 %v2115_v33 }
 0x83a   : > { %v1495_v50 = vpop.f32.mrb[37].mxu1 }
 0x83b   : > { %v2051_v51 = vpop.f32.mrb[38].mxu1 }
 0x83c   : > { %v1513_v39 = vpack.c.bf16 %v2051_v51, %v2050_v38  ;;  %v1498_v53 = vpop.f32.mrb[39].mxu1 }
 0x83d   : > { %v1512_v56 = vpack.c.bf16 %v1498_v53, %v1495_v50 }
 0x83f   : > { %2058 = vmatprep.mubr.msk.bf16.mxu0 %vm754_vm3, %v1512_v56 }
 0x840   : > { %2059 = vmatmul.mubr.msk.bf16.gmra.mrb[28].mxu0 %vm754_vm3, %v1513_v39 }
 0x841   : > { %2064 = vmatprep.mubr.msk.bf16.mxu0 %vm754_vm3, %v1010_v42 }
 0x848   : > { %2065 = vmatmul.mubr.msk.bf16.vlgmr.msra.gmra.mrb[24].mxu0 %vm754_vm3, %v1011_v41 }
 0x849   : > { %2068 = vmatprep.mubr.msk.bf16.mxu0 %vm754_vm3, %v1012_v44 }
 0x850   : > { %2069 = vmatmul.mubr.msk.bf16.gmra.mrb[28].mxu0 %vm754_vm3, %v1013_v55 }
 0x91b   : > { %v2066_v28 = vpop.f32.mrb[24].mxu0 }
 0x91c   : > { %v1692_v42 = vadd.f32 %v2066_v28, %v1873_v37  ;;  %v1652_v36 = vpop.f32.mrb[25].mxu0 }
 0x91d   : > { %v1690_v40 = vadd.f32 %v1873_v37, %v1652_v36  ;;  %v2067_v41 = vpop.f32.mrb[26].mxu0 }
 0x91e   : > { %v1700_v43 = vadd.f32 %v2196_v21, %v1692_v42  ;;  %v1693_v48 = vadd.f32 %v2067_v41, %v1873_v37  ;;  %v1655_v55 = vpop.f32.mrb[27].mxu0 }
 0x91f   : > { %v1698_v44 = vadd.f32 %v2197_v49, %v1690_v40  ;;  %v1691_v61 = vadd.f32 %v1873_v37, %v1655_v55 }
 0x920   : > { %1708 = vst.msk [vmem:[%s2624_s20 + $0x10] sm:$0xff] %vm361_vm0, %v1700_v43  ;;  %v1701_v1 = vadd.f32 %v2198_v63, %v1693_v48 }
 0x921   : > { %1706 = vst.msk [vmem:[%s2624_s20] sm:$0xff] %vm361_vm0, %v1698_v44  ;;  %v1699_v3 = vadd.f32 %v2199_v2, %v1691_v61 }
 0x922   : > { %1709 = vst.msk [vmem:[%s2624_s20 + $0x18] sm:$0xff] %vm361_vm0, %v1701_v1 }
 0x923   : > { %1707 = vst.msk [vmem:[%s2624_s20 + $0x8] sm:$0xff] %vm361_vm0, %v1699_v3  ;;  %v2070_v4 = vpop.f32.mrb[28].mxu0 }
 0x924   : > { %v1696_v52 = vadd.f32 %v2070_v4, %v1873_v37  ;;  %v1668_v54 = vpop.f32.mrb[29].mxu0 }
 0x925   : > { %v1694_v58 = vadd.f32 %v1873_v37, %v1668_v54  ;;  %v2071_v57 = vpop.f32.mrb[30].mxu0 }
 0x926   : > { %v1704_v62 = vadd.f32 %v2200_v59, %v1696_v52  ;;  %v1697_v60 = vadd.f32 %v2071_v57, %v1873_v37  ;;  %v1671_v0 = vpop.f32.mrb[31].mxu0 }
 0x927   : > { %v1702_v6 = vadd.f32 %v2201_v5, %v1694_v58  ;;  %v1695_v7 = vadd.f32 %v1873_v37, %v1671_v0 }
 0x928   : > { %1712 = vst.msk [vmem:[%s2624_s20 + $0x30] sm:$0xff] %vm361_vm0, %v1704_v62  ;;  %v1705_v9 = vadd.f32 %v2202_v8, %v1697_v60 }
 0x929   : > { %1710 = vst.msk [vmem:[%s2624_s20 + $0x20] sm:$0xff] %vm361_vm0, %v1702_v6  ;;  %v1703_v11 = vadd.f32 %v2203_v10, %v1695_v7 }
 0x92a   : > { %1713 = vst.msk [vmem:[%s2624_s20 + $0x38] sm:$0xff] %vm361_vm0, %v1705_v9 }
 0x92b   : > { %1711 = vst.msk [vmem:[%s2624_s20 + $0x28] sm:$0xff] %vm361_vm0, %v1703_v11 }
 0x92c PF: > { %s19_s30 = sadd.s32 1, %s2210_s30  }
 0x92d   : > { %p16_p4 = scmp.ge.s32.totalorder %s19_s30, 4  }
 0x92f   :  { %18 = sbr.rel (!%p16_p4) target bundleno = 1 (0x1), region = 93 }

// kernel: cross_attn_up_block.13
= control target key start
LH: loop header
LB: loop body
LE: loop exit
PB: predicated region body
PF: predicated region fallthrough
CT: control target
= control target key end

     0   :  { %8 = vsyncpa [#allocation3], 0  ;;  %s1953_s0 = inlined_call_operand.vmem [shape: bf16[2,256,288], index: 0, kind: input, shape index: {}]   ;;  %s1954_s1 = inlined_call_operand.vmem [shape: bf16[288,32], index: 1, kind: input, shape index: {}]   ;;  %s1955_s2 = inlined_call_operand.vmem [shape: f32[1,32], index: 2, kind: input, shape index: {}]   ;;  %s1956_s3 = inlined_call_operand.hbm [shape: f32[2,256,32], index: 3, kind: output, shape index: {}]  }
   0x1   :  { %10 = vsyncpa [#allocation3 + $0x1], 0  ;;  %s1592_s12 = smov 0   ;;  %s1594_s13 = smov 0  }
   0x2   :  { %s1596_s14 = smov 0   ;;  %s1598_s15 = smov 0  }
   0x3 LB: > { %s1613_s16 = sadd.s32 4294967295, %s1567_s15   ;;  %s1104_s17 = sadd.s32 4294967294, %s1567_s15   ;;  %s1567_s15 = sphi %s1598_s15, %s1962_s15   ;;  %s1563_s14 = sphi %s1596_s14, %s1961_s14   ;;  %s1559_s13 = sphi %s1594_s13, %s1960_s13   ;;  %s1555_s12 = sphi %s1592_s12, %s1959_s12  }
   0x4   : > { %s1617_s18 = sadd.s32 1, %s1567_s15   ;;  %s91_s19 = sadd.s32 1, %s1563_s14 }
   0x5   : > { %s88_s20 = ssub.s32 %s1567_s15, %s1617_s18  ;;  %p101_p0 = scmp.ne.s32.totalorder %s1563_s14, %s1559_s13 }
   0x6   : > { %p89_p1 = scmp.eq.s32.totalorder %s88_s20, 0  ;;  %p102_p2 = scmp.eq.s32.totalorder %s1613_s16, 1 }
   0x7   : > { %p107_p3 = scmp.ne.s32.totalorder %s1559_s13, %s1555_s12  ;;  %p108_p4 = scmp.eq.s32.totalorder %s1104_s17, 1 }
   0x8   : > { %s1628_s21 = scalar_select %p89_p1, %s1563_s14, %s91_s19  }
   0x9   : > { %p1630_p5 = por %p102_p2, %p101_p0  ;;  %p1634_p6 = por %p108_p4, %p107_p3 }
   0xa   : > { %p1107_p7 = scmp.ge.s32.totalorder %s1567_s15, 1  ;;  %p140_p8 = scmp.lt.s32.totalorder %s1567_s15, 3 }
   0xc   : > { %p141_p9 = pnand %p1107_p7, %p140_p8 }
   0xd   : > { %v1423_v0 = vld [vmem:[%s1954_s1 + $0x40] sm:$0xff] (!%p141_p9)   ;;  %v1425_v2 = vld [vmem:[%s1954_s1 + $0x48] sm:$0xff] (!%p141_p9)   ;;  %p164_p10 = scmp.lt.s32.totalorder (!%p141_p9), %s1613_s16, 1  ;;  %v1427_v4 = vld [vmem:[%s1954_s1 + $0x50] sm:$0xff] (!%p141_p9)   ;;  %vm625_vm0 = vcmask (!%p141_p9), 261120   ;;  %s1569_s19 = smov (!%p141_p9), [#allocation2]  }
   0xe   : > { %144 = sbr.rel (%p141_p9) target bundleno = 370 (0x172), region = 32  ;;  %v1424_v1 = vld [vmem:[%s1954_s1] sm:$0xff] (!%p141_p9)   ;;  %1199 = vmatprep.subr.bf16.mxu0 (!%p141_p9), %v1423_v0  ;;  %1365 = vmatprep.subr.bf16.mxu1 (!%p141_p9), %v1423_v0  ;;  %v1426_v3 = vld [vmem:[%s1954_s1 + $0x8] sm:$0xff] (!%p141_p9)   ;;  %v1428_v5 = vld [vmem:[%s1954_s1 + $0x10] sm:$0xff] (!%p141_p9)   ;;  %s1509_s20 = sshll.u32 (!%p141_p9), %s1569_s19, 4  ;;  %s1510_s20 = int_to_ptr.vmem [resolvable:$false] %s1509_s20 }
   0xf   : > { %1200 = vmatpush3.bf16.msra.mxu0 (!%p141_p9), %v1424_v1  ;;  %1373 = vmatpush3.bf16.msra.mxu1 (!%p141_p9), %v1424_v1  ;;  %v1429_v6 = vld [vmem:[%s1954_s1 + $0x58] sm:$0xff] (!%p141_p9)   ;;  %v1431_v8 = vld [vmem:[%s1954_s1 + $0x60] sm:$0xff] (!%p141_p9)   ;;  %v1433_v10 = vld [vmem:[%s1954_s1 + $0x68] sm:$0xff] (!%p141_p9)   ;;  %s1511_s24 = scalar_lea.vmem (!%p141_p9), %s1510_s20, 8192 }
  0x10   : > { %1201 = vmatprep.subr.bf16.mxu0 (!%p141_p9), %v1425_v2  ;;  %1366 = vmatprep.subr.bf16.mxu1 (!%p141_p9), %v1425_v2  ;;  %v1430_v7 = vld [vmem:[%s1954_s1 + $0x18] sm:$0xff] (!%p141_p9)   ;;  %v1432_v9 = vld [vmem:[%s1954_s1 + $0x20] sm:$0xff] (!%p141_p9)   ;;  %v1434_v13 = vld [vmem:[%s1954_s1 + $0x28] sm:$0xff] (!%p141_p9)  }
  0x11   : > { %v1435_v14 = vld [vmem:[%s1954_s1 + $0x70] sm:$0xff] (!%p141_p9)   ;;  %v1437_v16 = vld [vmem:[%s1954_s1 + $0x78] sm:$0xff] (!%p141_p9)   ;;  %v1445_v18 = vld [vmem:[%s1954_s1 + $0x80] sm:$0xff] (!%p141_p9)  }
  0x12   : > { %v1436_v15 = vld [vmem:[%s1954_s1 + $0x30] sm:$0xff] (!%p141_p9)   ;;  %v1438_v17 = vld [vmem:[%s1954_s1 + $0x38] sm:$0xff] (!%p141_p9)   ;;  %v1458_v23 = vld [vmem:[%s1954_s1 + $0x88] sm:$0xff] (!%p141_p9)  }
  0x13   : > { %1202 = vmatpush3.bf16.msra.mxu0 (!%p141_p9), %v1426_v3  ;;  %1374 = vmatpush3.bf16.msra.mxu1 (!%p141_p9), %v1426_v3 }
  0x14   : > { %1203 = vmatprep.subr.bf16.mxu0 (!%p141_p9), %v1427_v4  ;;  %1367 = vmatprep.subr.bf16.mxu1 (!%p141_p9), %v1427_v4 }
  0x15   : > { %s165_s7 = scalar_select %p164_p10, %s1613_s16, 1 }
  0x17   : > { %s1381_s17 = smul.u32 384, %s165_s7  ;;  %1204 = vmatpush3.bf16.msra.mxu0 %v1428_v5  ;;  %1375 = vmatpush3.bf16.msra.mxu1 %v1428_v5  ;;  %s1198_s7 = sshll.u32 %s1613_s16, 12 }
  0x18   : > { %1205 = vmatprep.subr.bf16.mxu0 %v1429_v6  ;;  %1368 = vmatprep.subr.bf16.mxu1 %v1429_v6  ;;  %s1901_s11 = scalar_lea.hbm %s1956_s3, %s1198_s7 }
  0x19   : > { %s1672_s28 = scalar_lea.vmem %s1953_s0, %s1381_s17 }
  0x1a   : > { %v1441_v11 = vld [vmem:[%s1672_s28 + $0x4] ss:$12 sps:$4 sm:$0xff]   ;;  %v1439_v19 = vld [vmem:[%s1672_s28] ss:$12 sps:$4 sm:$0xff]   ;;  %v1446_v21 = vld [vmem:[%s1672_s28 + $0x1c] ss:$12 sps:$4 sm:$0xff]  }
  0x1b   : > { %1206 = vmatpush3.bf16.msra.mxu0 %v1430_v7  ;;  %1376 = vmatpush3.bf16.msra.mxu1 %v1430_v7  ;;  %v1444_v12 = vld [vmem:[%s1672_s28 + $0x124] ss:$12 sps:$4 sm:$0xff]   ;;  %v1442_v20 = vld [vmem:[%s1672_s28 + $0x120] ss:$12 sps:$4 sm:$0xff]   ;;  %v1448_v22 = vld [vmem:[%s1672_s28 + $0x13c] ss:$12 sps:$4 sm:$0xff]  }
  0x1c   : > { %1207 = vmatprep.subr.bf16.mxu0 %v1431_v8  ;;  %1369 = vmatprep.subr.bf16.mxu1 %v1431_v8  ;;  %v1450_v24 = vld [vmem:[%s1672_s28 + $0x18] ss:$12 sps:$4 sm:$0xff]   ;;  %v1452_v26 = vld [vmem:[%s1672_s28 + $0x34] ss:$12 sps:$4 sm:$0xff]   ;;  %v1456_v28 = vld [vmem:[%s1672_s28 + $0x30] ss:$12 sps:$4 sm:$0xff]  }
  0x1d   : > { %706 = vmatprep.mubr.bf16.mxu0 %v1441_v11  ;;  %802 = vmatprep.mubr.bf16.mxu1 %v1444_v12  ;;  %v1451_v25 = vld [vmem:[%s1672_s28 + $0x138] ss:$12 sps:$4 sm:$0xff]   ;;  %v1454_v27 = vld [vmem:[%s1672_s28 + $0x154] ss:$12 sps:$4 sm:$0xff]   ;;  %v1457_v29 = vld [vmem:[%s1672_s28 + $0x150] ss:$12 sps:$4 sm:$0xff]  }
  0x1e   : > { %v1459_v30 = vld [vmem:[%s1672_s28 + $0x4c] ss:$12 sps:$4 sm:$0xff]   ;;  %v1463_v32 = vld [vmem:[%s1672_s28 + $0x48] ss:$12 sps:$4 sm:$0xff]   ;;  %v1465_v34 = vld [vmem:[%s1672_s28 + $0x64] ss:$12 sps:$4 sm:$0xff]  }
  0x1f   : > { %1208 = vmatpush3.bf16.msra.mxu0 %v1432_v9  ;;  %1377 = vmatpush3.bf16.msra.mxu1 %v1432_v9  ;;  %v1461_v31 = vld [vmem:[%s1672_s28 + $0x16c] ss:$12 sps:$4 sm:$0xff]   ;;  %v1464_v33 = vld [vmem:[%s1672_s28 + $0x168] ss:$12 sps:$4 sm:$0xff]   ;;  %v1474_v41 = vld [vmem:[%s1672_s28 + $0x50] ss:$12 sps:$4 sm:$0xff]  }
  0x20   : > { %1209 = vmatprep.subr.bf16.mxu0 %v1433_v10  ;;  %1370 = vmatprep.subr.bf16.mxu1 %v1433_v10  ;;  %v1467_v35 = vld [vmem:[%s1672_s28 + $0x8] ss:$12 sps:$4 sm:$0xff]   ;;  %v1468_v36 = vld [vmem:[%s1672_s28 + $0x60] ss:$12 sps:$4 sm:$0xff]   ;;  %v1472_v39 = vld [vmem:[%s1672_s28 + $0x38] ss:$12 sps:$4 sm:$0xff]  }
  0x21   : > { %v1469_v37 = vld [vmem:[%s1672_s28 + $0x20] ss:$12 sps:$4 sm:$0xff]   ;;  %v1470_v38 = vld [vmem:[%s1672_s28 + $0x7c] ss:$12 sps:$4 sm:$0xff]   ;;  %v1473_v40 = vld [vmem:[%s1672_s28 + $0x78] ss:$12 sps:$4 sm:$0xff]  }
  0x22   : > { %v1475_v42 = vld [vmem:[%s1672_s28 + $0x94] ss:$12 sps:$4 sm:$0xff]   ;;  %v1478_v44 = vld [vmem:[%s1672_s28 + $0x90] ss:$12 sps:$4 sm:$0xff]   ;;  %v1480_v46 = vld [vmem:[%s1672_s28 + $0xac] ss:$12 sps:$4 sm:$0xff]  }
  0x23   : > { %1210 = vmatpush3.bf16.msra.mxu0 %v1434_v13  ;;  %1378 = vmatpush3.bf16.msra.mxu1 %v1434_v13  ;;  %v1477_v43 = vld [vmem:[%s1672_s28 + $0x68] ss:$12 sps:$4 sm:$0xff]   ;;  %v1479_v45 = vld [vmem:[%s1672_s28 + $0x80] ss:$12 sps:$4 sm:$0xff]   ;;  %v1482_v47 = vld [vmem:[%s1672_s28 + $0x98] ss:$12 sps:$4 sm:$0xff]  }
  0x24   : > { %1211 = vmatprep.subr.bf16.mxu0 %v1435_v14  ;;  %1371 = vmatprep.subr.bf16.mxu1 %v1435_v14  ;;  %v1483_v48 = vld [vmem:[%s1672_s28 + $0xa8] ss:$12 sps:$4 sm:$0xff]   ;;  %v1484_v49 = vld [vmem:[%s1672_s28 + $0xb0] ss:$12 sps:$4 sm:$0xff]   ;;  %v1488_v52 = vld [vmem:[%s1672_s28 + $0xc0] ss:$12 sps:$4 sm:$0xff]  }
  0x25   : > { %v1485_v50 = vld [vmem:[%s1672_s28 + $0xc4] ss:$12 sps:$4 sm:$0xff]   ;;  %v1487_v51 = vld [vmem:[%s1672_s28 + $0xc8] ss:$12 sps:$4 sm:$0xff]   ;;  %v1489_v53 = vld [vmem:[%s1672_s28 + $0xe0] ss:$12 sps:$4 sm:$0xff]  }
  0x26   : > { %v1490_v54 = vld [vmem:[%s1672_s28 + $0xdc] ss:$12 sps:$4 sm:$0xff]   ;;  %v1492_v55 = vld [vmem:[%s1672_s28 + $0xf8] ss:$12 sps:$4 sm:$0xff]   ;;  %v1495_v58 = vld [vmem:[%s1672_s28 + $0xf4] ss:$12 sps:$4 sm:$0xff]  }
  0x27   : > { %1212 = vmatpush3.bf16.msra.mxu0 %v1436_v15  ;;  %1379 = vmatpush3.bf16.msra.mxu1 %v1436_v15  ;;  %v1493_v56 = vld [vmem:[%s1672_s28 + $0xd8] ss:$12 sps:$4 sm:$0xff]   ;;  %v1494_v57 = vld [vmem:[%s1672_s28 + $0x110] ss:$12 sps:$4 sm:$0xff]   ;;  %v1497_v59 = vld [vmem:[%s1672_s28 + $0x128] ss:$12 sps:$4 sm:$0xff]  }
  0x28   : > { %1213 = vmatprep.subr.bf16.mxu0 %v1437_v16  ;;  %1372 = vmatprep.subr.bf16.mxu1 %v1437_v16  ;;  %v1498_v60 = vld [vmem:[%s1672_s28 + $0xf0] ss:$12 sps:$4 sm:$0xff]   ;;  %v1499_v61 = vld [vmem:[%s1672_s28 + $0x140] ss:$12 sps:$4 sm:$0xff]   ;;  %v1502_v63 = vld [vmem:[%s1672_s28 + $0x158] ss:$12 sps:$4 sm:$0xff]  }
  0x29   : > { %v1500_v62 = vld [vmem:[%s1672_s28 + $0x10c] ss:$12 sps:$4 sm:$0xff]   ;;  %v1503_v0 = vld [vmem:[%s1672_s28 + $0x108] ss:$12 sps:$4 sm:$0xff]   ;;  %v1504_v1 = vld [vmem:[%s1672_s28 + $0x170] ss:$12 sps:$4 sm:$0xff]  }
  0x2a   : > { %s161_s28 = sand.u32 1, %s1559_s13  }
  0x2b   : > { %1214 = vmatpush3.bf16.msra.mxu0 %v1438_v17  ;;  %1380 = vmatpush3.bf16.msra.mxu1 %v1438_v17  ;;  %s1108_s30 = sshll.u32 %s161_s28, 8  ;;  %s1912_s16 = scalar_lea.sflag [#allocation3], %s161_s28 }
  0x2c   : > { %1329 = vmatprep.subr.bf16.mxu1 %v1445_v18  ;;  %s1793_s6 = scalar_lea.vmem [#allocation2], %s1108_s30 }
  0x2d   : > { %s1042_s8 = sshll.u32 %s1793_s6, 4  ;;  %s1903_s8 = int_to_ptr.vmem [resolvable:$true] %s1042_s8 }
  0x2e   : > { %707 = vmatmul.mubr.bf16.vlgmr.msra.gmra.mrb[0].mxu0 %v1439_v19  ;;  %803 = vmatmul.mubr.bf16.vlgmr.msra.gmra.mrb[0].mxu1 %v1442_v20  ;;  %s1505_s17 = scalar_lea.vmem %s1903_s8, 4096  ;;  %p1512_p0 = scmp.lt.s32.totalorder %s1903_s8, %s1510_s20 }
  0x2f   : > { %1330 = vmatpush3.bf16.msra.mxu1 %v1445_v18  ;;  %714 = vmatprep.mubr.bf16.mxu0 %v1446_v21  ;;  %p1506_p11 = scmp.ne.s32.totalorder %s1903_s8, %s1505_s17  ;;  %p1513_p1 = scmp.lt.s32.totalorder %s1511_s24, %s1505_s17 }
  0x30   : > { %810 = vmatprep.mubr.bf16.mxu1 %v1448_v22  ;;  %1331 = vmatprep.subr.bf16.mxu1 %v1458_v23 }
  0x31   : > { %p1507_p12 = pnand %p1506_p11, %p1630_p5  ;;  %p1514_p2 = por %p1513_p1, %p1512_p0 }
  0x33   : > { %1332 = vmatpush3.bf16.msra.mxu1 %v1458_v23  ;;  %p1508_p13 = pneg %p1507_p12 }
  0x35   : > { %p1515_p3 = pnand %p1514_p2, %p1508_p13 }
  0x36   : > { %715 = vmatmul.mubr.bf16.gmra.mrb[4].mxu0 %v1450_v24  ;;  %811 = vmatmul.mubr.bf16.gmra.mrb[4].mxu1 %v1451_v25 }
  0x37   : > { %722 = vmatprep.mubr.bf16.mxu0 %v1452_v26  ;;  %818 = vmatprep.mubr.bf16.mxu1 %v1454_v27 }
  0x3e   : > { %723 = vmatmul.mubr.bf16.gmra.mrb[8].mxu0 %v1456_v28  ;;  %819 = vmatmul.mubr.bf16.gmra.mrb[8].mxu1 %v1457_v29 }
  0x3f   : > { %730 = vmatprep.mubr.bf16.mxu0 %v1459_v30  ;;  %826 = vmatprep.mubr.bf16.mxu1 %v1461_v31 }
  0x46   : > { %731 = vmatmul.mubr.bf16.gmra.mrb[12].mxu0 %v1463_v32  ;;  %827 = vmatmul.mubr.bf16.gmra.mrb[12].mxu1 %v1464_v33 }
  0x47   : > { %738 = vmatprep.mubr.bf16.mxu0 %v1465_v34  ;;  %1333 = vmatprep.mubr.msk.bf16.mxu1 %vm625_vm0, %v1467_v35 }
  0x4e   : > { %739 = vmatmul.mubr.bf16.gmra.mrb[16].mxu0 %v1468_v36  ;;  %1334 = vmatmul.mubr.msk.bf16.vlgmr.msra.gmra.mrb[16].mxu1 %vm625_vm0, %v1469_v37 }
  0x4f   : > { %746 = vmatprep.mubr.bf16.mxu0 %v1470_v38  ;;  %1337 = vmatprep.mubr.msk.bf16.mxu1 %vm625_vm0, %v1472_v39 }
  0x56   : > { %747 = vmatmul.mubr.bf16.gmra.mrb[20].mxu0 %v1473_v40  ;;  %1338 = vmatmul.mubr.msk.bf16.gmra.mrb[20].mxu1 %vm625_vm0, %v1474_v41 }
  0x57   : > { %754 = vmatprep.mubr.bf16.mxu0 %v1475_v42  ;;  %1341 = vmatprep.mubr.msk.bf16.mxu1 %vm625_vm0, %v1477_v43 }
  0x5e   : > { %755 = vmatmul.mubr.bf16.gmra.mrb[24].mxu0 %v1478_v44  ;;  %1342 = vmatmul.mubr.msk.bf16.gmra.mrb[24].mxu1 %vm625_vm0, %v1479_v45 }
  0x5f   : > { %762 = vmatprep.mubr.bf16.mxu0 %v1480_v46  ;;  %1345 = vmatprep.mubr.msk.bf16.mxu1 %vm625_vm0, %v1482_v47 }
  0x66   : > { %763 = vmatmul.mubr.bf16.gmra.mrb[28].mxu0 %v1483_v48  ;;  %1346 = vmatmul.mubr.msk.bf16.gmra.mrb[28].mxu1 %vm625_vm0, %v1484_v49 }
  0x67   : > { %770 = vmatprep.mubr.bf16.mxu0 %v1485_v50  ;;  %1349 = vmatprep.mubr.msk.bf16.mxu1 %vm625_vm0, %v1487_v51  ;;  %v1787_v50 = vld [vmem:[%s1955_s2] ss:$0 sm:$0xff] }
  0x6e   : > { %771 = vmatmul.mubr.bf16.gmra.mrb[32].mxu0 %v1488_v52  ;;  %1350 = vmatmul.mubr.msk.bf16.gmra.mrb[32].mxu1 %vm625_vm0, %v1489_v53 }
  0x6f   : > { %778 = vmatprep.mubr.bf16.mxu0 %v1490_v54  ;;  %1353 = vmatprep.mubr.msk.bf16.mxu1 %vm625_vm0, %v1492_v55 }
  0x76   : > { %779 = vmatmul.mubr.bf16.gmra.mrb[36].mxu0 %v1493_v56  ;;  %1354 = vmatmul.mubr.msk.bf16.gmra.mrb[36].mxu1 %vm625_vm0, %v1494_v57 }
  0x77   : > { %786 = vmatprep.mubr.bf16.mxu0 %v1495_v58  ;;  %1357 = vmatprep.mubr.msk.bf16.mxu1 %vm625_vm0, %v1497_v59 }
  0x7e   : > { %787 = vmatmul.mubr.bf16.gmra.mrb[40].mxu0 %v1498_v60  ;;  %1358 = vmatmul.mubr.msk.bf16.gmra.mrb[40].mxu1 %vm625_vm0, %v1499_v61 }
  0x7f   : > { %794 = vmatprep.mubr.bf16.mxu0 %v1500_v62  ;;  %1361 = vmatprep.mubr.msk.bf16.mxu1 %vm625_vm0, %v1502_v63 }
  0x86   : > { %795 = vmatmul.mubr.bf16.gmra.mrb[44].mxu0 %v1503_v0  ;;  %1362 = vmatmul.mubr.msk.bf16.gmra.mrb[44].mxu1 %vm625_vm0, %v1504_v1 }
 0x101   : > { %v1215_v2 = vpop.f32.mrb[0].mxu0  ;;  %v1287_v3 = vpop.f32.mrb[0].mxu1 }
 0x102   : > { %v1216_v4 = vpop.f32.mrb[1].mxu0  ;;  %v1288_v5 = vpop.f32.mrb[1].mxu1 }
 0x103   : > { %v1217_v6 = vadd.f32 %v1216_v4, %v1215_v2  ;;  %v1218_v7 = vpop.f32.mrb[2].mxu0  ;;  %v1765_v8 = vadd.f32 %v1288_v5, %v1287_v3  ;;  %v1290_v9 = vpop.f32.mrb[2].mxu1 }
 0x104   : > { %v1219_v10 = vpop.f32.mrb[3].mxu0  ;;  %v1291_v11 = vpop.f32.mrb[3].mxu1 }
 0x105   : > { %v1220_v12 = vadd.f32 %v1219_v10, %v1218_v7  ;;  %v1767_v13 = vadd.f32 %v1291_v11, %v1290_v9  ;;  %v709_v54 = vadd.f32 %v1217_v6, %v1787_v50 }
 0x107   : > { %v712_v63 = vadd.f32 %v1220_v12, %v1787_v50 }
 0x109   : > { %v1221_v14 = vpop.f32.mrb[4].mxu0  ;;  %v1293_v15 = vpop.f32.mrb[4].mxu1 }
 0x10a   : > { %v1222_v16 = vpop.f32.mrb[5].mxu0  ;;  %v1294_v17 = vpop.f32.mrb[5].mxu1 }
 0x10b   : > { %v1223_v18 = vadd.f32 %v1222_v16, %v1221_v14  ;;  %v1224_v19 = vpop.f32.mrb[6].mxu0  ;;  %v1769_v20 = vadd.f32 %v1294_v17, %v1293_v15  ;;  %v1296_v21 = vpop.f32.mrb[6].mxu1 }
 0x10c   : > { %v1225_v22 = vpop.f32.mrb[7].mxu0  ;;  %v1297_v23 = vpop.f32.mrb[7].mxu1 }
 0x10d   : > { %v1226_v24 = vadd.f32 %v1225_v22, %v1224_v19  ;;  %v1771_v25 = vadd.f32 %v1297_v23, %v1296_v21  ;;  %v717_v51 = vadd.f32 %v1223_v18, %v1787_v50 }
 0x10f   : > { %v720_v58 = vadd.f32 %v1226_v24, %v1787_v50 }
 0x111   : > { %v1227_v26 = vpop.f32.mrb[8].mxu0  ;;  %v1299_v27 = vpop.f32.mrb[8].mxu1 }
 0x112   : > { %v1228_v28 = vpop.f32.mrb[9].mxu0  ;;  %v1300_v29 = vpop.f32.mrb[9].mxu1 }
 0x113   : > { %v1229_v30 = vadd.f32 %v1228_v28, %v1227_v26  ;;  %v1230_v31 = vpop.f32.mrb[10].mxu0  ;;  %v1773_v32 = vadd.f32 %v1300_v29, %v1299_v27  ;;  %v1302_v33 = vpop.f32.mrb[10].mxu1 }
 0x114   : > { %v1231_v34 = vpop.f32.mrb[11].mxu0  ;;  %v1303_v35 = vpop.f32.mrb[11].mxu1 }
 0x115   : > { %v1232_v36 = vadd.f32 %v1231_v34, %v1230_v31  ;;  %v1775_v37 = vadd.f32 %v1303_v35, %v1302_v33  ;;  %v725_v9 = vadd.f32 %v1229_v30, %v1787_v50 }
 0x117   : > { %v728_v19 = vadd.f32 %v1232_v36, %v1787_v50 }
 0x119   : > { %v1233_v38 = vpop.f32.mrb[12].mxu0  ;;  %v1305_v39 = vpop.f32.mrb[12].mxu1 }
 0x11a   : > { %v1234_v40 = vpop.f32.mrb[13].mxu0  ;;  %v1306_v41 = vpop.f32.mrb[13].mxu1 }
 0x11b   : > { %v1235_v42 = vadd.f32 %v1234_v40, %v1233_v38  ;;  %v1236_v43 = vpop.f32.mrb[14].mxu0  ;;  %v1777_v44 = vadd.f32 %v1306_v41, %v1305_v39  ;;  %v1308_v45 = vpop.f32.mrb[14].mxu1 }
 0x11c   : > { %v1237_v46 = vpop.f32.mrb[15].mxu0  ;;  %v1309_v47 = vpop.f32.mrb[15].mxu1 }
 0x11d   : > { %v1238_v48 = vadd.f32 %v1237_v46, %v1236_v43  ;;  %v1780_v49 = vadd.f32 %v1309_v47, %v1308_v45  ;;  %v733_v5 = vadd.f32 %v1235_v42, %v1787_v50 }
 0x11f   : > { %v736_v14 = vadd.f32 %v1238_v48, %v1787_v50 }
 0x121   : > { %v1239_v52 = vpop.f32.mrb[16].mxu0  ;;  %v1335_v53 = vpop.f32.mrb[16].mxu1 }
 0x122   : > { %v878_v55 = vadd.f32 %v1335_v53, %v717_v51  ;;  %v1240_v56 = vpop.f32.mrb[17].mxu0  ;;  %v869_v57 = vpop.f32.mrb[17].mxu1 }
 0x123   : > { %v1241_v59 = vadd.f32 %v1240_v56, %v1239_v52  ;;  %v870_v60 = vadd.f32 %v869_v57, %v709_v54  ;;  %v1242_v61 = vpop.f32.mrb[18].mxu0  ;;  %v1336_v62 = vpop.f32.mrb[18].mxu1 }
 0x124   : > { %998 = vst.msk [vmem:[%s1793_s6 + $0x10] sm:$0xff] %vm625_vm0, %v878_v55  ;;  %v881_v0 = vadd.f32 %v1336_v62, %v720_v58  ;;  %v1243_v1 = vpop.f32.mrb[19].mxu0  ;;  %v872_v2 = vpop.f32.mrb[19].mxu1 }
 0x125   : > { %996 = vst.msk [vmem:[%s1793_s6] sm:$0xff] %vm625_vm0, %v870_v60  ;;  %v1244_v3 = vadd.f32 %v1243_v1, %v1242_v61  ;;  %v873_v4 = vadd.f32 %v872_v2, %v712_v63  ;;  %v741_v30 = vadd.f32 %v1241_v59, %v1787_v50 }
 0x126   : > { %999 = vst.msk [vmem:[%s1793_s6 + $0x18] sm:$0xff] %vm625_vm0, %v881_v0 }
 0x127   : > { %997 = vst.msk [vmem:[%s1793_s6 + $0x8] sm:$0xff] %vm625_vm0, %v873_v4  ;;  %v744_v41 = vadd.f32 %v1244_v3, %v1787_v50 }
 0x129   : > { %v1245_v6 = vpop.f32.mrb[20].mxu0  ;;  %v1339_v7 = vpop.f32.mrb[20].mxu1 }
 0x12a   : > { %v894_v10 = vadd.f32 %v1339_v7, %v733_v5  ;;  %v1246_v11 = vpop.f32.mrb[21].mxu0  ;;  %v885_v12 = vpop.f32.mrb[21].mxu1 }
 0x12b   : > { %v1247_v15 = vadd.f32 %v1246_v11, %v1245_v6  ;;  %v886_v16 = vadd.f32 %v885_v12, %v725_v9  ;;  %v1248_v17 = vpop.f32.mrb[22].mxu0  ;;  %v1340_v18 = vpop.f32.mrb[22].mxu1 }
 0x12c   : > { %1002 = vst.msk [vmem:[%s1793_s6 + $0x30] sm:$0xff] %vm625_vm0, %v894_v10  ;;  %v897_v21 = vadd.f32 %v1340_v18, %v736_v14  ;;  %v1249_v22 = vpop.f32.mrb[23].mxu0  ;;  %v888_v23 = vpop.f32.mrb[23].mxu1 }
 0x12d   : > { %1000 = vst.msk [vmem:[%s1793_s6 + $0x20] sm:$0xff] %vm625_vm0, %v886_v16  ;;  %v1250_v24 = vadd.f32 %v1249_v22, %v1248_v17  ;;  %v889_v26 = vadd.f32 %v888_v23, %v728_v19  ;;  %v749_v27 = vadd.f32 %v1247_v15, %v1787_v50 }
 0x12e   : > { %1003 = vst.msk [vmem:[%s1793_s6 + $0x38] sm:$0xff] %vm625_vm0, %v897_v21 }
 0x12f   : > { %1001 = vst.msk [vmem:[%s1793_s6 + $0x28] sm:$0xff] %vm625_vm0, %v889_v26  ;;  %v752_v35 = vadd.f32 %v1250_v24, %v1787_v50 }
 0x131   : > { %v1251_v28 = vpop.f32.mrb[24].mxu0  ;;  %v1343_v29 = vpop.f32.mrb[24].mxu1 }
 0x132   : > { %v910_v31 = vadd.f32 %v1343_v29, %v749_v27  ;;  %v1252_v33 = vpop.f32.mrb[25].mxu0  ;;  %v901_v34 = vpop.f32.mrb[25].mxu1 }
 0x133   : > { %v1253_v36 = vadd.f32 %v1252_v33, %v1251_v28  ;;  %v902_v38 = vadd.f32 %v901_v34, %v741_v30  ;;  %v1254_v39 = vpop.f32.mrb[26].mxu0  ;;  %v1344_v40 = vpop.f32.mrb[26].mxu1 }
 0x134   : > { %1006 = vst.msk [vmem:[%s1793_s6 + $0x50] sm:$0xff] %vm625_vm0, %v910_v31  ;;  %v913_v42 = vadd.f32 %v1344_v40, %v752_v35  ;;  %v1255_v43 = vpop.f32.mrb[27].mxu0  ;;  %v904_v45 = vpop.f32.mrb[27].mxu1 }
 0x135   : > { %1004 = vst.msk [vmem:[%s1793_s6 + $0x40] sm:$0xff] %vm625_vm0, %v902_v38  ;;  %v1256_v46 = vadd.f32 %v1255_v43, %v1254_v39  ;;  %v905_v47 = vadd.f32 %v904_v45, %v744_v41  ;;  %v757_v52 = vadd.f32 %v1253_v36, %v1787_v50  ;;  %v813_v36 = vadd.f32 %v1769_v20, %v1787_v50 }
 0x136   : > { %1007 = vst.msk [vmem:[%s1793_s6 + $0x58] sm:$0xff] %vm625_vm0, %v913_v42  ;;  %v805_v41 = vadd.f32 %v1765_v8, %v1787_v50 }
 0x137   : > { %1005 = vst.msk [vmem:[%s1793_s6 + $0x48] sm:$0xff] %vm625_vm0, %v905_v47  ;;  %v760_v59 = vadd.f32 %v1256_v46, %v1787_v50  ;;  %v816_v46 = vadd.f32 %v1771_v25, %v1787_v50 }
 0x139   : > { %v1257_v48 = vpop.f32.mrb[28].mxu0  ;;  %v1347_v51 = vpop.f32.mrb[28].mxu1 }
 0x13a   : > { %v1258_v53 = vpop.f32.mrb[29].mxu0  ;;  %v917_v54 = vpop.f32.mrb[29].mxu1 }
 0x13b   : > { %v1259_v55 = vadd.f32 %v1258_v53, %v1257_v48  ;;  %v918_v56 = vadd.f32 %v917_v54, %v757_v52  ;;  %v1260_v57 = vpop.f32.mrb[30].mxu0  ;;  %v1348_v58 = vpop.f32.mrb[30].mxu1  ;;  %v808_v52 = vadd.f32 %v1767_v13, %v1787_v50  ;;  %v829_v13 = vadd.f32 %v1777_v44, %v1787_v50 }
 0x13c   : > { %v1261_v60 = vpop.f32.mrb[31].mxu0  ;;  %v920_v61 = vpop.f32.mrb[31].mxu1 }
 0x13d   : > { %v765_v62 = vadd.f32 %v1259_v55, %v1787_v50  ;;  %1008 = vst.msk [vmem:[%s1793_s6 + $0x60] sm:$0xff] %vm625_vm0, %v918_v56  ;;  %v1262_v63 = vadd.f32 %v1261_v60, %v1260_v57  ;;  %v921_v0 = vadd.f32 %v920_v61, %v760_v59 }
 0x13f   : > { %v926_v1 = vadd.f32 %v1347_v51, %v765_v62  ;;  %v768_v2 = vadd.f32 %v1262_v63, %v1787_v50  ;;  %1009 = vst.msk [vmem:[%s1793_s6 + $0x68] sm:$0xff] %vm625_vm0, %v921_v0  ;;  %v821_v62 = vadd.f32 %v1773_v32, %v1787_v50  ;;  %v824_v32 = vadd.f32 %v1775_v37, %v1787_v50 }
 0x141   : > { %1010 = vst.msk [vmem:[%s1793_s6 + $0x70] sm:$0xff] %vm625_vm0, %v926_v1  ;;  %v929_v3 = vadd.f32 %v1348_v58, %v768_v2  ;;  %v1263_v4 = vpop.f32.mrb[32].mxu0  ;;  %v1351_v5 = vpop.f32.mrb[32].mxu1  ;;  %v832_v2 = vadd.f32 %v1780_v49, %v1787_v50 }
 0x142   : > { %v1264_v6 = vpop.f32.mrb[33].mxu0  ;;  %v933_v7 = vpop.f32.mrb[33].mxu1 }
 0x143   : > { %1011 = vst.msk [vmem:[%s1793_s6 + $0x78] sm:$0xff] %vm625_vm0, %v929_v3  ;;  %v1265_v9 = vadd.f32 %v1264_v6, %v1263_v4  ;;  %v1266_v10 = vpop.f32.mrb[34].mxu0  ;;  %v1352_v11 = vpop.f32.mrb[34].mxu1 }
 0x144   : > { %v1267_v12 = vpop.f32.mrb[35].mxu0  ;;  %v936_v14 = vpop.f32.mrb[35].mxu1 }
 0x145   : > { %v773_v15 = vadd.f32 %v1265_v9, %v1787_v50  ;;  %v1268_v16 = vadd.f32 %v1267_v12, %v1266_v10 }
 0x147   : > { %v934_v17 = vadd.f32 %v933_v7, %v773_v15  ;;  %v776_v18 = vadd.f32 %v1268_v16, %v1787_v50 }
 0x149   : > { %1012 = vst.msk [vmem:[%s1793_s6 + $0x80] sm:$0xff] %vm625_vm0, %v934_v17  ;;  %v937_v19 = vadd.f32 %v936_v14, %v776_v18  ;;  %v1269_v21 = vpop.f32.mrb[36].mxu0  ;;  %v1843_v22 = vpop.f32.mrb[36].mxu1 }
 0x14a   : > { %v1270_v23 = vpop.f32.mrb[37].mxu0  ;;  %v949_v24 = vpop.f32.mrb[37].mxu1 }
 0x14b   : > { %1013 = vst.msk [vmem:[%s1793_s6 + $0x88] sm:$0xff] %vm625_vm0, %v937_v19  ;;  %v1271_v26 = vadd.f32 %v1270_v23, %v1269_v21  ;;  %v1272_v27 = vpop.f32.mrb[38].mxu0  ;;  %v1847_v28 = vpop.f32.mrb[38].mxu1 }
 0x14c   : > { %v1273_v29 = vpop.f32.mrb[39].mxu0  ;;  %v952_v30 = vpop.f32.mrb[39].mxu1 }
 0x14d   : > { %v781_v31 = vadd.f32 %v1271_v26, %v1787_v50  ;;  %v1274_v33 = vadd.f32 %v1273_v29, %v1272_v27 }
 0x14f   : > { %v942_v34 = vadd.f32 %v1351_v5, %v781_v31  ;;  %v784_v35 = vadd.f32 %v1274_v33, %v1787_v50 }
 0x151   : > { %1014 = vst.msk [vmem:[%s1793_s6 + $0x90] sm:$0xff] %vm625_vm0, %v942_v34  ;;  %v945_v38 = vadd.f32 %v1352_v11, %v784_v35  ;;  %v1275_v39 = vpop.f32.mrb[40].mxu0  ;;  %v1359_v40 = vpop.f32.mrb[40].mxu1 }
 0x152   : > { %v974_v42 = vadd.f32 %v1359_v40, %v813_v36  ;;  %v1276_v43 = vpop.f32.mrb[41].mxu0  ;;  %v965_v45 = vpop.f32.mrb[41].mxu1 }
 0x153   : > { %1015 = vst.msk [vmem:[%s1793_s6 + $0x98] sm:$0xff] %vm625_vm0, %v945_v38  ;;  %v1277_v20 = vadd.f32 %v1276_v43, %v1275_v39  ;;  %v966_v47 = vadd.f32 %v965_v45, %v805_v41  ;;  %v1278_v48 = vpop.f32.mrb[42].mxu0  ;;  %v1360_v51 = vpop.f32.mrb[42].mxu1 }
 0x154   : > { %1022 = vst.msk [vmem:[%s1793_s6 + $0xd0] sm:$0xff] %vm625_vm0, %v974_v42  ;;  %v977_v8 = vadd.f32 %v1360_v51, %v816_v46  ;;  %v1279_v53 = vpop.f32.mrb[43].mxu0  ;;  %v968_v54 = vpop.f32.mrb[43].mxu1 }
 0x155   : > { %v789_v55 = vadd.f32 %v1277_v20, %v1787_v50  ;;  %1020 = vst.msk [vmem:[%s1793_s6 + $0xc0] sm:$0xff] %vm625_vm0, %v966_v47  ;;  %v1280_v25 = vadd.f32 %v1279_v53, %v1278_v48  ;;  %v969_v56 = vadd.f32 %v968_v54, %v808_v52 }
 0x156   : > { %1023 = vst.msk [vmem:[%s1793_s6 + $0xd8] sm:$0xff] %vm625_vm0, %v977_v8 }
 0x157   : > { %v950_v57 = vadd.f32 %v949_v24, %v789_v55  ;;  %v792_v58 = vadd.f32 %v1280_v25, %v1787_v50  ;;  %1021 = vst.msk [vmem:[%s1793_s6 + $0xc8] sm:$0xff] %vm625_vm0, %v969_v56 }
 0x159   : > { %1016 = vst.msk [vmem:[%s1793_s6 + $0xa0] sm:$0xff] %vm625_vm0, %v950_v57  ;;  %v953_v59 = vadd.f32 %v952_v30, %v792_v58  ;;  %v1281_v60 = vpop.f32.mrb[44].mxu0  ;;  %v1363_v61 = vpop.f32.mrb[44].mxu1 }
 0x15a   : > { %v990_v63 = vadd.f32 %v1363_v61, %v829_v13  ;;  %v1282_v0 = vpop.f32.mrb[45].mxu0  ;;  %v981_v1 = vpop.f32.mrb[45].mxu1 }
 0x15b   : > { %1017 = vst.msk [vmem:[%s1793_s6 + $0xa8] sm:$0xff] %vm625_vm0, %v953_v59  ;;  %v1283_v44 = vadd.f32 %v1282_v0, %v1281_v60  ;;  %v982_v3 = vadd.f32 %v981_v1, %v821_v62  ;;  %v1284_v4 = vpop.f32.mrb[46].mxu0  ;;  %v1364_v5 = vpop.f32.mrb[46].mxu1 }
 0x15c   : > { %1026 = vst.msk [vmem:[%s1793_s6 + $0xf0] sm:$0xff] %vm625_vm0, %v990_v63  ;;  %v993_v6 = vadd.f32 %v1364_v5, %v832_v2  ;;  %v1285_v7 = vpop.f32.mrb[47].mxu0  ;;  %v984_v9 = vpop.f32.mrb[47].mxu1 }
 0x15d   : > { %v797_v49 = vadd.f32 %v1283_v44, %v1787_v50  ;;  %1024 = vst.msk [vmem:[%s1793_s6 + $0xe0] sm:$0xff] %vm625_vm0, %v982_v3  ;;  %v1286_v10 = vadd.f32 %v1285_v7, %v1284_v4  ;;  %v985_v11 = vadd.f32 %v984_v9, %v824_v32 }
 0x15e   : > { %1027 = vst.msk [vmem:[%s1793_s6 + $0xf8] sm:$0xff] %vm625_vm0, %v993_v6 }
 0x15f   : > { %v958_v37 = vadd.f32 %v1843_v22, %v797_v49  ;;  %v800_v12 = vadd.f32 %v1286_v10, %v1787_v50  ;;  %1025 = vst.msk [vmem:[%s1793_s6 + $0xe8] sm:$0xff] %vm625_vm0, %v985_v11 }
 0x161   : > { %1018 = vst.msk [vmem:[%s1793_s6 + $0xb0] sm:$0xff] %vm625_vm0, %v958_v37  ;;  %v961_v14 = vadd.f32 %v1847_v28, %v800_v12 }
 0x163   : > { %1019 = vst.msk [vmem:[%s1793_s6 + $0xb8] sm:$0xff] %vm625_vm0, %v961_v14 }
 0x164   : > { %1518 = shalt.err (!%p1515_p3)
}
 0x165   : > { %s1519_s25 = scalar_lea.hbm %s1901_s11, 4096  ;;  %s1523_s29 = scalar_lea.hbm %s1956_s3, 8192 }
 0x166   : > { %p1520_p4 = scmp.ne.s32.totalorder %s1901_s11, %s1519_s25  ;;  %p1524_p9 = scmp.lt.u32.totalorder %s1901_s11, %s1956_s3 }
 0x167   : > { %p1525_p10 = scmp.lt.u32.totalorder %s1523_s29, %s1519_s25  ;;  %p1527_p12 = scmp.lt.u32.totalorder %s1519_s25, %s1901_s11 }
 0x168   : > { %p1521_p7 = pnand %p1520_p4, %p1630_p5 }
 0x169   : > { %p1526_p11 = por %p1525_p10, %p1524_p9 }
 0x16a   : > { %p1522_p8 = pneg %p1521_p7 }
 0x16b   : > { %p1528_p13 = por %p1527_p12, %p1526_p11 }
 0x16d   : > { %p1529_p0 = pnand %p1528_p13, %p1522_p8 }
 0x16f   : > { %1532 = shalt.err (!%p1529_p0)
}
 0x170   : > { %s1570_s4 = smov 128   ;;  %s1571_s5 = smov 8  }
 0x171   : > { %1382 = dma.vmem_to_hbm [thread:$0]  (%p1630_p5), %s1903_s8, 4096, %s1901_s11, %s1912_s16, %s1570_s4, %s1570_s4, %s1571_s5  }
 0x172 PF: > { %p1388_p1 = scmp.ge.s32.totalorder %s1567_s15, 2  ;;  %s1057_s6 = sand.u32 1, %s1555_s12  }
 0x173   : > { %s1058_s7 = scalar_lea.sflag [#allocation3], %s1057_s6 }
 0x174   : > { %p1385_p2 = pnand %p1388_p1, %p1634_p6 }
 0x176   : > { %1550 = dma.done.wait (!%p1385_p2), %s1058_s7, 4096  }
 0x177   : > { %1552 = vsyncadd (!%p1385_p2), %s1058_s7, 4294963200  ;;  %p13_p3 = scmp.ge.s32.totalorder %s1617_s18, 4   ;;  %s1959_s12 = smov %s1559_s13 }
 0x178   : > { %s1960_s13 = smov %s1563_s14  ;;  %s1961_s14 = smov %s1628_s21 }
 0x179   : > { %s1962_s15 = smov %s1617_s18  ;;  %15 = sbr.rel (!%p13_p3) target bundleno = 3 (0x3), region = 67 }
 0x180   :  { %1063 = vsyncpa [#allocation3], 1 }
 0x181   :  { %1065 = vsyncpa [#allocation3 + $0x1], 1 }

</bundles_post_ra>
